<compile_context>
chip_gen: v6e
topology: v6e:2x2x1
jax: 0.10.0
libtpu: 0.0.40
codegen_flags: <defaults>
</compile_context>

<pallas_src>
import math

import jax
import jax.numpy as jnp
from jax.experimental import pallas as pl
from jax.experimental.pallas import tpu as pltpu

# f32 matmuls everywhere (glue precomputes + in-kernel dots traced under this
# config) so the Pallas path matches the pure-JAX reference.
jax.config.update("jax_default_matmul_precision", "highest")


def _round_up(v, m):
    return ((v + m - 1) // m) * m


# ----------------------------------------------------------------------------
# Kernel 1: edge kernel -- Fourier message + in-kernel gather/scatter + counts
# ----------------------------------------------------------------------------
def conv_edge_aggregate(xT, src, dst, p, *, F, TE=256, NC=2):
    """xT: [D, N_pad] node features (nodes in lanes, zero-padded).
    src/dst: [E] int32 edge endpoints (self loops included).
    Returns per-core partial sums [NC, F+1, N_pad]; row F holds degree counts.
    """
    D, N_pad = xT.shape
    FD = F * D
    E = src.shape[0]
    n_steps = max(1, pl.cdiv(E, TE * NC))
    E_pad = n_steps * TE * NC
    pad = E_pad - E

    # Padded edges get id == N_pad -> zero one-hot column/row (fully masked).
    dst_p = jnp.pad(dst.astype(jnp.int32), (0, pad), constant_values=N_pad)
    src_p = jnp.pad(src.astype(jnp.int32), (0, pad), constant_values=N_pad)
    ids_row = jnp.stack([dst_p, src_p])            # [2, E_pad]  (dst ; src)
    dst_col = dst_p[:, None]                       # [E_pad, 1]  (for scatter)

    # Per-node precompute (algebraic hoist, not a per-edge rescale): the
    # freq_generator weights / bias are applied once per node here; the
    # in-kernel [., N_pad] x [N_pad, TE] matmul then performs gather + linear
    # in a single MXU pass, so edge features never round-trip HBM.
    WX = jnp.dot(p["wfg"], xT)                     # [FD, N_pad]
    BX = jnp.dot(p["bjmat"], xT)                   # [F,  N_pad]
    cnx = jnp.concatenate([WX, xT, BX], axis=0)    # [FD + D + F, N_pad]
    cw = p["cw"]                                   # [2F, Wpad]  (Rsum | wout+bias)
    Wpad = cw.shape[1]

    def kernel(ids_ref, dcol_ref, cnx_ref, cw_ref, o_ref):
        @pl.when(pl.program_id(1) == 0)
        def _init():
            o_ref[...] = jnp.zeros_like(o_ref)

        # one-hot masks built in-kernel from int32 edge ids
        rows = jax.lax.broadcasted_iota(jnp.int32, (N_pad, TE), 0)
        m_dst = (rows == ids_ref[0:1, :]).astype(jnp.float32)      # [N_pad, TE]
        m_src = (rows == ids_ref[1:2, :]).astype(jnp.float32)      # [N_pad, TE]

        cnx_v = cnx_ref[...]
        # gather + freq_generator linear fused: freqs[f*D+d, e] (no bias term)
        freqs = jnp.dot(cnx_v[0:FD, :], m_dst,
                        preferred_element_type=jnp.float32)         # [FD, TE]
        # gather of [x_j ; bias-projection(x_j)] in one pass
        g = jnp.dot(cnx_v[FD:FD + D + F, :], m_src,
                    preferred_element_type=jnp.float32)             # [D+F, TE]
        xj = g[0:D, :]                                              # [D, TE]
        bx = g[D:D + F, :]                                          # [F, TE]

        cw_v = cw_ref[...]
        # bilinear contraction sum_d freqs[f,d,e] * xj[d,e]  via a K=FD matmul
        xj_tiled = jnp.concatenate([xj] * F, axis=0)                # [FD, TE]
        proj = jnp.dot(cw_v[0:F, 0:FD], freqs * xj_tiled,
                       preferred_element_type=jnp.float32) + bx     # [F, TE]

        # 2 EUP transcendentals + double-angle identities; full 128/256 lanes.
        s1 = jnp.sin(proj)
        c1 = jnp.cos(proj)
        s2 = 2.0 * s1 * c1
        c2 = 1.0 - 2.0 * s1 * s1
        s4 = 2.0 * s2 * c2
        c4 = 1.0 - 2.0 * s2 * s2
        ones = jnp.ones((1, TE), jnp.float32)
        emb = jnp.concatenate([s1, c1, s2, c2, s4, c4, ones], axis=0)  # [6F+1, TE]
        msg = jnp.dot(cw_v[F:2 * F, 0:6 * F + 1], emb,
                      preferred_element_type=jnp.float32)              # [F, TE]
        msgc = jnp.concatenate([msg, ones], axis=0)                    # [F+1, TE]

        # in-kernel scatter (K = TE matmul); ones row accumulates degree counts
        lanes = jax.lax.broadcasted_iota(jnp.int32, (TE, N_pad), 1)
        mt_dst = (dcol_ref[...] == lanes).astype(jnp.float32)          # [TE, N_pad]
        o_ref[...] += jnp.dot(msgc, mt_dst,
                              preferred_element_type=jnp.float32)[None]

    steps = NC * n_steps
    flops = int(steps * 2 * TE * (FD * N_pad + (D + F) * N_pad + F * FD
                                  + F * (6 * F + 1) + (F + 1) * N_pad)
                + steps * TE * (FD + 12 * F))
    cost = pl.CostEstimate(
        flops=flops,
        transcendentals=int(steps * 2 * F * TE),
        bytes_accessed=int(4 * (3 * E_pad + (FD + D + F) * N_pad
                                + 2 * F * Wpad + NC * (F + 1) * N_pad)))

    return pl.pallas_call(
        kernel,
        out_shape=jax.ShapeDtypeStruct((NC, F + 1, N_pad), jnp.float32),
        grid=(NC, n_steps),
        in_specs=[
            pl.BlockSpec((2, TE), lambda c, e: (0, c * n_steps + e)),
            pl.BlockSpec((TE, 1), lambda c, e: (c * n_steps + e, 0)),
            pl.BlockSpec((FD + D + F, N_pad), lambda c, e: (0, 0)),
            pl.BlockSpec((2 * F, Wpad), lambda c, e: (0, 0)),
        ],
        out_specs=pl.BlockSpec((1, F + 1, N_pad), lambda c, e: (c, 0, 0)),
        compiler_params=pltpu.CompilerParams(
            dimension_semantics=("parallel", "arbitrary"),
            vmem_limit_bytes=48 * 1024 * 1024),
        cost_estimate=cost,
    )(ids_row, dst_col, cnx, cw)


# ----------------------------------------------------------------------------
# Kernel 2: node kernel -- mean + update MLP + BN(eval, folded) + ReLU
# ----------------------------------------------------------------------------
def conv_node_update(xT, agg, p, *, F, TN=128):
    """xT: [D, N_pad]; agg: [NC, F+1, N_pad] partial sums (+counts).
    Returns relu(bn(update_mlp([x, mean]))) as [F, N_pad] (nodes in lanes)."""
    D, N_pad = xT.shape
    NC = agg.shape[0]
    H = p["w1cat"].shape[0]

    def kernel(x_ref, a_ref, w1_ref, w2_ref, o_ref):
        a = jnp.sum(a_ref[...], axis=0)                          # [F+1, TN]
        cnt = jnp.maximum(a[F:F + 1, :], 1.0)                    # degree >= 1
        mean = a[0:F, :] / cnt                                   # mean aggregation
        ones = jnp.ones((1, TN), jnp.float32)
        z = jnp.concatenate([x_ref[...], mean, ones], axis=0)    # [D+F+1, TN]
        h = jnp.maximum(jnp.dot(w1_ref[...], z,
                                preferred_element_type=jnp.float32), 0.0)
        h1 = jnp.concatenate([h, ones], axis=0)                  # [H+1, TN]
        o_ref[...] = jnp.maximum(
            jnp.dot(w2_ref[...], h1, preferred_element_type=jnp.float32), 0.0)

    return pl.pallas_call(
        kernel,
        out_shape=jax.ShapeDtypeStruct((F, N_pad), jnp.float32),
        grid=(N_pad // TN,),
        in_specs=[
            pl.BlockSpec((D, TN), lambda j: (0, j)),
            pl.BlockSpec((NC, F + 1, TN), lambda j: (0, 0, j)),
            pl.BlockSpec((H, D + F + 1), lambda j: (0, 0)),
            pl.BlockSpec((F, H + 1), lambda j: (0, 0)),
        ],
        out_specs=pl.BlockSpec((F, TN), lambda j: (0, j)),
        compiler_params=pltpu.CompilerParams(
            dimension_semantics=("parallel",),
            vmem_limit_bytes=32 * 1024 * 1024),
    )(xT, agg, p["w1cat"], p["w2cat"])


# ----------------------------------------------------------------------------
# Kernel 3: attentional readout + classifier (masks built in-kernel)
# ----------------------------------------------------------------------------
def readout_classifier(hT, brow, bcol, wgn, wc1, wc2, *, num_graphs,
                       num_classes):
    # TODO(synk): tile over N (two-pass per-graph softmax) for production N.
    F, N_pad = hT.shape
    G = num_graphs

    def kernel(h_ref, br_ref, bc_ref, wgn_ref, w1_ref, w2_ref, o_ref):
        h = h_ref[...]                                            # [F, N_pad]
        ones_n = jnp.ones((1, N_pad), jnp.float32)
        z = jnp.dot(wgn_ref[...], jnp.concatenate([h, ones_n], axis=0),
                    preferred_element_type=jnp.float32)           # [F+1, N_pad]
        xn = jnp.maximum(z[0:F, :], 0.0)                          # nn branch
        gate = 1.0 / (1.0 + jnp.exp(-z[F:F + 1, :]))              # sigmoid gate

        grows = jax.lax.broadcasted_iota(jnp.int32, (G, N_pad), 0)
        mg = (grows == br_ref[...]).astype(jnp.float32)           # [G, N_pad]
        masked = jnp.where(mg > 0.5, gate, -1e30)
        seg_max = jnp.max(masked, axis=1, keepdims=True)          # [G, 1]
        node_max = jnp.sum(mg * seg_max, axis=0, keepdims=True)   # [1, N_pad]
        e = jnp.exp(gate - node_max)
        seg_den = jnp.maximum(jnp.sum(mg * e, axis=1, keepdims=True), 1e-20)
        node_inv = jnp.sum(mg * (1.0 / seg_den), axis=0, keepdims=True)
        alpha = e * node_inv                                      # pad nodes -> 0

        glanes = jax.lax.broadcasted_iota(jnp.int32, (N_pad, G), 1)
        mgT = (bc_ref[...] == glanes).astype(jnp.float32)         # [N_pad, G]
        pooled = jnp.dot(alpha * xn, mgT,
                         preferred_element_type=jnp.float32)      # [F, G]
        ones_g = jnp.ones((1, G), jnp.float32)
        hid = jnp.maximum(
            jnp.dot(w1_ref[...], jnp.concatenate([pooled, ones_g], axis=0),
                    preferred_element_type=jnp.float32), 0.0)     # [H, G]
        o_ref[...] = jnp.dot(
            w2_ref[...], jnp.concatenate([hid, ones_g], axis=0),
            preferred_element_type=jnp.float32)                   # [C, G]

    vmem = pl.BlockSpec(memory_space=pltpu.MemorySpace.VMEM)
    return pl.pallas_call(
        kernel,
        out_shape=jax.ShapeDtypeStruct((num_classes, G), jnp.float32),
        in_specs=[vmem] * 6,
        out_specs=vmem,
        compiler_params=pltpu.CompilerParams(vmem_limit_bytes=32 * 1024 * 1024),
    )(hT, brow, bcol, wgn, wc1, wc2)


# ----------------------------------------------------------------------------
# Parameter construction (deterministic, PyTorch-default-style uniform init)
# ----------------------------------------------------------------------------
def init_linear(key, fan_in, fan_out):
    kw, kb = jax.random.split(key)
    bound = 1.0 / math.sqrt(fan_in)
    w = jax.random.uniform(kw, (fan_out, fan_in), jnp.float32, -bound, bound)
    b = jax.random.uniform(kb, (fan_out,), jnp.float32, -bound, bound)
    return w, b


def init_conv(key, in_dim, hidden_dim, out_dim):
    D, F, H = in_dim, out_dim, hidden_dim
    FD = F * D
    ks = jax.random.split(key, 5)
    wfg, bfg = init_linear(ks[0], D, F * D)          # freq_generator
    _wph, _bph = init_linear(ks[1], D, F)            # phase_generator (unused in fwd)
    wout, bout = init_linear(ks[2], 6 * F, F)        # out_proj
    w1, b1 = init_linear(ks[3], D + F, H)            # update_mlp[0]
    w2, b2 = init_linear(ks[4], H, F)                # update_mlp[2]

    # BatchNorm1d defaults at init (eval mode): mean=0, var=1, gamma=1, beta=0
    bn_gamma = jnp.ones((F,), jnp.float32)
    bn_beta = jnp.zeros((F,), jnp.float32)
    bn_mean = jnp.zeros((F,), jnp.float32)
    bn_var = jnp.ones((F,), jnp.float32)
    sc = bn_gamma / jnp.sqrt(bn_var + 1e-5)
    sh = bn_beta - bn_mean * sc

    # kernel-ready coalesced slabs
    rsum = (jnp.arange(FD)[None, :] // D
            == jnp.arange(F)[:, None]).astype(jnp.float32)        # [F, FD]
    woutb = jnp.concatenate([wout, bout[:, None]], axis=1)        # [F, 6F+1]
    wpad = max(FD, 6 * F + 1)
    cw = jnp.concatenate([
        jnp.pad(rsum, ((0, 0), (0, wpad - FD))),
        jnp.pad(woutb, ((0, 0), (0, wpad - (6 * F + 1)))),
    ], axis=0)                                                    # [2F, wpad]

    w1cat = jnp.concatenate([w1, b1[:, None]], axis=1)            # [H, D+F+1]
    w2eff = w2 * sc[:, None]                                      # BN folded
    b2eff = b2 * sc + sh
    w2cat = jnp.concatenate([w2eff, b2eff[:, None]], axis=1)      # [F, H+1]

    return dict(
        # original layout (pure-JAX reference)
        wfg=wfg, bfg=bfg, wout=wout, bout_vec=bout, w1=w1, b1_vec=b1,
        w2=w2, b2_vec=b2, bn_gamma=bn_gamma, bn_beta=bn_beta,
        bn_mean=bn_mean, bn_var=bn_var,
        # kernel layout
        bjmat=bfg.reshape(F, D), cw=cw, w1cat=w1cat, w2cat=w2cat,
    )


# ----------------------------------------------------------------------------
# Model forward (Pallas path)
# ----------------------------------------------------------------------------
def model_forward(x, edge_index, batch, params, *, num_graphs, num_classes,
                  TE=256, NC=2):
    N, _ = x.shape
    N_pad = _round_up(max(N, 1), 128)          # lane-dense node axis
    F = params["out_dim"]

    # add_self_loops (same edge_index feeds both conv layers)
    loops = jnp.arange(N, dtype=jnp.int32)
    src = jnp.concatenate([edge_index[0].astype(jnp.int32), loops])
    dst = jnp.concatenate([edge_index[1].astype(jnp.int32), loops])

    xT = jnp.pad(x.T, ((0, 0), (0, N_pad - N)))                   # [D, N_pad]

    agg1 = conv_edge_aggregate(xT, src, dst, params["conv1"], F=F, TE=TE, NC=NC)
    h1 = conv_node_update(xT, agg1, params["conv1"], F=F)         # conv1+bn1+relu
    agg2 = conv_edge_aggregate(h1, src, dst, params["conv2"], F=F, TE=TE, NC=NC)
    h2 = conv_node_update(h1, agg2, params["conv2"], F=F)         # conv2+bn2+relu
    # dropout == identity in eval mode

    # padded nodes get batch id == num_graphs -> excluded from readout masks
    brow = jnp.pad(batch.astype(jnp.int32), (0, N_pad - N),
                   constant_values=num_graphs)[None, :]           # [1, N_pad]
    bcol = brow[0][:, None]                                       # [N_pad, 1]
    r, c = params["readout"], params["classifier"]
    logitsT = readout_classifier(h2, brow, bcol, r["wgn"], c["w1cat"],
                                 c["w2cat"], num_graphs=num_graphs,
                                 num_classes=num_classes)
    return logitsT.T                                              # [G, C]


# ----------------------------------------------------------------------------
# Pure-JAX reference (mirrors the PyTorch forward, eval mode)
# ----------------------------------------------------------------------------
def ref_fourier(h_src, h_i, p, F):
    E, D = h_src.shape
    freqs = (h_i @ p["wfg"].T + p["bfg"]).reshape(E, F, D)
    proj = jnp.einsum("efd,ed->ef", freqs, h_src)
    emb = jnp.concatenate([jnp.sin(proj), jnp.cos(proj),
                           jnp.sin(2 * proj), jnp.cos(2 * proj),
                           jnp.sin(4 * proj), jnp.cos(4 * proj)], axis=-1)
    return emb @ p["wout"].T + p["bout_vec"]


def ref_conv_bn_relu(x, src, dst, p, F):
    N = x.shape[0]
    msgs = ref_fourier(x[src], x[dst], p, F)
    sums = jax.ops.segment_sum(msgs, dst, num_segments=N)
    counts = jax.ops.segment_sum(jnp.ones((src.shape[0],), jnp.float32), dst,
                                 num_segments=N)
    aggr = sums / jnp.maximum(counts, 1.0)[:, None]
    h = jnp.maximum(jnp.concatenate([x, aggr], -1) @ p["w1"].T + p["b1_vec"], 0.0)
    out = h @ p["w2"].T + p["b2_vec"]
    out = (out - p["bn_mean"]) / jnp.sqrt(p["bn_var"] + 1e-5) * p["bn_gamma"] \
        + p["bn_beta"]
    return jnp.maximum(out, 0.0)


def ref_forward(x, edge_index, batch, params, num_graphs):
    N = x.shape[0]
    loops = jnp.arange(N, dtype=edge_index.dtype)
    src = jnp.concatenate([edge_index[0], loops])
    dst = jnp.concatenate([edge_index[1], loops])
    F = params["out_dim"]
    h = ref_conv_bn_relu(x, src, dst, params["conv1"], F)
    h = ref_conv_bn_relu(h, src, dst, params["conv2"], F)
    r, c = params["readout"], params["classifier"]
    gate = jax.nn.sigmoid(h @ r["wg"].T + r["bg_vec"])[:, 0]
    xn = jnp.maximum(h @ r["wn"].T + r["bn_vec"], 0.0)
    seg_max = jax.ops.segment_max(gate, batch, num_segments=num_graphs)
    e = jnp.exp(gate - seg_max[batch])
    den = jax.ops.segment_sum(e, batch, num_segments=num_graphs)
    alpha = e / den[batch]
    pooled = jax.ops.segment_sum(alpha[:, None] * xn, batch,
                                 num_segments=num_graphs)
    hid = jnp.maximum(pooled @ c["w1"].T + c["b1_vec"], 0.0)
    return hid @ c["w2"].T + c["b2_vec"]


# ----------------------------------------------------------------------------
if __name__ == "__main__":
    in_dim, hidden_dim, out_dim, num_classes = 8, 32, 16, 4
    N, G = 16, 2

    key = jax.random.PRNGKey(0)
    k_x, k_c1, k_c2, k_ro, k_cl = jax.random.split(key, 5)

    # --- graph: two 8-node bidirectional rings (self-loops added by the model)
    def ring_edges(offset, n):
        s = [offset + i for i in range(n)]
        t = [offset + (i + 1) % n for i in range(n)]
        return s + t, t + s

    s0, t0 = ring_edges(0, 8)
    s1, t1 = ring_edges(8, 8)
    src = jnp.array(s0 + s1, dtype=jnp.int32)
    dst = jnp.array(t0 + t1, dtype=jnp.int32)
    edge_index = jnp.stack([src, dst])                            # [2, 32]
    batch = jnp.array([0] * 8 + [1] * 8, dtype=jnp.int32)
    x = jax.random.normal(k_x, (N, in_dim), dtype=jnp.float32)

    # --- parameters ----------------------------------------------------------
    params = {
        "out_dim": out_dim,
        "conv1": init_conv(k_c1, in_dim, hidden_dim, out_dim),
        "conv2": init_conv(k_c2, out_dim, hidden_dim, out_dim),
    }
    kg, kn = jax.random.split(k_ro)
    wg, bg = init_linear(kg, out_dim, 1)
    wn, bn_ = init_linear(kn, out_dim, out_dim)
    # gate row stored LAST so in-kernel slices stay sublane-aligned
    wgn = jnp.concatenate([
        jnp.concatenate([wn, wg], axis=0),
        jnp.concatenate([bn_, bg], axis=0)[:, None],
    ], axis=1)                                                    # [F+1, F+1]
    params["readout"] = dict(wg=wg, bg_vec=bg, wn=wn, bn_vec=bn_, wgn=wgn)

    kc1, kc2 = jax.random.split(k_cl)
    wc1, bc1 = init_linear(kc1, out_dim, hidden_dim)
    wc2, bc2 = init_linear(kc2, hidden_dim, num_classes)
    params["classifier"] = dict(
        w1=wc1, b1_vec=bc1, w2=wc2, b2_vec=bc2,
        w1cat=jnp.concatenate([wc1, bc1[:, None]], axis=1),       # [H, F+1]
        w2cat=jnp.concatenate([wc2, bc2[:, None]], axis=1))       # [C, H+1]

    # --- run Pallas kernels ---------------------------------------------------
    logits = model_forward(x, edge_index, batch, params,
                           num_graphs=G, num_classes=num_classes)
    logits = jax.block_until_ready(logits)

    # --- cross-check against a pure-JAX reference -----------------------------
    ref = jax.block_until_ready(ref_forward(x, edge_index, batch, params, G))
    assert logits.shape == (G, num_classes)
    assert jnp.allclose(logits, ref, rtol=2e-3, atol=2e-3), (logits, ref)

    print("KERNEL_OK")
</pallas_src>

<mosaic_0001>
module attributes {stable_mosaic.version = 11 : i64} {
  func.func @kernel(%arg0: i32, %arg1: i32, %arg2: memref<2x256xi32, #tpu.memory_space<vmem>>, %arg3: memref<256x1xi32, #tpu.memory_space<vmem>>, %arg4: memref<152x128xf32, #tpu.memory_space<vmem>>, %arg5: memref<32x128xf32, #tpu.memory_space<vmem>>, %arg6: memref<1x17x128xf32, #tpu.memory_space<vmem>>) attributes {dimension_semantics = [#tpu.dimension_semantics<parallel>, #tpu.dimension_semantics<arbitrary>], iteration_bounds = array<i64: 2, 1>, scalar_prefetch = 0 : i64, scratch_operands = 0 : i64, tpu.core_type = #tpu.core_type<tc>, window_params = [{transform_indices = @transform_0, window_bounds = array<i64: 2, 256>}, {transform_indices = @transform_1, window_bounds = array<i64: 256, 1>}, {pipeline_mode = #tpu.pipeline_mode<synchronous>, transform_indices = @transform_2, window_bounds = array<i64: 152, 128>}, {pipeline_mode = #tpu.pipeline_mode<synchronous>, transform_indices = @transform_3, window_bounds = array<i64: 32, 128>}, {transform_indices = @transform_4, window_bounds = array<i64: 1, 17, 128>}]} {
    %c0_i32 = arith.constant 0 : i32
    %0 = arith.cmpi eq, %arg1, %c0_i32 : i32
    %1 = arith.extui %0 : i1 to i32
    %c0_i32_0 = arith.constant 0 : i32
    %2 = arith.cmpi ne, %1, %c0_i32_0 : i32
    scf.if %2 {
      %cst_26 = arith.constant 0.000000e+00 : f32
      %61 = vector.broadcast %cst_26 : f32 to vector<1x17x128xf32>
      %c0_27 = arith.constant 0 : index
      %c0_28 = arith.constant 0 : index
      %c0_29 = arith.constant 0 : index
      %62 = vector.load %arg6[%c0_27, %c0_28, %c0_29] : memref<1x17x128xf32, #tpu.memory_space<vmem>>, vector<1x17x128xf32>
      tpu.vector_store %arg6[%c0_27, %c0_28, %c0_29], %61 {strides = array<i32>} : memref<1x17x128xf32, #tpu.memory_space<vmem>>, vector<1x17x128xf32>,
    } else {
    }
    %3 = tpu.iota {dimensions = array<i32: 0>} : vector<128x256xi32>
    %c0 = arith.constant 0 : index
    %c0_1 = arith.constant 0 : index
    %4 = vector.load %arg2[%c0, %c0_1] : memref<2x256xi32, #tpu.memory_space<vmem>>, vector<1x256xi32>
    %5 = vector.broadcast %4 : vector<1x256xi32> to vector<128x256xi32>
    %6 = arith.cmpi eq, %3, %5 : vector<128x256xi32>
    %7 = arith.extui %6 : vector<128x256xi1> to vector<128x256xi32>
    %8 = arith.sitofp %7 : vector<128x256xi32> to vector<128x256xf32>
    %c1 = arith.constant 1 : index
    %c0_2 = arith.constant 0 : index
    %9 = vector.load %arg2[%c1, %c0_2] : memref<2x256xi32, #tpu.memory_space<vmem>>, vector<1x256xi32>
    %10 = vector.broadcast %9 : vector<1x256xi32> to vector<128x256xi32>
    %11 = arith.cmpi eq, %3, %10 : vector<128x256xi32>
    %12 = arith.extui %11 : vector<128x256xi1> to vector<128x256xi32>
    %13 = arith.sitofp %12 : vector<128x256xi32> to vector<128x256xf32>
    %c0_3 = arith.constant 0 : index
    %c0_4 = arith.constant 0 : index
    %14 = vector.load %arg4[%c0_3, %c0_4] : memref<152x128xf32, #tpu.memory_space<vmem>>, vector<152x128xf32>
    %15 = vector.extract_strided_slice %14 {offsets = [0, 0], sizes = [128, 128], strides = [1, 1]} : vector<152x128xf32> to vector<128x128xf32>
    %cst = arith.constant dense<0.000000e+00> : vector<128x256xf32>
    %16 = tpu.matmul %15, %8, %cst {dimension_numbers = #tpu.dot_dimension_numbers<[1], [0], [0], [1], [0, 0, 1, 1], [], []>, precision = #tpu.contract_precision<fp32>} : vector<128x128xf32>, vector<128x256xf32>, vector<128x256xf32> -> vector<128x256xf32>
    %17 = vector.extract_strided_slice %14 {offsets = [128, 0], sizes = [24, 128], strides = [1, 1]} : vector<152x128xf32> to vector<24x128xf32>
    %cst_5 = arith.constant dense<0.000000e+00> : vector<24x256xf32>
    %18 = tpu.matmul %17, %13, %cst_5 {dimension_numbers = #tpu.dot_dimension_numbers<[1], [0], [0], [1], [0, 0, 1, 1], [], []>, precision = #tpu.contract_precision<fp32>} : vector<24x128xf32>, vector<128x256xf32>, vector<24x256xf32> -> vector<24x256xf32>
    %19 = vector.extract_strided_slice %18 {offsets = [0, 0], sizes = [8, 256], strides = [1, 1]} : vector<24x256xf32> to vector<8x256xf32>
    %20 = vector.extract_strided_slice %18 {offsets = [8, 0], sizes = [16, 256], strides = [1, 1]} : vector<24x256xf32> to vector<16x256xf32>
    %c0_6 = arith.constant 0 : index
    %c0_7 = arith.constant 0 : index
    %21 = vector.load %arg5[%c0_6, %c0_7] : memref<32x128xf32, #tpu.memory_space<vmem>>, vector<32x128xf32>
    %22 = tpu.concatenate %19, %19, %19, %19, %19, %19, %19, %19, %19, %19, %19, %19, %19, %19, %19, %19 in 0 : vector<8x256xf32>, vector<8x256xf32>, vector<8x256xf32>, vector<8x256xf32>, vector<8x256xf32>, vector<8x256xf32>, vector<8x256xf32>, vector<8x256xf32>, vector<8x256xf32>, vector<8x256xf32>, vector<8x256xf32>, vector<8x256xf32>, vector<8x256xf32>, vector<8x256xf32>, vector<8x256xf32>, vector<8x256xf32> -> vector<128x256xf32>
    %23 = vector.extract_strided_slice %21 {offsets = [0, 0], sizes = [16, 128], strides = [1, 1]} : vector<32x128xf32> to vector<16x128xf32>
    %24 = arith.mulf %16, %22 : vector<128x256xf32>
    %cst_8 = arith.constant dense<0.000000e+00> : vector<16x256xf32>
    %25 = tpu.matmul %23, %24, %cst_8 {dimension_numbers = #tpu.dot_dimension_numbers<[1], [0], [0], [1], [0, 0, 1, 1], [], []>, precision = #tpu.contract_precision<fp32>} : vector<16x128xf32>, vector<128x256xf32>, vector<16x256xf32> -> vector<16x256xf32>
    %26 = arith.addf %25, %20 : vector<16x256xf32>
    %27 = math.sin %26 : vector<16x256xf32>
    %28 = math.cos %26 : vector<16x256xf32>
    %cst_9 = arith.constant 2.000000e+00 : f32
    %29 = vector.broadcast %cst_9 : f32 to vector<16x256xf32>
    %30 = arith.mulf %29, %27 : vector<16x256xf32>
    %31 = arith.mulf %30, %28 : vector<16x256xf32>
    %cst_10 = arith.constant 2.000000e+00 : f32
    %32 = vector.broadcast %cst_10 : f32 to vector<16x256xf32>
    %33 = arith.mulf %32, %27 : vector<16x256xf32>
    %34 = arith.mulf %33, %27 : vector<16x256xf32>
    %cst_11 = arith.constant 1.000000e+00 : f32
    %35 = vector.broadcast %cst_11 : f32 to vector<16x256xf32>
    %36 = arith.subf %35, %34 : vector<16x256xf32>
    %cst_12 = arith.constant 2.000000e+00 : f32
    %37 = vector.broadcast %cst_12 : f32 to vector<16x256xf32>
    %38 = arith.mulf %37, %31 : vector<16x256xf32>
    %39 = arith.mulf %38, %36 : vector<16x256xf32>
    %cst_13 = arith.constant 2.000000e+00 : f32
    %40 = vector.broadcast %cst_13 : f32 to vector<16x256xf32>
    %41 = arith.mulf %40, %31 : vector<16x256xf32>
    %42 = arith.mulf %41, %31 : vector<16x256xf32>
    %cst_14 = arith.constant 1.000000e+00 : f32
    %43 = vector.broadcast %cst_14 : f32 to vector<16x256xf32>
    %44 = arith.subf %43, %42 : vector<16x256xf32>
    %cst_15 = arith.constant 1.000000e+00 : f32
    %45 = vector.broadcast %cst_15 : f32 to vector<1x256xf32>
    %46 = tpu.concatenate %27, %28, %31, %36, %39, %44, %45 in 0 : vector<16x256xf32>, vector<16x256xf32>, vector<16x256xf32>, vector<16x256xf32>, vector<16x256xf32>, vector<16x256xf32>, vector<1x256xf32> -> vector<97x256xf32>
    %47 = vector.extract_strided_slice %21 {offsets = [16, 0], sizes = [16, 97], strides = [1, 1]} : vector<32x128xf32> to vector<16x97xf32>
    %cst_16 = arith.constant dense<0.000000e+00> : vector<16x256xf32>
    %48 = tpu.matmul %47, %46, %cst_16 {dimension_numbers = #tpu.dot_dimension_numbers<[1], [0], [0], [1], [0, 0, 1, 1], [], []>, precision = #tpu.contract_precision<fp32>} : vector<16x97xf32>, vector<97x256xf32>, vector<16x256xf32> -> vector<16x256xf32>
    %49 = tpu.concatenate %48, %45 in 0 : vector<16x256xf32>, vector<1x256xf32> -> vector<17x256xf32>
    %50 = tpu.iota {dimensions = array<i32: 1>} : vector<256x128xi32>
    %c0_17 = arith.constant 0 : index
    %c0_18 = arith.constant 0 : index
    %51 = vector.load %arg3[%c0_17, %c0_18] : memref<256x1xi32, #tpu.memory_space<vmem>>, vector<256x1xi32>
    %52 = vector.broadcast %51 : vector<256x1xi32> to vector<256x128xi32>
    %53 = arith.cmpi eq, %52, %50 : vector<256x128xi32>
    %54 = arith.extui %53 : vector<256x128xi1> to vector<256x128xi32>
    %55 = arith.sitofp %54 : vector<256x128xi32> to vector<256x128xf32>
    %c0_19 = arith.constant 0 : index
    %c0_20 = arith.constant 0 : index
    %c0_21 = arith.constant 0 : index
    %56 = vector.load %arg6[%c0_19, %c0_20, %c0_21] : memref<1x17x128xf32, #tpu.memory_space<vmem>>, vector<1x17x128xf32>
    %cst_22 = arith.constant dense<0.000000e+00> : vector<17x128xf32>
    %57 = tpu.matmul %49, %55, %cst_22 {dimension_numbers = #tpu.dot_dimension_numbers<[1], [0], [0], [1], [0, 0, 1, 1], [], []>, precision = #tpu.contract_precision<fp32>} : vector<17x256xf32>, vector<256x128xf32>, vector<17x128xf32> -> vector<17x128xf32>
    %58 = vector.shape_cast %57 : vector<17x128xf32> to vector<1x17x128xf32>
    %59 = arith.addf %56, %58 : vector<1x17x128xf32>
    %c0_23 = arith.constant 0 : index
    %c0_24 = arith.constant 0 : index
    %c0_25 = arith.constant 0 : index
    %60 = vector.load %arg6[%c0_23, %c0_24, %c0_25] : memref<1x17x128xf32, #tpu.memory_space<vmem>>, vector<1x17x128xf32>
    tpu.vector_store %arg6[%c0_23, %c0_24, %c0_25], %59 {strides = array<i32>} : memref<1x17x128xf32, #tpu.memory_space<vmem>>, vector<1x17x128xf32>,
    return
  }
  func.func @transform_0(%arg0: i32, %arg1: i32) -> (i32, i32) {
    %c1_i32 = arith.constant 1 : i32
    %0 = arith.muli %arg0, %c1_i32 : i32
    %1 = arith.addi %0, %arg1 : i32
    %c0_i32 = arith.constant 0 : i32
    %c0_i32_0 = arith.constant 0 : i32
    return %c0_i32, %1 : i32, i32
  }
  func.func @transform_1(%arg0: i32, %arg1: i32) -> (i32, i32) {
    %c1_i32 = arith.constant 1 : i32
    %0 = arith.muli %arg0, %c1_i32 : i32
    %1 = arith.addi %0, %arg1 : i32
    %c0_i32 = arith.constant 0 : i32
    %c0_i32_0 = arith.constant 0 : i32
    return %1, %c0_i32 : i32, i32
  }
  func.func @transform_2(%arg0: i32, %arg1: i32) -> (i32, i32) {
    %c0_i32 = arith.constant 0 : i32
    %c0_i32_0 = arith.constant 0 : i32
    %c0_i32_1 = arith.constant 0 : i32
    return %c0_i32, %c0_i32_0 : i32, i32
  }
  func.func @transform_3(%arg0: i32, %arg1: i32) -> (i32, i32) {
    %c0_i32 = arith.constant 0 : i32
    %c0_i32_0 = arith.constant 0 : i32
    %c0_i32_1 = arith.constant 0 : i32
    return %c0_i32, %c0_i32_0 : i32, i32
  }
  func.func @transform_4(%arg0: i32, %arg1: i32) -> (i32, i32, i32) {
    %c0_i32 = arith.constant 0 : i32
    %c0_i32_0 = arith.constant 0 : i32
    %c0_i32_1 = arith.constant 0 : i32
    return %arg0, %c0_i32, %c0_i32_0 : i32, i32, i32
  }
}

</mosaic_0001>

<bundles_post_ra>
// kernel: tpu_custom_call.1
= control target key start
LH: loop header
LB: loop body
LE: loop exit
PB: predicated region body
PF: predicated region fallthrough
CT: control target
= control target key end

     0   :  { %s7747_s15 = smov 0   ;;  %s7749_s16 = smov 0   ;;  %s13039_s0 = inlined_call_operand.vmem [shape: s32[2,512], index: 0, kind: input, shape index: {}]   ;;  %s13040_s1 = inlined_call_operand.vmem [shape: s32[512,1], index: 1, kind: input, shape index: {}]   ;;  %s13041_s2 = inlined_call_operand.vmem [shape: f32[152,128], index: 2, kind: input, shape index: {}]   ;;  %s13042_s3 = inlined_call_operand.vmem [shape: f32[32,128], index: 3, kind: input, shape index: {}]   ;;  %s13043_s4 = inlined_call_operand.vmem [shape: f32[2,17,128], index: 4, kind: output, shape index: {}]  }
   0x1   :  { %s7751_s17 = smov 0  }
   0x2 LB: > { %s26_s18 = sadd.s32 1, %s7707_s16  ;;  %p6944_p0 = scmp.ge.s32.totalorder %s7711_s17, 1  ;;  %s7711_s17 = sphi %s7751_s17, %s14_s17   ;;  %s7707_s16 = sphi %s7749_s16, %s14215_s16   ;;  %s7703_s15 = sphi %s7747_s15, %s14214_s15  }
   0x3   : > { %p28_p1 = scmp.ge.s32.totalorder %s26_s18, 2  ;;  %p194_p2 = scmp.lt.s32.totalorder %s7711_s17, 3 }
   0x5   : > { %s14217_s18 = smov (%p28_p1, %s26_s18), 0  ;;  %p195_p3 = pnand %p6944_p0, %p194_p2 }
   0x7   : > { %198 = sbr.rel (%p195_p3) target bundleno = 1603 (0x643), region = 36 }
   0xc   : > { %s6945_s19 = sshll.u32 %s7703_s15, 1  ;;  %v13044_v0 = vlaneseq  ;;  %v483_v1 = vld [vmem:[%s13041_s2] sm:$0xff]  ;;  %v484_v2 = vld [vmem:[%s13041_s2 + $0x8] sm:$0xff]  ;;  %v485_v3 = vld [vmem:[%s13041_s2 + $0x10] sm:$0xff]  ;;  %v13070_v4 = vmov 0.0   ;;  %v13074_v43 = vmov 1.0  }
   0xd   : > { %p229_p4 = scmp.lt.s32.totalorder %s6945_s19, 3  ;;  %598 = vmatprep.mubr.f32.mxu0 %v13070_v4  ;;  %v7778_v5 = vand.u32 4294901760, %v483_v1  ;;  %v7780_v6 = vand.u32 4294901760, %v484_v2  ;;  %v7782_v7 = vand.u32 4294901760, %v485_v3  ;;  %999 = vmatprep.mubr.f32.mxu1 %v13070_v4  ;;  %v486_v8 = vld [vmem:[%s13041_s2 + $0x18] sm:$0xff]  ;;  %v7791_v9 = vld [vmem:[%s13041_s2 + $0x20] sm:$0xff] }
   0xe   : > { %v7794_v10 = vshrl.u32 %v13044_v0, 7  ;;  %v7796_v11 = vand.u32 4294901760, %v486_v8  ;;  %v7799_v12 = vand.u32 4294901760, %v7791_v9  ;;  %v7804_v13 = vld [vmem:[%s13041_s2 + $0x28] sm:$0xff]  ;;  %s6947_s22 = sshll.u32 %s7703_s15, 5  ;;  %p243_p6 = scmp.lt.s32.totalorder %s7703_s15, 1 }
   0xf   : > { %13470 = vst [vmem:[#allocation2_spill] sm:$0xff] %v7778_v5  ;;  %13471 = vst [vmem:[#allocation3_spill] sm:$0xff] %v7780_v6  ;;  %s14219_s19 = smov (!%p229_p4, %s6945_s19), 3  ;;  %v7807_v14 = vsub.f32 %v483_v1, %v7778_v5  ;;  %v7810_v15 = vsub.f32 %v484_v2, %v7780_v6  ;;  %v7813_v16 = vsub.f32 %v485_v3, %v7782_v7  ;;  %v7816_v17 = vand.u32 4294901760, %v7804_v13  ;;  %p237_p5 = scmp.lt.s32.totalorder %s6947_s22, 63 }
  0x10   : > { %13472 = vst [vmem:[#allocation4_spill] sm:$0xff] %v7782_v7  ;;  %13473 = vst [vmem:[#allocation5_spill] sm:$0xff] %v7796_v11  ;;  %v7819_v18 = vadd.s32 120, %v7794_v10  ;;  %v13052_v19 = vsub.s32 1, %v7794_v10  ;;  %v13057_v20 = vsub.s32 0, %v7794_v10  ;;  %v7824_v21 = vadd.s32 112, %v7794_v10 }
  0x11   : > { %13474 = vst [vmem:[#allocation6_spill] sm:$0xff] %v7799_v12  ;;  %13475 = vst [vmem:[#allocation7_spill] sm:$0xff] %v7807_v14  ;;  %s6946_s6 = sshll.u32 %s14219_s19, 1  ;;  %v7827_v22 = vadd.s32 104, %v7794_v10  ;;  %v7830_v23 = vadd.s32 96, %v7794_v10  ;;  %v7833_v24 = vadd.s32 88, %v7794_v10  ;;  %v7866_v34 = vsub.f32 %v486_v8, %v7796_v11 }
  0x12   : > { %13476 = vst [vmem:[#allocation8_spill] sm:$0xff] %v7816_v17  ;;  %v7836_v25 = vadd.s32 80, %v7794_v10  ;;  %s7841_s9 = scalar_lea.vmem %s13039_s0, %s6946_s6  ;;  %v7844_v26 = vadd.s32 72, %v7794_v10  ;;  %v7847_v27 = vadd.s32 64, %v7794_v10  ;;  %v7850_v28 = vadd.s32 56, %v7794_v10  ;;  %s14221_s22 = smov (!%p237_p5, %s6947_s22), 63 }
  0x13   : > { %v7853_v29 = vadd.s32 48, %v7794_v10  ;;  %v272_v30 = vld [vmem:[%s7841_s9] ss:$2 sm:$0x3]  ;;  %v7857_v31 = vadd.s32 40, %v7794_v10  ;;  %v7860_v32 = vadd.s32 32, %v7794_v10 }
  0x14   : > { %13477 = vst [vmem:[#allocation9_spill] sm:$0xff] %v7847_v27  ;;  %13478 = vst [vmem:[#allocation10_spill] sm:$0xff] %v7850_v28  ;;  %v7863_v33 = vadd.s32 24, %v7794_v10  ;;  %v7870_v35 = vrot.slane %v272_v30, %v13052_v19  ;;  %v7874_v36 = vrot.slane %v272_v30, %v13057_v20  ;;  %v7877_v37 = vadd.s32 16, %v7794_v10  ;;  %s6948_s23 = sshll.u32 %s14221_s22, 3  ;;  %s14223_s15 = smov (!%p243_p6, %s7703_s15), 1 }
  0x15   : > { %13479 = vst [vmem:[#allocation11_spill] sm:$0xff] %v7853_v29  ;;  %13480 = vst [vmem:[#allocation12_spill] sm:$0xff] %v7857_v31  ;;  %v7880_v38 = vadd.s32 8, %v7794_v10  ;;  %s11178_s26 = scalar_lea.vmem %s13040_s1, %s6948_s23  ;;  %s7621_s5 = smul.u32 24, %s14223_s15 }
  0x16   : > { %13481 = vst [vmem:[#allocation13_spill] sm:$0xff] %v7860_v32  ;;  %13482 = vst [vmem:[#allocation14_spill] sm:$0xff] %v7863_v33  ;;  %vm312_vm0 = vcmp.eq.s32.totalorder %v7819_v18, %v7870_v35  ;;  %vm311_vm1 = vcmp.eq.s32.totalorder %v7819_v18, %v7874_v36  ;;  %vm310_vm2 = vcmp.eq.s32.totalorder %v7824_v21, %v7870_v35 }
  0x17   : > { %13483 = vst [vmem:[#allocation15_spill] sm:$0xff] %v7866_v34  ;;  %13484 = vst [vmem:[#allocation16_spill] sm:$0xff] %v7877_v37  ;;  %vm309_vm3 = vcmp.eq.s32.totalorder %v7824_v21, %v7874_v36  ;;  %7015 = vmatprep.subr.msk.mxu0 %vm312_vm0, %v13074_v43  ;;  %v6979_v44 = vsel %vm310_vm2, 1.0, %v13070_v4  ;;  %vm13135_vm4 = vcmp.eq.s32.totalorder %v7827_v22, %v7870_v35  ;;  %v6981_v60 = vsel %vm312_vm0, 1.0, %v13070_v4  ;;  %s13022_s8 = scalar_lea.vmem %s13043_s4, %s7621_s5 }
  0x18   : > { %13485 = vst [vmem:[#allocation17_spill] sm:$0xff] %v7880_v38  ;;  %v6978_v45 = vsel %vm309_vm3, 1.0, %v13070_v4  ;;  %vm13134_vm5 = vcmp.eq.s32.totalorder %v7827_v22, %v7874_v36  ;;  %7016 = vmatpush1.msk.msra.mxu0 %vm311_vm1, %v13074_v43  ;;  %v7914_v46 = vsub.f32 %v6979_v44, %v6979_v44  ;;  %v6977_v48 = vsel %vm13135_vm4, 1.0, %v13070_v4 }
  0x19   : > { %v7916_v47 = vsub.f32 %v6978_v45, %v6978_v45  ;;  %v6976_v49 = vsel %vm13134_vm5, 1.0, %v13070_v4  ;;  %7017 = vmatprep.subr.msk.mxu0 %vm310_vm2, %v13074_v43  ;;  %v7930_v50 = vsub.f32 %v6977_v48, %v6977_v48  ;;  %vm306_vm6 = vcmp.eq.s32.totalorder %v7830_v23, %v7870_v35 }
  0x1a   : > { %v7932_v51 = vsub.f32 %v6976_v49, %v6976_v49  ;;  %vm305_vm7 = vcmp.eq.s32.totalorder %v7830_v23, %v7874_v36  ;;  %7018 = vmatpush1.msk.msra.mxu0 %vm309_vm3, %v13074_v43  ;;  %v6975_v52 = vsel %vm306_vm6, 1.0, %v13070_v4  ;;  %vm304_vm8 = vcmp.eq.s32.totalorder %v7833_v24, %v7870_v35 }
  0x1b   : > { %v6974_v53 = vsel %vm305_vm7, 1.0, %v13070_v4  ;;  %vm303_vm9 = vcmp.eq.s32.totalorder %v7833_v24, %v7874_v36  ;;  %7019 = vmatprep.subr.msk.mxu0 %vm13135_vm4, %v13074_v43  ;;  %v7958_v54 = vsub.f32 %v6975_v52, %v6975_v52  ;;  %v6973_v56 = vsel %vm304_vm8, 1.0, %v13070_v4 }
  0x1c   : > { %v7960_v55 = vsub.f32 %v6974_v53, %v6974_v53  ;;  %v6972_v57 = vsel %vm303_vm9, 1.0, %v13070_v4  ;;  %7020 = vmatpush1.msk.msra.mxu0 %vm13134_vm5, %v13074_v43  ;;  %v7974_v58 = vsub.f32 %v6973_v56, %v6973_v56  ;;  %vm302_vm10 = vcmp.eq.s32.totalorder %v7836_v25, %v7870_v35 }
  0x1d   : > { %v7976_v59 = vsub.f32 %v6972_v57, %v6972_v57  ;;  %7021 = vmatprep.subr.msk.mxu0 %vm306_vm6, %v13074_v43  ;;  %v7988_v61 = vsub.f32 %v6981_v60, %v6981_v60  ;;  %v6971_v62 = vsel %vm302_vm10, 1.0, %v13070_v4  ;;  %v6980_v63 = vsel %vm311_vm1, 1.0, %v13070_v4 }
  0x1e   : > { %vm301_vm11 = vcmp.eq.s32.totalorder %v7836_v25, %v7874_v36  ;;  %7022 = vmatpush1.msk.msra.mxu0 %vm305_vm7, %v13074_v43  ;;  %v8004_v1 = vsub.f32 %v6971_v62, %v6971_v62  ;;  %v8006_v2 = vsub.f32 %v6980_v63, %v6980_v63  ;;  %v13046_v8 = vand.u32 4294901760, %v7914_v46 }
  0x1f   : > { %13486 = vst [vmem:[#allocation18_spill] sm:$0xff] %v7988_v61  ;;  %v6970_v3 = vsel %vm301_vm11, 1.0, %v13070_v4  ;;  %7023 = vmatprep.subr.msk.mxu0 %vm304_vm8, %v13074_v43  ;;  %v13051_v30 = vand.u32 4294901760, %v7988_v61  ;;  %vm300_vm12 = vcmp.eq.s32.totalorder %v7844_v26, %v7870_v35  ;;  %v13045_v45 = vand.u32 4294901760, %v7916_v47 }
  0x20   : > { %v8018_v44 = vsub.f32 %v6970_v3, %v6970_v3  ;;  %7024 = vmatpush1.msk.msra.mxu0 %vm303_vm9, %v13074_v43  ;;  %v13047_v48 = vand.u32 4294901760, %v8006_v2  ;;  %v790_v49 = vsub.f32 %v7914_v46, %v13046_v8  ;;  %v6969_v52 = vsel %vm300_vm12, 1.0, %v13070_v4 }
  0x21   : > { %vm13184_vm13 = vcmp.eq.s32.totalorder %v7844_v26, %v7874_v36  ;;  %v778_v53 = vsub.f32 %v7988_v61, %v13051_v30  ;;  %7025 = vmatprep.subr.msk.mxu0 %vm302_vm10, %v13074_v43  ;;  %v8044_v56 = vsub.f32 %v6969_v52, %v6969_v52  ;;  %v796_v57 = vsub.f32 %v7916_v47, %v13045_v45 }
  0x22   : > { %v6968_v60 = vsel %vm13184_vm13, 1.0, %v13070_v4  ;;  %v784_v62 = vsub.f32 %v8006_v2, %v13047_v48  ;;  %7026 = vmatpush1.msk.msra.mxu0 %vm301_vm11, %v13074_v43  ;;  %v791_v63 = vand.u32 4294901760, %v790_v49  ;;  %v13048_v52 = vand.u32 4294901760, %v7930_v50 }
  0x23   : > { %v8060_v3 = vsub.f32 %v6968_v60, %v6968_v60  ;;  %v779_v0 = vand.u32 4294901760, %v778_v53  ;;  %7027 = vmatprep.subr.msk.mxu0 %vm300_vm12, %v13074_v43  ;;  %v797_v45 = vand.u32 4294901760, %v796_v57  ;;  %vm13049_vm14 = vcmp.eq.s32.totalorder %v7847_v27, %v7870_v35 }
  0x24   : > { %v13050_v8 = vand.u32 4294901760, %v7932_v51  ;;  %v785_v48 = vand.u32 4294901760, %v784_v62  ;;  %7028 = vmatpush1.msk.msra.mxu0 %vm13184_vm13, %v13074_v43  ;;  %v802_v49 = vsub.f32 %v7930_v50, %v13048_v52  ;;  %v6967_v53 = vsel %vm13049_vm14, 1.0, %v13070_v4 }
  0x25   : > { %vm13053_vm15 = vcmp.eq.s32.totalorder %v7847_v27, %v7874_v36  ;;  %780 = vmatprep.subr.mxu1 %v779_v0  ;;  %7029 = vmatprep.subr.msk.mxu0 %vm13049_vm14, %v13074_v43  ;;  %v8087_v57 = vsub.f32 %v6967_v53, %v6967_v53  ;;  %v13056_v52 = vand.u32 4294901760, %v7958_v54  ;;  %vm13054_vm14 = vcmp.eq.s32.totalorder %v7850_v28, %v7870_v35 }
  0x26   : > { %v808_v60 = vsub.f32 %v7932_v51, %v13050_v8  ;;  %v6966_v62 = vsel %vm13053_vm15, 1.0, %v13070_v4  ;;  %786 = vmatpush1.msra.mxu1 %v785_v48  ;;  %v803_v0 = vand.u32 4294901760, %v802_v49  ;;  %7030 = vmatpush1.msk.msra.mxu0 %vm13053_vm15, %v13074_v43  ;;  %v13055_v8 = vand.u32 4294901760, %v7960_v55 }
  0x27   : > { %v8101_v53 = vsub.f32 %v6966_v62, %v6966_v62  ;;  %792 = vmatprep.subr.mxu1 %v791_v63  ;;  %v814_v19 = vsub.f32 %v7958_v54, %v13056_v52  ;;  %v6965_v48 = vsel %vm13054_vm14, 1.0, %v13070_v4  ;;  %7031 = vmatprep.subr.msk.mxu0 %vm13054_vm14, %v13074_v43  ;;  %vm13058_vm15 = vcmp.eq.s32.totalorder %v7850_v28, %v7874_v36 }
  0x28   : > { %v809_v30 = vand.u32 4294901760, %v808_v60  ;;  %798 = vmatpush1.msra.mxu1 %v797_v45  ;;  %v8119_v63 = vsub.f32 %v6965_v48, %v6965_v48  ;;  %v820_v49 = vsub.f32 %v7960_v55, %v13055_v8  ;;  %v6964_v60 = vsel %vm13058_vm15, 1.0, %v13070_v4  ;;  %7032 = vmatpush1.msk.msra.mxu0 %vm13058_vm15, %v13074_v43 }
  0x29   : > { %v13061_v62 = vand.u32 4294901760, %v7974_v58  ;;  %804 = vmatprep.subr.mxu1 %v803_v0  ;;  %v815_v45 = vand.u32 4294901760, %v814_v19  ;;  %v8133_v48 = vsub.f32 %v6964_v60, %v6964_v60  ;;  %vm13059_vm14 = vcmp.eq.s32.totalorder %v7853_v29, %v7870_v35 }
  0x2a   : > { %13487 = vst [vmem:[#allocation19_spill] sm:$0xff] %v8119_v63  ;;  %v13060_v8 = vand.u32 4294901760, %v7976_v59  ;;  %810 = vmatpush1.msra.mxu1 %v809_v30  ;;  %v821_v52 = vand.u32 4294901760, %v820_v49  ;;  %v6963_v42 = vsel %vm13059_vm14, 1.0, %v13070_v4  ;;  %7033 = vmatprep.subr.msk.mxu0 %vm13059_vm14, %v13074_v43  ;;  %vm13062_vm15 = vcmp.eq.s32.totalorder %v7853_v29, %v7874_v36 }
  0x2b   : > { %13488 = vst [vmem:[#allocation20_spill] sm:$0xff] %v8133_v48  ;;  %v826_v20 = vsub.f32 %v7974_v58, %v13061_v62  ;;  %816 = vmatprep.subr.mxu1 %v815_v45  ;;  %v8151_v19 = vsub.f32 %v6963_v42, %v6963_v42  ;;  %v6962_v0 = vsel %vm13062_vm15, 1.0, %v13070_v4  ;;  %7034 = vmatpush1.msk.msra.mxu0 %vm13062_vm15, %v13074_v43  ;;  %v13065_v49 = vand.u32 4294901760, %v8004_v1 }
  0x2c   : > { %v832_v30 = vsub.f32 %v7976_v59, %v13060_v8  ;;  %822 = vmatpush1.msra.mxu1 %v821_v52  ;;  %v8165_v42 = vsub.f32 %v6962_v0, %v6962_v0  ;;  %vm13063_vm14 = vcmp.eq.s32.totalorder %v7857_v31, %v7870_v35  ;;  %v13064_v45 = vand.u32 4294901760, %v8018_v44 }
  0x2d   : > { %13489 = vst [vmem:[#allocation21_spill] sm:$0xff] %v8151_v19  ;;  %v827_v60 = vand.u32 4294901760, %v826_v20  ;;  %v838_v62 = vsub.f32 %v8004_v1, %v13065_v49  ;;  %v6961_v41 = vsel %vm13063_vm14, 1.0, %v13070_v4  ;;  %7035 = vmatprep.subr.msk.mxu0 %vm13063_vm14, %v13074_v43  ;;  %vm13066_vm15 = vcmp.eq.s32.totalorder %v7857_v31, %v7874_v36 }
  0x2e   : > { %13490 = vst [vmem:[#allocation22_spill] sm:$0xff] %v8165_v42  ;;  %v833_v8 = vand.u32 4294901760, %v832_v30  ;;  %v8183_v20 = vsub.f32 %v6961_v41, %v6961_v41  ;;  %v844_v52 = vsub.f32 %v8018_v44, %v13064_v45  ;;  %v6960_v30 = vsel %vm13066_vm15, 1.0, %v13070_v4  ;;  %7036 = vmatpush1.msk.msra.mxu0 %vm13066_vm15, %v13074_v43 }
  0x2f   : > { %828 = vmatprep.subr.mxu1 %v827_v60  ;;  %v13069_v0 = vand.u32 4294901760, %v8044_v56  ;;  %v839_v60 = vand.u32 4294901760, %v838_v62  ;;  %v8197_v41 = vsub.f32 %v6960_v30, %v6960_v30  ;;  %vm13067_vm14 = vcmp.eq.s32.totalorder %v7860_v32, %v7870_v35 }
  0x30   : > { %13491 = vst [vmem:[#allocation23_spill] sm:$0xff] %v8183_v20  ;;  %834 = vmatpush1.msra.mxu1 %v833_v8  ;;  %v13068_v45 = vand.u32 4294901760, %v8060_v3  ;;  %v845_v49 = vand.u32 4294901760, %v844_v52  ;;  %v6959_v39 = vsel %vm13067_vm14, 1.0, %v13070_v4  ;;  %7037 = vmatprep.subr.msk.mxu0 %vm13067_vm14, %v13074_v43  ;;  %vm13078_vm15 = vcmp.eq.s32.totalorder %v7860_v32, %v7874_v36 }
  0x31   : > { %13492 = vst [vmem:[#allocation24_spill] sm:$0xff] %v8197_v41  ;;  %v850_v40 = vsub.f32 %v8044_v56, %v13069_v0  ;;  %840 = vmatprep.subr.mxu1 %v839_v60  ;;  %v8215_v8 = vsub.f32 %v6959_v39, %v6959_v39  ;;  %v6958_v52 = vsel %vm13078_vm15, 1.0, %v13070_v4  ;;  %7038 = vmatpush1.msk.msra.mxu0 %vm13078_vm15, %v13074_v43  ;;  %v13081_v30 = vand.u32 4294901760, %v8087_v57 }
  0x32   : > { %v856_v62 = vsub.f32 %v8060_v3, %v13068_v45  ;;  %846 = vmatpush1.msra.mxu1 %v845_v49  ;;  %v8229_v39 = vsub.f32 %v6958_v52, %v6958_v52  ;;  %vm13079_vm14 = vcmp.eq.s32.totalorder %v7863_v33, %v7870_v35  ;;  %v13080_v45 = vand.u32 4294901760, %v8101_v53 }
  0x33   : > { %13493 = vst [vmem:[#allocation25_spill] sm:$0xff] %v8215_v8  ;;  %v851_v60 = vand.u32 4294901760, %v850_v40  ;;  %v862_v4 = vsub.f32 %v8087_v57, %v13081_v30  ;;  %v13495_v31 = vmov 0.0   ;;  %v13496_v32 = vmov 1.0  }
  0x34   : > { %13494 = vst [vmem:[#allocation26_spill] sm:$0xff] %v8229_v39  ;;  %v857_v0 = vand.u32 4294901760, %v856_v62  ;;  %v6957_v43 = vsel %vm13079_vm14, 1.0, %v13495_v31  ;;  %7039 = vmatprep.subr.msk.mxu0 %vm13079_vm14, %v13496_v32  ;;  %vm13086_vm15 = vcmp.eq.s32.totalorder %v7863_v33, %v7874_v36  ;;  %v868_v49 = vsub.f32 %v8101_v53, %v13080_v45 }
  0x35   : > { %852 = vmatprep.subr.mxu1 %v851_v60  ;;  %v8247_v40 = vsub.f32 %v6957_v43, %v6957_v43  ;;  %v6956_v62 = vsel %vm13086_vm15, 1.0, %v13495_v31  ;;  %7040 = vmatpush1.msk.msra.mxu0 %vm13086_vm15, %v13496_v32  ;;  %v13089_v52 = vand.u32 4294901760, %v8119_v63  ;;  %v863_v60 = vand.u32 4294901760, %v862_v4 }
  0x36   : > { %858 = vmatpush1.msra.mxu1 %v857_v0  ;;  %v8261_v43 = vsub.f32 %v6956_v62, %v6956_v62  ;;  %vm13087_vm14 = vcmp.eq.s32.totalorder %v7877_v37, %v7870_v35  ;;  %v13088_v45 = vand.u32 4294901760, %v8133_v48  ;;  %v869_v30 = vand.u32 4294901760, %v868_v49 }
  0x37   : > { %v874_v29 = vsub.f32 %v8119_v63, %v13089_v52  ;;  %v6955_v33 = vsel %vm13087_vm14, 1.0, %v13495_v31  ;;  %7041 = vmatprep.subr.msk.mxu0 %vm13087_vm14, %v13496_v32  ;;  %vm13094_vm15 = vcmp.eq.s32.totalorder %v7877_v37, %v7874_v36  ;;  %864 = vmatprep.subr.mxu1 %v863_v60  ;;  %v13097_v62 = vand.u32 4294901760, %v8151_v19 }
  0x38   : > { %v8279_v4 = vsub.f32 %v6955_v33, %v6955_v33  ;;  %v880_v0 = vsub.f32 %v8133_v48, %v13088_v45  ;;  %v6954_v49 = vsel %vm13094_vm15, 1.0, %v13495_v31  ;;  %7042 = vmatpush1.msk.msra.mxu0 %vm13094_vm15, %v13496_v32  ;;  %870 = vmatpush1.msra.mxu1 %v869_v30  ;;  %vm13095_vm14 = vcmp.eq.s32.totalorder %v7880_v38, %v7870_v35 }
  0x39   : > { %v875_v60 = vand.u32 4294901760, %v874_v29  ;;  %v8293_v33 = vsub.f32 %v6954_v49, %v6954_v49  ;;  %v13096_v45 = vand.u32 4294901760, %v8165_v42  ;;  %v886_v48 = vsub.f32 %v8151_v19, %v13097_v62  ;;  %7043 = vmatprep.subr.msk.mxu0 %vm13095_vm14, %v13496_v32 }
  0x3a   : > { %v881_v52 = vand.u32 4294901760, %v880_v0  ;;  %v6953_v37 = vsel %vm13095_vm14, 1.0, %v13495_v31  ;;  %vm13102_vm15 = vcmp.eq.s32.totalorder %v7880_v38, %v7874_v36  ;;  %v13103_v49 = vand.u32 4294901760, %v8183_v20 }
  0x3b   : > { %876 = vmatprep.subr.mxu1 %v875_v60  ;;  %v8311_v29 = vsub.f32 %v6953_v37, %v6953_v37  ;;  %v892_v30 = vsub.f32 %v8165_v42, %v13096_v45  ;;  %v6952_v0 = vsel %vm13102_vm15, 1.0, %v13495_v31  ;;  %7044 = vmatpush1.msk.msra.mxu0 %vm13102_vm15, %v13496_v32  ;;  %v887_v60 = vand.u32 4294901760, %v886_v48 }
  0x3c   : > { %882 = vmatpush1.msra.mxu1 %v881_v52  ;;  %v8325_v37 = vsub.f32 %v6952_v0, %v6952_v0  ;;  %vm282_vm14 = vcmp.eq.s32.totalorder %v7794_v10, %v7870_v35  ;;  %v13104_v45 = vand.u32 4294901760, %v8197_v41  ;;  %v898_v42 = vsub.f32 %v8183_v20, %v13103_v49 }
  0x3d   : > { %v893_v62 = vand.u32 4294901760, %v892_v30  ;;  %v6951_v38 = vsel %vm282_vm14, 1.0, %v13495_v31  ;;  %7045 = vmatprep.subr.msk.mxu0 %vm282_vm14, %v13496_v32  ;;  %vm281_vm15 = vcmp.eq.s32.totalorder %v7794_v10, %v7874_v36  ;;  %888 = vmatprep.subr.mxu1 %v887_v60  ;;  %v13116_v0 = vand.u32 4294901760, %v8215_v8 }
  0x3e   : > { %v8343_v48 = vsub.f32 %v6951_v38, %v6951_v38  ;;  %v904_v52 = vsub.f32 %v8197_v41, %v13104_v45  ;;  %v6950_v30 = vsel %vm281_vm15, 1.0, %v13495_v31  ;;  %7046 = vmatpush1.msk.msra.mxu0 %vm281_vm15, %v13496_v32  ;;  %v899_v60 = vand.u32 4294901760, %v898_v42 }
  0x3f   : > { %894 = vmatpush1.msra.mxu1 %v893_v62  ;;  %v8357_v38 = vsub.f32 %v6950_v30, %v6950_v30  ;;  %v13497_v49 = vand.u32 4294901760, %v7807_v14  ;;  %v13117_v41 = vand.u32 4294901760, %v8229_v39  ;;  %1114 = vmatprep.subr.mxu0 %v7988_v61  ;;  %v910_v19 = vsub.f32 %v8215_v8, %v13116_v0 }
  0x40   : > { %v905_v20 = vand.u32 4294901760, %v904_v52  ;;  %v13123_v28 = vand.u32 4294901760, %v8247_v40  ;;  %v13122_v62 = vand.u32 4294901760, %v8261_v43  ;;  %900 = vmatprep.subr.mxu1 %v899_v60  ;;  %v13124_v60 = vand.u32 4294901760, %v8293_v33 }
  0x41   : > { %v602_v45 = vsub.f32 %v7807_v14, %v13497_v49  ;;  %v916_v30 = vsub.f32 %v8229_v39, %v13117_v41  ;;  %v13127_v49 = vand.u32 4294901760, %v8279_v4  ;;  %v13498_v14 = vand.u32 4294901760, %v7810_v15 }
  0x42   : > { %906 = vmatpush1.msra.mxu1 %v905_v20  ;;  %v911_v61 = vand.u32 4294901760, %v910_v19  ;;  %v922_v0 = vsub.f32 %v8247_v40, %v13123_v28  ;;  %v13126_v28 = vand.u32 4294901760, %v8325_v37 }
  0x43   : > { %v603_v42 = vand.u32 4294901760, %v602_v45  ;;  %v613_v52 = vsub.f32 %v7810_v15, %v13498_v14  ;;  %v928_v45 = vsub.f32 %v8261_v43, %v13122_v62  ;;  %v917_v41 = vand.u32 4294901760, %v916_v30 }
  0x44   : > { %v934_v39 = vsub.f32 %v8279_v4, %v13127_v49  ;;  %v13125_v14 = vand.u32 4294901760, %v8311_v29  ;;  %912 = vmatprep.subr.mxu1 %v911_v61  ;;  %v923_v19 = vand.u32 4294901760, %v922_v0  ;;  %v940_v62 = vsub.f32 %v8293_v33, %v13124_v60 }
  0x45   : > { %604 = vmatmul.mubr.f32.vlgmr.msra.gmra.mxu0 %v603_v42  ;;  %v614_v8 = vand.u32 4294901760, %v613_v52  ;;  %v929_v20 = vand.u32 4294901760, %v928_v45  ;;  %918 = vmatpush1.msra.mxu1 %v917_v41  ;;  %v13130_v52 = vand.u32 4294901760, %v8343_v48  ;;  %v13499_v61 = vand.u32 4294901760, %v7813_v16 }
  0x46   : > { %609 = vmatprep.mubr.f32.mxu0 %v13495_v31  ;;  %v935_v42 = vand.u32 4294901760, %v934_v39  ;;  %v946_v30 = vsub.f32 %v8311_v29, %v13125_v14  ;;  %1117 = vmatpush1.msra.mxu0 %v8006_v2  ;;  %v941_v45 = vand.u32 4294901760, %v940_v62  ;;  %v952_v60 = vsub.f32 %v8325_v37, %v13126_v28 }
  0x47   : > { %v624_v0 = vsub.f32 %v7813_v16, %v13499_v61  ;;  %924 = vmatprep.subr.mxu1 %v923_v19  ;;  %1120 = vmatprep.subr.mxu0 %v7914_v46  ;;  %v13500_v39 = vand.u32 4294901760, %v7866_v34  ;;  %v489_v61 = vld [vmem:[%s13041_s2 + $0x30] sm:$0xff]  ;;  %v958_v62 = vsub.f32 %v8343_v48, %v13130_v52  ;;  %v8416_v49 = vsub.f32 %v7791_v9, %v7799_v12 }
  0x48   : > { %930 = vmatpush1.msra.mxu1 %v929_v20  ;;  %v947_v19 = vand.u32 4294901760, %v946_v30  ;;  %v953_v41 = vand.u32 4294901760, %v952_v60  ;;  %v490_v20 = vld [vmem:[%s13041_s2 + $0x38] sm:$0xff]  ;;  %1123 = vmatpush1.msra.mxu0 %v7916_v47  ;;  %v8431_v60 = vand.u32 4294901760, %v489_v61 }
  0x49   : > { %v635_v14 = vsub.f32 %v7866_v34, %v13500_v39  ;;  %615 = vmatmul.mubr.f32.gmra.mxu0 %v614_v8  ;;  %v625_v28 = vand.u32 4294901760, %v624_v0  ;;  %936 = vmatprep.subr.mxu1 %v935_v42  ;;  %v13501_v39 = vand.u32 4294901760, %v8357_v38  ;;  %v8424_v8 = vsub.f32 %v7804_v13, %v7816_v17 }
  0x4a   : > { %620 = vmatprep.mubr.f32.mxu0 %v13495_v31  ;;  %942 = vmatpush1.msra.mxu1 %v941_v45  ;;  %v959_v30 = vand.u32 4294901760, %v958_v62  ;;  %v13132_v9 = vand.u32 4294901760, %v8416_v49  ;;  %13502 = vst [vmem:[#allocation27_spill] sm:$0xff] %v8431_v60  ;;  %v8439_v62 = vsub.f32 %v489_v61, %v8431_v60 }
  0x4b   : > { %v964_v34 = vsub.f32 %v8357_v38, %v13501_v39  ;;  %948 = vmatprep.subr.mxu1 %v947_v19  ;;  %v636_v0 = vand.u32 4294901760, %v635_v14  ;;  %1126 = vmatprep.subr.mxu0 %v7930_v50  ;;  %v13131_v45 = vand.u32 4294901760, %v8424_v8  ;;  %v8441_v39 = vand.u32 4294901760, %v490_v20 }
  0x4c   : > { %954 = vmatpush1.msra.mxu1 %v953_v41  ;;  %v646_v13 = vsub.f32 %v8416_v49, %v13132_v9  ;;  %1129 = vmatpush1.msra.mxu0 %v7932_v51  ;;  %v13133_v61 = vand.u32 4294901760, %v8439_v62  ;;  %v493_v9 = vld [vmem:[%s13041_s2 + $0x50] sm:$0xff] }
  0x4d   : > { %v965_v42 = vand.u32 4294901760, %v964_v34  ;;  %626 = vmatmul.mubr.f32.gmra.mxu0 %v625_v28  ;;  %13503 = vst [vmem:[#allocation28_spill] sm:$0xff] %v8441_v39  ;;  %v491_v34 = vld [vmem:[%s13041_s2 + $0x40] sm:$0xff]  ;;  %960 = vmatprep.subr.mxu1 %v959_v30  ;;  %v657_v41 = vsub.f32 %v8424_v8, %v13131_v45  ;;  %v8464_v19 = vsub.f32 %v490_v20, %v8441_v39  ;;  %v492_v30 = vld [vmem:[%s13041_s2 + $0x48] sm:$0xff] }
  0x4e   : > { %631 = vmatprep.mubr.f32.mxu0 %v13495_v31  ;;  %v8453_v28 = vand.u32 4294901760, %v491_v34  ;;  %v647_v14 = vand.u32 4294901760, %v646_v13  ;;  %v6982_v20 = vld [vmem:[%s7841_s9 + $0x1] ss:$2 sm:$0x3]  ;;  %v668_v13 = vsub.f32 %v8439_v62, %v13133_v61  ;;  %v13508_v61 = vsub.s32 1, %v7794_v10  ;;  %1132 = vmatprep.subr.mxu0 %v7958_v54 }
  0x4f   : > { %966 = vmatpush1.msra.mxu1 %v965_v42  ;;  %v8485_v42 = vand.u32 4294901760, %v492_v30  ;;  %1135 = vmatpush1.msra.mxu0 %v7960_v55 }
  0x50   : > { %1001 = vmatmul.mubr.f32.vlgmr.msra.gmra.mxu1 %v7778_v5  ;;  %7047 = vmatprep.subr.msk.mxu1 %vm312_vm0, %v13496_v32  ;;  %13504 = vst [vmem:[#allocation29_spill] sm:$0xff] %v8453_v28  ;;  %v8493_v45 = vsub.f32 %v491_v34, %v8453_v28  ;;  %v8509_v52 = vrot.slane %v6982_v20, %v13508_v61  ;;  %v8518_v34 = vand.u32 4294901760, %v493_v9  ;;  %v669_v61 = vand.u32 4294901760, %v668_v13  ;;  %v494_v5 = vld [vmem:[%s13041_s2 + $0x58] sm:$0xff] }
  0x51   : > { %7048 = vmatpush1.msk.msra.mxu1 %vm311_vm1, %v13496_v32  ;;  %637 = vmatmul.mubr.f32.gmra.mxu0 %v636_v0  ;;  %13505 = vst [vmem:[#allocation30_spill] sm:$0xff] %v8485_v42  ;;  %v658_v0 = vand.u32 4294901760, %v657_v41 }
  0x52   : > { %1006 = vmatprep.mubr.f32.mxu1 %v13495_v31  ;;  %7049 = vmatprep.subr.msk.mxu1 %vm310_vm2, %v13496_v32  ;;  %13509 = vst [vmem:[#allocation32_spill] sm:$0xff] %v8509_v52  ;;  %13510 = vst [vmem:[#allocation33_spill] sm:$0xff] %v8518_v34 }
  0x53   : > { %7050 = vmatpush1.msk.msra.mxu1 %vm309_vm3, %v13496_v32  ;;  %642 = vmatprep.mubr.f32.mxu0 %v13495_v31 }
  0x54   : > { %1008 = vmatmul.mubr.f32.gmra.mxu1 %v7780_v6  ;;  %7051 = vmatprep.subr.msk.mxu1 %vm13135_vm4, %v13496_v32  ;;  %v8530_v6 = vsub.f32 %v492_v30, %v8485_v42  ;;  %v8547_v30 = vand.u32 4294901760, %v494_v5  ;;  %vm13517_vm4 = vcmp.eq.s32.totalorder %v7847_v27, %v7870_v35 }
  0x55   : > { %648 = vmatmul.mubr.f32.gmra.mxu0 %v647_v14  ;;  %1013 = vmatprep.mubr.f32.mxu1 %v13495_v31  ;;  %v13506_v14 = vsub.s32 0, %v7794_v10 }
  0x56   : > { %7052 = vmatpush1.msk.msra.mxu1 %vm13134_vm5, %v13496_v32  ;;  %653 = vmatprep.mubr.f32.mxu0 %v13495_v31  ;;  %13512 = vst [vmem:[#allocation34_spill] sm:$0xff] %v8530_v6 }
  0x57   : > { %v8505_v41 = vrot.slane %v6982_v20, %v13506_v14  ;;  %7053 = vmatprep.subr.msk.mxu1 %vm306_vm6, %v13496_v32  ;;  %v13511_v20 = vand.u32 4294901760, %v8464_v19  ;;  %1138 = vmatprep.subr.mxu0 %v7974_v58 }
  0x58   : > { %1015 = vmatmul.mubr.f32.gmra.mxu1 %v7782_v7  ;;  %v13144_v7 = vand.u32 4294901760, %v8493_v45  ;;  %1141 = vmatpush1.msra.mxu0 %v7976_v59 }
  0x59   : > { %13507 = vst [vmem:[#allocation31_spill] sm:$0xff] %v8505_v41  ;;  %659 = vmatmul.mubr.f32.gmra.mxu0 %v658_v0  ;;  %1020 = vmatprep.mubr.f32.mxu1 %v13495_v31  ;;  %v679_v14 = vsub.f32 %v8464_v19, %v13511_v20  ;;  %v13149_v20 = vand.u32 4294901760, %v8530_v6  ;;  %v8555_v41 = vsub.f32 %v493_v9, %v8518_v34 }
  0x5a   : > { %7054 = vmatpush1.msk.msra.mxu1 %vm305_vm7, %v13496_v32  ;;  %664 = vmatprep.mubr.f32.mxu0 %v13495_v31  ;;  %v690_v13 = vsub.f32 %v8493_v45, %v13144_v7  ;;  %v8573_v9 = vsub.f32 %v494_v5, %v8547_v30  ;;  %v496_v5 = vld [vmem:[%s13041_s2 + $0x68] sm:$0xff] }
  0x5b   : > { %7055 = vmatprep.subr.msk.mxu1 %vm304_vm8, %v13496_v32  ;;  %v680_v0 = vand.u32 4294901760, %v679_v14  ;;  %13513 = vst [vmem:[#allocation35_spill] sm:$0xff] %v8555_v41  ;;  %1144 = vmatprep.subr.mxu0 %v8004_v1  ;;  %v701_v7 = vsub.f32 %v8530_v6, %v13149_v20  ;;  %v8605_v6 = vand.u32 4294901760, %v496_v5 }
  0x5c   : > { %1022 = vmatmul.mubr.f32.gmra.mxu1 %v7796_v11  ;;  %1147 = vmatpush1.msra.mxu0 %v8018_v44  ;;  %13514 = vst [vmem:[#allocation36_spill] sm:$0xff] %v8573_v9  ;;  %v691_v14 = vand.u32 4294901760, %v690_v13  ;;  %v13154_v11 = vand.u32 4294901760, %v8555_v41 }
  0x5d   : > { %670 = vmatmul.mubr.f32.gmra.mxu0 %v669_v61  ;;  %1027 = vmatprep.mubr.f32.mxu1 %v13495_v31  ;;  %v495_v61 = vld [vmem:[%s13041_s2 + $0x60] sm:$0xff]  ;;  %v702_v13 = vand.u32 4294901760, %v701_v7  ;;  %13516 = vst [vmem:[#allocation38_spill] sm:$0xff] %v8605_v6  ;;  %v497_v7 = vld [vmem:[%s13041_s2 + $0x70] sm:$0xff] }
  0x5e   : > { %7056 = vmatpush1.msk.msra.mxu1 %vm303_vm9, %v13496_v32  ;;  %675 = vmatprep.mubr.f32.mxu0 %v13495_v31  ;;  %v8580_v52 = vand.u32 4294901760, %v495_v61  ;;  %v712_v20 = vsub.f32 %v8555_v41, %v13154_v11  ;;  %v8630_v41 = vand.u32 4294901760, %v497_v7 }
  0x5f   : > { %7057 = vmatprep.subr.msk.mxu1 %vm302_vm10, %v13496_v32  ;;  %1150 = vmatprep.subr.mxu0 %v8044_v56 }
  0x60   : > { %1029 = vmatmul.mubr.f32.gmra.mxu1 %v7799_v12  ;;  %1153 = vmatpush1.msra.mxu0 %v8060_v3  ;;  %v8603_v12 = vsub.f32 %v495_v61, %v8580_v52  ;;  %13519 = vst [vmem:[#allocation40_spill] sm:$0xff] %v8630_v41 }
  0x61   : > { %681 = vmatmul.mubr.f32.gmra.mxu0 %v680_v0  ;;  %1034 = vmatprep.mubr.f32.mxu1 %v13495_v31  ;;  %v13161_v0 = vand.u32 4294901760, %v8573_v9 }
  0x62   : > { %7058 = vmatpush1.msk.msra.mxu1 %vm301_vm11, %v13496_v32  ;;  %686 = vmatprep.mubr.f32.mxu0 %v13495_v31  ;;  %13515 = vst [vmem:[#allocation37_spill] sm:$0xff] %v8603_v12  ;;  %v13167_v11 = vand.u32 4294901760, %v8603_v12 }
  0x63   : > { %7059 = vmatprep.subr.msk.mxu1 %vm300_vm12, %v13496_v32  ;;  %1156 = vmatprep.subr.mxu0 %v8087_v57  ;;  %v723_v61 = vsub.f32 %v8573_v9, %v13161_v0 }
  0x64   : > { %1036 = vmatmul.mubr.f32.gmra.mxu1 %v7816_v17  ;;  %1159 = vmatpush1.msra.mxu0 %v8101_v53  ;;  %v8628_v17 = vsub.f32 %v496_v5, %v8605_v6  ;;  %v13523_v5 = vld [vmem:[#allocation20_spill] sm:$0xff]  ;;  %v734_v9 = vsub.f32 %v8603_v12, %v13167_v11  ;;  %v13529_v11 = vld [vmem:[#allocation22_spill] sm:$0xff] }
  0x65   : > { %692 = vmatmul.mubr.f32.gmra.mxu0 %v691_v14  ;;  %1041 = vmatprep.mubr.f32.mxu1 %v13495_v31  ;;  %v713_v14 = vand.u32 4294901760, %v712_v20  ;;  %v13521_v20 = vld [vmem:[#allocation10_spill] sm:$0xff]  ;;  %v724_v0 = vand.u32 4294901760, %v723_v61  ;;  %v13527_v61 = vld [vmem:[#allocation11_spill] sm:$0xff] }
  0x66   : > { %7060 = vmatpush1.msk.msra.mxu1 %vm13184_vm13, %v13496_v32  ;;  %697 = vmatprep.mubr.f32.mxu0 %v13495_v31  ;;  %13518 = vst [vmem:[#allocation39_spill] sm:$0xff] %v8628_v17  ;;  %vm13522_vm5 = vcmp.eq.s32.totalorder %v13521_v20, %v7870_v35 }
  0x67   : > { %7061 = vmatprep.subr.msk.mxu1 %vm13517_vm4, %v13496_v32  ;;  %vm13520_vm4 = vcmp.eq.s32.totalorder %v7847_v27, %v7874_v36  ;;  %1162 = vmatprep.subr.mxu0 %v8119_v63  ;;  %v13172_v63 = vand.u32 4294901760, %v8628_v17  ;;  %v8655_v27 = vsub.f32 %v497_v7, %v8630_v41  ;;  %v735_v7 = vand.u32 4294901760, %v734_v9  ;;  %v13532_v9 = vld [vmem:[#allocation12_spill] sm:$0xff] }
  0x68   : > { %1043 = vmatmul.mubr.f32.gmra.mxu1 %v8431_v60  ;;  %v498_v60 = vld [vmem:[%s13041_s2 + $0x78] sm:$0xff]  ;;  %1165 = vmatpush1.msra.mxu0 %v13523_v5 }
  0x69   : > { %703 = vmatmul.mubr.f32.gmra.mxu0 %v702_v13  ;;  %1048 = vmatprep.mubr.f32.mxu1 %v13495_v31  ;;  %v8647_v13 = vand.u32 4294901760, %v498_v60  ;;  %13524 = vst [vmem:[#allocation20_spill] sm:$0xff] %v8655_v27  ;;  %v13179_v12 = vand.u32 4294901760, %v8655_v27 }
  0x6a   : > { %7062 = vmatpush1.msk.msra.mxu1 %vm13520_vm4, %v13496_v32  ;;  %708 = vmatprep.mubr.f32.mxu0 %v13495_v31  ;;  %vm13528_vm4 = vcmp.eq.s32.totalorder %v13527_v61, %v7870_v35 }
  0x6b   : > { %7063 = vmatprep.subr.msk.mxu1 %vm13522_vm5, %v13496_v32  ;;  %vm13525_vm5 = vcmp.eq.s32.totalorder %v13521_v20, %v7874_v36 }
  0x6c   : > { %1050 = vmatmul.mubr.f32.gmra.mxu1 %v8441_v39  ;;  %v745_v39 = vsub.f32 %v8628_v17, %v13172_v63  ;;  %v13534_v63 = vld [vmem:[#allocation24_spill] sm:$0xff] }
  0x6d   : > { %714 = vmatmul.mubr.f32.gmra.mxu0 %v713_v14  ;;  %1055 = vmatprep.mubr.f32.mxu1 %v13495_v31  ;;  %v13526_v14 = vld [vmem:[#allocation21_spill] sm:$0xff] }
  0x6e   : > { %7064 = vmatpush1.msk.msra.mxu1 %vm13525_vm5, %v13496_v32  ;;  %719 = vmatprep.mubr.f32.mxu0 %v13495_v31  ;;  %vm13530_vm5 = vcmp.eq.s32.totalorder %v13527_v61, %v7874_v36 }
  0x6f   : > { %1168 = vmatprep.subr.mxu0 %v13526_v14  ;;  %7065 = vmatprep.subr.msk.mxu1 %vm13528_vm4, %v13496_v32  ;;  %v8675_v14 = vsub.f32 %v498_v60, %v8647_v13  ;;  %vm13533_vm4 = vcmp.eq.s32.totalorder %v13532_v9, %v7870_v35  ;;  %v746_v60 = vand.u32 4294901760, %v745_v39  ;;  %v13539_v39 = vld [vmem:[#allocation26_spill] sm:$0xff] }
  0x70   : > { %1057 = vmatmul.mubr.f32.gmra.mxu1 %v8453_v28  ;;  %1171 = vmatpush1.msra.mxu0 %v13529_v11  ;;  %v756_v28 = vsub.f32 %v8655_v27, %v13179_v12 }
  0x71   : > { %725 = vmatmul.mubr.f32.gmra.mxu0 %v724_v0  ;;  %1062 = vmatprep.mubr.f32.mxu1 %v13495_v31  ;;  %v13531_v0 = vld [vmem:[#allocation23_spill] sm:$0xff]  ;;  %v13185_v17 = vand.u32 4294901760, %v8675_v14 }
  0x72   : > { %7066 = vmatpush1.msk.msra.mxu1 %vm13530_vm5, %v13496_v32  ;;  %730 = vmatprep.mubr.f32.mxu0 %v13495_v31  ;;  %vm13535_vm5 = vcmp.eq.s32.totalorder %v13532_v9, %v7874_v36  ;;  %v757_v12 = vand.u32 4294901760, %v756_v28 }
  0x73   : > { %1174 = vmatprep.subr.mxu0 %v13531_v0  ;;  %7067 = vmatprep.subr.msk.mxu1 %vm13533_vm4, %v13496_v32  ;;  %v767_v27 = vsub.f32 %v8675_v14, %v13185_v17 }
  0x74   : > { %1064 = vmatmul.mubr.f32.gmra.mxu1 %v8485_v42  ;;  %1177 = vmatpush1.msra.mxu0 %v13534_v63  ;;  %v13536_v42 = vld [vmem:[#allocation25_spill] sm:$0xff] }
  0x75   : > { %736 = vmatmul.mubr.f32.gmra.mxu0 %v735_v7  ;;  %1069 = vmatprep.mubr.f32.mxu1 %v13495_v31  ;;  %v13537_v7 = vld [vmem:[#allocation13_spill] sm:$0xff]  ;;  %v768_v28 = vand.u32 4294901760, %v767_v27  ;;  %v13547_v27 = vld [vmem:[#allocation7_spill] sm:$0xff] }
  0x76   : > { %7068 = vmatpush1.msk.msra.mxu1 %vm13535_vm5, %v13496_v32  ;;  %741 = vmatprep.mubr.f32.mxu0 %v13495_v31  ;;  %vm13538_vm4 = vcmp.eq.s32.totalorder %v13537_v7, %v7870_v35  ;;  %vm13540_vm5 = vcmp.eq.s32.totalorder %v13537_v7, %v7874_v36 }
  0x77   : > { %1180 = vmatprep.subr.mxu0 %v13536_v42  ;;  %7069 = vmatprep.subr.msk.mxu1 %vm13538_vm4, %v13496_v32 }
  0x78   : > { %1071 = vmatmul.mubr.f32.gmra.mxu1 %v8518_v34  ;;  %1183 = vmatpush1.msra.mxu0 %v13539_v39  ;;  %v13541_v34 = vld [vmem:[#allocation14_spill] sm:$0xff] }
  0x79   : > { %747 = vmatmul.mubr.f32.gmra.mxu0 %v746_v60  ;;  %1076 = vmatprep.mubr.f32.mxu1 %v13495_v31  ;;  %vm13542_vm4 = vcmp.eq.s32.totalorder %v13541_v34, %v7870_v35  ;;  %v13548_v60 = vld [vmem:[#allocation17_spill] sm:$0xff] }
  0x7a   : > { %7070 = vmatpush1.msk.msra.mxu1 %vm13540_vm5, %v13496_v32  ;;  %752 = vmatprep.mubr.f32.mxu0 %v13495_v31  ;;  %vm13543_vm5 = vcmp.eq.s32.totalorder %v13541_v34, %v7874_v36  ;;  %vm13550_vm13 = vcmp.eq.s32.totalorder %v13548_v60, %v7874_v36 }
  0x7b   : > { %1186 = vmatprep.subr.mxu0 %v8247_v40  ;;  %7071 = vmatprep.subr.msk.mxu1 %vm13542_vm4, %v13496_v32 }
  0x7c   : > { %1078 = vmatmul.mubr.f32.gmra.mxu1 %v8547_v30  ;;  %1189 = vmatpush1.msra.mxu0 %v8261_v43 }
  0x7d   : > { %758 = vmatmul.mubr.f32.gmra.mxu0 %v757_v12  ;;  %1083 = vmatprep.mubr.f32.mxu1 %v13495_v31  ;;  %v13544_v12 = vld [vmem:[#allocation16_spill] sm:$0xff] }
  0x7e   : > { %1192 = vmatprep.subr.mxu0 %v8279_v4  ;;  %7072 = vmatpush1.msk.msra.mxu1 %vm13543_vm5, %v13496_v32  ;;  %vm13545_vm4 = vcmp.eq.s32.totalorder %v13544_v12, %v7870_v35  ;;  %vm13546_vm5 = vcmp.eq.s32.totalorder %v13544_v12, %v7874_v36 }
  0x7f   : > { %763 = vmatprep.mubr.f32.mxu0 %v13495_v31  ;;  %1195 = vmatpush1.msra.mxu0 %v8293_v33 }
  0x80   : > { %1085 = vmatmul.mubr.f32.gmra.mxu1 %v8580_v52  ;;  %1198 = vmatprep.subr.mxu0 %v8311_v29 }
  0x81   : > { %769 = vmatmul.mubr.f32.gmra.mxu0 %v768_v28  ;;  %1090 = vmatprep.mubr.f32.mxu1 %v13495_v31  ;;  %v13551_v28 = vld [vmem:[#allocation18_spill] sm:$0xff] }
  0x82   : > { %1201 = vmatpush1.msra.mxu0 %v8325_v37  ;;  %7073 = vmatprep.subr.msk.mxu1 %vm13545_vm4, %v13496_v32  ;;  %vm13549_vm4 = vcmp.eq.s32.totalorder %v13548_v60, %v7870_v35  ;;  %v13552_v17 = vand.u32 4294901760, %v13551_v28  ;;  %v13579_v28 = vld [vmem:[#allocation9_spill] sm:$0xff] }
  0x83   : > { %1204 = vmatprep.subr.mxu0 %v8343_v48  ;;  %7074 = vmatpush1.msk.msra.mxu1 %vm13546_vm5, %v13496_v32  ;;  %vm13608_vm5 = vcmp.eq.s32.totalorder %v13537_v7, %v7874_v36 }
  0x84   : > { %1092 = vmatmul.mubr.f32.gmra.mxu1 %v8605_v6  ;;  %1207 = vmatpush1.msra.mxu0 %v8357_v38  ;;  %v13554_v6 = vand.u32 4294901760, %v7914_v46  ;;  %v13559_v46 = vand.u32 4294901760, %v7810_v15 }
  0x85   : > { %1240 = vmatprep.mubr.f32.mxu0 %v13495_v31  ;;  %1097 = vmatprep.mubr.f32.mxu1 %v13495_v31 }
  0x86   : > { %1243 = vmatmul.mubr.f32.vlgmr.msra.gmra.mxu0 %v13547_v27  ;;  %7075 = vmatprep.subr.msk.mxu1 %vm13549_vm4, %v13496_v32 }
  0x87   : > { %7076 = vmatpush1.msk.msra.mxu1 %vm13550_vm13, %v13496_v32  ;;  %1248 = vmatprep.mubr.f32.mxu0 %v13495_v31  ;;  %vm13606_vm13 = vcmp.eq.s32.totalorder %v13537_v7, %v7870_v35 }
  0x88   : > { %1099 = vmatmul.mubr.f32.gmra.mxu1 %v8630_v41  ;;  %7077 = vmatprep.subr.msk.mxu1 %vm282_vm14, %v13496_v32  ;;  %v13553_v41 = vand.u32 4294901760, %v8006_v2  ;;  %v13556_v2 = vand.u32 4294901760, %v13547_v27  ;;  %v13571_v27 = vand.u32 4294901760, %v8018_v44  ;;  %v13573_v44 = vand.u32 4294901760, %v8424_v8 }
  0x89   : > { %1104 = vmatprep.mubr.f32.mxu1 %v13495_v31  ;;  %7078 = vmatpush1.msk.msra.mxu1 %vm281_vm15, %v13496_v32 }
  0x8a   : > { %1251 = vmatmul.mubr.f32.gmra.mxu0 %v7810_v15  ;;  %1613 = vmatprep.subr.mxu0 %v13552_v17  ;;  %v13555_v17 = vand.u32 4294901760, %v7916_v47  ;;  %v13560_v47 = vand.u32 4294901760, %v7932_v51  ;;  %v13563_v15 = vand.u32 4294901760, %v7958_v54  ;;  %v13565_v51 = vand.u32 4294901760, %v7960_v55 }
  0x8b   : > { %1256 = vmatprep.mubr.f32.mxu0 %v13495_v31  ;;  %1617 = vmatpush1.msra.mxu0 %v13553_v41  ;;  %v13557_v41 = vand.u32 4294901760, %v7930_v50  ;;  %v13564_v50 = vand.u32 4294901760, %v7813_v16  ;;  %v13568_v55 = vand.u32 4294901760, %v7976_v59  ;;  %v13570_v59 = vand.u32 4294901760, %v8416_v49 }
  0x8c   : > { %1106 = vmatmul.mubr.f32.gmra.mxu1 %v8647_v13  ;;  %7079 = vmatprep.subr.msk.mxu1 %vm312_vm0, %v13496_v32  ;;  %vm13561_vm0 = vcmp.eq.s32.totalorder %v7827_v22, %v7870_v35 }
  0x8d   : > { %1465 = vmatprep.mubr.f32.mxu1 %v13495_v31  ;;  %1621 = vmatprep.subr.mxu0 %v13554_v6  ;;  %v13558_v6 = vld [vmem:[#allocation15_spill] sm:$0xff] }
  0x8e   : > { %1259 = vmatmul.mubr.f32.gmra.mxu0 %v7813_v16  ;;  %v13566_v16 = vand.u32 4294901760, %v7974_v58  ;;  %v13567_v54 = vand.u32 4294901760, %v13558_v6  ;;  %v13569_v58 = vand.u32 4294901760, %v8004_v1  ;;  %v13572_v1 = vand.u32 4294901760, %v8044_v56 }
  0x8f   : > { %1264 = vmatprep.mubr.f32.mxu0 %v13495_v31  ;;  %1625 = vmatpush1.msra.mxu0 %v13555_v17  ;;  %v13576_v56 = vand.u32 4294901760, %v8087_v57  ;;  %v13581_v17 = vld [vmem:[#allocation34_spill] sm:$0xff]  ;;  %v13583_v57 = vld [vmem:[#allocation19_spill] sm:$0xff] }
  0x90   : > { %1469 = vmatmul.mubr.f32.vlgmr.msra.gmra.mxu1 %v13556_v2  ;;  %1629 = vmatprep.subr.mxu0 %v13557_v41  ;;  %v13586_v2 = vand.u32 4294901760, %v13523_v5  ;;  %v13588_v41 = vld [vmem:[#allocation35_spill] sm:$0xff]  ;;  %v13592_v5 = vand.u32 4294901760, %v8493_v45 }
  0x91   : > { %7080 = vmatpush1.msk.msra.mxu1 %vm311_vm1, %v13496_v32  ;;  %1474 = vmatprep.mubr.f32.mxu1 %v13495_v31  ;;  %vm13562_vm1 = vcmp.eq.s32.totalorder %v7827_v22, %v7874_v36 }
  0x92   : > { %1267 = vmatmul.mubr.f32.gmra.mxu0 %v13558_v6  ;;  %7081 = vmatprep.subr.msk.mxu1 %vm310_vm2, %v13496_v32  ;;  %vm13575_vm2 = vcmp.eq.s32.totalorder %v7844_v26, %v7874_v36 }
  0x93   : > { %7082 = vmatpush1.msk.msra.mxu1 %vm309_vm3, %v13496_v32  ;;  %1272 = vmatprep.mubr.f32.mxu0 %v13495_v31  ;;  %vm13580_vm3 = vcmp.eq.s32.totalorder %v13579_v28, %v7870_v35 }
  0x94   : > { %1478 = vmatmul.mubr.f32.gmra.mxu1 %v13559_v46  ;;  %1633 = vmatpush1.msra.mxu0 %v13560_v47  ;;  %v13593_v46 = vand.u32 4294901760, %v13529_v11  ;;  %v13595_v47 = vld [vmem:[#allocation36_spill] sm:$0xff]  ;;  %v13598_v11 = vand.u32 4294901760, %v13581_v17 }
  0x95   : > { %1483 = vmatprep.mubr.f32.mxu1 %v13495_v31  ;;  %7083 = vmatprep.subr.msk.mxu1 %vm13561_vm0, %v13496_v32 }
  0x96   : > { %1275 = vmatmul.mubr.f32.gmra.mxu0 %v8416_v49  ;;  %7084 = vmatpush1.msk.msra.mxu1 %vm13562_vm1, %v13496_v32  ;;  %v13574_v49 = vand.u32 4294901760, %v8060_v3  ;;  %v13577_v3 = vand.u32 4294901760, %v8439_v62  ;;  %vm13614_vm1 = vcmp.eq.s32.totalorder %v13541_v34, %v7870_v35 }
  0x97   : > { %1280 = vmatprep.mubr.f32.mxu0 %v13495_v31  ;;  %1637 = vmatprep.subr.mxu0 %v13563_v15  ;;  %v13599_v15 = vand.u32 4294901760, %v13534_v63  ;;  %v13604_v63 = vand.u32 4294901760, %v13588_v41 }
  0x98   : > { %1487 = vmatmul.mubr.f32.gmra.mxu1 %v13564_v50  ;;  %1641 = vmatpush1.msra.mxu0 %v13565_v51  ;;  %v13601_v50 = vld [vmem:[#allocation37_spill] sm:$0xff]  ;;  %v13605_v51 = vand.u32 4294901760, %v13539_v39 }
  0x99   : > { %1492 = vmatprep.mubr.f32.mxu1 %v13495_v31  ;;  %7085 = vmatprep.subr.msk.mxu1 %vm306_vm6, %v13496_v32  ;;  %vm13582_vm6 = vcmp.eq.s32.totalorder %v13579_v28, %v7874_v36 }
  0x9a   : > { %1283 = vmatmul.mubr.f32.gmra.mxu0 %v8424_v8  ;;  %7086 = vmatpush1.msk.msra.mxu1 %vm305_vm7, %v13496_v32  ;;  %v13578_v8 = vand.u32 4294901760, %v8101_v53  ;;  %v13585_v53 = vand.u32 4294901760, %v8464_v19  ;;  %vm13587_vm7 = vcmp.eq.s32.totalorder %v13521_v20, %v7870_v35 }
  0x9b   : > { %1288 = vmatprep.mubr.f32.mxu0 %v13495_v31  ;;  %1645 = vmatprep.subr.mxu0 %v13566_v16  ;;  %v13607_v16 = vld [vmem:[#allocation39_spill] sm:$0xff] }
  0x9c   : > { %1496 = vmatmul.mubr.f32.gmra.mxu1 %v13567_v54  ;;  %1649 = vmatpush1.msra.mxu0 %v13568_v55  ;;  %v13611_v54 = vand.u32 4294901760, %v8247_v40  ;;  %v13612_v55 = vand.u32 4294901760, %v13595_v47  ;;  %v13615_v40 = vld [vmem:[#allocation31_spill] sm:$0xff] }
  0x9d   : > { %1501 = vmatprep.mubr.f32.mxu1 %v13495_v31  ;;  %7087 = vmatprep.subr.msk.mxu1 %vm304_vm8, %v13496_v32  ;;  %vm13589_vm8 = vcmp.eq.s32.totalorder %v13521_v20, %v7874_v36 }
  0x9e   : > { %1291 = vmatmul.mubr.f32.gmra.mxu0 %v8439_v62  ;;  %7088 = vmatpush1.msk.msra.mxu1 %vm303_vm9, %v13496_v32  ;;  %v13584_v62 = vand.u32 4294901760, %v13583_v57  ;;  %vm13594_vm9 = vcmp.eq.s32.totalorder %v13527_v61, %v7870_v35 }
  0x9f   : > { %1296 = vmatprep.mubr.f32.mxu0 %v13495_v31  ;;  %1653 = vmatprep.subr.mxu0 %v13569_v58  ;;  %v13613_v58 = vand.u32 4294901760, %v8261_v43  ;;  %v13616_v43 = vld [vmem:[#allocation20_spill] sm:$0xff] }
  0xa0   : > { %1505 = vmatmul.mubr.f32.gmra.mxu1 %v13570_v59  ;;  %1657 = vmatpush1.msra.mxu0 %v13571_v27  ;;  %v13617_v27 = vand.u32 4294901760, %v8279_v4  ;;  %v13620_v4 = vand.u32 4294901760, %v13601_v50 }
  0xa1   : > { %1510 = vmatprep.mubr.f32.mxu1 %v13495_v31  ;;  %7089 = vmatprep.subr.msk.mxu1 %vm302_vm10, %v13496_v32  ;;  %vm13596_vm10 = vcmp.eq.s32.totalorder %v13527_v61, %v7874_v36 }
  0xa2   : > { %1299 = vmatmul.mubr.f32.gmra.mxu0 %v8464_v19  ;;  %7090 = vmatpush1.msk.msra.mxu1 %vm301_vm11, %v13496_v32  ;;  %v13590_v19 = vld [vmem:[#allocation21_spill] sm:$0xff]  ;;  %vm13600_vm11 = vcmp.eq.s32.totalorder %v13532_v9, %v7870_v35 }
  0xa3   : > { %1304 = vmatprep.mubr.f32.mxu0 %v13495_v31  ;;  %1661 = vmatprep.subr.mxu0 %v13572_v1  ;;  %v13591_v6 = vand.u32 4294901760, %v13590_v19  ;;  %v13628_v19 = vand.u32 4294901760, %v8357_v38 }
  0xa4   : > { %1514 = vmatmul.mubr.f32.gmra.mxu1 %v13573_v44  ;;  %1665 = vmatpush1.msra.mxu0 %v13574_v49  ;;  %v13621_v49 = vand.u32 4294901760, %v8293_v33 }
  0xa5   : > { %1519 = vmatprep.mubr.f32.mxu1 %v13495_v31  ;;  %7091 = vmatprep.subr.msk.mxu1 %vm300_vm12, %v13496_v32  ;;  %vm13602_vm12 = vcmp.eq.s32.totalorder %v13532_v9, %v7874_v36 }
  0xa6   : > { %1307 = vmatmul.mubr.f32.gmra.mxu0 %v8493_v45  ;;  %7092 = vmatpush1.msk.msra.mxu1 %vm13575_vm2, %v13496_v32  ;;  %v13597_v45 = vand.u32 4294901760, %v13531_v0  ;;  %v13603_v0 = vand.u32 4294901760, %v13536_v42  ;;  %v13609_v42 = vld [vmem:[#allocation32_spill] sm:$0xff]  ;;  %vm415_vm2 = vcmp.eq.s32.totalorder %v7824_v21, %v13615_v40 }
  0xa7   : > { %1312 = vmatprep.mubr.f32.mxu0 %v13495_v31  ;;  %1669 = vmatprep.subr.mxu0 %v13576_v56  ;;  %vm13610_vm4 = vcmp.eq.s32.totalorder %v7819_v18, %v13609_v42  ;;  %vm416_vm0 = vcmp.eq.s32.totalorder %v7824_v21, %v13609_v42  ;;  %v7011_v56 = vsel %vm415_vm2, 1.0, %v13495_v31 }
  0xa8   : > { %1523 = vmatmul.mubr.f32.gmra.mxu1 %v13577_v3  ;;  %1673 = vmatpush1.msra.mxu0 %v13578_v8  ;;  %v7014_v39 = vsel %vm13610_vm4, 1.0, %v13495_v31  ;;  %v7012_v44 = vsel %vm416_vm0, 1.0, %v13495_v31  ;;  %v13622_v8 = vand.u32 4294901760, %v8311_v29  ;;  %v9046_v29 = vsub.f32 %v7011_v56, %v7011_v56 }
  0xa9   : > { %1528 = vmatprep.mubr.f32.mxu1 %v13495_v31  ;;  %7093 = vmatprep.subr.msk.mxu1 %vm13580_vm3, %v13496_v32  ;;  %v8989_v59 = vsub.f32 %v7014_v39, %v7014_v39  ;;  %vm13240_vm3 = vcmp.eq.s32.totalorder %v7827_v22, %v13609_v42  ;;  %v9036_v57 = vsub.f32 %v7012_v44, %v7012_v44 }
  0xaa   : > { %1315 = vmatmul.mubr.f32.gmra.mxu0 %v13581_v17  ;;  %7094 = vmatpush1.msk.msra.mxu1 %vm13582_vm6, %v13496_v32  ;;  %vm13618_vm6 = vcmp.eq.s32.totalorder %v7819_v18, %v13615_v40  ;;  %v7010_v3 = vsel %vm13240_vm3, 1.0, %v13495_v31  ;;  %vm13197_vm4 = vcmp.eq.s32.totalorder %v7833_v24, %v13615_v40 }
  0xab   : > { %1320 = vmatprep.mubr.f32.mxu0 %v13495_v31  ;;  %1677 = vmatprep.subr.mxu0 %v13584_v62  ;;  %v7013_v1 = vsel %vm13618_vm6, 1.0, %v13495_v31  ;;  %v13220_v17 = vand.u32 4294901760, %v8989_v59  ;;  %v13624_v62 = vand.u32 4294901760, %v8325_v37  ;;  %v13626_v37 = vand.u32 4294901760, %v13607_v16 }
  0xac   : > { %1532 = vmatmul.mubr.f32.gmra.mxu1 %v13585_v53  ;;  %1681 = vmatpush1.msra.mxu0 %v13586_v2  ;;  %v9028_v33 = vsub.f32 %v7013_v1, %v7013_v1  ;;  %v9048_v53 = vsub.f32 %v7010_v3, %v7010_v3  ;;  %v13209_v38 = vand.u32 4294901760, %v9036_v57  ;;  %vm13633_vm6 = vcmp.eq.s32.totalorder %v13548_v60, %v7874_v36  ;;  %v13637_v3 = vld [vmem:[#allocation4_spill] sm:$0xff] }
  0xad   : > { %1537 = vmatprep.mubr.f32.mxu1 %v13495_v31  ;;  %7095 = vmatprep.subr.msk.mxu1 %vm13587_vm7, %v13496_v32  ;;  %vm13619_vm7 = vcmp.eq.s32.totalorder %v13541_v34, %v7874_v36  ;;  %v13635_v1 = vand.u32 4294901760, %v8675_v14 }
  0xae   : > { %1323 = vmatmul.mubr.f32.gmra.mxu0 %v13588_v41  ;;  %7096 = vmatpush1.msk.msra.mxu1 %vm13589_vm8, %v13496_v32  ;;  %vm13241_vm8 = vcmp.eq.s32.totalorder %v7827_v22, %v13615_v40  ;;  %v13627_v41 = vand.u32 4294901760, %v8343_v48  ;;  %v13629_v48 = vld [vmem:[#allocation2_spill] sm:$0xff] }
  0xaf   : > { %1328 = vmatprep.mubr.f32.mxu0 %v13495_v31  ;;  %1685 = vmatprep.subr.mxu0 %v13591_v6  ;;  %v7009_v2 = vsel %vm13241_vm8, 1.0, %v13495_v31  ;;  %v2225_v6 = vsub.f32 %v8989_v59, %v13220_v17 }
  0xb0   : > { %1541 = vmatmul.mubr.f32.gmra.mxu1 %v13592_v5  ;;  %1689 = vmatpush1.msra.mxu0 %v13593_v46  ;;  %v13218_v5 = vand.u32 4294901760, %v9028_v33 }
  0xb1   : > { %1546 = vmatprep.mubr.f32.mxu1 %v13495_v31  ;;  %7097 = vmatprep.subr.msk.mxu1 %vm13594_vm9, %v13496_v32  ;;  %vm13623_vm9 = vcmp.eq.s32.totalorder %v13544_v12, %v7870_v35 }
  0xb2   : > { %1331 = vmatmul.mubr.f32.gmra.mxu0 %v13595_v47  ;;  %7098 = vmatpush1.msk.msra.mxu1 %vm13596_vm10, %v13496_v32  ;;  %vm13193_vm10 = vcmp.eq.s32.totalorder %v7830_v23, %v13609_v42  ;;  %v9074_v47 = vsub.f32 %v7009_v2, %v7009_v2 }
  0xb3   : > { %1336 = vmatprep.mubr.f32.mxu0 %v13495_v31  ;;  %1693 = vmatprep.subr.mxu0 %v13597_v45  ;;  %v7008_v46 = vsel %vm13193_vm10, 1.0, %v13495_v31 }
  0xb4   : > { %1550 = vmatmul.mubr.f32.gmra.mxu1 %v13598_v11  ;;  %1697 = vmatpush1.msra.mxu0 %v13599_v15  ;;  %v13208_v11 = vand.u32 4294901760, %v9046_v29  ;;  %v13207_v15 = vand.u32 4294901760, %v9048_v53 }
  0xb5   : > { %1555 = vmatprep.mubr.f32.mxu1 %v13495_v31  ;;  %7099 = vmatprep.subr.msk.mxu1 %vm13600_vm11, %v13496_v32  ;;  %vm13625_vm11 = vcmp.eq.s32.totalorder %v13544_v12, %v7874_v36 }
  0xb6   : > { %1339 = vmatmul.mubr.f32.gmra.mxu0 %v13601_v50  ;;  %7100 = vmatpush1.msk.msra.mxu1 %vm13602_vm12, %v13496_v32  ;;  %vm13192_vm12 = vcmp.eq.s32.totalorder %v7830_v23, %v13615_v40  ;;  %v13631_v50 = vand.u32 4294901760, %v13616_v43 }
  0xb7   : > { %1344 = vmatprep.mubr.f32.mxu0 %v13495_v31  ;;  %1701 = vmatprep.subr.mxu0 %v13603_v0  ;;  %v7007_v45 = vsel %vm13192_vm12, 1.0, %v13495_v31  ;;  %v9097_v0 = vsub.f32 %v7008_v46, %v7008_v46 }
  0xb8   : > { %1559 = vmatmul.mubr.f32.gmra.mxu1 %v13604_v63  ;;  %1705 = vmatpush1.msra.mxu0 %v13605_v51  ;;  %v2226_v63 = vand.u32 4294901760, %v2225_v6  ;;  %v2231_v51 = vsub.f32 %v9028_v33, %v13218_v5 }
  0xb9   : > { %1564 = vmatprep.mubr.f32.mxu1 %v13495_v31  ;;  %7101 = vmatprep.subr.msk.mxu1 %vm13606_vm13, %v13496_v32  ;;  %vm13204_vm13 = vcmp.eq.s32.totalorder %v7833_v24, %v13609_v42  ;;  %v13201_v36 = vand.u32 4294901760, %v9097_v0 }
  0xba   : > { %1347 = vmatmul.mubr.f32.gmra.mxu0 %v13607_v16  ;;  %7102 = vmatpush1.msk.msra.mxu1 %vm13608_vm5, %v13496_v32  ;;  %vm13630_vm5 = vcmp.eq.s32.totalorder %v13548_v60, %v7870_v35  ;;  %v9107_v16 = vsub.f32 %v7007_v45, %v7007_v45  ;;  %v7006_v39 = vsel %vm13204_vm13, 1.0, %v13495_v31  ;;  %v2243_v35 = vsub.f32 %v9046_v29, %v13208_v11 }
  0xbb   : > { %1352 = vmatprep.mubr.f32.mxu0 %v13495_v31  ;;  %1709 = vmatprep.subr.mxu0 %v13611_v54  ;;  %v13634_v54 = vld [vmem:[#allocation3_spill] sm:$0xff]  ;;  %v9148_v44 = vsub.f32 %v7006_v39, %v7006_v39 }
  0xbc   : > { %1568 = vmatmul.mubr.f32.gmra.mxu1 %v13612_v55  ;;  %1713 = vmatpush1.msra.mxu0 %v13613_v58  ;;  %v2237_v55 = vsub.f32 %v9036_v57, %v13209_v38  ;;  %v13202_v58 = vand.u32 4294901760, %v9074_v47 }
  0xbd   : > { %1573 = vmatprep.mubr.f32.mxu1 %v13495_v31  ;;  %7103 = vmatprep.subr.msk.mxu1 %vm13614_vm1, %v13496_v32  ;;  %vm13632_vm1 = vcmp.eq.s32.totalorder %v7819_v18, %v13609_v42  ;;  %v13196_v6 = vand.u32 4294901760, %v9148_v44 }
  0xbe   : > { %1355 = vmatmul.mubr.f32.gmra.mxu0 %v13616_v43  ;;  %1717 = vmatprep.subr.mxu0 %v13617_v27  ;;  %v7005_v43 = vsel %vm13197_vm4, 1.0, %v13495_v31  ;;  %v2249_v27 = vsub.f32 %v9048_v53, %v13207_v15  ;;  %v13643_v15 = vld [vmem:[#allocation29_spill] sm:$0xff] }
  0xbf   : > { %7104 = vmatpush1.msk.msra.mxu1 %vm13619_vm7, %v13496_v32  ;;  %1360 = vmatprep.mubr.f32.mxu0 %v13495_v31  ;;  %vm13198_vm7 = vcmp.eq.s32.totalorder %v7836_v25, %v13609_v42  ;;  %v9152_v56 = vsub.f32 %v7005_v43, %v7005_v43  ;;  %v2273_v43 = vsub.f32 %v9148_v44, %v13196_v6 }
  0xc0   : > { %1577 = vmatmul.mubr.f32.gmra.mxu1 %v13620_v4  ;;  %1721 = vmatpush1.msra.mxu0 %v13621_v49  ;;  %v2232_v4 = vand.u32 4294901760, %v2231_v51  ;;  %v13200_v49 = vand.u32 4294901760, %v9107_v16  ;;  %v13638_v51 = vld [vmem:[#allocation5_spill] sm:$0xff] }
  0xc1   : > { %1582 = vmatprep.mubr.f32.mxu1 %v13495_v31  ;;  %1725 = vmatprep.subr.mxu0 %v13622_v8  ;;  %v2238_v8 = vand.u32 4294901760, %v2237_v55  ;;  %v13191_v45 = vand.u32 4294901760, %v9152_v56 }
  0xc2   : > { %1363 = vmatmul.mubr.f32.gmra.mxu0 %v8675_v14  ;;  %7105 = vmatprep.subr.msk.mxu1 %vm13623_vm9, %v13496_v32  ;;  %v7004_v14 = vsel %vm13198_vm7, 1.0, %v13495_v31  ;;  %vm406_vm9 = vcmp.eq.s32.totalorder %v7844_v26, %v13609_v42 }
  0xc3   : > { %1729 = vmatpush1.msra.mxu0 %v13624_v62  ;;  %7106 = vmatpush1.msk.msra.mxu1 %vm13625_vm11, %v13496_v32  ;;  %v2255_v62 = vsub.f32 %v9074_v47, %v13202_v58  ;;  %v9186_v46 = vsub.f32 %v7004_v14, %v7004_v14  ;;  %vm13210_vm11 = vcmp.eq.s32.totalorder %v7844_v26, %v13615_v40 }
  0xc4   : > { %1586 = vmatmul.mubr.f32.gmra.mxu1 %v13626_v37  ;;  %1733 = vmatprep.subr.mxu0 %v13627_v41  ;;  %v2244_v37 = vand.u32 4294901760, %v2243_v35  ;;  %v2250_v41 = vand.u32 4294901760, %v2249_v27  ;;  %v7001_v55 = vsel %vm13210_vm11, 1.0, %v13495_v31 }
  0xc5   : > { %1737 = vmatpush1.msra.mxu0 %v13628_v19  ;;  %1770 = vmatprep.mubr.f32.mxu0 %v13495_v31  ;;  %v2261_v19 = vsub.f32 %v9097_v0, %v13201_v36  ;;  %v2256_v39 = vand.u32 4294901760, %v2255_v62  ;;  %v13190_v35 = vand.u32 4294901760, %v9186_v46  ;;  %v9228_v62 = vsub.f32 %v7001_v55, %v7001_v55  ;;  %v13642_v36 = vld [vmem:[#allocation28_spill] sm:$0xff] }
  0xc6   : > { %1591 = vmatprep.mubr.f32.mxu1 %v13495_v31  ;;  %1772 = vmatmul.mubr.f32.vlgmr.msra.gmra.mxu0 %v13629_v48 }
  0xc7   : > { %7107 = vmatprep.subr.msk.mxu1 %vm13630_vm5, %v13496_v32  ;;  %1777 = vmatprep.mubr.f32.mxu0 %v13495_v31  ;;  %vm404_vm5 = vcmp.eq.s32.totalorder %v13579_v28, %v13609_v42 }
  0xc8   : > { %1595 = vmatmul.mubr.f32.gmra.mxu1 %v13631_v50  ;;  %7111 = vmatprep.subr.msk.mxu0 %vm13632_vm1, %v13496_v32  ;;  %vm13211_vm1 = vcmp.eq.s32.totalorder %v13579_v28, %v13615_v40 }
  0xc9   : > { %7108 = vmatpush1.msk.msra.mxu1 %vm13633_vm6, %v13496_v32  ;;  %1600 = vmatprep.mubr.f32.mxu1 %v13495_v31  ;;  %vm13215_vm6 = vcmp.eq.s32.totalorder %v13521_v20, %v13609_v42 }
  0xca   : > { %1779 = vmatmul.mubr.f32.gmra.mxu0 %v13634_v54  ;;  %7109 = vmatprep.subr.msk.mxu1 %vm282_vm14, %v13496_v32  ;;  %vm13203_vm14 = vcmp.eq.s32.totalorder %v7836_v25, %v13615_v40 }
  0xcb   : > { %7110 = vmatpush1.msk.msra.mxu1 %vm281_vm15, %v13496_v32  ;;  %1784 = vmatprep.mubr.f32.mxu0 %v13495_v31  ;;  %vm13636_vm15 = vcmp.eq.s32.totalorder %v7819_v18, %v13615_v40  ;;  %v7003_v2 = vsel %vm13203_vm14, 1.0, %v13495_v31 }
  0xcc   : > { %1604 = vmatmul.mubr.f32.gmra.mxu1 %v13635_v1  ;;  %7112 = vmatpush1.msk.msra.mxu0 %vm13636_vm15, %v13496_v32  ;;  %v9195_v50 = vsub.f32 %v7003_v2, %v7003_v2  ;;  %v2262_v1 = vand.u32 4294901760, %v2261_v19  ;;  %v7000_v2 = vsel %vm404_vm5, 1.0, %v13495_v31  ;;  %vm13216_vm15 = vcmp.eq.s32.totalorder %v13521_v20, %v13615_v40 }
  0xcd   : > { %1979 = vmatprep.mubr.f32.mxu1 %v13495_v31  ;;  %2227 = vmatprep.subr.mxu1 %v2226_v63  ;;  %v7002_v63 = vsel %vm406_vm9, 1.0, %v13495_v31  ;;  %v2285_v19 = vsub.f32 %v9186_v46, %v13190_v35 }
  0xce   : > { %1786 = vmatmul.mubr.f32.gmra.mxu0 %v13637_v3  ;;  %7113 = vmatprep.subr.msk.mxu0 %vm416_vm0, %v13496_v32  ;;  %v9220_v27 = vsub.f32 %v7002_v63, %v7002_v63  ;;  %v13194_v14 = vand.u32 4294901760, %v9195_v50 }
  0xcf   : > { %1791 = vmatprep.mubr.f32.mxu0 %v13495_v31  ;;  %7114 = vmatpush1.msk.msra.mxu0 %vm415_vm2, %v13496_v32 }
  0xd0   : > { %1981 = vmatmul.mubr.f32.vlgmr.msra.gmra.mxu1 %v13629_v48  ;;  %7115 = vmatprep.subr.msk.mxu0 %vm13240_vm3, %v13496_v32  ;;  %v2267_v48 = vsub.f32 %v9107_v16, %v13200_v49  ;;  %v2291_v35 = vsub.f32 %v9195_v50, %v13194_v14 }
  0xd1   : > { %2233 = vmatpush1.msra.mxu1 %v2232_v4  ;;  %1986 = vmatprep.mubr.f32.mxu1 %v13495_v31 }
  0xd2   : > { %1793 = vmatmul.mubr.f32.gmra.mxu0 %v13638_v51  ;;  %2239 = vmatprep.subr.mxu1 %v2238_v8  ;;  %v2268_v4 = vand.u32 4294901760, %v2267_v48  ;;  %v13639_v8 = vld [vmem:[#allocation6_spill] sm:$0xff]  ;;  %v13195_v48 = vand.u32 4294901760, %v9220_v27 }
  0xd3   : > { %2245 = vmatpush1.msra.mxu1 %v2244_v37  ;;  %1798 = vmatprep.mubr.f32.mxu0 %v13495_v31  ;;  %v6999_v37 = vsel %vm13211_vm1, 1.0, %v13495_v31 }
  0xd4   : > { %1988 = vmatmul.mubr.f32.gmra.mxu1 %v13634_v54  ;;  %7116 = vmatpush1.msk.msra.mxu0 %vm13241_vm8, %v13496_v32  ;;  %v2279_v54 = vsub.f32 %v9152_v56, %v13191_v45  ;;  %v9259_v55 = vsub.f32 %v6999_v37, %v6999_v37  ;;  %v13199_v45 = vand.u32 4294901760, %v9228_v62 }
  0xd5   : > { %1993 = vmatprep.mubr.f32.mxu1 %v13495_v31  ;;  %2251 = vmatprep.subr.mxu1 %v2250_v41  ;;  %v2274_v41 = vand.u32 4294901760, %v2273_v43  ;;  %v13640_v43 = vld [vmem:[#allocation8_spill] sm:$0xff] }
  0xd6   : > { %1800 = vmatmul.mubr.f32.gmra.mxu0 %v13639_v8  ;;  %2257 = vmatpush1.msra.mxu1 %v2256_v39  ;;  %v2280_v63 = vand.u32 4294901760, %v2279_v54  ;;  %v9257_v39 = vsub.f32 %v7000_v2, %v7000_v2  ;;  %v2297_v54 = vsub.f32 %v9220_v27, %v13195_v48  ;;  %v13205_v37 = vand.u32 4294901760, %v9259_v55  ;;  %v13641_v48 = vld [vmem:[#allocation27_spill] sm:$0xff] }
  0xd7   : > { %1805 = vmatprep.mubr.f32.mxu0 %v13495_v31  ;;  %7117 = vmatprep.subr.msk.mxu0 %vm13193_vm10, %v13496_v32  ;;  %vm13226_vm10 = vcmp.eq.s32.totalorder %v13527_v61, %v13615_v40  ;;  %v2303_v6 = vsub.f32 %v9228_v62, %v13199_v45 }
  0xd8   : > { %1995 = vmatmul.mubr.f32.gmra.mxu1 %v13637_v3  ;;  %7118 = vmatpush1.msk.msra.mxu0 %vm13192_vm12, %v13496_v32  ;;  %v6998_v3 = vsel %vm13215_vm6, 1.0, %v13495_v31  ;;  %vm13221_vm12 = vcmp.eq.s32.totalorder %v13527_v61, %v13609_v42  ;;  %v2315_v45 = vsub.f32 %v9259_v55, %v13205_v37 }
  0xd9   : > { %2000 = vmatprep.mubr.f32.mxu1 %v13495_v31  ;;  %2263 = vmatprep.subr.mxu1 %v2262_v1  ;;  %v6997_v1 = vsel %vm13216_vm15, 1.0, %v13495_v31  ;;  %v9289_v2 = vsub.f32 %v6998_v3, %v6998_v3  ;;  %v2292_v3 = vand.u32 4294901760, %v2291_v35 }
  0xda   : > { %1807 = vmatmul.mubr.f32.gmra.mxu0 %v13640_v43  ;;  %2269 = vmatpush1.msra.mxu1 %v2268_v4  ;;  %v2286_v4 = vand.u32 4294901760, %v2285_v19  ;;  %v9296_v14 = vsub.f32 %v6997_v1, %v6997_v1  ;;  %v6996_v19 = vsel %vm13221_vm12, 1.0, %v13495_v31  ;;  %v2298_v1 = vand.u32 4294901760, %v2297_v54 }
  0xdb   : > { %1812 = vmatprep.mubr.f32.mxu0 %v13495_v31  ;;  %7119 = vmatprep.subr.msk.mxu0 %vm13204_vm13, %v13496_v32  ;;  %v13214_v35 = vand.u32 4294901760, %v9289_v2  ;;  %vm395_vm13 = vcmp.eq.s32.totalorder %v13537_v7, %v13615_v40  ;;  %v2316_v37 = vand.u32 4294901760, %v2315_v45 }
  0xdc   : > { %2002 = vmatmul.mubr.f32.gmra.mxu1 %v13638_v51  ;;  %7120 = vmatpush1.msk.msra.mxu0 %vm13197_vm4, %v13496_v32  ;;  %v13206_v51 = vand.u32 4294901760, %v9257_v39  ;;  %vm13227_vm4 = vcmp.eq.s32.totalorder %v13532_v9, %v13609_v42  ;;  %v13212_v49 = vand.u32 4294901760, %v9296_v14  ;;  %v6991_v45 = vsel %vm395_vm13, 1.0, %v13495_v31 }
  0xdd   : > { %2007 = vmatprep.mubr.f32.mxu1 %v13495_v31  ;;  %2275 = vmatprep.subr.mxu1 %v2274_v41  ;;  %v6995_v41 = vsel %vm13226_vm10, 1.0, %v13495_v31 }
  0xde   : > { %1814 = vmatmul.mubr.f32.gmra.mxu0 %v13641_v48  ;;  %2281 = vmatpush1.msra.mxu1 %v2280_v63  ;;  %v9323_v63 = vsub.f32 %v6996_v19, %v6996_v19  ;;  %v2304_v19 = vand.u32 4294901760, %v2303_v6  ;;  %v9336_v58 = vsub.f32 %v6995_v41, %v6995_v41  ;;  %v2321_v6 = vsub.f32 %v9289_v2, %v13214_v35 }
  0xdf   : > { %1819 = vmatprep.mubr.f32.mxu0 %v13495_v31  ;;  %7121 = vmatprep.subr.msk.mxu0 %vm13198_vm7, %v13496_v32  ;;  %vm13230_vm7 = vcmp.eq.s32.totalorder %v13532_v9, %v13615_v40 }
  0xe0   : > { %2009 = vmatmul.mubr.f32.gmra.mxu1 %v13639_v8  ;;  %7122 = vmatpush1.msk.msra.mxu0 %vm13203_vm14, %v13496_v32  ;;  %v2309_v8 = vsub.f32 %v9257_v39, %v13206_v51  ;;  %v6993_v54 = vsel %vm13230_vm7, 1.0, %v13495_v31  ;;  %vm396_vm14 = vcmp.eq.s32.totalorder %v13537_v7, %v13609_v42  ;;  %v13217_v11 = vand.u32 4294901760, %v9336_v58 }
  0xe1   : > { %2014 = vmatprep.mubr.f32.mxu1 %v13495_v31  ;;  %2287 = vmatprep.subr.mxu1 %v2286_v4  ;;  %v6994_v4 = vsel %vm13227_vm4, 1.0, %v13495_v31  ;;  %v9372_v38 = vsub.f32 %v6993_v54, %v6993_v54 }
  0xe2   : > { %1821 = vmatmul.mubr.f32.gmra.mxu0 %v13642_v36  ;;  %2293 = vmatpush1.msra.mxu1 %v2292_v3  ;;  %v13213_v3 = vand.u32 4294901760, %v9323_v63  ;;  %v2310_v41 = vand.u32 4294901760, %v2309_v8  ;;  %v9368_v51 = vsub.f32 %v6994_v4, %v6994_v4  ;;  %v2322_v8 = vand.u32 4294901760, %v2321_v6  ;;  %v13644_v6 = vld [vmem:[#allocation30_spill] sm:$0xff] }
  0xe3   : > { %1826 = vmatprep.mubr.f32.mxu0 %v13495_v31  ;;  %7123 = vmatprep.subr.msk.mxu0 %vm406_vm9, %v13496_v32  ;;  %v13222_v35 = vand.u32 4294901760, %v9372_v38 }
  0xe4   : > { %2016 = vmatmul.mubr.f32.gmra.mxu1 %v13640_v43  ;;  %7124 = vmatpush1.msk.msra.mxu0 %vm13210_vm11, %v13496_v32  ;;  %v2327_v43 = vsub.f32 %v9296_v14, %v13212_v49  ;;  %vm394_vm11 = vcmp.eq.s32.totalorder %v13541_v34, %v13609_v42  ;;  %v13219_v4 = vand.u32 4294901760, %v9368_v51 }
  0xe5   : > { %2021 = vmatprep.mubr.f32.mxu1 %v13495_v31  ;;  %2299 = vmatprep.subr.mxu1 %v2298_v1  ;;  %v6992_v1 = vsel %vm396_vm14, 1.0, %v13495_v31  ;;  %v2351_v5 = vsub.f32 %v9372_v38, %v13222_v35 }
  0xe6   : > { %1828 = vmatmul.mubr.f32.gmra.mxu0 %v13643_v15  ;;  %2305 = vmatpush1.msra.mxu1 %v2304_v19  ;;  %v2333_v19 = vsub.f32 %v9323_v63, %v13213_v3  ;;  %v9399_v54 = vsub.f32 %v6992_v1, %v6992_v1  ;;  %v2328_v49 = vand.u32 4294901760, %v2327_v43  ;;  %v2339_v3 = vsub.f32 %v9336_v58, %v13217_v11 }
  0xe7   : > { %1833 = vmatprep.mubr.f32.mxu0 %v13495_v31  ;;  %7125 = vmatprep.subr.msk.mxu0 %vm404_vm5, %v13496_v32  ;;  %v2352_v61 = vand.u32 4294901760, %v2351_v5 }
  0xe8   : > { %2023 = vmatmul.mubr.f32.gmra.mxu1 %v13641_v48  ;;  %7126 = vmatpush1.msk.msra.mxu0 %vm13211_vm1, %v13496_v32  ;;  %v9401_v48 = vsub.f32 %v6991_v45, %v6991_v45  ;;  %vm393_vm1 = vcmp.eq.s32.totalorder %v13541_v34, %v13615_v40  ;;  %v13229_v1 = vand.u32 4294901760, %v9399_v54  ;;  %v2340_v11 = vand.u32 4294901760, %v2339_v3 }
  0xe9   : > { %2028 = vmatprep.mubr.f32.mxu1 %v13495_v31  ;;  %2311 = vmatprep.subr.mxu1 %v2310_v41  ;;  %v6990_v41 = vsel %vm394_vm11, 1.0, %v13495_v31  ;;  %v6989_v43 = vsel %vm393_vm1, 1.0, %v13495_v31 }
  0xea   : > { %1835 = vmatmul.mubr.f32.gmra.mxu0 %v13644_v6  ;;  %2317 = vmatpush1.msra.mxu1 %v2316_v37  ;;  %v2334_v37 = vand.u32 4294901760, %v2333_v19  ;;  %v13228_v45 = vand.u32 4294901760, %v9401_v48  ;;  %v13645_v19 = vld [vmem:[#allocation33_spill] sm:$0xff]  ;;  %v9452_v17 = vsub.f32 %v6989_v43, %v6989_v43 }
  0xeb   : > { %1840 = vmatprep.mubr.f32.mxu0 %v13495_v31  ;;  %7127 = vmatprep.subr.msk.mxu0 %vm13215_vm6, %v13496_v32  ;;  %vm392_vm6 = vcmp.eq.s32.totalorder %v13544_v12, %v13609_v42 }
  0xec   : > { %2030 = vmatmul.mubr.f32.gmra.mxu1 %v13642_v36  ;;  %7128 = vmatpush1.msk.msra.mxu0 %vm13216_vm15, %v13496_v32  ;;  %v2345_v36 = vsub.f32 %v9368_v51, %v13219_v4  ;;  %vm391_vm15 = vcmp.eq.s32.totalorder %v13544_v12, %v13615_v40  ;;  %v499_v4 = vld [vmem:[%s13041_s2 + $0x80] sm:$0xff]  ;;  %13646 = vst [vmem:[#allocation22_spill] sm:$0xff] %v9452_v17 }
  0xed   : > { %2035 = vmatprep.mubr.f32.mxu1 %v13495_v31  ;;  %2323 = vmatprep.subr.mxu1 %v2322_v8  ;;  %v9442_v8 = vsub.f32 %v6990_v41, %v6990_v41  ;;  %v6987_v3 = vsel %vm391_vm15, 1.0, %v13495_v31  ;;  %v2363_v43 = vsub.f32 %v9401_v48, %v13228_v45  ;;  %v9476_v35 = vand.u32 4294901760, %v499_v4 }
  0xee   : > { %1842 = vmatmul.mubr.f32.gmra.mxu0 %v13645_v19  ;;  %2329 = vmatpush1.msra.mxu1 %v2328_v49  ;;  %v6988_v49 = vsel %vm392_vm6, 1.0, %v13495_v31  ;;  %v2346_v41 = vand.u32 4294901760, %v2345_v36  ;;  %v13231_v36 = vand.u32 4294901760, %v9452_v17 }
  0xef   : > { %1847 = vmatprep.mubr.f32.mxu0 %v13495_v31  ;;  %7129 = vmatprep.subr.msk.mxu0 %vm13221_vm12, %v13496_v32  ;;  %vm390_vm12 = vcmp.eq.s32.totalorder %v13548_v60, %v13609_v42  ;;  %13647 = vst [vmem:[#allocation23_spill] sm:$0xff] %v9476_v35  ;;  %v9479_v20 = vsub.f32 %v6988_v49, %v6988_v49  ;;  %v13232_v28 = vand.u32 4294901760, %v9442_v8  ;;  %v2364_v49 = vand.u32 4294901760, %v2363_v43 }
  0xf0   : > { %2037 = vmatmul.mubr.f32.gmra.mxu1 %v13643_v15  ;;  %7130 = vmatpush1.msk.msra.mxu0 %vm13226_vm10, %v13496_v32  ;;  %v2357_v15 = vsub.f32 %v9399_v54, %v13229_v1  ;;  %v6986_v5 = vsel %vm390_vm12, 1.0, %v13495_v31  ;;  %vm389_vm10 = vcmp.eq.s32.totalorder %v13548_v60, %v13615_v40 }
  0xf1   : > { %2042 = vmatprep.mubr.f32.mxu1 %v13495_v31  ;;  %2335 = vmatprep.subr.mxu1 %v2334_v37  ;;  %v9487_v37 = vsub.f32 %v6987_v3, %v6987_v3  ;;  %v9505_v3 = vsub.f32 %v499_v4, %v9476_v35  ;;  %v9511_v45 = vsub.f32 %v6986_v5, %v6986_v5  ;;  %v6985_v1 = vsel %vm389_vm10, 1.0, %v13495_v31  ;;  %v13648_v5 = vld [vmem:[#allocation38_spill] sm:$0xff] }
  0xf2   : > { %1849 = vmatmul.mubr.f32.gmra.mxu0 %v8547_v30  ;;  %2341 = vmatpush1.msra.mxu1 %v2340_v11  ;;  %v2358_v11 = vand.u32 4294901760, %v2357_v15  ;;  %v9539_v43 = vsub.f32 %v6985_v1, %v6985_v1 }
  0xf3   : > { %1854 = vmatprep.mubr.f32.mxu0 %v13495_v31  ;;  %7131 = vmatprep.subr.msk.mxu0 %vm13227_vm4, %v13496_v32  ;;  %vm388_vm4 = vcmp.eq.s32.totalorder %v7794_v10, %v13609_v42 }
  0xf4   : > { %2044 = vmatmul.mubr.f32.gmra.mxu1 %v13644_v6  ;;  %7132 = vmatpush1.msk.msra.mxu0 %vm13230_vm7, %v13496_v32  ;;  %v2369_v6 = vsub.f32 %v9442_v8, %v13232_v28  ;;  %v6984_v4 = vsel %vm388_vm4, 1.0, %v13495_v31  ;;  %vm13237_vm7 = vcmp.eq.s32.totalorder %v7794_v10, %v13615_v40 }
  0xf5   : > { %2049 = vmatprep.mubr.f32.mxu1 %v13495_v31  ;;  %2347 = vmatprep.subr.mxu1 %v2346_v41  ;;  %v13233_v41 = vand.u32 4294901760, %v9479_v20  ;;  %v9542_v28 = vsub.f32 %v6984_v4, %v6984_v4  ;;  %v6983_v15 = vsel %vm13237_vm7, 1.0, %v13495_v31 }
  0xf6   : > { %1856 = vmatmul.mubr.f32.gmra.mxu0 %v8580_v52  ;;  %2353 = vmatpush1.msra.mxu1 %v2352_v61  ;;  %v2375_v61 = vsub.f32 %v9452_v17, %v13231_v36  ;;  %v2370_v36 = vand.u32 4294901760, %v2369_v6  ;;  %v13239_v6 = vand.u32 4294901760, %v9505_v3 }
  0xf7   : > { %1861 = vmatprep.mubr.f32.mxu0 %v13495_v31  ;;  %7133 = vmatprep.subr.msk.mxu0 %vm396_vm14, %v13496_v32 }
  0xf8   : > { %2051 = vmatmul.mubr.f32.gmra.mxu1 %v13645_v19  ;;  %7134 = vmatpush1.msk.msra.mxu0 %vm395_vm13, %v13496_v32  ;;  %v2381_v19 = vsub.f32 %v9479_v20, %v13233_v41  ;;  %v2376_v1 = vand.u32 4294901760, %v2375_v61  ;;  %v9571_v61 = vsub.f32 %v6983_v15, %v6983_v15  ;;  %v13650_v41 = vld [vmem:[#allocation40_spill] sm:$0xff]  ;;  %v2192_v34 = vsub.f32 %v9505_v3, %v13239_v6 }
  0xf9   : > { %2056 = vmatprep.mubr.f32.mxu1 %v13495_v31  ;;  %2359 = vmatprep.subr.mxu1 %v2358_v11  ;;  %v13649_v11 = vand.u32 4294901760, %v9487_v37  ;;  %v13651_v15 = vand.u32 4294901760, %v9511_v45 }
  0xfa   : > { %1863 = vmatmul.mubr.f32.gmra.mxu0 %v13648_v5  ;;  %2365 = vmatpush1.msra.mxu1 %v2364_v49 }
  0xfb   : > { %1868 = vmatprep.mubr.f32.mxu0 %v13495_v31  ;;  %7135 = vmatprep.subr.msk.mxu0 %vm394_vm11, %v13496_v32  ;;  %v2387_v49 = vsub.f32 %v9487_v37, %v13649_v11  ;;  %v2393_v7 = vsub.f32 %v9511_v45, %v13651_v15  ;;  %v13238_v11 = vand.u32 4294901760, %v9542_v28 }
  0xfc   : > { %2058 = vmatmul.mubr.f32.gmra.mxu1 %v8547_v30  ;;  %7136 = vmatpush1.msk.msra.mxu0 %vm393_vm1, %v13496_v32  ;;  %v2382_v30 = vand.u32 4294901760, %v2381_v19 }
  0xfd   : > { %2063 = vmatprep.mubr.f32.mxu1 %v13495_v31  ;;  %7137 = vmatprep.subr.msk.mxu0 %vm392_vm6, %v13496_v32  ;;  %v2388_v4 = vand.u32 4294901760, %v2387_v49  ;;  %v2394_v49 = vand.u32 4294901760, %v2393_v7  ;;  %v2405_v15 = vsub.f32 %v9542_v28, %v13238_v11 }
  0xfe   : > { %1870 = vmatmul.mubr.f32.gmra.mxu0 %v13650_v41  ;;  %2371 = vmatprep.subr.mxu1 %v2370_v36  ;;  %v13652_v36 = vand.u32 4294901760, %v9539_v43 }
  0xff   : > { %7138 = vmatpush1.msk.msra.mxu0 %vm391_vm15, %v13496_v32  ;;  %2377 = vmatpush1.msra.mxu1 %v2376_v1  ;;  %v13236_v1 = vand.u32 4294901760, %v9571_v61 }
 0x100   : > { %2065 = vmatmul.mubr.f32.gmra.mxu1 %v8580_v52  ;;  %1875 = vmatprep.mubr.f32.mxu0 %v13495_v31  ;;  %v2399_v19 = vsub.f32 %v9539_v43, %v13652_v36  ;;  %v2193_v52 = vand.u32 4294901760, %v2192_v34  ;;  %v500_v36 = vld [vmem:[%s13041_s2 + $0x88] sm:$0xff] }
 0x101   : > { %7139 = vmatprep.subr.msk.mxu0 %vm390_vm12, %v13496_v32  ;;  %2070 = vmatprep.mubr.f32.mxu1 %v13495_v31 }
 0x102   : > { %1877 = vmatmul.mubr.f32.gmra.mxu0 %v8647_v13  ;;  %2383 = vmatprep.subr.mxu1 %v2382_v30  ;;  %v2400_v7 = vand.u32 4294901760, %v2399_v19  ;;  %v2406_v30 = vand.u32 4294901760, %v2405_v15  ;;  %v501_v15 = vld [vmem:[%s13041_s2 + $0x90] sm:$0xff] }
 0x103   : > { %7140 = vmatpush1.msk.msra.mxu0 %vm389_vm10, %v13496_v32  ;;  %2389 = vmatpush1.msra.mxu1 %v2388_v4  ;;  %v2411_v4 = vsub.f32 %v9571_v61, %v13236_v1 }
 0x104   : > { %2072 = vmatmul.mubr.f32.gmra.mxu1 %v13648_v5  ;;  %7141 = vmatprep.subr.msk.mxu0 %vm388_vm4, %v13496_v32 }
 0x105   : > { %7142 = vmatpush1.msk.msra.mxu0 %vm13237_vm7, %v13496_v32  ;;  %2188 = vmatprep.mubr.f32.mxu0 %v13495_v31  ;;  %v605_v34 = vpop.f32.mrf.mxu0  ;;  %v2412_v1 = vand.u32 4294901760, %v2411_v4  ;;  %vm13656_vm7 = vcmp.eq.s32.totalorder %v7819_v18, %v13609_v42  ;;  %v9655_v4 = vand.u32 4294901760, %v501_v15 }
 0x106   : > { %2470 = vmatprep.subr.mxu0 %v8989_v59  ;;  %2077 = vmatprep.mubr.f32.mxu1 %v13495_v31 }
 0x107   : > { %2194 = vmatmul.mubr.f32.vlgmr.msra.gmra.mxu0 %v2193_v52  ;;  %2395 = vmatprep.subr.mxu1 %v2394_v49  ;;  %v9620_v5 = vpop.f32.mrf.mxu0  ;;  %v9633_v49 = vand.u32 4294901760, %v500_v36 }
 0x108   : > { %13653 = vst [vmem:[#allocation12_spill] sm:$0xff] %v9620_v5  ;;  %2473 = vmatpush1.msra.mxu0 %v9028_v33  ;;  %2079 = vmatmul.mubr.f32.gmra.mxu1 %v13650_v41 }
 0x109   : > { %2476 = vmatprep.subr.mxu0 %v9036_v57  ;;  %2401 = vmatpush1.msra.mxu1 %v2400_v7  ;;  %v616_v19 = vpop.f32.mrf.mxu0  ;;  %13655 = vst [vmem:[#allocation25_spill] sm:$0xff] %v9633_v49 }
 0x10a   : > { %2479 = vmatpush1.msra.mxu0 %v9046_v29  ;;  %2084 = vmatprep.mubr.f32.mxu1 %v13495_v31 }
 0x10b   : > { %2482 = vmatprep.subr.mxu0 %v9048_v53  ;;  %2407 = vmatprep.subr.mxu1 %v2406_v30  ;;  %v9631_v52 = vpop.f32.mrf.mxu0 }
 0x10c   : > { %13654 = vst [vmem:[#allocation24_spill] sm:$0xff] %v9631_v52  ;;  %2485 = vmatpush1.msra.mxu0 %v9074_v47  ;;  %2086 = vmatmul.mubr.f32.gmra.mxu1 %v8647_v13 }
 0x10d   : > { %2488 = vmatprep.subr.mxu0 %v9097_v0  ;;  %2413 = vmatpush1.msra.mxu1 %v2412_v1  ;;  %v627_v41 = vpop.f32.mrf.mxu0  ;;  %v9651_v1 = vsub.f32 %v500_v36, %v9633_v49 }
 0x10e   : > { %2491 = vmatpush1.msra.mxu0 %v9107_v16  ;;  %2446 = vmatprep.mubr.f32.mxu1 %v13495_v31 }
 0x10f   : > { %2494 = vmatprep.subr.mxu0 %v9148_v44  ;;  %7143 = vmatprep.subr.msk.mxu1 %vm13656_vm7, %v13496_v32  ;;  %v9648_v13 = vpop.f32.mrf.mxu0  ;;  %vm13658_vm7 = vcmp.eq.s32.totalorder %v7819_v18, %v13615_v40 }
 0x110   : > { %13657 = vst [vmem:[#allocation26_spill] sm:$0xff] %v9648_v13  ;;  %2497 = vmatpush1.msra.mxu0 %v9152_v56  ;;  %v1002_v7 = vpop.f32.mrf.mxu1  ;;  %2448 = vmatmul.mubr.f32.vlgmr.msra.gmra.mxu1 %v9476_v35  ;;  %v9685_v13 = vsub.f32 %v501_v15, %v9655_v4 }
 0x111   : > { %v9657_v30 = vadd.f32 %v1002_v7, %v605_v34  ;;  %2500 = vmatprep.subr.mxu0 %v9186_v46  ;;  %7144 = vmatpush1.msk.msra.mxu1 %vm13658_vm7, %v13496_v32  ;;  %v638_v11 = vpop.f32.mrf.mxu0  ;;  %vm13662_vm7 = vcmp.eq.s32.totalorder %v7830_v23, %v13609_v42 }
 0x112   : > { %2503 = vmatpush1.msra.mxu0 %v9195_v50  ;;  %7145 = vmatprep.subr.msk.mxu1 %vm416_vm0, %v13496_v32  ;;  %v9669_v36 = vpop.f32.mrf.mxu1 }
 0x113   : > { %13659 = vst [vmem:[#allocation16_spill] sm:$0xff] %v9669_v36  ;;  %2506 = vmatprep.subr.mxu0 %v9220_v27  ;;  %7146 = vmatpush1.msk.msra.mxu1 %vm415_vm2, %v13496_v32  ;;  %v9676_v34 = vpop.f32.mrf.mxu0 }
 0x114   : > { %13660 = vst [vmem:[#allocation7_spill] sm:$0xff] %v9676_v34  ;;  %2509 = vmatpush1.msra.mxu0 %v9228_v62  ;;  %7147 = vmatprep.subr.msk.mxu1 %vm13240_vm3, %v13496_v32  ;;  %v1009_v6 = vpop.f32.mrf.mxu1  ;;  %vm13664_vm3 = vcmp.eq.s32.totalorder %v7830_v23, %v13615_v40 }
 0x115   : > { %v9687_v52 = vadd.f32 %v1009_v6, %v616_v19  ;;  %2512 = vmatprep.subr.mxu0 %v9257_v39  ;;  %7148 = vmatpush1.msk.msra.mxu1 %vm13241_vm8, %v13496_v32  ;;  %v649_v7 = vpop.f32.mrf.mxu0  ;;  %v13666_v19 = vand.u32 4294901760, %v9651_v1  ;;  %vm13670_vm8 = vcmp.eq.s32.totalorder %v7836_v25, %v13609_v42 }
 0x116   : > { %2515 = vmatpush1.msra.mxu0 %v9259_v55  ;;  %7149 = vmatprep.subr.msk.mxu1 %vm13662_vm7, %v13496_v32  ;;  %v9699_v34 = vpop.f32.mrf.mxu1  ;;  %vm13667_vm7 = vcmp.eq.s32.totalorder %v7833_v24, %v13609_v42 }
 0x117   : > { %13661 = vst [vmem:[#allocation17_spill] sm:$0xff] %v9687_v52  ;;  %13663 = vst [vmem:[#allocation18_spill] sm:$0xff] %v9699_v34  ;;  %2518 = vmatprep.subr.mxu0 %v9289_v2  ;;  %7150 = vmatpush1.msk.msra.mxu1 %vm13664_vm3, %v13496_v32  ;;  %v9706_v6 = vpop.f32.mrf.mxu0  ;;  %v2203_v15 = vsub.f32 %v9651_v1, %v13666_v19  ;;  %vm13669_vm3 = vcmp.eq.s32.totalorder %v7833_v24, %v13615_v40  ;;  %v13678_v52 = vld [vmem:[#allocation9_spill] sm:$0xff] }
 0x118   : > { %13665 = vst [vmem:[#allocation15_spill] sm:$0xff] %v9706_v6  ;;  %2521 = vmatpush1.msra.mxu0 %v9296_v14  ;;  %7151 = vmatprep.subr.msk.mxu1 %vm13667_vm7, %v13496_v32  ;;  %v1016_v34 = vpop.f32.mrf.mxu1  ;;  %vm13672_vm7 = vcmp.eq.s32.totalorder %v7836_v25, %v13615_v40 }
 0x119   : > { %v9717_v5 = vadd.f32 %v1016_v34, %v627_v41  ;;  %2524 = vmatprep.subr.mxu0 %v9323_v63  ;;  %7152 = vmatpush1.msk.msra.mxu1 %vm13669_vm3, %v13496_v32  ;;  %v660_v19 = vpop.f32.mrf.mxu0  ;;  %v2204_v34 = vand.u32 4294901760, %v2203_v15  ;;  %vm13680_vm3 = vcmp.eq.s32.totalorder %v13678_v52, %v13615_v40 }
 0x11a   : > { %2527 = vmatpush1.msra.mxu0 %v9336_v58  ;;  %7153 = vmatprep.subr.msk.mxu1 %vm13670_vm8, %v13496_v32  ;;  %v9729_v6 = vpop.f32.mrf.mxu1  ;;  %vm13676_vm8 = vcmp.eq.s32.totalorder %v7844_v26, %v13615_v40 }
 0x11b   : > { %13668 = vst [vmem:[#allocation34_spill] sm:$0xff] %v9717_v5  ;;  %13671 = vst [vmem:[#allocation19_spill] sm:$0xff] %v9729_v6  ;;  %2530 = vmatprep.subr.mxu0 %v9368_v51  ;;  %7154 = vmatpush1.msk.msra.mxu1 %vm13672_vm7, %v13496_v32  ;;  %v9736_v41 = vpop.f32.mrf.mxu0  ;;  %v13674_v6 = vand.u32 4294901760, %v9685_v13 }
 0x11c   : > { %13673 = vst [vmem:[#allocation35_spill] sm:$0xff] %v9736_v41  ;;  %2533 = vmatpush1.msra.mxu0 %v9372_v38  ;;  %7155 = vmatprep.subr.msk.mxu1 %vm406_vm9, %v13496_v32  ;;  %v1023_v36 = vpop.f32.mrf.mxu1 }
 0x11d   : > { %v2214_v35 = vsub.f32 %v9685_v13, %v13674_v6  ;;  %v9746_v5 = vadd.f32 %v1023_v36, %v638_v11  ;;  %2536 = vmatprep.subr.mxu0 %v9399_v54  ;;  %7156 = vmatpush1.msk.msra.mxu1 %vm13676_vm8, %v13496_v32  ;;  %v671_v15 = vpop.f32.mrf.mxu0 }
 0x11e   : > { %2199 = vmatprep.mubr.f32.mxu0 %v13495_v31  ;;  %2539 = vmatpush1.msra.mxu0 %v9401_v48  ;;  %v9755_v41 = vpop.f32.mrf.mxu1 }
 0x11f   : > { %13675 = vst [vmem:[#allocation21_spill] sm:$0xff] %v9746_v5  ;;  %13677 = vst [vmem:[#allocation36_spill] sm:$0xff] %v9755_v41  ;;  %7157 = vmatprep.subr.msk.mxu1 %vm404_vm5, %v13496_v32  ;;  %2205 = vmatmul.mubr.f32.gmra.mxu0 %v2204_v34  ;;  %v9761_v11 = vpop.f32.mrf.mxu0  ;;  %v2215_v6 = vand.u32 4294901760, %v2214_v35  ;;  %v13681_v41 = vld [vmem:[#allocation10_spill] sm:$0xff] }
 0x120   : > { %13679 = vst [vmem:[#allocation37_spill] sm:$0xff] %v9761_v11  ;;  %2542 = vmatprep.subr.mxu0 %v9442_v8  ;;  %7158 = vmatpush1.msk.msra.mxu1 %vm13680_vm3, %v13496_v32  ;;  %v1030_v36 = vpop.f32.mrf.mxu1  ;;  %vm13682_vm7 = vcmp.eq.s32.totalorder %v13681_v41, %v13609_v42  ;;  %vm13684_vm8 = vcmp.eq.s32.totalorder %v13681_v41, %v13615_v40 }
 0x121   : > { %2545 = vmatpush1.msra.mxu0 %v9452_v17  ;;  %7159 = vmatprep.subr.msk.mxu1 %vm13682_vm7, %v13496_v32  ;;  %v9773_v5 = vadd.f32 %v1030_v36, %v649_v7  ;;  %v682_v34 = vpop.f32.mrf.mxu0  ;;  %v13687_v17 = vld [vmem:[#allocation11_spill] sm:$0xff] }
 0x122   : > { %2548 = vmatprep.subr.mxu0 %v9479_v20  ;;  %7160 = vmatpush1.msk.msra.mxu1 %vm13684_vm8, %v13496_v32  ;;  %v9780_v11 = vpop.f32.mrf.mxu1  ;;  %vm13688_vm3 = vcmp.eq.s32.totalorder %v13687_v17, %v13609_v42  ;;  %vm13689_vm7 = vcmp.eq.s32.totalorder %v13687_v17, %v13615_v40  ;;  %vm13691_vm8 = vcmp.eq.s32.totalorder %v13532_v9, %v13609_v42 }
 0x123   : > { %13683 = vst [vmem:[#allocation39_spill] sm:$0xff] %v9773_v5  ;;  %13685 = vst [vmem:[#allocation32_spill] sm:$0xff] %v9780_v11  ;;  %2210 = vmatprep.mubr.f32.mxu0 %v13495_v31  ;;  %2551 = vmatpush1.msra.mxu0 %v9487_v37  ;;  %v9784_v35 = vpop.f32.mrf.mxu0  ;;  %v13698_v5 = vand.u32 4294901760, %v8989_v59 }
 0x124   : > { %13686 = vst [vmem:[#allocation31_spill] sm:$0xff] %v9784_v35  ;;  %7161 = vmatprep.subr.msk.mxu1 %vm13688_vm3, %v13496_v32  ;;  %2216 = vmatmul.mubr.f32.gmra.mxu0 %v2215_v6  ;;  %v1037_v7 = vpop.f32.mrf.mxu1  ;;  %vm13694_vm3 = vcmp.eq.s32.totalorder %v13532_v9, %v13615_v40 }
 0x125   : > { %2554 = vmatprep.subr.mxu0 %v9511_v45  ;;  %7162 = vmatpush1.msk.msra.mxu1 %vm13689_vm7, %v13496_v32  ;;  %v9795_v36 = vadd.f32 %v1037_v7, %v660_v19  ;;  %v693_v11 = vpop.f32.mrf.mxu0  ;;  %vm13709_vm7 = vcmp.eq.s32.totalorder %v7794_v10, %v13615_v40 }
 0x126   : > { %2557 = vmatpush1.msra.mxu0 %v9539_v43  ;;  %7163 = vmatprep.subr.msk.mxu1 %vm13691_vm8, %v13496_v32  ;;  %v9802_v35 = vpop.f32.mrf.mxu1  ;;  %vm13713_vm8 = vcmp.eq.s32.totalorder %v7819_v18, %v13609_v42 }
 0x127   : > { %13690 = vst [vmem:[#allocation20_spill] sm:$0xff] %v9795_v36  ;;  %13692 = vst [vmem:[#allocation2_spill] sm:$0xff] %v9802_v35  ;;  %2453 = vmatprep.mubr.f32.mxu1 %v13495_v31  ;;  %2560 = vmatprep.subr.mxu0 %v9542_v28  ;;  %v9806_v6 = vpop.f32.mrf.mxu0 }
 0x128   : > { %13693 = vst [vmem:[#allocation3_spill] sm:$0xff] %v9806_v6  ;;  %7164 = vmatpush1.msk.msra.mxu1 %vm13694_vm3, %v13496_v32  ;;  %2563 = vmatpush1.msra.mxu0 %v9571_v61  ;;  %v1044_v19 = vpop.f32.mrf.mxu1  ;;  %vm13715_vm3 = vcmp.eq.s32.totalorder %v7819_v18, %v13615_v40 }
 0x129   : > { %2455 = vmatmul.mubr.f32.gmra.mxu1 %v9633_v49  ;;  %2596 = vmatprep.mubr.f32.mxu0 %v13495_v31  ;;  %v9815_v7 = vadd.f32 %v1044_v19, %v671_v15  ;;  %v704_v35 = vpop.f32.mrf.mxu0 }
 0x12a   : > { %7165 = vmatprep.subr.msk.mxu1 %vm396_vm14, %v13496_v32  ;;  %2599 = vmatmul.mubr.f32.vlgmr.msra.gmra.mxu0 %v9505_v3  ;;  %v9822_v6 = vpop.f32.mrf.mxu1 }
 0x12b   : > { %13695 = vst [vmem:[#allocation4_spill] sm:$0xff] %v9815_v7  ;;  %13697 = vst [vmem:[#allocation5_spill] sm:$0xff] %v9822_v6  ;;  %7166 = vmatpush1.msk.msra.mxu1 %vm395_vm13, %v13496_v32  ;;  %2748 = vmatprep.subr.mxu0 %v13698_v5  ;;  %v9830_v15 = vpop.f32.mrf.mxu0  ;;  %v13701_v7 = vand.u32 4294901760, %v9028_v33 }
 0x12c   : > { %13699 = vst [vmem:[#allocation6_spill] sm:$0xff] %v9830_v15  ;;  %7167 = vmatprep.subr.msk.mxu1 %vm394_vm11, %v13496_v32  ;;  %v1051_v49 = vpop.f32.mrf.mxu1  ;;  %2460 = vmatprep.mubr.f32.mxu1 %v13495_v31  ;;  %v13702_v15 = vand.u32 4294901760, %v9036_v57 }
 0x12d   : > { %2752 = vmatpush1.msra.mxu0 %v13701_v7  ;;  %7168 = vmatpush1.msk.msra.mxu1 %vm393_vm1, %v13496_v32  ;;  %v9843_v59 = vadd.f32 %v1051_v49, %v682_v34  ;;  %v715_v5 = vpop.f32.mrf.mxu0  ;;  %v13703_v49 = vand.u32 4294901760, %v9046_v29  ;;  %v13704_v34 = vand.u32 4294901760, %v9048_v53  ;;  %v13705_v29 = vand.u32 4294901760, %v9074_v47 }
 0x12e   : > { %2756 = vmatprep.subr.mxu0 %v13702_v15  ;;  %2462 = vmatmul.mubr.f32.gmra.mxu1 %v9655_v4  ;;  %v9848_v6 = vpop.f32.mrf.mxu1  ;;  %v13706_v53 = vand.u32 4294901760, %v9097_v0 }
 0x12f   : > { %2604 = vmatprep.mubr.f32.mxu0 %v13495_v31  ;;  %7169 = vmatprep.subr.msk.mxu1 %vm392_vm6, %v13496_v32  ;;  %v9855_v33 = vpop.f32.mrf.mxu0 }
 0x130   : > { %2760 = vmatpush1.msra.mxu0 %v13703_v49  ;;  %7170 = vmatpush1.msk.msra.mxu1 %vm391_vm15, %v13496_v32  ;;  %v1058_v57 = vpop.f32.mrf.mxu1 }
 0x131   : > { %2607 = vmatmul.mubr.f32.gmra.mxu0 %v9651_v1  ;;  %2764 = vmatprep.subr.mxu0 %v13704_v34  ;;  %v9866_v7 = vadd.f32 %v1058_v57, %v693_v11  ;;  %v726_v15 = vpop.f32.mrf.mxu0  ;;  %v13708_v57 = vand.u32 4294901760, %v9107_v16  ;;  %v13711_v16 = vand.u32 4294901760, %v9505_v3 }
 0x132   : > { %7171 = vmatprep.subr.msk.mxu1 %vm390_vm12, %v13496_v32  ;;  %2768 = vmatpush1.msra.mxu0 %v13705_v29  ;;  %v9874_v49 = vpop.f32.mrf.mxu1 }
 0x133   : > { %7172 = vmatpush1.msk.msra.mxu1 %vm389_vm10, %v13496_v32  ;;  %2772 = vmatprep.subr.mxu0 %v13706_v53  ;;  %v9882_v11 = vpop.f32.mrf.mxu0  ;;  %v13710_v53 = vand.u32 4294901760, %v9148_v44 }
 0x134   : > { %13707 = vst [vmem:[#allocation8_spill] sm:$0xff] %v9882_v11  ;;  %2612 = vmatprep.mubr.f32.mxu0 %v13495_v31  ;;  %7173 = vmatprep.subr.msk.mxu1 %vm388_vm4, %v13496_v32  ;;  %v1065_v47 = vpop.f32.mrf.mxu1  ;;  %v13712_v11 = vand.u32 4294901760, %v9152_v56  ;;  %v13716_v56 = vand.u32 4294901760, %v9195_v50  ;;  %v13718_v50 = vand.u32 4294901760, %v9228_v62  ;;  %v13723_v62 = vand.u32 4294901760, %v9259_v55 }
 0x135   : > { %2776 = vmatpush1.msra.mxu0 %v13708_v57  ;;  %7174 = vmatpush1.msk.msra.mxu1 %vm13709_vm7, %v13496_v32  ;;  %v9895_v0 = vadd.f32 %v1065_v47, %v704_v35  ;;  %v737_v34 = vpop.f32.mrf.mxu0  ;;  %v13714_v47 = vand.u32 4294901760, %v9186_v46  ;;  %v13717_v46 = vand.u32 4294901760, %v9220_v27  ;;  %vm13724_vm7 = vcmp.eq.s32.totalorder %v7830_v23, %v13609_v42 }
 0x136   : > { %2615 = vmatmul.mubr.f32.gmra.mxu0 %v9685_v13  ;;  %2717 = vmatprep.mubr.f32.mxu1 %v13495_v31  ;;  %v9899_v29 = vpop.f32.mrf.mxu1 }
 0x137   : > { %2780 = vmatprep.subr.mxu0 %v13710_v53  ;;  %2721 = vmatmul.mubr.f32.vlgmr.msra.gmra.mxu1 %v13711_v16  ;;  %v9905_v57 = vpop.f32.mrf.mxu0  ;;  %v13719_v53 = vand.u32 4294901760, %v9651_v1 }
 0x138   : > { %2784 = vmatpush1.msra.mxu0 %v13712_v11  ;;  %7175 = vmatprep.subr.msk.mxu1 %vm13713_vm8, %v13496_v32  ;;  %v1072_v35 = vpop.f32.mrf.mxu1  ;;  %vm13726_vm8 = vcmp.eq.s32.totalorder %v7830_v23, %v13615_v40 }
 0x139   : > { %2788 = vmatprep.subr.mxu0 %v13714_v47  ;;  %7176 = vmatpush1.msk.msra.mxu1 %vm13715_vm3, %v13496_v32  ;;  %v9919_v44 = vadd.f32 %v1072_v35, %v715_v5  ;;  %v748_v3 = vpop.f32.mrf.mxu0  ;;  %v13721_v35 = vand.u32 4294901760, %v9257_v39  ;;  %v13725_v39 = vand.u32 4294901760, %v9289_v2  ;;  %vm13729_vm3 = vcmp.eq.s32.totalorder %v7833_v24, %v13609_v42 }
 0x13a   : > { %2792 = vmatpush1.msra.mxu0 %v13716_v56  ;;  %7177 = vmatprep.subr.msk.mxu1 %vm416_vm0, %v13496_v32  ;;  %v9927_v11 = vpop.f32.mrf.mxu1  ;;  %vm13720_vm0 = vcmp.eq.s32.totalorder %v7827_v22, %v13609_v42  ;;  %v13728_v56 = vand.u32 4294901760, %v9685_v13 }
 0x13b   : > { %2726 = vmatprep.mubr.f32.mxu1 %v13495_v31  ;;  %2796 = vmatprep.subr.mxu0 %v13717_v46  ;;  %v9932_v18 = vpop.f32.mrf.mxu0  ;;  %v13730_v46 = vand.u32 4294901760, %v9323_v63  ;;  %v13736_v63 = vand.u32 4294901760, %v9372_v38  ;;  %v13739_v38 = vand.u32 4294901760, %v9401_v48  ;;  %v13742_v48 = vld [vmem:[#allocation22_spill] sm:$0xff] }
 0x13c   : > { %7178 = vmatpush1.msk.msra.mxu1 %vm415_vm2, %v13496_v32  ;;  %2800 = vmatpush1.msra.mxu0 %v13718_v50  ;;  %v1079_v5 = vpop.f32.mrf.mxu1  ;;  %vm13722_vm2 = vcmp.eq.s32.totalorder %v7827_v22, %v13615_v40  ;;  %v13727_v22 = vand.u32 4294901760, %v9296_v14  ;;  %v13732_v14 = vand.u32 4294901760, %v9336_v58 }
 0x13d   : > { %2730 = vmatmul.mubr.f32.gmra.mxu1 %v13719_v53  ;;  %7179 = vmatprep.subr.msk.mxu1 %vm13720_vm0, %v13496_v32  ;;  %v9946_v27 = vadd.f32 %v1079_v5, %v726_v15  ;;  %v759_v16 = vpop.f32.mrf.mxu0  ;;  %vm13731_vm0 = vcmp.eq.s32.totalorder %v7833_v24, %v13615_v40 }
 0x13e   : > { %2804 = vmatprep.subr.mxu0 %v13721_v35  ;;  %7180 = vmatpush1.msk.msra.mxu1 %vm13722_vm2, %v13496_v32  ;;  %v9954_v21 = vpop.f32.mrf.mxu1  ;;  %vm13733_vm2 = vcmp.eq.s32.totalorder %v7836_v25, %v13609_v42 }
 0x13f   : > { %2808 = vmatpush1.msra.mxu0 %v13723_v62  ;;  %7181 = vmatprep.subr.msk.mxu1 %vm13724_vm7, %v13496_v32  ;;  %v9962_v1 = vpop.f32.mrf.mxu0  ;;  %vm13735_vm7 = vcmp.eq.s32.totalorder %v7836_v25, %v13615_v40  ;;  %v13748_v62 = vand.u32 4294901760, %v9487_v37  ;;  %v13752_v37 = vand.u32 4294901760, %v9539_v43  ;;  %v13757_v43 = vand.u32 4294901760, %v9571_v61 }
 0x140   : > { %2735 = vmatprep.mubr.f32.mxu1 %v13495_v31  ;;  %2812 = vmatprep.subr.mxu0 %v13725_v39  ;;  %v1086_v15 = vpop.f32.mrf.mxu1 }
 0x141   : > { %7182 = vmatpush1.msk.msra.mxu1 %vm13726_vm8, %v13496_v32  ;;  %2816 = vmatpush1.msra.mxu0 %v13727_v22  ;;  %v9973_v55 = vadd.f32 %v1086_v15, %v737_v34  ;;  %v770_v47 = vpop.f32.mrf.mxu0  ;;  %v13734_v34 = vand.u32 4294901760, %v9368_v51  ;;  %v13737_v51 = vand.u32 4294901760, %v9399_v54  ;;  %vm13738_vm8 = vcmp.eq.s32.totalorder %v7844_v26, %v13615_v40 }
 0x142   : > { %2739 = vmatmul.mubr.f32.gmra.mxu1 %v13728_v56  ;;  %7183 = vmatprep.subr.msk.mxu1 %vm13729_vm3, %v13496_v32  ;;  %v9981_v2 = vpop.f32.mrf.mxu1  ;;  %v13740_v54 = vand.u32 4294901760, %v9442_v8  ;;  %v13745_v8 = vand.u32 4294901760, %v9479_v20  ;;  %vm13746_vm3 = vcmp.eq.s32.totalorder %v13681_v41, %v13615_v40  ;;  %v13750_v20 = vand.u32 4294901760, %v9511_v45 }
 0x143   : > { %2820 = vmatprep.subr.mxu0 %v13730_v46  ;;  %7184 = vmatpush1.msk.msra.mxu1 %vm13731_vm0, %v13496_v32  ;;  %v9989_v23 = vpop.f32.mrf.mxu0  ;;  %vm13749_vm0 = vcmp.eq.s32.totalorder %v13687_v17, %v13609_v42  ;;  %v13754_v45 = vand.u32 4294901760, %v9542_v28  ;;  %v13758_v28 = vld [vmem:[#allocation23_spill] sm:$0xff] }
 0x144   : > { %2824 = vmatpush1.msra.mxu0 %v13732_v14  ;;  %7185 = vmatprep.subr.msk.mxu1 %vm13733_vm2, %v13496_v32  ;;  %v1093_v13 = vpop.f32.mrf.mxu1  ;;  %vm13751_vm2 = vcmp.eq.s32.totalorder %v13687_v17, %v13615_v40  ;;  %v13756_v17 = vld [vmem:[#allocation34_spill] sm:$0xff] }
 0x145   : > { %2828 = vmatprep.subr.mxu0 %v13734_v34  ;;  %7186 = vmatpush1.msk.msra.mxu1 %vm13735_vm7, %v13496_v32  ;;  %v10003_v24 = vadd.f32 %v1093_v13, %v748_v3  ;;  %vm13753_vm7 = vcmp.eq.s32.totalorder %v13532_v9, %v13609_v42  ;;  %v13759_v34 = vld [vmem:[#allocation21_spill] sm:$0xff] }
 0x146   : > { %2832 = vmatpush1.msra.mxu0 %v13736_v63  ;;  %7187 = vmatprep.subr.msk.mxu1 %vm406_vm9, %v13496_v32  ;;  %v10011_v58 = vpop.f32.mrf.mxu1  ;;  %v1244_v50 = vpop.f32.mrf.mxu0  ;;  %vm13741_vm9 = vcmp.eq.s32.totalorder %v13678_v52, %v13615_v40  ;;  %v13747_v52 = vld [vmem:[#allocation17_spill] sm:$0xff] }
 0x147   : > { %2836 = vmatprep.subr.mxu0 %v13737_v51  ;;  %7188 = vmatpush1.msk.msra.mxu1 %vm13738_vm8, %v13496_v32  ;;  %v1245_v25 = vadd.f32 %v1244_v50, %v9657_v30  ;;  %v13743_v30 = vand.u32 4294901760, %v13742_v48  ;;  %vm13755_vm8 = vcmp.eq.s32.totalorder %v13532_v9, %v13615_v40  ;;  %v13760_v51 = vld [vmem:[#allocation25_spill] sm:$0xff] }
 0x148   : > { %2840 = vmatpush1.msra.mxu0 %v13739_v38  ;;  %7189 = vmatprep.subr.msk.mxu1 %vm404_vm5, %v13496_v32  ;;  %v1100_v3 = vpop.f32.mrf.mxu1  ;;  %v10026_v5 = vpop.f32.mrf.mxu0  ;;  %vm13744_vm5 = vcmp.eq.s32.totalorder %v13681_v41, %v13609_v42 }
 0x149   : > { %2844 = vmatprep.subr.mxu0 %v13740_v54  ;;  %7190 = vmatpush1.msk.msra.mxu1 %vm13741_vm9, %v13496_v32  ;;  %v10034_v26 = vadd.f32 %v1100_v3, %v759_v16  ;;  %v13761_v3 = vld [vmem:[#allocation39_spill] sm:$0xff] }
 0x14a   : > { %2848 = vmatpush1.msra.mxu0 %v13743_v30  ;;  %7191 = vmatprep.subr.msk.mxu1 %vm13744_vm5, %v13496_v32  ;;  %v10042_v53 = vpop.f32.mrf.mxu1  ;;  %v1252_v35 = vpop.f32.mrf.mxu0 }
 0x14b   : > { %2852 = vmatprep.subr.mxu0 %v13745_v8  ;;  %7192 = vmatpush1.msk.msra.mxu1 %vm13746_vm3, %v13496_v32  ;;  %v1253_v16 = vadd.f32 %v1252_v35, %v13747_v52  ;;  %v13763_v8 = vld [vmem:[#allocation20_spill] sm:$0xff] }
 0x14c   : > { %2856 = vmatpush1.msra.mxu0 %v13748_v62  ;;  %7193 = vmatprep.subr.msk.mxu1 %vm13749_vm0, %v13496_v32  ;;  %v1107_v39 = vpop.f32.mrf.mxu1  ;;  %v10057_v15 = vpop.f32.mrf.mxu0 }
 0x14d   : > { %2860 = vmatprep.subr.mxu0 %v13750_v20  ;;  %7194 = vmatpush1.msk.msra.mxu1 %vm13751_vm2, %v13496_v32  ;;  %v10065_v41 = vadd.f32 %v1107_v39, %v770_v47 }
 0x14e   : > { %2864 = vmatpush1.msra.mxu0 %v13752_v37  ;;  %7195 = vmatprep.subr.msk.mxu1 %vm13753_vm7, %v13496_v32  ;;  %v10073_v22 = vpop.f32.mrf.mxu1  ;;  %v1260_v56 = vpop.f32.mrf.mxu0 }
 0x14f   : > { %2868 = vmatprep.subr.mxu0 %v13754_v45  ;;  %7196 = vmatpush1.msk.msra.mxu1 %vm13755_vm8, %v13496_v32  ;;  %v1261_v47 = vadd.f32 %v1260_v56, %v13756_v17 }
 0x150   : > { %2872 = vmatpush1.msra.mxu0 %v13757_v43  ;;  %2905 = vmatprep.mubr.f32.mxu0 %v13495_v31  ;;  %v1470_v46 = vpop.f32.mrf.mxu1  ;;  %v10085_v14 = vpop.f32.mrf.mxu0 }
 0x151   : > { %7197 = vmatprep.subr.msk.mxu1 %vm396_vm14, %v13496_v32  ;;  %2907 = vmatmul.mubr.f32.vlgmr.msra.gmra.mxu0 %v13758_v28  ;;  %v10092_v13 = vadd.f32 %v1470_v46, %v1245_v25 }
 0x152   : > { %7198 = vmatpush1.msk.msra.mxu1 %vm395_vm13, %v13496_v32  ;;  %2912 = vmatprep.mubr.f32.mxu0 %v13495_v31  ;;  %v10099_v9 = vpop.f32.mrf.mxu1  ;;  %v1268_v61 = vpop.f32.mrf.mxu0 }
 0x153   : > { %7199 = vmatprep.subr.msk.mxu1 %vm394_vm11, %v13496_v32  ;;  %3023 = vmatprep.mubr.f32.mxu1 %v13495_v31  ;;  %v1269_v63 = vadd.f32 %v1268_v61, %v13759_v34 }
 0x154   : > { %7200 = vmatpush1.msk.msra.mxu1 %vm393_vm1, %v13496_v32  ;;  %v1479_v36 = vpop.f32.mrf.mxu1  ;;  %v10111_v50 = vpop.f32.mrf.mxu0 }
 0x155   : > { %7201 = vmatprep.subr.msk.mxu1 %vm392_vm6, %v13496_v32  ;;  %2914 = vmatmul.mubr.f32.gmra.mxu0 %v13760_v51  ;;  %v10118_v25 = vadd.f32 %v1479_v36, %v1253_v16  ;;  %v13765_v36 = vld [vmem:[#allocation37_spill] sm:$0xff] }
 0x156   : > { %7202 = vmatpush1.msk.msra.mxu1 %vm391_vm15, %v13496_v32  ;;  %2919 = vmatprep.mubr.f32.mxu0 %v13495_v31  ;;  %v10125_v19 = vpop.f32.mrf.mxu1  ;;  %v1276_v38 = vpop.f32.mrf.mxu0 }
 0x157   : > { %7203 = vmatprep.subr.msk.mxu1 %vm390_vm12, %v13496_v32  ;;  %v1277_v54 = vadd.f32 %v1276_v38, %v13761_v3  ;;  %vm13762_vm12 = vcmp.eq.s32.totalorder %v7794_v10, %v13615_v40  ;;  %v13764_v40 = vld [vmem:[#allocation4_spill] sm:$0xff] }
 0x158   : > { %7204 = vmatpush1.msk.msra.mxu1 %vm389_vm10, %v13496_v32  ;;  %v1488_v48 = vpop.f32.mrf.mxu1  ;;  %v10136_v12 = vpop.f32.mrf.mxu0 }
 0x159   : > { %7205 = vmatprep.subr.msk.mxu1 %vm388_vm4, %v13496_v32  ;;  %2921 = vmatmul.mubr.f32.gmra.mxu0 %v9655_v4  ;;  %v10143_v30 = vadd.f32 %v1488_v48, %v1261_v47 }
 0x15a   : > { %7206 = vmatpush1.msk.msra.mxu1 %vm13762_vm12, %v13496_v32  ;;  %v10149_v35 = vpop.f32.mrf.mxu1  ;;  %v1284_v60 = vpop.f32.mrf.mxu0  ;;  %3177 = vmatprep.mubr.f32.mxu0 %v13495_v31 }
 0x15b   : > { %3025 = vmatmul.mubr.f32.vlgmr.msra.gmra.mxu1 %v13758_v28  ;;  %v1285_v52 = vadd.f32 %v1284_v60, %v13763_v8 }
 0x15c   : > { %3030 = vmatprep.mubr.f32.mxu1 %v13495_v31  ;;  %v1497_v42 = vpop.f32.mrf.mxu1  ;;  %v10155_v16 = vpop.f32.mrf.mxu0 }
 0x15d   : > { %v10157_v62 = vadd.f32 %v1497_v42, %v1269_v63  ;;  %v13767_v42 = vld [vmem:[#allocation31_spill] sm:$0xff] }
 0x15e   : > { %v10159_v39 = vpop.f32.mrf.mxu1  ;;  %v1292_v10 = vpop.f32.mrf.mxu0 }
 0x15f   : > { %3032 = vmatmul.mubr.f32.gmra.mxu1 %v13760_v51  ;;  %v1293_v20 = vadd.f32 %v1292_v10, %v13764_v40  ;;  %v13766_v51 = vld [vmem:[#allocation5_spill] sm:$0xff]  ;;  %v1054_v10 = vadd.f32 %v9848_v6, %v13767_v42  ;;  %v13769_v42 = vld [vmem:[#allocation6_spill] sm:$0xff] }
 0x160   : > { %3037 = vmatprep.mubr.f32.mxu1 %v13495_v31  ;;  %v1506_v37 = vpop.f32.mrf.mxu1  ;;  %v1294_v56 = vpop.f32.mrf.mxu0  ;;  %v1047_v38 = vadd.f32 %v13766_v51, %v13765_v36  ;;  %v13768_v51 = vld [vmem:[#allocation3_spill] sm:$0xff] }
 0x161   : > { %v10164_v45 = vadd.f32 %v1506_v37, %v1277_v54 }
 0x162   : > { %v10166_v17 = vpop.f32.mrf.mxu1  ;;  %v1300_v47 = vpop.f32.mrf.mxu0  ;;  %v1295_v60 = vadd.f32 %v1294_v56, %v1047_v38 }
 0x163   : > { %3039 = vmatmul.mubr.f32.gmra.mxu1 %v9655_v4  ;;  %v1301_v43 = vadd.f32 %v1300_v47, %v9843_v59 }
 0x164   : > { %v1515_v46 = vpop.f32.mrf.mxu1  ;;  %v1302_v28 = vpop.f32.mrf.mxu0  ;;  %3424 = vmatprep.mubr.f32.mxu1 %v13495_v31 }
 0x165   : > { %v10171_v61 = vadd.f32 %v1515_v46, %v1285_v52  ;;  %v1303_v46 = vadd.f32 %v1302_v28, %v1054_v10 }
 0x166   : > { %v10173_v34 = vpop.f32.mrf.mxu1  ;;  %v1308_v63 = vpop.f32.mrf.mxu0 }
 0x167   : > { %v1309_v3 = vadd.f32 %v1308_v63, %v9866_v7 }
 0x168   : > { %v1524_v54 = vpop.f32.mrf.mxu1  ;;  %v1310_v48 = vpop.f32.mrf.mxu0 }
 0x169   : > { %v10178_v4 = vadd.f32 %v1524_v54, %v1293_v20  ;;  %v1061_v20 = vadd.f32 %v9874_v49, %v13768_v51 }
 0x16a   : > { %v1526_v59 = vpop.f32.mrf.mxu1  ;;  %v1316_v8 = vpop.f32.mrf.mxu0 }
 0x16b   : > { %v10182_v52 = vadd.f32 %v1526_v59, %v1295_v60  ;;  %v1317_v40 = vadd.f32 %v1316_v8, %v9895_v0  ;;  %v1311_v60 = vadd.f32 %v1310_v48, %v1061_v20 }
 0x16c   : > { %v1533_v37 = vpop.f32.mrf.mxu1  ;;  %v1318_v47 = vpop.f32.mrf.mxu0 }
 0x16d   : > { %v10185_v36 = vadd.f32 %v1533_v37, %v1301_v43  ;;  %v1068_v43 = vadd.f32 %v9899_v29, %v13769_v42 }
 0x16e   : > { %v1535_v7 = vpop.f32.mrf.mxu1  ;;  %v1324_v63 = vpop.f32.mrf.mxu0 }
 0x16f   : > { %v10189_v56 = vadd.f32 %v1535_v7, %v1303_v46  ;;  %v1325_v38 = vadd.f32 %v1324_v63, %v9919_v44  ;;  %v1319_v46 = vadd.f32 %v1318_v47, %v1068_v43 }
 0x170   : > { %v1542_v54 = vpop.f32.mrf.mxu1  ;;  %v1326_v6 = vpop.f32.mrf.mxu0 }
 0x171   : > { %v10192_v59 = vadd.f32 %v1542_v54, %v1309_v3  ;;  %v1075_v3 = vadd.f32 %v9927_v11, %v9855_v33 }
 0x172   : > { %v1544_v0 = vpop.f32.mrf.mxu1  ;;  %v1332_v8 = vpop.f32.mrf.mxu0 }
 0x173   : > { %v10196_v28 = vadd.f32 %v1544_v0, %v1311_v60  ;;  %v1333_v10 = vadd.f32 %v1332_v8, %v9946_v27  ;;  %v1327_v54 = vadd.f32 %v1326_v6, %v1075_v3  ;;  %v13770_v8 = vld [vmem:[#allocation8_spill] sm:$0xff] }
 0x174   : > { %v1551_v37 = vpop.f32.mrf.mxu1  ;;  %v1334_v49 = vpop.f32.mrf.mxu0 }
 0x175   : > { %v10199_v7 = vadd.f32 %v1551_v37, %v1317_v40  ;;  %v1082_v40 = vadd.f32 %v9954_v21, %v13770_v8 }
 0x176   : > { %v1553_v44 = vpop.f32.mrf.mxu1  ;;  %v1340_v63 = vpop.f32.mrf.mxu0 }
 0x177   : > { %v10203_v48 = vadd.f32 %v1553_v44, %v1319_v46  ;;  %v1341_v51 = vadd.f32 %v1340_v63, %v9973_v55  ;;  %v1335_v11 = vadd.f32 %v1334_v49, %v1082_v40 }
 0x178   : > { %v1560_v20 = vpop.f32.mrf.mxu1  ;;  %v1342_v29 = vpop.f32.mrf.mxu0 }
 0x179   : > { %v10206_v60 = vadd.f32 %v1560_v20, %v1325_v38  ;;  %v1089_v38 = vadd.f32 %v9981_v2, %v9905_v57 }
 0x17a   : > { %v1562_v27 = vpop.f32.mrf.mxu1  ;;  %v1348_v0 = vpop.f32.mrf.mxu0 }
 0x17b   : > { %v10210_v47 = vadd.f32 %v1562_v27, %v1327_v54  ;;  %v1349_v42 = vadd.f32 %v1348_v0, %v10003_v24  ;;  %v1343_v3 = vadd.f32 %v1342_v29, %v1089_v38  ;;  %v13771_v38 = vld [vmem:[#allocation12_spill] sm:$0xff] }
 0x17c   : > { %v1569_v43 = vpop.f32.mrf.mxu1  ;;  %v1350_v33 = vpop.f32.mrf.mxu0 }
 0x17d   : > { %v10213_v37 = vadd.f32 %v1569_v43, %v1333_v10  ;;  %v1096_v10 = vadd.f32 %v10011_v58, %v9932_v18 }
 0x17e   : > { %v1571_v55 = vpop.f32.mrf.mxu1  ;;  %v1356_v46 = vpop.f32.mrf.mxu0 }
 0x17f   : > { %v10217_v6 = vadd.f32 %v1571_v55, %v1335_v11  ;;  %v1357_v44 = vadd.f32 %v1356_v46, %v10034_v26  ;;  %v1351_v2 = vadd.f32 %v1350_v33, %v1096_v10  ;;  %v13772_v33 = vld [vmem:[#allocation16_spill] sm:$0xff] }
 0x180   : > { %v1578_v63 = vpop.f32.mrf.mxu1  ;;  %v1358_v21 = vpop.f32.mrf.mxu0 }
 0x181   : > { %v10220_v20 = vadd.f32 %v1578_v63, %v1341_v51  ;;  %v1103_v51 = vadd.f32 %v10042_v53, %v9962_v1  ;;  %v1110_v63 = vadd.f32 %v10073_v22, %v9989_v23 }
 0x182   : > { %v1580_v24 = vpop.f32.mrf.mxu1  ;;  %v1364_v54 = vpop.f32.mrf.mxu0 }
 0x183   : > { %v10224_v49 = vadd.f32 %v1580_v24, %v1343_v3  ;;  %v1365_v27 = vadd.f32 %v1364_v54, %v10065_v41  ;;  %v1359_v58 = vadd.f32 %v1358_v21, %v1103_v51 }
 0x184   : > { %v1587_v0 = vpop.f32.mrf.mxu1  ;;  %v1366_v57 = vpop.f32.mrf.mxu0 }
 0x185   : > { %v10227_v8 = vadd.f32 %v1587_v0, %v1349_v42  ;;  %v1005_v42 = vadd.f32 %v13772_v33, %v13771_v38  ;;  %v1367_v54 = vadd.f32 %v1366_v57, %v1110_v63  ;;  %v13773_v0 = vld [vmem:[#allocation24_spill] sm:$0xff] }
 0x186   : > { %v1589_v26 = vpop.f32.mrf.mxu1  ;;  %v1773_v40 = vpop.f32.mrf.mxu0 }
 0x187   : > { %v10231_v29 = vadd.f32 %v1589_v26, %v1351_v2  ;;  %v1774_v43 = vadd.f32 %v1773_v40, %v10092_v13  ;;  %v1247_v13 = vadd.f32 %v10026_v5, %v1005_v42  ;;  %v13774_v2 = vld [vmem:[#allocation18_spill] sm:$0xff] }
 0x188   : > { %v1596_v11 = vpop.f32.mrf.mxu1  ;;  %v1775_v18 = vpop.f32.mrf.mxu0  ;;  %v1012_v26 = vadd.f32 %v13774_v2, %v13773_v0 }
 0x189   : > { %v10234_v55 = vadd.f32 %v1596_v11, %v1357_v44  ;;  %v1473_v40 = vadd.f32 %v10099_v9, %v1247_v13 }
 0x18a   : > { %v1598_v41 = vpop.f32.mrf.mxu1  ;;  %v1780_v46 = vpop.f32.mrf.mxu0  ;;  %v1255_v11 = vadd.f32 %v10057_v15, %v1012_v26 }
 0x18b   : > { %v10240_v3 = vadd.f32 %v1598_v41, %v1359_v58  ;;  %v1781_v1 = vadd.f32 %v1780_v46, %v10118_v25  ;;  %v1776_v58 = vadd.f32 %v1775_v18, %v1473_v40  ;;  %v13776_v41 = vld [vmem:[#allocation26_spill] sm:$0xff]  ;;  %v13777_v46 = vld [vmem:[#allocation19_spill] sm:$0xff] }
 0x18c   : > { %v1605_v53 = vpop.f32.mrf.mxu1  ;;  %v1782_v24 = vpop.f32.mrf.mxu0  ;;  %v1019_v38 = vadd.f32 %v13777_v46, %v13776_v41  ;;  %v1482_v33 = vadd.f32 %v10125_v19, %v1255_v11  ;;  %v13784_v11 = vld [vmem:[#allocation15_spill] sm:$0xff] }
 0x18d   : > { %v10244_v21 = vadd.f32 %v1605_v53, %v1365_v27 }
 0x18e   : > { %v1607_v44 = vpop.f32.mrf.mxu1  ;;  %v1787_v10 = vpop.f32.mrf.mxu0  ;;  %v1263_v53 = vadd.f32 %v10085_v14, %v1019_v38  ;;  %v1783_v13 = vadd.f32 %v1782_v24, %v1482_v33 }
 0x18f   : > { %v10249_v51 = vadd.f32 %v1607_v44, %v1367_v54  ;;  %v1788_v23 = vadd.f32 %v1787_v10, %v10143_v30  ;;  %v13780_v54 = vld [vmem:[#allocation7_spill] sm:$0xff]  ;;  %v13781_v44 = vld [vmem:[#allocation36_spill] sm:$0xff] }
 0x190   : > { %v1982_v22 = vpop.f32.mrf.mxu1  ;;  %v1789_v25 = vpop.f32.mrf.mxu0  ;;  %v1026_v10 = vadd.f32 %v13781_v44, %v13780_v54  ;;  %v1491_v0 = vadd.f32 %v10149_v35, %v1263_v53  ;;  %v13789_v53 = vld [vmem:[#allocation2_spill] sm:$0xff] }
 0x191   : > { %v10253_v5 = vadd.f32 %v1982_v22, %v1774_v43 }
 0x192   : > { %v1984_v27 = vpop.f32.mrf.mxu1  ;;  %v1794_v57 = vpop.f32.mrf.mxu0  ;;  %v1271_v40 = vadd.f32 %v10111_v50, %v1026_v10  ;;  %v1790_v22 = vadd.f32 %v1789_v25, %v1491_v0 }
 0x193   : > { %13775 = vst [vmem:[#allocation27_spill] sm:$0xff] %v10253_v5  ;;  %v10258_v42 = vadd.f32 %v1984_v27, %v1776_v58  ;;  %v1795_v9 = vadd.f32 %v1794_v57, %v10157_v62  ;;  %v13785_v58 = vld [vmem:[#allocation32_spill] sm:$0xff] }
 0x194   : > { %v1989_v63 = vpop.f32.mrf.mxu1  ;;  %v1796_v30 = vpop.f32.mrf.mxu0  ;;  %v1033_v27 = vadd.f32 %v13785_v58, %v13784_v11  ;;  %v1500_v57 = vadd.f32 %v10159_v39, %v1271_v40 }
 0x195   : > { %13778 = vst [vmem:[#allocation28_spill] sm:$0xff] %v10258_v42  ;;  %v10262_v15 = vadd.f32 %v1989_v63, %v1781_v1  ;;  %v13788_v63 = vld [vmem:[#allocation35_spill] sm:$0xff] }
 0x196   : > { %v1991_v43 = vpop.f32.mrf.mxu1  ;;  %v1801_v18 = vpop.f32.mrf.mxu0  ;;  %v1279_v38 = vadd.f32 %v10136_v12, %v1033_v27  ;;  %v1797_v33 = vadd.f32 %v1796_v30, %v1500_v57 }
 0x197   : > { %13779 = vst [vmem:[#allocation29_spill] sm:$0xff] %v10262_v15  ;;  %v10267_v2 = vadd.f32 %v1991_v43, %v1783_v13  ;;  %v1802_v19 = vadd.f32 %v1801_v18, %v10164_v45  ;;  %v1040_v13 = vadd.f32 %v13789_v53, %v13788_v63 }
 0x198   : > { %v1996_v26 = vpop.f32.mrf.mxu1  ;;  %v1803_v62 = vpop.f32.mrf.mxu0  ;;  %v1509_v43 = vadd.f32 %v10166_v17, %v1279_v38 }
 0x199   : > { %13782 = vst [vmem:[#allocation30_spill] sm:$0xff] %v10267_v2  ;;  %v10271_v14 = vadd.f32 %v1996_v26, %v1788_v23  ;;  %v1287_v44 = vadd.f32 %v10155_v16, %v1040_v13 }
 0x19a   : > { %v1998_v1 = vpop.f32.mrf.mxu1  ;;  %v1808_v24 = vpop.f32.mrf.mxu0  ;;  %v1804_v10 = vadd.f32 %v1803_v62, %v1509_v43 }
 0x19b   : > { %13783 = vst [vmem:[#allocation33_spill] sm:$0xff] %v10271_v14  ;;  %v10276_v41 = vadd.f32 %v1998_v1, %v1790_v22  ;;  %v1809_v35 = vadd.f32 %v1808_v24, %v10171_v61  ;;  %v1518_v26 = vadd.f32 %v10173_v34, %v1287_v44 }
 0x19c   : > { %v2003_v46 = vpop.f32.mrf.mxu1  ;;  %v1810_v45 = vpop.f32.mrf.mxu0 }
 0x19d   : > { %13786 = vst [vmem:[#allocation38_spill] sm:$0xff] %v10276_v41  ;;  %v10280_v50 = vadd.f32 %v2003_v46, %v1795_v9 }
 0x19e   : > { %v2005_v23 = vpop.f32.mrf.mxu1  ;;  %v1815_v25 = vpop.f32.mrf.mxu0 }
 0x19f   : > { %13787 = vst [vmem:[#allocation40_spill] sm:$0xff] %v10280_v50  ;;  %v10285_v18 = vadd.f32 %v2005_v23, %v1797_v33  ;;  %v1816_v39 = vadd.f32 %v1815_v25, %v10178_v4  ;;  %v1811_v4 = vadd.f32 %v1810_v45, %v1518_v26 }
 0x1a0   : > { %v2010_v54 = vpop.f32.mrf.mxu1  ;;  %v1817_v61 = vpop.f32.mrf.mxu0 }
 0x1a1   : > { %13790 = vst [vmem:[#allocation9_spill] sm:$0xff] %v10285_v18  ;;  %v10289_v12 = vadd.f32 %v2010_v54, %v1802_v19  ;;  %v1818_v9 = vadd.f32 %v1817_v61, %v10182_v52 }
 0x1a2   : > { %v2012_v30 = vpop.f32.mrf.mxu1  ;;  %v1822_v0 = vpop.f32.mrf.mxu0 }
 0x1a3   : > { %13791 = vst [vmem:[#allocation10_spill] sm:$0xff] %v10289_v12  ;;  %v10293_v40 = vadd.f32 %v2012_v30, %v1804_v10  ;;  %v1823_v17 = vadd.f32 %v1822_v0, %v10185_v36 }
 0x1a4   : > { %v2017_v22 = vpop.f32.mrf.mxu1  ;;  %v1824_v1 = vpop.f32.mrf.mxu0 }
 0x1a5   : > { %13792 = vst [vmem:[#allocation11_spill] sm:$0xff] %v10293_v40  ;;  %v10296_v24 = vadd.f32 %v2017_v22, %v1809_v35  ;;  %v1825_v16 = vadd.f32 %v1824_v1, %v10189_v56 }
 0x1a6   : > { %v2019_v62 = vpop.f32.mrf.mxu1  ;;  %v1829_v19 = vpop.f32.mrf.mxu0 }
 0x1a7   : > { %13793 = vst [vmem:[#allocation13_spill] sm:$0xff] %v10296_v24  ;;  %v10299_v11 = vadd.f32 %v2019_v62, %v1811_v4  ;;  %v1830_v52 = vadd.f32 %v1829_v19, %v10192_v59 }
 0x1a8   : > { %v2024_v58 = vpop.f32.mrf.mxu1  ;;  %v1831_v27 = vpop.f32.mrf.mxu0 }
 0x1a9   : > { %13794 = vst [vmem:[#allocation14_spill] sm:$0xff] %v10299_v11  ;;  %v10302_v34 = vadd.f32 %v2024_v58, %v1816_v39  ;;  %v1832_v57 = vadd.f32 %v1831_v27, %v10196_v28 }
 0x1aa   : > { %v2026_v36 = vpop.f32.mrf.mxu1  ;;  %v1836_v46 = vpop.f32.mrf.mxu0 }
 0x1ab   : > { %13795 = vst [vmem:[#allocation22_spill] sm:$0xff] %v10302_v34  ;;  %v10305_v38 = vadd.f32 %v2026_v36, %v1818_v9  ;;  %v1837_v35 = vadd.f32 %v1836_v46, %v10199_v7 }
 0x1ac   : > { %v2031_v45 = vpop.f32.mrf.mxu1  ;;  %v1838_v56 = vpop.f32.mrf.mxu0 }
 0x1ad   : > { %13796 = vst [vmem:[#allocation17_spill] sm:$0xff] %v10305_v38  ;;  %v10308_v33 = vadd.f32 %v2031_v45, %v1823_v17  ;;  %v1839_v23 = vadd.f32 %v1838_v56, %v10203_v48 }
 0x1ae   : > { %v2033_v25 = vpop.f32.mrf.mxu1  ;;  %v10311_v59 = vpop.f32.mrf.mxu0 }
 0x1af   : > { %13797 = vst [vmem:[#allocation34_spill] sm:$0xff] %v10308_v33  ;;  %v10313_v63 = vadd.f32 %v2033_v25, %v1825_v16 }
 0x1b0   : > { %v2038_v53 = vpop.f32.mrf.mxu1  ;;  %v10315_v13 = vpop.f32.mrf.mxu0 }
 0x1b1   : > { %13798 = vst [vmem:[#allocation23_spill] sm:$0xff] %v10313_v63  ;;  %v10317_v28 = vadd.f32 %v2038_v53, %v1830_v52 }
 0x1b2   : > { %v2040_v43 = vpop.f32.mrf.mxu1  ;;  %v10321_v7 = vpop.f32.mrf.mxu0 }
 0x1b3   : > { %13799 = vst [vmem:[#allocation21_spill] sm:$0xff] %v10317_v28  ;;  %v10319_v39 = vadd.f32 %v2040_v43, %v1832_v57 }
 0x1b4   : > { %v2045_v54 = vpop.f32.mrf.mxu1  ;;  %v10325_v48 = vpop.f32.mrf.mxu0 }
 0x1b5   : > { %13800 = vst [vmem:[#allocation25_spill] sm:$0xff] %v10319_v39  ;;  %v10323_v61 = vadd.f32 %v2045_v54, %v1837_v35 }
 0x1b6   : > { %v2047_v44 = vpop.f32.mrf.mxu1  ;;  %v10333_v0 = vpop.f32.mrf.mxu0 }
 0x1b7   : > { %13801 = vst [vmem:[#allocation39_spill] sm:$0xff] %v10323_v61  ;;  %v10327_v10 = vadd.f32 %v2047_v44, %v1839_v23 }
 0x1b8   : > { %v10329_v9 = vpop.f32.mrf.mxu1  ;;  %v10337_v17 = vpop.f32.mrf.mxu0 }
 0x1b9   : > { %13802 = vst [vmem:[#allocation20_spill] sm:$0xff] %v10327_v10 }
 0x1ba   : > { %v10331_v30 = vpop.f32.mrf.mxu1  ;;  %v10341_v1 = vpop.f32.mrf.mxu0 }
 0x1bc   : > { %v10335_v26 = vpop.f32.mrf.mxu1  ;;  %v10345_v16 = vpop.f32.mrf.mxu0 }
 0x1be   : > { %v10339_v22 = vpop.f32.mrf.mxu1  ;;  %v10349_v19 = vpop.f32.mrf.mxu0 }
 0x1c0   : > { %v10343_v4 = vpop.f32.mrf.mxu1  ;;  %v10353_v58 = vpop.f32.mrf.mxu0 }
 0x1c2   : > { %v10347_v62 = vpop.f32.mrf.mxu1  ;;  %v10357_v57 = vpop.f32.mrf.mxu0 }
 0x1c4   : > { %v10351_v52 = vpop.f32.mrf.mxu1  ;;  %v10361_v46 = vpop.f32.mrf.mxu0 }
 0x1c6   : > { %v10355_v27 = vpop.f32.mrf.mxu1 }
 0x1c7   : > { %13803 = vst [vmem:[#allocation4_spill] sm:$0xff] %v10355_v27  ;;  %v2195_v45 = vpop.f32.mrf.mxu0 }
 0x1c8   : > { %v10359_v36 = vpop.f32.mrf.mxu1 }
 0x1c9   : > { %v2197_v23 = vpop.f32.mrf.mxu0 }
 0x1ca   : > { %v10363_v35 = vpop.f32.mrf.mxu1 }
 0x1cc   : > { %v10365_v56 = vpop.f32.mrf.mxu1 }
 0x1ce   : > { %v10367_v25 = vpop.f32.mrf.mxu1 }
 0x1d0   : > { %v2449_v54 = vpop.f32.mrf.mxu1 }
 0x1d2   : > { %v2451_v31 = vpop.f32.mrf.mxu1 }
 0x1df   : > { %v2206_v53 = vpop.f32.mrf.mxu0 }
 0x1e1   : > { %v2208_v43 = vpop.f32.mrf.mxu0 }
 0x1e4   : > { %v2217_v44 = vpop.f32.mrf.mxu0 }
 0x1e6   : > { %v2219_v32 = vpop.f32.mrf.mxu0 }
 0x1e9   : > { %v2456_v5 = vpop.f32.mrf.mxu1 }
 0x1ea   : > { %v2457_v42 = vadd.f32 %v2456_v5, %v2206_v53  ;;  %v2600_v15 = vpop.f32.mrf.mxu0 }
 0x1eb   : > { %v2458_v2 = vpop.f32.mrf.mxu1 }
 0x1ec   : > { %v2459_v14 = vadd.f32 %v2458_v2, %v2208_v43  ;;  %v2602_v41 = vpop.f32.mrf.mxu0 }
 0x1ee   : > { %v2463_v50 = vpop.f32.mrf.mxu1 }
 0x1ef   : > { %v2464_v18 = vadd.f32 %v2463_v50, %v2217_v44 }
 0x1f0   : > { %v2465_v12 = vpop.f32.mrf.mxu1 }
 0x1f1   : > { %v2608_v40 = vpop.f32.mrf.mxu0  ;;  %v2466_v24 = vadd.f32 %v2465_v12, %v2219_v32 }
 0x1f2   : > { %v2609_v11 = vadd.f32 %v2608_v40, %v2457_v42  ;;  %v3045_v42 = vld [vmem:[%s13042_s3] sm:$0xff] }
 0x1f3   : > { %v2610_v34 = vpop.f32.mrf.mxu0 }
 0x1f4   : > { %v2611_v38 = vadd.f32 %v2610_v34, %v2459_v14  ;;  %v10380_v14 = vand.u32 4294901760, %v3045_v42  ;;  %v1846_v34 = vadd.f32 %v10315_v13, %v10210_v47  ;;  %v1860_v47 = vadd.f32 %v10337_v17, %v10224_v49 }
 0x1f5   : > { %v1879_v49 = vadd.f32 %v10357_v57, %v10244_v21 }
 0x1f6   : > { %v2616_v33 = vpop.f32.mrf.mxu0  ;;  %13808 = vst [vmem:[#allocation6_spill] sm:$0xff] %v10380_v14  ;;  %v10386_v12 = vsub.f32 %v3045_v42, %v10380_v14 }
 0x1f7   : > { %v2617_v63 = vadd.f32 %v2616_v33, %v2464_v18  ;;  %v2722_v28 = vpop.f32.mrf.mxu1  ;;  %v3046_v18 = vld [vmem:[%s13042_s3 + $0x8] sm:$0xff]  ;;  %v1851_v33 = vadd.f32 %v10321_v7, %v10213_v37  ;;  %v2055_v37 = vadd.f32 %v10331_v30, %v1846_v34 }
 0x1f8   : > { %v2618_v39 = vpop.f32.mrf.mxu0  ;;  %13809 = vst [vmem:[#allocation8_spill] sm:$0xff] %v10386_v12  ;;  %v10388_v40 = vand.u32 4294901760, %v3046_v18 }
 0x1f9   : > { %v2619_v10 = vadd.f32 %v2618_v39, %v2466_v24  ;;  %v2724_v61 = vpop.f32.mrf.mxu1  ;;  %v2450_v24 = vadd.f32 %v2449_v54, %v2195_v45  ;;  %v2452_v39 = vadd.f32 %v2451_v31, %v2197_v23  ;;  %v13250_v54 = vand.u32 4294901760, %v10386_v12 }
 0x1fa   : > { %13810 = vst [vmem:[#allocation12_spill] sm:$0xff] %v10388_v40  ;;  %v1865_v31 = vadd.f32 %v10341_v1, %v10227_v8  ;;  %v1881_v8 = vadd.f32 %v10361_v46, %v10249_v51  ;;  %v13812_v46 = vld [vmem:[#allocation4_spill] sm:$0xff] }
 0x1fc   : > { %v2090_v1 = vadd.f32 %v10367_v25, %v1881_v8 }
 0x1fd   : > { %v2731_v27 = vpop.f32.mrf.mxu1 }
 0x1fe   : > { %v10369_v5 = vadd.f32 %v2731_v27, %v2609_v11  ;;  %v1844_v11 = vadd.f32 %v10311_v59, %v10206_v60  ;;  %v1858_v27 = vadd.f32 %v10333_v0, %v10220_v20  ;;  %v10403_v60 = vsub.f32 %v3046_v18, %v10388_v40 }
 0x1ff   : > { %v2733_v53 = vpop.f32.mrf.mxu1  ;;  %v2603_v59 = vadd.f32 %v2602_v41, %v2452_v39  ;;  %v1867_v20 = vadd.f32 %v10345_v16, %v10231_v29  ;;  %v10425_v29 = vsub.f32 %v10386_v12, %v13250_v54  ;;  %v2088_v0 = vadd.f32 %v10365_v56, %v1879_v49  ;;  %v13813_v39 = vld [vmem:[#allocation39_spill] sm:$0xff] }
 0x200   : > { %13804 = vst [vmem:[#allocation37_spill] sm:$0xff] %v10369_v5  ;;  %v10371_v2 = vadd.f32 %v2733_v53, %v2611_v38  ;;  %v2053_v45 = vadd.f32 %v10329_v9, %v1844_v11  ;;  %13811 = vst [vmem:[#allocation16_spill] sm:$0xff] %v10403_v60  ;;  %v2074_v9 = vadd.f32 %v10351_v52, %v1865_v31 }
 0x201   : > { %v2725_v41 = vadd.f32 %v2724_v61, %v2603_v59  ;;  %v2067_v17 = vadd.f32 %v10343_v4, %v1858_v27  ;;  %v2076_v56 = vadd.f32 %v13812_v46, %v1867_v20 }
 0x202   : > { %13805 = vst [vmem:[#allocation5_spill] sm:$0xff] %v10371_v2  ;;  %v2740_v43 = vpop.f32.mrf.mxu1 }
 0x203   : > { %v10373_v50 = vadd.f32 %v2740_v43, %v2617_v63  ;;  %v1853_v63 = vadd.f32 %v10325_v48, %v10217_v6  ;;  %v2060_v6 = vadd.f32 %v10335_v26, %v1851_v33  ;;  %v1874_v48 = vadd.f32 %v10353_v58, %v10240_v3 }
 0x204   : > { %v2742_v44 = vpop.f32.mrf.mxu1 }
 0x205   : > { %13806 = vst [vmem:[#allocation31_spill] sm:$0xff] %v10373_v50  ;;  %v10375_v32 = vadd.f32 %v2742_v44, %v2619_v10  ;;  %v2601_v10 = vadd.f32 %v2600_v15, %v2450_v24  ;;  %v1872_v15 = vadd.f32 %v10349_v19, %v10234_v55  ;;  %v13249_v55 = vand.u32 4294901760, %v10403_v60 }
 0x206   : > { %v2062_v26 = vadd.f32 %v10339_v22, %v1853_v63  ;;  %v2083_v51 = vadd.f32 %v10363_v35, %v1874_v48 }
 0x207   : > { %13807 = vst [vmem:[#allocation3_spill] sm:$0xff] %v10375_v32  ;;  %v2723_v13 = vadd.f32 %v2722_v28, %v2601_v10  ;;  %v2081_v3 = vadd.f32 %v10359_v36, %v1872_v15  ;;  %v2069_v36 = vadd.f32 %v10347_v62, %v1860_v47  ;;  %v10447_v4 = vsub.f32 %v10403_v60, %v13249_v55  ;;  %v13833_v32 = vld [vmem:[#allocation11_spill] sm:$0xff]  ;;  %v13837_v60 = vld [vmem:[#allocation9_spill] sm:$0xff] }
 0x211   : > { %v2908_v38 = vpop.f32.mrf.mxu0 }
 0x212   : > { %v2909_v28 = vadd.f32 %v2908_v38, %v2723_v13 }
 0x213   : > { %v2910_v7 = vpop.f32.mrf.mxu0 }
 0x214   : > { %v2911_v21 = vadd.f32 %v2910_v7, %v2725_v41 }
 0x21b   : > { %v3026_v30 = vpop.f32.mrf.mxu1 }
 0x21c   : > { %v10430_v61 = vadd.f32 %v3026_v30, %v2909_v28 }
 0x21d   : > { %v3028_v16 = vpop.f32.mrf.mxu1 }
 0x21e   : > { %v10436_v19 = vadd.f32 %v3028_v16, %v2911_v21  ;;  %v3079_v52 = vmul.f32 %v10430_v61, %v2088_v0  ;;  %v3077_v58 = vmul.f32 %v10430_v61, %v2081_v3  ;;  %v3075_v57 = vmul.f32 %v10430_v61, %v2074_v9  ;;  %v13815_v0 = vld [vmem:[#allocation20_spill] sm:$0xff] }
 0x21f   : > { %v3073_v53 = vmul.f32 %v10430_v61, %v2067_v17  ;;  %v3071_v42 = vmul.f32 %v10430_v61, %v2060_v6  ;;  %v3069_v63 = vmul.f32 %v10430_v61, %v2053_v45  ;;  %v3067_v10 = vmul.f32 %v10430_v61, %v13813_v39 }
 0x220   : > { %v3080_v35 = vmul.f32 %v10436_v19, %v2090_v1  ;;  %v10450_v23 = vand.u32 4294901760, %v3079_v52  ;;  %v3078_v25 = vmul.f32 %v10436_v19, %v2083_v51  ;;  %v10454_v43 = vand.u32 4294901760, %v3077_v58 }
 0x221   : > { %v3076_v62 = vmul.f32 %v10436_v19, %v2076_v56  ;;  %v10457_v44 = vand.u32 4294901760, %v3075_v57  ;;  %v3074_v34 = vmul.f32 %v10436_v19, %v2069_v36  ;;  %v10480_v47 = vand.u32 4294901760, %v3073_v53 }
 0x222   : > { %v10460_v18 = vand.u32 4294901760, %v3080_v35  ;;  %v10463_v24 = vsub.f32 %v3079_v52, %v10450_v23  ;;  %v10465_v11 = vand.u32 4294901760, %v3078_v25  ;;  %v10469_v38 = vsub.f32 %v3077_v58, %v10454_v43 }
 0x223   : > { %v10471_v33 = vand.u32 4294901760, %v3076_v62  ;;  %v10478_v27 = vsub.f32 %v3075_v57, %v10457_v44  ;;  %v3072_v59 = vmul.f32 %v10436_v19, %v2062_v26  ;;  %v10487_v31 = vand.u32 4294901760, %v3071_v42 }
 0x224   : > { %3082 = vmatprep.subr.mxu0 %v10460_v18  ;;  %v10484_v13 = vsub.f32 %v3080_v35, %v10460_v18  ;;  %v13258_v45 = vand.u32 4294901760, %v10463_v24  ;;  %v10491_v6 = vmul.f32 %v10436_v19, %v2055_v37  ;;  %v10494_v20 = vsub.f32 %v3078_v25, %v10465_v11 }
 0x225   : > { %3084 = vmatpush1.msra.mxu0 %v10450_v23  ;;  %v10497_v15 = vand.u32 4294901760, %v3074_v34  ;;  %v10500_v7 = vsub.f32 %v3073_v53, %v10480_v47  ;;  %v10502_v48 = vand.u32 4294901760, %v3072_v59  ;;  %v10507_v41 = vsub.f32 %v3071_v42, %v10487_v31  ;;  %v13818_v53 = vld [vmem:[#allocation25_spill] sm:$0xff] }
 0x226   : > { %3086 = vmatprep.subr.mxu0 %v10465_v11  ;;  %v13259_v49 = vand.u32 4294901760, %v10484_v13  ;;  %v3209_v37 = vsub.f32 %v10463_v24, %v13258_v45  ;;  %v10513_v28 = vand.u32 4294901760, %v10491_v6  ;;  %v13257_v9 = vand.u32 4294901760, %v10494_v20  ;;  %v13830_v45 = vld [vmem:[#allocation14_spill] sm:$0xff] }
 0x227   : > { %3088 = vmatpush1.msra.mxu0 %v10454_v43  ;;  %v10520_v30 = vand.u32 4294901760, %v3069_v63  ;;  %v13255_v3 = vand.u32 4294901760, %v10469_v38  ;;  %v10525_v21 = vmul.f32 %v10436_v19, %v13815_v0  ;;  %v10532_v51 = vsub.f32 %v3076_v62, %v10471_v33  ;;  %v13820_v0 = vld [vmem:[#allocation23_spill] sm:$0xff] }
 0x228   : > { %3090 = vmatprep.subr.mxu0 %v10471_v33  ;;  %v3203_v8 = vsub.f32 %v10484_v13, %v13259_v49  ;;  %v3210_v26 = vand.u32 4294901760, %v3209_v37  ;;  %v3215_v17 = vsub.f32 %v10494_v20, %v13257_v9  ;;  %v10534_v1 = vand.u32 4294901760, %v3067_v10 }
 0x229   : > { %13814 = vst [vmem:[#allocation24_spill] sm:$0xff] %v10520_v30  ;;  %3092 = vmatpush1.msra.mxu0 %v10457_v44  ;;  %v10538_v52 = vsub.f32 %v3069_v63, %v10520_v30  ;;  %v3221_v58 = vsub.f32 %v10469_v38, %v13255_v3  ;;  %v10544_v57 = vand.u32 4294901760, %v10525_v21  ;;  %v13253_v46 = vand.u32 4294901760, %v10532_v51  ;;  %v13819_v63 = vld [vmem:[#allocation21_spill] sm:$0xff] }
 0x22a   : > { %13816 = vst [vmem:[#allocation18_spill] sm:$0xff] %v10534_v1  ;;  %3094 = vmatprep.subr.mxu0 %v10497_v15  ;;  %v3204_v16 = vand.u32 4294901760, %v3203_v8  ;;  %v3216_v36 = vand.u32 4294901760, %v3215_v17  ;;  %v10549_v56 = vsub.f32 %v3067_v10, %v10534_v1  ;;  %v13252_v35 = vand.u32 4294901760, %v10478_v27 }
 0x22b   : > { %13817 = vst [vmem:[#allocation26_spill] sm:$0xff] %v10544_v57  ;;  %3096 = vmatpush1.msra.mxu0 %v10480_v47  ;;  %v3222_v25 = vand.u32 4294901760, %v3221_v58  ;;  %v10555_v62 = vmul.f32 %v10436_v19, %v13818_v53  ;;  %v10558_v42 = vsub.f32 %v3074_v34, %v10497_v15  ;;  %v3065_v39 = vmul.f32 %v10430_v61, %v13819_v63 }
 0x22c   : > { %3098 = vmatprep.subr.mxu0 %v10502_v48  ;;  %3205 = vmatprep.subr.mxu1 %v3204_v16  ;;  %v3227_v10 = vsub.f32 %v10532_v51, %v13253_v46  ;;  %v3233_v37 = vsub.f32 %v10478_v27, %v13252_v35  ;;  %v13251_v8 = vand.u32 4294901760, %v10500_v7  ;;  %v10572_v34 = vmul.f32 %v10436_v19, %v13820_v0  ;;  %v13825_v35 = vld [vmem:[#allocation17_spill] sm:$0xff] }
 0x22d   : > { %3100 = vmatpush1.msra.mxu0 %v10487_v31  ;;  %3211 = vmatpush1.msra.mxu1 %v3210_v26  ;;  %v10576_v17 = vand.u32 4294901760, %v10555_v62  ;;  %v13254_v26 = vand.u32 4294901760, %v10558_v42  ;;  %v10579_v16 = vand.u32 4294901760, %v3065_v39  ;;  %v10582_v58 = vsub.f32 %v3072_v59, %v10502_v48 }
 0x22e   : > { %3102 = vmatprep.subr.mxu0 %v10513_v28  ;;  %3217 = vmatprep.subr.mxu1 %v3216_v36  ;;  %v3228_v53 = vand.u32 4294901760, %v3227_v10  ;;  %v3234_v63 = vand.u32 4294901760, %v3233_v37  ;;  %v3245_v0 = vsub.f32 %v10500_v7, %v13251_v8  ;;  %v10589_v36 = vand.u32 4294901760, %v10572_v34  ;;  %v13824_v10 = vld [vmem:[#allocation34_spill] sm:$0xff] }
 0x22f   : > { %13821 = vst [vmem:[#allocation19_spill] sm:$0xff] %v10576_v17  ;;  %13822 = vst [vmem:[#allocation7_spill] sm:$0xff] %v10579_v16  ;;  %3104 = vmatpush1.msra.mxu0 %v10520_v30  ;;  %3223 = vmatpush1.msra.mxu1 %v3222_v25  ;;  %v3239_v55 = vsub.f32 %v10558_v42, %v13254_v26  ;;  %v10596_v59 = vsub.f32 %v3065_v39, %v10579_v16  ;;  %v13256_v25 = vand.u32 4294901760, %v10582_v58 }
 0x230   : > { %13823 = vst [vmem:[#allocation36_spill] sm:$0xff] %v10589_v36  ;;  %3106 = vmatprep.subr.mxu0 %v10544_v57  ;;  %v3063_v37 = vmul.f32 %v10430_v61, %v13824_v10  ;;  %3229 = vmatprep.subr.mxu1 %v3228_v53  ;;  %v3246_v54 = vand.u32 4294901760, %v3245_v0  ;;  %v13260_v8 = vand.u32 4294901760, %v10507_v41  ;;  %v10605_v46 = vmul.f32 %v10436_v19, %v13825_v35  ;;  %v13827_v0 = vld [vmem:[#allocation22_spill] sm:$0xff] }
 0x231   : > { %3108 = vmatpush1.msra.mxu0 %v10534_v1  ;;  %v10609_v26 = vsub.f32 %v10491_v6, %v10513_v28  ;;  %3235 = vmatpush1.msra.mxu1 %v3234_v63  ;;  %v3240_v39 = vand.u32 4294901760, %v3239_v55  ;;  %v3251_v53 = vsub.f32 %v10582_v58, %v13256_v25  ;;  %v3061_v3 = vmul.f32 %v10430_v61, %v13827_v0 }
 0x232   : > { %3110 = vmatprep.subr.mxu0 %v10576_v17  ;;  %v10615_v10 = vand.u32 4294901760, %v3063_v37  ;;  %v3257_v6 = vsub.f32 %v10507_v41, %v13260_v8  ;;  %v10624_v35 = vand.u32 4294901760, %v10605_v46  ;;  %v13262_v63 = vand.u32 4294901760, %v10538_v52 }
 0x233   : > { %3112 = vmatpush1.msra.mxu0 %v10579_v16  ;;  %v13261_v55 = vand.u32 4294901760, %v10609_v26  ;;  %3241 = vmatprep.subr.mxu1 %v3240_v39  ;;  %v3252_v25 = vand.u32 4294901760, %v3251_v53  ;;  %v10632_v0 = vand.u32 4294901760, %v3061_v3  ;;  %v10636_v49 = vmul.f32 %v10436_v19, %v13830_v45 }
 0x234   : > { %13826 = vst [vmem:[#allocation15_spill] sm:$0xff] %v10615_v10  ;;  %13828 = vst [vmem:[#allocation32_spill] sm:$0xff] %v10624_v35  ;;  %3114 = vmatprep.subr.mxu0 %v10589_v36  ;;  %v10630_v9 = vsub.f32 %v3063_v37, %v10615_v10  ;;  %3247 = vmatpush1.msra.mxu1 %v3246_v54  ;;  %v3258_v8 = vand.u32 4294901760, %v3257_v6  ;;  %v3269_v53 = vsub.f32 %v10538_v52, %v13262_v63  ;;  %v13832_v6 = vld [vmem:[#allocation13_spill] sm:$0xff] }
 0x235   : > { %13829 = vst [vmem:[#allocation35_spill] sm:$0xff] %v10632_v0  ;;  %3116 = vmatpush1.msra.mxu0 %v10615_v10  ;;  %v3263_v39 = vsub.f32 %v10609_v26, %v13261_v55  ;;  %v10647_v37 = vsub.f32 %v10525_v21, %v10544_v57  ;;  %3253 = vmatprep.subr.mxu1 %v3252_v25  ;;  %v10654_v45 = vand.u32 4294901760, %v10636_v49  ;;  %v13265_v22 = vand.u32 4294901760, %v10549_v56 }
 0x236   : > { %3118 = vmatprep.subr.mxu0 %v10624_v35  ;;  %v10651_v54 = vsub.f32 %v3061_v3, %v10632_v0  ;;  %v3059_v55 = vmul.f32 %v10430_v61, %v13832_v6  ;;  %3259 = vmatpush1.msra.mxu1 %v3258_v8  ;;  %v3270_v21 = vand.u32 4294901760, %v3269_v53  ;;  %v10663_v50 = vmul.f32 %v10436_v19, %v13833_v32 }
 0x237   : > { %v3264_v63 = vand.u32 4294901760, %v3263_v39  ;;  %3120 = vmatpush1.msra.mxu0 %v10632_v0  ;;  %v13268_v25 = vand.u32 4294901760, %v10647_v37  ;;  %v3281_v6 = vsub.f32 %v10549_v56, %v13265_v22  ;;  %v10673_v8 = vsub.f32 %v10555_v62, %v10576_v17  ;;  %v13835_v39 = vld [vmem:[#allocation10_spill] sm:$0xff] }
 0x238   : > { %13831 = vst [vmem:[#allocation2_spill] sm:$0xff] %v10651_v54  ;;  %3122 = vmatprep.subr.mxu0 %v10654_v45  ;;  %v10666_v3 = vand.u32 4294901760, %v3059_v55  ;;  %v3057_v53 = vmul.f32 %v10430_v61, %v13835_v39  ;;  %v10681_v2 = vand.u32 4294901760, %v10663_v50  ;;  %v13273_v5 = vand.u32 4294901760, %v10596_v59 }
 0x239   : > { %3265 = vmatprep.subr.mxu1 %v3264_v63  ;;  %v3275_v32 = vsub.f32 %v10647_v37, %v13268_v25  ;;  %v10686_v22 = vmul.f32 %v10436_v19, %v13837_v60  ;;  %v3282_v63 = vand.u32 4294901760, %v3281_v6  ;;  %v13280_v39 = vand.u32 4294901760, %v10673_v8 }
 0x23a   : > { %13834 = vst [vmem:[#allocation4_spill] sm:$0xff] %v10666_v3  ;;  %13836 = vst [vmem:[#allocation39_spill] sm:$0xff] %v10681_v2  ;;  %3271 = vmatpush1.msra.mxu1 %v3270_v21  ;;  %3124 = vmatpush1.msra.mxu0 %v10666_v3  ;;  %v10690_v62 = vsub.f32 %v3059_v55, %v10666_v3  ;;  %v10693_v12 = vand.u32 4294901760, %v3057_v53  ;;  %v3293_v0 = vsub.f32 %v10596_v59, %v13273_v5 }
 0x23b   : > { %v3276_v25 = vand.u32 4294901760, %v3275_v32  ;;  %3126 = vmatprep.subr.mxu0 %v10681_v2  ;;  %v10700_v60 = vand.u32 4294901760, %v10686_v22  ;;  %v10704_v21 = vsub.f32 %v10572_v34, %v10589_v36  ;;  %v3287_v55 = vsub.f32 %v10673_v8, %v13280_v39  ;;  %v13840_v32 = vld [vmem:[#allocation40_spill] sm:$0xff]  ;;  %v13841_v36 = vld [vmem:[#allocation38_spill] sm:$0xff] }
 0x23c   : > { %13838 = vst [vmem:[#allocation20_spill] sm:$0xff] %v10693_v12  ;;  %3128 = vmatpush1.msra.mxu0 %v10693_v12  ;;  %v10711_v6 = vsub.f32 %v3057_v53, %v10693_v12  ;;  %v3055_v3 = vmul.f32 %v10430_v61, %v13840_v32  ;;  %v13285_v5 = vand.u32 4294901760, %v10630_v9  ;;  %v3294_v10 = vand.u32 4294901760, %v3293_v0  ;;  %v13843_v0 = vld [vmem:[#allocation33_spill] sm:$0xff] }
 0x23d   : > { %13839 = vst [vmem:[#allocation25_spill] sm:$0xff] %v10700_v60  ;;  %3277 = vmatprep.subr.mxu1 %v3276_v25  ;;  %3130 = vmatprep.subr.mxu0 %v10700_v60  ;;  %v13290_v34 = vand.u32 4294901760, %v10704_v21  ;;  %v3054_v16 = vmul.f32 %v10436_v19, %v13841_v36  ;;  %v10722_v39 = vsub.f32 %v10605_v46, %v10624_v35  ;;  %v3288_v53 = vand.u32 4294901760, %v3287_v55 }
 0x23e   : > { %3283 = vmatpush1.msra.mxu1 %v3282_v63  ;;  %v10724_v12 = vand.u32 4294901760, %v3055_v3  ;;  %v3305_v25 = vsub.f32 %v10630_v9, %v13285_v5  ;;  %v3053_v32 = vmul.f32 %v10430_v61, %v13843_v0  ;;  %v13845_v0 = vld [vmem:[#allocation30_spill] sm:$0xff] }
 0x23f   : > { %v3299_v17 = vsub.f32 %v10704_v21, %v13290_v34  ;;  %v10734_v36 = vand.u32 4294901760, %v3054_v16  ;;  %v13293_v46 = vand.u32 4294901760, %v10722_v39  ;;  %3289 = vmatprep.subr.mxu1 %v3288_v53  ;;  %v3052_v1 = vmul.f32 %v10436_v19, %v13845_v0 }
 0x240   : > { %13842 = vst [vmem:[#allocation21_spill] sm:$0xff] %v10724_v12  ;;  %3132 = vmatpush1.msra.mxu0 %v10724_v12  ;;  %v10740_v55 = vsub.f32 %v3055_v3, %v10724_v12  ;;  %v3306_v5 = vand.u32 4294901760, %v3305_v25  ;;  %v10742_v35 = vand.u32 4294901760, %v3053_v32  ;;  %3295 = vmatpush1.msra.mxu1 %v3294_v10  ;;  %v13846_v53 = vand.u32 4294901760, %v10651_v54  ;;  %v13847_v10 = vld [vmem:[#allocation29_spill] sm:$0xff] }
 0x241   : > { %v3300_v34 = vand.u32 4294901760, %v3299_v17  ;;  %3134 = vmatprep.subr.mxu0 %v10734_v36  ;;  %v3311_v63 = vsub.f32 %v10722_v39, %v13293_v46  ;;  %v10755_v3 = vsub.f32 %v10636_v49, %v10654_v45  ;;  %v10761_v17 = vand.u32 4294901760, %v3052_v1 }
 0x242   : > { %13844 = vst [vmem:[#allocation23_spill] sm:$0xff] %v10742_v35  ;;  %v3317_v57 = vsub.f32 %v10651_v54, %v13846_v53  ;;  %3136 = vmatpush1.msra.mxu0 %v10742_v35  ;;  %v10759_v25 = vsub.f32 %v3053_v32, %v10742_v35  ;;  %v3051_v0 = vmul.f32 %v10430_v61, %v13847_v10  ;;  %v13302_v46 = vand.u32 4294901760, %v10690_v62  ;;  %v13848_v54 = vld [vmem:[#allocation28_spill] sm:$0xff] }
 0x243   : > { %3301 = vmatprep.subr.mxu1 %v3300_v34  ;;  %v3312_v12 = vand.u32 4294901760, %v3311_v63  ;;  %v13303_v53 = vand.u32 4294901760, %v10755_v3  ;;  %v3050_v49 = vmul.f32 %v10436_v19, %v13848_v54  ;;  %3138 = vmatprep.subr.mxu0 %v10761_v17  ;;  %v10777_v10 = vsub.f32 %v10663_v50, %v10681_v2  ;;  %v13850_v34 = vld [vmem:[#allocation27_spill] sm:$0xff] }
 0x244   : > { %v3318_v30 = vand.u32 4294901760, %v3317_v57  ;;  %3307 = vmatpush1.msra.mxu1 %v3306_v5  ;;  %v10770_v32 = vand.u32 4294901760, %v3051_v0  ;;  %v3329_v35 = vsub.f32 %v10690_v62, %v13302_v46  ;;  %v3049_v57 = vmul.f32 %v10430_v61, %v13850_v34 }
 0x245   : > { %3313 = vmatprep.subr.mxu1 %v3312_v12  ;;  %v3323_v5 = vsub.f32 %v10755_v3, %v13303_v53  ;;  %v10784_v19 = vand.u32 4294901760, %v3050_v49  ;;  %v13306_v54 = vand.u32 4294901760, %v10711_v6  ;;  %v10789_v63 = vsub.f32 %v10686_v22, %v10700_v60 }
 0x246   : > { %13849 = vst [vmem:[#allocation34_spill] sm:$0xff] %v10770_v32  ;;  %3319 = vmatpush1.msra.mxu1 %v3318_v30  ;;  %3140 = vmatpush1.msra.mxu0 %v10770_v32  ;;  %v10793_v50 = vsub.f32 %v3051_v0, %v10770_v32  ;;  %v3330_v61 = vand.u32 4294901760, %v3329_v35  ;;  %v13307_v12 = vand.u32 4294901760, %v10777_v10  ;;  %v10796_v34 = vand.u32 4294901760, %v3049_v57 }
 0x247   : > { %13851 = vst [vmem:[#allocation17_spill] sm:$0xff] %v10784_v19  ;;  %v3324_v46 = vand.u32 4294901760, %v3323_v5  ;;  %3142 = vmatprep.subr.mxu0 %v10784_v19  ;;  %v3341_v53 = vsub.f32 %v10711_v6, %v13306_v54  ;;  %v13310_v22 = vand.u32 4294901760, %v10789_v63  ;;  %v10812_v5 = vsub.f32 %v3054_v16, %v10734_v36 }
 0x248   : > { %13852 = vst [vmem:[#allocation22_spill] sm:$0xff] %v10796_v34  ;;  %v3335_v0 = vsub.f32 %v10777_v10, %v13307_v12  ;;  %3144 = vmatpush1.msra.mxu0 %v10796_v34  ;;  %v10809_v35 = vsub.f32 %v3049_v57, %v10796_v34  ;;  %v13854_v54 = vand.u32 4294901760, %v10425_v29  ;;  %v13855_v12 = vand.u32 4294901760, %v10740_v55 }
 0x249   : > { %3325 = vmatprep.subr.mxu1 %v3324_v46  ;;  %v3347_v30 = vsub.f32 %v10789_v63, %v13310_v22  ;;  %v10824_v57 = vsub.f32 %v3052_v1, %v10761_v17  ;;  %3441 = vmatprep.subr.mxu0 %v10484_v13  ;;  %v3193_v29 = vand.u32 4294901760, %v10447_v4  ;;  %v3342_v32 = vand.u32 4294901760, %v3341_v53 }
 0x24a   : > { %13853 = vst [vmem:[#allocation14_spill] sm:$0xff] %v10809_v35  ;;  %3183 = vmatmul.mubr.f32.vlgmr.msra.gmra.mxu0 %v13854_v54  ;;  %v3353_v60 = vsub.f32 %v10740_v55, %v13855_v12  ;;  %3331 = vmatpush1.msra.mxu1 %v3330_v61  ;;  %v3336_v16 = vand.u32 4294901760, %v3335_v0  ;;  %v13856_v22 = vmov 0.0   ;;  %v13857_v12 = vand.u32 4294901760, %v10759_v25 }
 0x24b   : > { %3444 = vmatpush1.msra.mxu0 %v10463_v24  ;;  %3188 = vmatprep.mubr.f32.mxu0 %v13856_v22  ;;  %v13315_v61 = vand.u32 4294901760, %v10824_v57  ;;  %v10837_v0 = vsub.f32 %v3050_v49, %v10784_v19  ;;  %v3348_v46 = vand.u32 4294901760, %v3347_v30  ;;  %v13858_v4 = vand.u32 4294901760, %v10812_v5 }
 0x24c   : > { %v3365_v1 = vsub.f32 %v10759_v25, %v13857_v12  ;;  %3337 = vmatprep.subr.mxu1 %v3336_v16  ;;  %3447 = vmatprep.subr.mxu0 %v10494_v20  ;;  %v13316_v53 = vand.u32 4294901760, %v10809_v35  ;;  %v3354_v34 = vand.u32 4294901760, %v3353_v60  ;;  %v13859_v49 = vand.u32 4294901760, %v10793_v50 }
 0x24d   : > { %v3359_v54 = vsub.f32 %v10812_v5, %v13858_v4  ;;  %3343 = vmatpush1.msra.mxu1 %v3342_v32  ;;  %3450 = vmatpush1.msra.mxu0 %v10469_v38  ;;  %v3371_v12 = vsub.f32 %v10824_v57, %v13315_v61  ;;  %v13317_v16 = vand.u32 4294901760, %v10837_v0 }
 0x24e   : > { %v3377_v30 = vsub.f32 %v10793_v50, %v13859_v49  ;;  %3349 = vmatprep.subr.mxu1 %v3348_v46  ;;  %3194 = vmatmul.mubr.f32.gmra.mxu0 %v3193_v29  ;;  %v3366_v19 = vand.u32 4294901760, %v3365_v1  ;;  %v3389_v32 = vsub.f32 %v10809_v35, %v13316_v53  ;;  %v13862_v1 = vld [vmem:[#allocation26_spill] sm:$0xff]  ;;  %v13865_v49 = vld [vmem:[#allocation7_spill] sm:$0xff]  ;;  %v13873_v53 = vld [vmem:[#allocation25_spill] sm:$0xff] }
 0x24f   : > { %v3360_v4 = vand.u32 4294901760, %v3359_v54  ;;  %3355 = vmatpush1.msra.mxu1 %v3354_v34  ;;  %3453 = vmatprep.subr.mxu0 %v10532_v51  ;;  %v3383_v60 = vsub.f32 %v10837_v0, %v13317_v16  ;;  %v3372_v61 = vand.u32 4294901760, %v3371_v12  ;;  %v13861_v54 = vld [vmem:[#allocation24_spill] sm:$0xff]  ;;  %v13864_v12 = vld [vmem:[#allocation19_spill] sm:$0xff]  ;;  %v13874_v16 = vand.u32 4294901760, %v10484_v13 }
 0x250   : > { %3456 = vmatpush1.msra.mxu0 %v10478_v27  ;;  %v3378_v46 = vand.u32 4294901760, %v3377_v30  ;;  %v3390_v29 = vand.u32 4294901760, %v3389_v32  ;;  %v13866_v30 = vld [vmem:[#allocation36_spill] sm:$0xff]  ;;  %v13869_v32 = vld [vmem:[#allocation35_spill] sm:$0xff]  ;;  %3567 = vmatprep.mubr.f32.mxu0 %v13856_v22 }
 0x251   : > { %3361 = vmatprep.subr.mxu1 %v3360_v4  ;;  %3459 = vmatprep.subr.mxu0 %v10558_v42  ;;  %v3384_v34 = vand.u32 4294901760, %v3383_v60  ;;  %v13867_v4 = vld [vmem:[#allocation15_spill] sm:$0xff]  ;;  %v13868_v60 = vld [vmem:[#allocation32_spill] sm:$0xff] }
 0x252   : > { %3367 = vmatpush1.msra.mxu1 %v3366_v19  ;;  %3462 = vmatpush1.msra.mxu0 %v10500_v7  ;;  %v13860_v19 = vld [vmem:[#allocation2_spill] sm:$0xff]  ;;  %v13880_v13 = vld [vmem:[#allocation16_spill] sm:$0xff] }
 0x253   : > { %3373 = vmatprep.subr.mxu1 %v3372_v61  ;;  %3465 = vmatprep.subr.mxu0 %v10582_v58  ;;  %v13863_v61 = vld [vmem:[#allocation18_spill] sm:$0xff] }
 0x254   : > { %3379 = vmatpush1.msra.mxu1 %v3378_v46  ;;  %3468 = vmatpush1.msra.mxu0 %v10507_v41  ;;  %v13870_v46 = vld [vmem:[#allocation4_spill] sm:$0xff] }
 0x255   : > { %3385 = vmatprep.subr.mxu1 %v3384_v34  ;;  %3471 = vmatprep.subr.mxu0 %v10609_v26  ;;  %v13871_v34 = vld [vmem:[#allocation20_spill] sm:$0xff] }
 0x256   : > { %3391 = vmatpush1.msra.mxu1 %v3390_v29  ;;  %3474 = vmatpush1.msra.mxu0 %v10538_v52  ;;  %v13872_v29 = vld [vmem:[#allocation8_spill] sm:$0xff] }
 0x257   : > { %3426 = vmatmul.mubr.f32.vlgmr.msra.gmra.mxu1 %v10380_v14  ;;  %3585 = vmatprep.subr.mxu1 %v10460_v18  ;;  %v13876_v14 = vand.u32 4294901760, %v10463_v24  ;;  %v13883_v24 = vand.u32 4294901760, %v10478_v27  ;;  %v13890_v27 = vand.u32 4294901760, %v10507_v41  ;;  %v13898_v41 = vand.u32 4294901760, %v10704_v21 }
 0x258   : > { %3587 = vmatpush1.msra.mxu1 %v10450_v23  ;;  %3431 = vmatprep.mubr.f32.mxu1 %v13856_v22 }
 0x259   : > { %3589 = vmatprep.subr.mxu1 %v10465_v11  ;;  %3477 = vmatprep.subr.mxu0 %v10647_v37 }
 0x25a   : > { %3591 = vmatpush1.msra.mxu1 %v10454_v43  ;;  %3480 = vmatpush1.msra.mxu0 %v10549_v56 }
 0x25b   : > { %3433 = vmatmul.mubr.f32.gmra.mxu1 %v10388_v40  ;;  %3593 = vmatprep.subr.mxu1 %v10471_v33  ;;  %v13875_v40 = vld [vmem:[#allocation21_spill] sm:$0xff] }
 0x25c   : > { %3595 = vmatpush1.msra.mxu1 %v10457_v44  ;;  %3483 = vmatprep.subr.mxu0 %v10673_v8 }
 0x25d   : > { %3597 = vmatprep.subr.mxu1 %v10497_v15  ;;  %3486 = vmatpush1.msra.mxu0 %v10596_v59 }
 0x25e   : > { %3599 = vmatpush1.msra.mxu1 %v10480_v47  ;;  %3489 = vmatprep.subr.mxu0 %v10704_v21 }
 0x25f   : > { %3601 = vmatprep.subr.mxu1 %v10502_v48  ;;  %3492 = vmatpush1.msra.mxu0 %v10630_v9 }
 0x260   : > { %3603 = vmatpush1.msra.mxu1 %v10487_v31  ;;  %3495 = vmatprep.subr.mxu0 %v10722_v39 }
 0x261   : > { %3605 = vmatprep.subr.mxu1 %v10513_v28  ;;  %3498 = vmatpush1.msra.mxu0 %v13860_v19 }
 0x262   : > { %3607 = vmatpush1.msra.mxu1 %v13861_v54  ;;  %3501 = vmatprep.subr.mxu0 %v10755_v3 }
 0x263   : > { %3609 = vmatprep.subr.mxu1 %v13862_v1  ;;  %3504 = vmatpush1.msra.mxu0 %v10690_v62 }
 0x264   : > { %3611 = vmatpush1.msra.mxu1 %v13863_v61  ;;  %3507 = vmatprep.subr.mxu0 %v10777_v10 }
 0x265   : > { %3613 = vmatprep.subr.mxu1 %v13864_v12  ;;  %3510 = vmatpush1.msra.mxu0 %v10711_v6 }
 0x266   : > { %3615 = vmatpush1.msra.mxu1 %v13865_v49  ;;  %3513 = vmatprep.subr.mxu0 %v10789_v63 }
 0x267   : > { %3617 = vmatprep.subr.mxu1 %v13866_v30  ;;  %3516 = vmatpush1.msra.mxu0 %v10740_v55 }
 0x268   : > { %3619 = vmatpush1.msra.mxu1 %v13867_v4  ;;  %3519 = vmatprep.subr.mxu0 %v10812_v5 }
 0x269   : > { %3621 = vmatprep.subr.mxu1 %v13868_v60  ;;  %3522 = vmatpush1.msra.mxu0 %v10759_v25 }
 0x26a   : > { %3623 = vmatpush1.msra.mxu1 %v13869_v32  ;;  %3525 = vmatprep.subr.mxu0 %v10824_v57 }
 0x26b   : > { %3625 = vmatprep.subr.mxu1 %v10654_v45  ;;  %3528 = vmatpush1.msra.mxu0 %v10793_v50 }
 0x26c   : > { %3627 = vmatpush1.msra.mxu1 %v13870_v46  ;;  %3531 = vmatprep.subr.mxu0 %v10837_v0 }
 0x26d   : > { %3629 = vmatprep.subr.mxu1 %v10681_v2  ;;  %3534 = vmatpush1.msra.mxu0 %v10809_v35  ;;  %v13877_v35 = vand.u32 4294901760, %v10494_v20  ;;  %v13879_v2 = vand.u32 4294901760, %v10469_v38  ;;  %v13884_v20 = vld [vmem:[#allocation17_spill] sm:$0xff]  ;;  %v13888_v38 = vand.u32 4294901760, %v13872_v29 }
 0x26e   : > { %3631 = vmatpush1.msra.mxu1 %v13871_v34  ;;  %3570 = vmatmul.mubr.f32.vlgmr.msra.gmra.mxu0 %v13872_v29  ;;  %v13878_v34 = vld [vmem:[#allocation23_spill] sm:$0xff]  ;;  %v13921_v29 = vld [vmem:[#allocation5_spill] sm:$0xff] }
 0x26f   : > { %3633 = vmatprep.subr.mxu1 %v13873_v53  ;;  %3702 = vmatprep.subr.mxu0 %v13874_v16  ;;  %v13881_v16 = vand.u32 4294901760, %v10532_v51  ;;  %v13889_v51 = vand.u32 4294901760, %v10582_v58  ;;  %v13893_v58 = vand.u32 4294901760, %v10647_v37  ;;  %v13911_v37 = vand.u32 4294901760, %v10793_v50 }
 0x270   : > { %3635 = vmatpush1.msra.mxu1 %v13875_v40  ;;  %3706 = vmatpush1.msra.mxu0 %v13876_v14  ;;  %v13882_v14 = vld [vmem:[#allocation34_spill] sm:$0xff] }
 0x271   : > { %3637 = vmatprep.subr.mxu1 %v10734_v36  ;;  %3710 = vmatprep.subr.mxu0 %v13877_v35  ;;  %v13885_v35 = vand.u32 4294901760, %v10558_v42  ;;  %v13891_v42 = vand.u32 4294901760, %v10609_v26  ;;  %v13909_v26 = vand.u32 4294901760, %v10759_v25 }
 0x272   : > { %3575 = vmatprep.mubr.f32.mxu0 %v13856_v22  ;;  %3639 = vmatpush1.msra.mxu1 %v13878_v34  ;;  %v13886_v34 = vld [vmem:[#allocation22_spill] sm:$0xff] }
 0x273   : > { %3714 = vmatpush1.msra.mxu0 %v13879_v2  ;;  %3641 = vmatprep.subr.mxu1 %v10761_v17  ;;  %v13887_v2 = vand.u32 4294901760, %v10500_v7  ;;  %v13892_v7 = vand.u32 4294901760, %v10538_v52  ;;  %v13907_v52 = vand.u32 4294901760, %v10740_v55  ;;  %v13917_v55 = vld [vmem:[#allocation6_spill] sm:$0xff] }
 0x274   : > { %3578 = vmatmul.mubr.f32.gmra.mxu0 %v13880_v13  ;;  %3718 = vmatprep.subr.mxu0 %v13881_v16 }
 0x275   : > { %3643 = vmatpush1.msra.mxu1 %v13882_v14  ;;  %3722 = vmatpush1.msra.mxu0 %v13883_v24  ;;  %v13922_v24 = vld [vmem:[#allocation31_spill] sm:$0xff] }
 0x276   : > { %3645 = vmatprep.subr.mxu1 %v13884_v20  ;;  %3726 = vmatprep.subr.mxu0 %v13885_v35 }
 0x277   : > { %3647 = vmatpush1.msra.mxu1 %v13886_v34  ;;  %3680 = vmatprep.mubr.f32.mxu1 %v13856_v22 }
 0x278   : > { %3730 = vmatpush1.msra.mxu0 %v13887_v2  ;;  %3684 = vmatmul.mubr.f32.vlgmr.msra.gmra.mxu1 %v13888_v38 }
 0x279   : > { %3734 = vmatprep.subr.mxu0 %v13889_v51  ;;  %3875 = vmatprep.subr.mxu1 %v10460_v18  ;;  %v13894_v18 = vand.u32 4294901760, %v13880_v13 }
 0x27a   : > { %3738 = vmatpush1.msra.mxu0 %v13890_v27  ;;  %3877 = vmatpush1.msra.mxu1 %v10450_v23  ;;  %v13895_v23 = vand.u32 4294901760, %v10549_v56  ;;  %v13908_v56 = vand.u32 4294901760, %v10812_v5 }
 0x27b   : > { %3742 = vmatprep.subr.mxu0 %v13891_v42  ;;  %3879 = vmatprep.subr.mxu1 %v10465_v11  ;;  %v13896_v11 = vand.u32 4294901760, %v10673_v8  ;;  %v13912_v8 = vand.u32 4294901760, %v10837_v0 }
 0x27c   : > { %3689 = vmatprep.mubr.f32.mxu1 %v13856_v22  ;;  %3746 = vmatpush1.msra.mxu0 %v13892_v7 }
 0x27d   : > { %3881 = vmatpush1.msra.mxu1 %v10454_v43  ;;  %3750 = vmatprep.subr.mxu0 %v13893_v58  ;;  %v13897_v43 = vand.u32 4294901760, %v10596_v59  ;;  %v13910_v59 = vand.u32 4294901760, %v10824_v57 }
 0x27e   : > { %3693 = vmatmul.mubr.f32.gmra.mxu1 %v13894_v18  ;;  %3883 = vmatprep.subr.mxu1 %v10471_v33  ;;  %v13899_v33 = vand.u32 4294901760, %v10630_v9  ;;  %v13906_v9 = vand.u32 4294901760, %v10789_v63 }
 0x27f   : > { %3754 = vmatpush1.msra.mxu0 %v13895_v23  ;;  %3885 = vmatpush1.msra.mxu1 %v10457_v44  ;;  %v13900_v44 = vand.u32 4294901760, %v10722_v39  ;;  %v13914_v39 = vld [vmem:[#allocation14_spill] sm:$0xff] }
 0x280   : > { %3758 = vmatprep.subr.mxu0 %v13896_v11  ;;  %3887 = vmatprep.subr.mxu1 %v10497_v15  ;;  %v13901_v15 = vand.u32 4294901760, %v13860_v19  ;;  %v13915_v21 = vand.u32 4294901760, %v13914_v39 }
 0x281   : > { %3762 = vmatpush1.msra.mxu0 %v13897_v43  ;;  %3889 = vmatpush1.msra.mxu1 %v10480_v47  ;;  %v13902_v47 = vand.u32 4294901760, %v10755_v3  ;;  %v13919_v3 = vld [vmem:[#allocation12_spill] sm:$0xff] }
 0x282   : > { %3766 = vmatprep.subr.mxu0 %v13898_v41  ;;  %3891 = vmatprep.subr.mxu1 %v10502_v48  ;;  %v13903_v48 = vand.u32 4294901760, %v10690_v62  ;;  %v13913_v62 = vld [vmem:[#allocation39_spill] sm:$0xff] }
 0x283   : > { %3770 = vmatpush1.msra.mxu0 %v13899_v33  ;;  %3893 = vmatpush1.msra.mxu1 %v10487_v31  ;;  %v13904_v31 = vand.u32 4294901760, %v10777_v10 }
 0x284   : > { %3774 = vmatprep.subr.mxu0 %v13900_v44  ;;  %3895 = vmatprep.subr.mxu1 %v10513_v28  ;;  %v13905_v28 = vand.u32 4294901760, %v10711_v6  ;;  %v13916_v6 = vld [vmem:[#allocation20_spill] sm:$0xff] }
 0x285   : > { %3778 = vmatpush1.msra.mxu0 %v13901_v15  ;;  %3897 = vmatpush1.msra.mxu1 %v13861_v54 }
 0x286   : > { %3782 = vmatprep.subr.mxu0 %v13902_v47  ;;  %3899 = vmatprep.subr.mxu1 %v13862_v1 }
 0x287   : > { %3786 = vmatpush1.msra.mxu0 %v13903_v48  ;;  %3901 = vmatpush1.msra.mxu1 %v13863_v61 }
 0x288   : > { %3790 = vmatprep.subr.mxu0 %v13904_v31  ;;  %3903 = vmatprep.subr.mxu1 %v13864_v12 }
 0x289   : > { %3794 = vmatpush1.msra.mxu0 %v13905_v28  ;;  %3905 = vmatpush1.msra.mxu1 %v13865_v49 }
 0x28a   : > { %3798 = vmatprep.subr.mxu0 %v13906_v9  ;;  %3907 = vmatprep.subr.mxu1 %v13866_v30 }
 0x28b   : > { %3802 = vmatpush1.msra.mxu0 %v13907_v52  ;;  %3909 = vmatpush1.msra.mxu1 %v13867_v4 }
 0x28c   : > { %3806 = vmatprep.subr.mxu0 %v13908_v56  ;;  %3911 = vmatprep.subr.mxu1 %v13868_v60 }
 0x28d   : > { %3810 = vmatpush1.msra.mxu0 %v13909_v26  ;;  %3913 = vmatpush1.msra.mxu1 %v13869_v32  ;;  %v13920_v32 = vld [vmem:[#allocation37_spill] sm:$0xff] }
 0x28e   : > { %3814 = vmatprep.subr.mxu0 %v13910_v59  ;;  %3915 = vmatprep.subr.mxu1 %v10654_v45  ;;  %v13918_v45 = vld [vmem:[#allocation23_spill] sm:$0xff] }
 0x28f   : > { %3818 = vmatpush1.msra.mxu0 %v13911_v37  ;;  %3917 = vmatpush1.msra.mxu1 %v13870_v46 }
 0x290   : > { %3822 = vmatprep.subr.mxu0 %v13912_v8  ;;  %3919 = vmatprep.subr.mxu1 %v13913_v62 }
 0x291   : > { %3826 = vmatpush1.msra.mxu0 %v13915_v21  ;;  %3859 = vmatprep.mubr.f32.mxu0 %v13856_v22 }
 0x292   : > { %3921 = vmatpush1.msra.mxu1 %v13916_v6  ;;  %3861 = vmatmul.mubr.f32.vlgmr.msra.gmra.mxu0 %v13917_v55 }
 0x293   : > { %3923 = vmatprep.subr.mxu1 %v13873_v53  ;;  %3866 = vmatprep.mubr.f32.mxu0 %v13856_v22 }
 0x294   : > { %3925 = vmatpush1.msra.mxu1 %v13875_v40  ;;  %3970 = vmatprep.mubr.f32.mxu1 %v13856_v22  ;;  %v2915_v40 = vpop.f32.mrf.mxu0 }
 0x295   : > { %3927 = vmatprep.subr.mxu1 %v10734_v36  ;;  %v2916_v46 = vadd.f32 %v2915_v40, %v13920_v32  ;;  %v13923_v40 = vld [vmem:[#allocation3_spill] sm:$0xff] }
 0x296   : > { %3929 = vmatpush1.msra.mxu1 %v13918_v45  ;;  %3868 = vmatmul.mubr.f32.gmra.mxu0 %v13919_v3  ;;  %v2917_v36 = vpop.f32.mrf.mxu0 }
 0x297   : > { %3931 = vmatprep.subr.mxu1 %v10761_v17  ;;  %4946 = vmatprep.mubr.f32.mxu0 %v13856_v22  ;;  %v3033_v17 = vpop.f32.mrf.mxu1  ;;  %v2918_v13 = vadd.f32 %v2917_v36, %v13921_v29 }
 0x298   : > { %3933 = vmatpush1.msra.mxu1 %v13882_v14  ;;  %v2922_v25 = vpop.f32.mrf.mxu0 }
 0x299   : > { %3935 = vmatprep.subr.mxu1 %v13884_v20  ;;  %v3035_v63 = vpop.f32.mrf.mxu1  ;;  %v2923_v20 = vadd.f32 %v2922_v25, %v13922_v24 }
 0x29a   : > { %3937 = vmatpush1.msra.mxu1 %v13886_v34  ;;  %v2924_v10 = vpop.f32.mrf.mxu0  ;;  %v3034_v34 = vadd.f32 %v3033_v17, %v2916_v46  ;;  %v3036_v2 = vadd.f32 %v3035_v63, %v2918_v13 }
 0x29b   : > { %3972 = vmatmul.mubr.f32.vlgmr.msra.gmra.mxu1 %v13917_v55  ;;  %v3040_v5 = vpop.f32.mrf.mxu1  ;;  %v2925_v36 = vadd.f32 %v2924_v10, %v13923_v40 }
 0x29c   : > { %3977 = vmatprep.mubr.f32.mxu1 %v13856_v22  ;;  %v3041_v51 = vadd.f32 %v3040_v5, %v2923_v20  ;;  %v7716_v20 = vmov 2475754826  }
 0x29d   : > { %v3042_v0 = vpop.f32.mrf.mxu1 }
 0x29e   : > { %v3043_v5 = vadd.f32 %v3042_v0, %v2925_v36 }
 0x29f   : > { %3979 = vmatmul.mubr.f32.gmra.mxu1 %v13919_v3 }
 0x2a0   : > { %5163 = vmatprep.mubr.f32.mxu1 %v13856_v22 }
 0x30a   : > { %v3184_v50 = vpop.f32.mrf.mxu0 }
 0x30b   : > { %v3185_v35 = vadd.f32 %v3184_v50, %v3034_v34 }
 0x30c   : > { %v3186_v57 = vpop.f32.mrf.mxu0 }
 0x30d   : > { %v3187_v42 = vadd.f32 %v3186_v57, %v3036_v2  ;;  %v7718_v2 = vmov 2102212464  }
 0x30e   : > { %v3195_v53 = vpop.f32.mrf.mxu0 }
 0x30f   : > { %v3196_v58 = vadd.f32 %v3195_v53, %v3041_v51  ;;  %v7719_v51 = vmov 920167782  }
 0x310   : > { %v3197_v54 = vpop.f32.mrf.mxu0 }
 0x317   : > { %v3427_v19 = vpop.f32.mrf.mxu1 }
 0x318   : > { %v3428_v27 = vadd.f32 %v3427_v19, %v3185_v35  ;;  %v7717_v35 = vmov 2131351028  }
 0x319   : > { %v3429_v1 = vpop.f32.mrf.mxu1 }
 0x31a   : > { %v3430_v23 = vadd.f32 %v3429_v1, %v3187_v42 }
 0x31b   : > { %v3434_v12 = vpop.f32.mrf.mxu1 }
 0x31c   : > { %v3435_v43 = vadd.f32 %v3434_v12, %v3196_v58  ;;  %v3198_v12 = vadd.f32 %v3197_v54, %v3043_v5 }
 0x31d   : > { %v3436_v30 = vpop.f32.mrf.mxu1 }
 0x32e   : > { %v3571_v61 = vpop.f32.mrf.mxu0 }
 0x32f   : > { %v3572_v18 = vadd.f32 %v3571_v61, %v3428_v27 }
 0x330   : > { %v3573_v49 = vpop.f32.mrf.mxu0 }
 0x331   : > { %v3574_v33 = vadd.f32 %v3573_v49, %v3430_v23 }
 0x334   : > { %v3579_v4 = vpop.f32.mrf.mxu0 }
 0x335   : > { %v3580_v15 = vadd.f32 %v3579_v4, %v3435_v43 }
 0x336   : > { %v11039_v16 = vpop.f32.mrf.mxu0 }
 0x338   : > { %v3685_v60 = vpop.f32.mrf.mxu1 }
 0x339   : > { %v3686_v41 = vadd.f32 %v3685_v60, %v3572_v18  ;;  %v11060_v60 = vadd.f32 %v3436_v30, %v3198_v12 }
 0x33a   : > { %v3687_v14 = vpop.f32.mrf.mxu1 }
 0x33b   : > { %v3688_v48 = vadd.f32 %v3687_v14, %v3574_v33  ;;  %v7715_v14 = vmov 683565275  }
 0x33e   : > { %v3694_v7 = vpop.f32.mrf.mxu1 }
 0x33f   : > { %v3695_v9 = vadd.f32 %v3694_v7, %v3580_v15 }
 0x340   : > { %v11042_v44 = vpop.f32.mrf.mxu1 }
 0x352   : > { %v3862_v38 = vpop.f32.mrf.mxu0 }
 0x353   : > { %v3863_v47 = vadd.f32 %v3862_v38, %v3686_v41 }
 0x354   : > { %v3864_v11 = vpop.f32.mrf.mxu0 }
 0x355   : > { %v3865_v56 = vadd.f32 %v3864_v11, %v3688_v48  ;;  %v7720_v11 = vmov 1326507024  }
 0x356   : > { %v3869_v31 = vpop.f32.mrf.mxu0 }
 0x357   : > { %v3870_v59 = vadd.f32 %v3869_v31, %v3695_v9 }
 0x35b   : > { %v3973_v28 = vpop.f32.mrf.mxu1 }
 0x35c   : > { %v11044_v52 = vadd.f32 %v3973_v28, %v3863_v47 }
 0x35d   : > { %v3975_v26 = vpop.f32.mrf.mxu1 }
 0x35e   : > { %v3985_v37 = vand.u32 2147483647, %v11044_v52  ;;  %v3988_v8 = vand.u32 2139095040, %v11044_v52  ;;  %v11048_v62 = vadd.f32 %v3975_v26, %v3865_v56  ;;  %vm3987_vm7 = vcmp.lt.s32.totalorder %v11044_v52, 0 }
 0x35f   : > { %v3980_v39 = vpop.f32.mrf.mxu1 }
 0x360   : > { %v3989_v21 = vshrl.u32 %v3988_v8, 23  ;;  %v11050_v6 = vadd.f32 %v3980_v39, %v3870_v59  ;;  %v3992_v55 = vand.u32 8388607, %v3985_v37  ;;  %v4089_v45 = vand.u32 2147483647, %v11048_v62 }
 0x361   : > { %v4092_v3 = vand.u32 2139095040, %v11048_v62 }
 0x362   : > { %v7207_v25 = vadd.s32 4294967169, %v3989_v21  ;;  %v4096_v63 = vand.u32 8388607, %v4089_v45  ;;  %v4196_v50 = vand.u32 2139095040, %v11050_v6  ;;  %v3993_v53 = vor.u32 8388608, %v3992_v55 }
 0x363   : > { %v4093_v17 = vshrl.u32 %v4092_v3, 23  ;;  %v4193_v29 = vand.u32 2147483647, %v11050_v6 }
 0x364   : > { %v3995_v57 = vadd.s32 1, %v7207_v25  ;;  %v4097_v1 = vor.u32 8388608, %v4096_v63  ;;  %v4197_v61 = vshrl.u32 %v4196_v50, 23  ;;  %v11062_v46 = vshll.u32 %v3993_v53, 8 }
 0x365   : > { %v7211_v19 = vadd.s32 4294967169, %v4093_v17 }
 0x366   : > { %vm3996_vm10 = vcmp.gt.s32.totalorder %v3995_v57, 0  ;;  %v11064_v34 = vshll.u32 %v4097_v1, 8  ;;  %v7215_v0 = vadd.s32 4294967169, %v4197_v61 }
 0x367   : > { %v3997_v49 = vsel %vm3996_vm10, %v3995_v57, 0  ;;  %v4099_v4 = vadd.s32 1, %v7211_v19 }
 0x368   : > { %v3998_v10 = vshrl.u32 %v3997_v49, 5  ;;  %v3999_v32 = vand.u32 31, %v3997_v49  ;;  %v4203_v25 = vadd.s32 1, %v7215_v0 }
 0x369   : > { %vm4100_vm13 = vcmp.gt.s32.totalorder %v4099_v4, 0 }
 0x36a   : > { %v4000_v13 = vsub.s32 32, %v3999_v32  ;;  %v4002_v24 = vshll.u32 %v7715_v14, %v3999_v32  ;;  %v4005_v54 = vshll.u32 %v7716_v20, %v3999_v32  ;;  %v4008_v30 = vshll.u32 %v7717_v35, %v3999_v32 }
 0x36b   : > { %v4011_v38 = vshll.u32 %v7718_v2, %v3999_v32  ;;  %v4014_v27 = vshll.u32 %v7719_v51, %v3999_v32  ;;  %vm4017_vm4 = vcmp.lt.s32.totalorder %v3998_v10, 1  ;;  %vm4018_vm14 = vcmp.lt.s32.totalorder %v3998_v10, 2 }
 0x36c   : > { %v4003_v42 = vshrl.u32 %v7716_v20, %v4000_v13  ;;  %v4006_v7 = vshrl.u32 %v7717_v35, %v4000_v13  ;;  %v4009_v58 = vshrl.u32 %v7718_v2, %v4000_v13  ;;  %v4001_v18 = vshrl.u32 %v7715_v14, %v4000_v13 }
 0x36d   : > { %v4012_v23 = vshrl.u32 %v7719_v51, %v4000_v13  ;;  %v4015_v43 = vshrl.u32 %v7720_v11, %v4000_v13  ;;  %vm4019_vm11 = vcmp.lt.s32.totalorder %v3998_v10, 3  ;;  %v4101_v47 = vsel %vm4100_vm13, %v4099_v4, 0 }
 0x36e   : > { %v4004_v41 = vor.u32 %v4003_v42, %v4002_v24  ;;  %v4007_v33 = vor.u32 %v4006_v7, %v4005_v54  ;;  %v4010_v15 = vor.u32 %v4009_v58, %v4008_v30  ;;  %vm4020_vm1 = vcmp.lt.s32.totalorder %v3998_v10, 4 }
 0x36f   : > { %v4013_v48 = vor.u32 %v4012_v23, %v4011_v38  ;;  %v4016_v31 = vor.u32 %v4015_v43, %v4014_v27  ;;  %v4103_v28 = vand.u32 31, %v4101_v47  ;;  %v4102_v50 = vshrl.u32 %v4101_v47, 5 }
 0x370   : > { %v4021_v9 = vsel %vm4017_vm4, %v4001_v18, %v4004_v41  ;;  %v4022_v56 = vsel %vm4020_vm1, %v4010_v15, 2102212464  ;;  %v4025_v26 = vsel %vm4017_vm4, %v4004_v41, %v4007_v33  ;;  %v4029_v59 = vsel %vm4017_vm4, %v4007_v33, %v4010_v15 }
 0x371   : > { %v4023_v8 = vsel %vm4019_vm11, %v4007_v33, %v4022_v56  ;;  %v4026_v39 = vsel %vm4020_vm1, %v4013_v48, 920167782  ;;  %v4030_v21 = vsel %vm4020_vm1, %v4016_v31, 1326507024  ;;  %v4104_v55 = vsub.s32 32, %v4103_v28 }
 0x372   : > { %v4024_v3 = vsel %vm4018_vm14, %v4021_v9, %v4023_v8  ;;  %v4027_v40 = vsel %vm4019_vm11, %v4010_v15, %v4026_v39  ;;  %v4031_v36 = vsel %vm4019_vm11, %v4013_v48, %v4030_v21  ;;  %v4106_v5 = vshll.u32 %v7715_v14, %v4103_v28 }
 0x373   : > { %v4028_v17 = vsel %vm4018_vm14, %v4025_v26, %v4027_v40  ;;  %v4032_v63 = vsel %vm4018_vm14, %v4029_v59, %v4031_v36  ;;  %v4040_v61 = vmul.u32 %v11062_v46, %v4024_v3  ;;  %v4107_v12 = vshrl.u32 %v7716_v20, %v4104_v55 }
 0x374   : > { %v11090_v57 = vmul.u32.u64.low %v11062_v46, %v4032_v63  ;;  %v11091_v53 = vmul.u32.u64.high %v11062_v46, %v4032_v63, %v11090_v57  ;;  %v11094_v19 = vmul.u32.u64.low %v11062_v46, %v4028_v17  ;;  %v11095_v1 = vmul.u32.u64.high %v11062_v46, %v4028_v17, %v11094_v19 }
 0x375   : > { %v4109_v49 = vshll.u32 %v7716_v20, %v4103_v28  ;;  %v4110_v4 = vshrl.u32 %v7717_v35, %v4104_v55  ;;  %v4112_v10 = vshll.u32 %v7717_v35, %v4103_v28  ;;  %v4113_v32 = vshrl.u32 %v7718_v2, %v4104_v55 }
 0x376   : > { %v4115_v0 = vshll.u32 %v7718_v2, %v4103_v28  ;;  %v4116_v13 = vshrl.u32 %v7719_v51, %v4104_v55  ;;  %v4108_v24 = vor.u32 %v4107_v12, %v4106_v5  ;;  %v4118_v30 = vshll.u32 %v7719_v51, %v4103_v28 }
 0x377   : > { %v4111_v54 = vor.u32 %v4110_v4, %v4109_v49  ;;  %v4119_v46 = vshrl.u32 %v7720_v11, %v4104_v55  ;;  %vm4042_vm6 = vc.u32 %v11091_v53, %v11094_v19  ;;  %v4043_v38 = vadd.s32 1, %v11095_v1 }
 0x378   : > { %v4105_v27 = vshrl.u32 %v7715_v14, %v4104_v55  ;;  %v4114_v42 = vor.u32 %v4113_v32, %v4112_v10  ;;  %v4117_v7 = vor.u32 %v4116_v13, %v4115_v0  ;;  %vm4121_vm15 = vcmp.lt.s32.totalorder %v4102_v50, 1  ;;  %v3871_v55 = vpop.f32.mrf.mxu0 }
 0x379   : > { %v4120_v58 = vor.u32 %v4119_v46, %v4118_v30  ;;  %vm4122_vm9 = vcmp.lt.s32.totalorder %v4102_v50, 2  ;;  %v4044_v18 = vsel %vm4042_vm6, %v4043_v38, %v11095_v1  ;;  %vm4123_vm5 = vcmp.lt.s32.totalorder %v4102_v50, 3  ;;  %v3982_v1 = vpop.f32.mrf.mxu1 }
 0x37a   : > { %vm4124_vm3 = vcmp.lt.s32.totalorder %v4102_v50, 4  ;;  %v4129_v23 = vsel %vm4121_vm15, %v4108_v24, %v4111_v54  ;;  %v4045_v43 = vadd.s32 %v4044_v18, %v4040_v61  ;;  %v4133_v15 = vsel %vm4121_vm15, %v4111_v54, %v4114_v42 }
 0x37b   : > { %v4126_v41 = vsel %vm4124_vm3, %v4114_v42, 2102212464  ;;  %v4130_v33 = vsel %vm4124_vm3, %v4117_v7, 920167782  ;;  %v4125_v47 = vsel %vm4121_vm15, %v4105_v27, %v4108_v24  ;;  %v4134_v31 = vsel %vm4124_vm3, %v4120_v58, 1326507024 }
 0x37c   : > { %v4131_v48 = vsel %vm4123_vm5, %v4114_v42, %v4130_v33  ;;  %vm4204_vm0 = vcmp.gt.s32.totalorder %v4203_v25, 0  ;;  %v4046_v28 = vadd.s32 536870912, %v4045_v43  ;;  %v4127_v9 = vsel %vm4123_vm5, %v4111_v54, %v4126_v41 }
 0x37d   : > { %v4132_v56 = vsel %vm4122_vm9, %v4129_v23, %v4131_v48  ;;  %v4135_v26 = vsel %vm4123_vm5, %v4117_v7, %v4134_v31  ;;  %v3582_v59 = vadd.f32 %v11039_v16, %v11060_v60  ;;  %v4205_v17 = vsel %vm4204_vm0, %v4203_v25, 0 }
 0x37e   : > { %v4136_v8 = vsel %vm4122_vm9, %v4133_v15, %v4135_v26  ;;  %v11118_v39 = vmul.u32.u64.low %v11064_v34, %v4132_v56  ;;  %v11119_v21 = vmul.u32.u64.high %v11064_v34, %v4132_v56, %v11118_v39  ;;  %v4047_v3 = vshrl.u32 %v4046_v28, 30 }
 0x37f   : > { %v11123_v40 = vmul.u32.u64.low %v11064_v34, %v4136_v8  ;;  %v11124_v36 = vmul.u32.u64.high %v11064_v34, %v4136_v8, %v11123_v40  ;;  %v3697_v63 = vadd.f32 %v11042_v44, %v3582_v59  ;;  %v4128_v5 = vsel %vm4122_vm9, %v4125_v47, %v4127_v9 }
 0x380   : > { %v4048_v57 = vshll.u32 %v4047_v3, 30  ;;  %v4200_v16 = vand.u32 8388607, %v4193_v29  ;;  %v4207_v60 = vand.u32 31, %v4205_v17  ;;  %v4147_v12 = vadd.s32 1, %v11119_v21 }
 0x381   : > { %v3872_v61 = vadd.f32 %v3871_v55, %v3697_v63  ;;  %v4144_v4 = vmul.u32 %v11064_v34, %v4128_v5  ;;  %vm4146_vm2 = vc.u32 %v11124_v36, %v11118_v39  ;;  %v4041_v38 = vadd.s32 %v11094_v19, %v11091_v53 }
 0x382   : > { %v4049_v49 = vsub.s32 %v4045_v43, %v4048_v57  ;;  %v4148_v25 = vsel %vm4146_vm2, %v4147_v12, %v11119_v21  ;;  %v4201_v32 = vor.u32 8388608, %v4200_v16  ;;  %v4208_v0 = vsub.s32 32, %v4207_v60 }
 0x383   : > { %v11135_v44 = vadd.f32 %v3982_v1, %v3872_v61  ;;  %v4149_v10 = vadd.s32 %v4148_v25, %v4144_v4  ;;  %v4206_v42 = vshrl.u32 %v4205_v17, 5  ;;  %v4210_v18 = vshll.u32 %v7715_v14, %v4207_v60 }
 0x384   : > { %v4051_v50 = vsub.s32 0, %v4049_v49  ;;  %v4211_v34 = vshrl.u32 %v7716_v20, %v4208_v0  ;;  %v11140_v46 = vshll.u32 %v4201_v32, 8  ;;  %v4217_v7 = vshrl.u32 %v7718_v2, %v4208_v0 }
 0x385   : > { %v4150_v24 = vadd.s32 536870912, %v4149_v10  ;;  %v4300_v54 = vand.u32 2139095040, %v11135_v44  ;;  %v4214_v23 = vshrl.u32 %v7717_v35, %v4208_v0  ;;  %v4220_v43 = vshrl.u32 %v7719_v51, %v4208_v0 }
 0x386   : > { %v7208_v13 = vmin.u32 %v4051_v50, %v4049_v49  ;;  %v4071_v41 = vsub.s32 4, %v4047_v3  ;;  %v4216_v15 = vshll.u32 %v7717_v35, %v4207_v60  ;;  %v4212_v53 = vor.u32 %v4211_v34, %v4210_v18 }
 0x387   : > { %v11144_v27 = vshrl.u32 %v4150_v24, 30  ;;  %v4301_v47 = vshrl.u32 %v4300_v54, 23  ;;  %v4213_v19 = vshll.u32 %v7716_v20, %v4207_v60  ;;  %v4219_v48 = vshll.u32 %v7718_v2, %v4207_v60 }
 0x388   : > { %v4053_v30 = vclz %v7208_v13  ;;  %v4218_v9 = vor.u32 %v4217_v7, %v4216_v15  ;;  %v4223_v56 = vshrl.u32 %v7720_v11, %v4208_v0  ;;  %v4072_v55 = vsel %vm3987_vm7, %v4071_v41, %v4047_v3 }
 0x389   : > { %v4152_v33 = vshll.u32 %v11144_v27, 30  ;;  %v4215_v8 = vor.u32 %v4214_v23, %v4213_v19  ;;  %v4221_v21 = vor.u32 %v4220_v43, %v4219_v48  ;;  %v4209_v17 = vshrl.u32 %v7715_v14, %v4208_v0 }
 0x38a   : > { %v7209_v58 = vadd.s32 4294967294, %v4053_v30  ;;  %v4222_v63 = vshll.u32 %v7719_v51, %v4207_v60  ;;  %vm4228_vm12 = vcmp.lt.s32.totalorder %v4206_v42, 4  ;;  %vm4225_vm10 = vcmp.lt.s32.totalorder %v4206_v42, 1 }
 0x38b   : > { %v11154_v28 = vsub.s32 %v4149_v10, %v4152_v33  ;;  %v4230_v12 = vsel %vm4228_vm12, %v4218_v9, 2102212464  ;;  %v4233_v3 = vsel %vm4225_vm10, %v4212_v53, %v4215_v8  ;;  %v4234_v50 = vsel %vm4228_vm12, %v4221_v21, 920167782 }
 0x38c   : > { %vm7210_vm8 = vcmp.lt.s32.totalorder %v7209_v58, 0  ;;  %v4224_v61 = vor.u32 %v4223_v56, %v4222_v63  ;;  %vm4226_vm13 = vcmp.lt.s32.totalorder %v4206_v42, 2  ;;  %vm4227_vm4 = vcmp.lt.s32.totalorder %v4206_v42, 3 }
 0x38d   : > { %v4056_v31 = vsel %vm7210_vm8, 0, %v7209_v58  ;;  %v4155_v40 = vsub.s32 0, %v11154_v28  ;;  %v4229_v60 = vsel %vm4225_vm10, %v4209_v17, %v4212_v53  ;;  %v4231_v32 = vsel %vm4227_vm4, %v4215_v8, %v4230_v12 }
 0x38e   : > { %v4057_v26 = vsub.s32 32, %v4056_v31  ;;  %v4061_v59 = vsub.s32 4294967266, %v4056_v31  ;;  %v4058_v5 = vshll.u32 %v4049_v49, %v4056_v31  ;;  %v4235_v0 = vsel %vm4227_vm4, %v4218_v9, %v4234_v50 }
 0x38f   : > { %v7212_v1 = vmin.u32 %v4155_v40, %v11154_v28  ;;  %v4237_v13 = vsel %vm4225_vm10, %v4215_v8, %v4218_v9  ;;  %v4236_v30 = vsel %vm4226_vm13, %v4233_v3, %v4235_v0  ;;  %v4238_v34 = vsel %vm4228_vm12, %v4224_v61, 1326507024  ;;  %v5714_v40 = vld [vmem:[%s11178_s26 + $0xf0] sm:$0xff] }
 0x390   : > { %v4059_v57 = vshrl.u32 %v4041_v38, %v4057_v26  ;;  %v4062_v16 = vadd.s32 127, %v4061_v59  ;;  %v4239_v7 = vsel %vm4227_vm4, %v4221_v21, %v4238_v34  ;;  %v4232_v23 = vsel %vm4226_vm13, %v4229_v60, %v4231_v32  ;;  %v5715_v59 = vld [vmem:[%s11178_s26 + $0xf8] sm:$0xff]  ;;  %v5698_v3 = vld [vmem:[%s11178_s26 + $0x70] sm:$0xff] }
 0x391   : > { %v4157_v10 = vclz %v7212_v1  ;;  %v11169_v58 = vmul.u32.u64.low %v11140_v46, %v4236_v30  ;;  %v11170_v18 = vmul.u32.u64.high %v11140_v46, %v4236_v30, %v11169_v58  ;;  %v4240_v43 = vsel %vm4226_vm13, %v4237_v13, %v4239_v7 }
 0x392   : > { %v4060_v4 = vor.u32 %v4059_v57, %v4058_v5  ;;  %v4063_v25 = vshll.u32 %v4062_v16, 23  ;;  %v7219_v41 = vadd.s32 4294967169, %v4301_v47  ;;  %vm11186_vm11 = vcmp.le.f32.partialorder %v3985_v37, 0.7853982 }
 0x393   : > { %v7213_v54 = vadd.s32 4294967294, %v4157_v10  ;;  %v11181_v53 = vmul.u32.u64.low %v11140_v46, %v4240_v43  ;;  %v11182_v19 = vmul.u32.u64.high %v11140_v46, %v4240_v43, %v11181_v53  ;;  %v4297_v47 = vand.u32 2147483647, %v11135_v44 }
 0x394   : > { %v4064_v49 = vor.u32 4788187, %v4063_v25  ;;  %v4067_v24 = vcvt.s32.f32 %v4060_v4  ;;  %v4307_v31 = vadd.s32 1, %v7219_v41  ;;  %v4074_v56 = vsel %vm11186_vm11, 0, %v4072_v55  ;;  %v5699_v25 = vld [vmem:[%s11178_s26 + $0x78] sm:$0xff] }
 0x395   : > { %vm7214_vm14 = vcmp.lt.s32.totalorder %v7213_v54, 0  ;;  %v4251_v26 = vadd.s32 1, %v11170_v18  ;;  %vm4852_vm1 = vcmask 1040384   ;;  %v4248_v21 = vmul.u32 %v11140_v46, %v4232_v23 }
 0x396   : > { %v4065_v38 = vand.u32 2147483647, %v4064_v49  ;;  %v4160_v15 = vsel %vm7214_vm14, 0, %v7213_v54  ;;  %vm4308_vm6 = vcmp.gt.s32.totalorder %v4307_v31, 0  ;;  %v13926_v37 = vmov 1.0  }
 0x397   : > { %v4165_v42 = vsub.s32 4294967266, %v4160_v15  ;;  %7239 = vmatprep.subr.msk.mxu0 %vm4852_vm1, %v13926_v37  ;;  %v4161_v63 = vsub.s32 32, %v4160_v15  ;;  %vm4250_vm15 = vc.u32 %v11182_v19, %v11169_v58  ;;  %v4309_v55 = vsel %vm4308_vm6, %v4307_v31, 0  ;;  %v5712_v31 = vld [vmem:[%s11178_s26 + $0xe0] sm:$0xff] }
 0x398   : > { %v4068_v33 = vmul.f32 %v4067_v24, %v4065_v38  ;;  %7240 = vmatpush1.msk.msra.mxu0 %vm4852_vm1, %v13926_v37  ;;  %v7721_v5 = vmov 0   ;;  %v4078_v57 = vadd.s32 3, %v4074_v56  ;;  %v4145_v16 = vadd.s32 %v11118_v39, %v11124_v36  ;;  %v5713_v24 = vld [vmem:[%s11178_s26 + $0xe8] sm:$0xff] }
 0x399   : > { %v4166_v8 = vadd.s32 127, %v4165_v42  ;;  %7671 = vset.pattern.permute.xlu0 %v7721_v5  ;;  %v4252_v1 = vsel %vm4250_vm15, %v4251_v26, %v11170_v18  ;;  %7672 = vset.pattern.permute.xlu1 %v7721_v5  ;;  %v4311_v4 = vand.u32 31, %v4309_v55  ;;  %v4304_v39 = vand.u32 8388607, %v4297_v47  ;;  %v5697_v38 = vld [vmem:[%s11178_s26 + $0x68] sm:$0xff]  ;;  %v5696_v26 = vld [vmem:[%s11178_s26 + $0x60] sm:$0xff] }
 0x39a   : > { %v4069_v9 = vxor.u32 2147483648, %v4068_v33  ;;  %5810 = vperm.xlu0 %7671, %v5715_v59   ;;  %v4253_v12 = vadd.s32 %v4252_v1, %v4248_v21  ;;  %5807 = vperm.xlu1 %7672, %v5714_v40   ;;  %v4163_v50 = vshrl.u32 %v4145_v16, %v4161_v63  ;;  %v11217_v60 = vand.u32 3, %v4074_v56  ;;  %v5695_v16 = vld [vmem:[%s11178_s26 + $0x58] sm:$0xff] }
 0x39b   : > { %v4167_v61 = vshll.u32 %v4166_v8, 23  ;;  %v4312_v36 = vsub.s32 32, %v4311_v4  ;;  %v11219_v49 = vand.u32 3, %v4078_v57  ;;  %v4162_v32 = vshll.u32 %v11154_v28, %v4160_v15 }
 0x39c   : > { %v4070_v17 = vsel %vm3987_vm7, %v4069_v9, %v4068_v33  ;;  %v4254_v10 = vadd.s32 536870912, %v4253_v12  ;;  %v4305_v23 = vor.u32 8388608, %v4304_v39  ;;  %vm4499_vm9 = vcmp.eq.s32.totalorder %v11217_v60, 2 }
 0x39d   : > { %v4073_v46 = vsel %vm11186_vm11, %v11044_v52, %v4070_v17  ;;  %v4168_v0 = vor.u32 4788187, %v4167_v61  ;;  %v4315_v54 = vshrl.u32 %v7716_v20, %v4312_v36  ;;  %v4318_v30 = vshrl.u32 %v7717_v35, %v4312_v36 }
 0x39e   : > { %7673 = vcosq.f32 %v4073_v46  ;;  %5762 = vperm.xlu0 %7671, %v5699_v25   ;;  %v11222_v13 = vshrl.u32 %v4254_v10, 30  ;;  %5759 = vperm.xlu1 %7672, %v5698_v3   ;;  %v4324_v34 = vshrl.u32 %v7719_v51, %v4312_v36  ;;  %v4164_v7 = vor.u32 %v4163_v50, %v4162_v32  ;;  %v5710_v32 = vld [vmem:[%s11178_s26 + $0xd0] sm:$0xff] }
 0x39f   : > { %7675 = vsinq.f32 %v4073_v46  ;;  %v4314_v28 = vshll.u32 %v7715_v14, %v4311_v4  ;;  %v4317_v43 = vshll.u32 %v7716_v20, %v4311_v4  ;;  %v4321_v41 = vshrl.u32 %v7718_v2, %v4312_v36 }
 0x3a0   : > { %v4256_v18 = vshll.u32 %v11222_v13, 30  ;;  %v4323_v33 = vshll.u32 %v7718_v2, %v4311_v4  ;;  %vm4081_vm5 = vcmp.eq.s32.totalorder %v11219_v49, 0  ;;  %vm4496_vm3 = vcmp.eq.s32.totalorder %v11217_v60, 0 }
 0x3a1   : > { %v4169_v15 = vand.u32 2147483647, %v4168_v0  ;;  %v11239_v48 = vshrl.u32 %v4309_v55, 5  ;;  %v4320_v42 = vshll.u32 %v7717_v35, %v4311_v4  ;;  %vm4080_vm0 = vcmp.lt.s32.totalorder %v11219_v49, 2 }
 0x3a2   : > { %5804 = vperm.xlu0 %7671, %v5713_v24   ;;  %v11237_v53 = vsub.s32 %v4253_v12, %v4256_v18  ;;  %5756 = vperm.xlu1 %7672, %v5697_v38   ;;  %vm4495_vm2 = vcmp.lt.s32.totalorder %v11217_v60, 2  ;;  %v4316_v20 = vor.u32 %v4315_v54, %v4314_v28  ;;  %v4319_v2 = vor.u32 %v4318_v30, %v4317_v43 }
 0x3a3   : > { %v4325_v9 = vor.u32 %v4324_v34, %v4323_v33  ;;  %v4327_v56 = vshrl.u32 %v7720_v11, %v4312_v36  ;;  %vm4077_vm7 = vweird.f32 %v11044_v52  ;;  %vm4084_vm8 = vcmp.eq.s32.totalorder %v11219_v49, 2  ;;  %v5694_v34 = vld [vmem:[%s11178_s26 + $0x50] sm:$0xff] }
 0x3a4   : > { %v4249_v35 = vadd.s32 %v11169_v58, %v11182_v19  ;;  %v4259_v59 = vsub.s32 0, %v11237_v53  ;;  %v11252_v8 = vshll.u32 %v4305_v23, 8  ;;  %v4171_v21 = vcvt.s32.f32 %v4164_v7  ;;  %v5711_v58 = vld [vmem:[%s11178_s26 + $0xd8] sm:$0xff] }
 0x3a5   : > { %v4322_v40 = vor.u32 %v4321_v41, %v4320_v42  ;;  %v4326_v17 = vshll.u32 %v7719_v51, %v4311_v4  ;;  %v4854_v11 = vsel %vm4852_vm1, 1.0, %v7721_v5  ;;  %v4313_v55 = vshrl.u32 %v7715_v14, %v4312_v36  ;;  %v5709_v42 = vld [vmem:[%s11178_s26 + $0xc8] sm:$0xff] }
 0x3a6   : > { %5801 = vperm.xlu0 %7671, %v5712_v31   ;;  %v7216_v63 = vmin.u32 %v4259_v59, %v11237_v53  ;;  %vm4329_vm12 = vcmp.lt.s32.totalorder %v11239_v48, 1  ;;  %vm4332_vm10 = vcmp.lt.s32.totalorder %v11239_v48, 4  ;;  %5753 = vperm.xlu1 %7672, %v5696_v26   ;;  %v11262_v46 = vmul.f32 %v4171_v21, %v4169_v15 }
 0x3a7   : > { %v4328_v57 = vor.u32 %v4327_v56, %v4326_v17  ;;  %v4337_v51 = vsel %vm4329_vm12, %v4316_v20, %v4319_v2  ;;  %v4338_v5 = vsel %vm4332_vm10, %v4325_v9, 920167782  ;;  %vm4330_vm13 = vcmp.lt.s32.totalorder %v11239_v48, 2 }
 0x3a8   : > { %v4261_v61 = vclz %v7216_v63  ;;  %vm4331_vm4 = vcmp.lt.s32.totalorder %v11239_v48, 3  ;;  %v4333_v4 = vsel %vm4329_vm12, %v4313_v55, %v4316_v20  ;;  %v4334_v25 = vsel %vm4332_vm10, %v4322_v40, 2102212464 }
 0x3a9   : > { %v4339_v3 = vsel %vm4331_vm4, %v4322_v40, %v4338_v5  ;;  %v4341_v54 = vsel %vm4329_vm12, %v4319_v2, %v4322_v40  ;;  %v4342_v30 = vsel %vm4332_vm10, %v4328_v57, 1326507024  ;;  %v4335_v15 = vsel %vm4331_vm4, %v4319_v2, %v4334_v25  ;;  %v5693_v2 = vld [vmem:[%s11178_s26 + $0x48] sm:$0xff]  ;;  %v5708_v57 = vld [vmem:[%s11178_s26 + $0xc0] sm:$0xff] }
 0x3aa   : > { %5798 = vperm.xlu0 %7671, %v5711_v58   ;;  %v7217_v39 = vadd.s32 4294967294, %v4261_v61  ;;  %v4340_v36 = vsel %vm4330_vm13, %v4337_v51, %v4339_v3  ;;  %5750 = vperm.xlu1 %7672, %v5695_v16   ;;  %v4343_v18 = vsel %vm4331_vm4, %v4325_v9, %v4342_v30  ;;  %v4336_v40 = vsel %vm4330_vm13, %v4333_v4, %v4335_v15  ;;  %v5692_v5 = vld [vmem:[%s11178_s26 + $0x40] sm:$0xff] }
 0x3ab   : > { %v7674_v19 = vpop.eup %7673  ;;  %v4344_v49 = vsel %vm4330_vm13, %v4341_v54, %v4343_v18  ;;  %v11318_v20 = vmul.u32.u64.low %v11252_v8, %v4340_v36  ;;  %v11319_v9 = vmul.u32.u64.high %v11252_v8, %v4340_v36, %v11318_v20  ;;  %v11329_v17 = vsub.f32 %v4854_v11, %v4854_v11 }
 0x3ac   : > { %v7676_v1 = vpop.eup %7675  ;;  %v4085_v14 = vxor.u32 2147483648, %v7674_v19  ;;  %vm7218_vm14 = vcmp.lt.s32.totalorder %v7217_v39, 0  ;;  %v11314_v31 = vmul.u32.u64.low %v11252_v8, %v4344_v49  ;;  %v11315_v52 = vmul.u32.u64.high %v11252_v8, %v4344_v49, %v11314_v31 }
 0x3ad   : > { %v4082_v12 = vxor.u32 2147483648, %v7676_v1  ;;  %v4264_v43 = vsel %vm7218_vm14, 0, %v7217_v39  ;;  %v4173_v58 = vxor.u32 2147483648, %v11262_v46  ;;  %v11339_v11 = vand.u32 4294901760, %v11329_v17  ;;  %v5707_v39 = vld [vmem:[%s11178_s26 + $0xb8] sm:$0xff] }
 0x3ae   : > { %v4086_v50 = vsel %vm4084_vm8, %v4085_v14, %v7676_v1  ;;  %v4501_v10 = vsel %vm4499_vm9, %v4085_v14, %v7676_v1  ;;  %5795 = vperm.xlu0 %7671, %v5710_v32   ;;  %v4265_v41 = vsub.s32 32, %v4264_v43  ;;  %v4269_v33 = vsub.s32 4294967266, %v4264_v43  ;;  %5747 = vperm.xlu1 %7672, %v5694_v34  }
 0x3af   : > { %v4083_v0 = vsel %vm4081_vm5, %v7674_v19, %v4082_v12  ;;  %v4498_v24 = vsel %vm4496_vm3, %v7674_v19, %v4082_v12  ;;  %v4266_v26 = vshll.u32 %v11237_v53, %v4264_v43  ;;  %vm4354_vm11 = vc.u32 %v11315_v52, %v11318_v20  ;;  %13927 = vst [vmem:[#allocation13_spill] sm:$0xff] %v11339_v11 }
 0x3b0   : > { %v4087_v38 = vsel %vm4080_vm0, %v4083_v0, %v4086_v50  ;;  %v4502_v7 = vsel %vm4495_vm2, %v4498_v24, %v4501_v10  ;;  %v4267_v59 = vshrl.u32 %v4249_v35, %v4265_v41  ;;  %v4270_v21 = vadd.s32 127, %v4269_v33  ;;  %v5691_v0 = vld [vmem:[%s11178_s26 + $0x38] sm:$0xff]  ;;  %v5705_v41 = vld [vmem:[%s11178_s26 + $0xa8] sm:$0xff] }
 0x3b1   : > { %v11301_v23 = vsel %vm4077_vm7, nan, %v4087_v38  ;;  %v11305_v28 = vsel %vm4077_vm7, nan, %v4502_v7  ;;  %v4355_v53 = vadd.s32 1, %v11319_v9  ;;  %v4352_v19 = vmul.u32 %v11252_v8, %v4336_v40  ;;  %v5690_v7 = vld [vmem:[%s11178_s26 + $0x30] sm:$0xff]  ;;  %v5689_v33 = vld [vmem:[%s11178_s26 + $0x28] sm:$0xff] }
 0x3b2   : > { %v4813_v60 = vmul.f32 2.0, %v11301_v23  ;;  %5792 = vperm.xlu0 %7671, %v5709_v42   ;;  %v4268_v63 = vor.u32 %v4267_v59, %v4266_v26  ;;  %v4271_v55 = vshll.u32 %v4270_v21, 23  ;;  %5744 = vperm.xlu1 %7672, %v5693_v2   ;;  %vm4091_vm6 = vcmp.lt.s32.totalorder %v11048_v62, 0  ;;  %v5704_v26 = vld [vmem:[%s11178_s26 + $0xa0] sm:$0xff] }
 0x3b3   : > { %v4356_v48 = vsel %vm4354_vm11, %v4355_v53, %v11319_v9  ;;  %v4174_v8 = vsel %vm4091_vm6, %v4173_v58, %v11262_v46  ;;  %v4978_v12 = vsub.f32 %v11329_v17, %v11339_v11  ;;  %vm11354_vm15 = vcmp.le.f32.partialorder %v4089_v45, 0.7853982  ;;  %v5688_v21 = vld [vmem:[%s11178_s26 + $0x20] sm:$0xff]  ;;  %v5703_v53 = vld [vmem:[%s11178_s26 + $0x98] sm:$0xff] }
 0x3b4   : > { %v11323_v56 = vmul.f32 %v4813_v60, %v11305_v28  ;;  %v4272_v35 = vor.u32 4788187, %v4271_v55  ;;  %v4821_v51 = vmul.f32 %v4813_v60, %v11301_v23  ;;  %v4275_v1 = vcvt.s32.f32 %v4268_v63 }
 0x3b5   : > { %v4357_v14 = vadd.s32 %v4356_v48, %v4352_v19  ;;  %v4979_v50 = vand.u32 4294901760, %v4978_v12  ;;  %v4177_v46 = vsel %vm11354_vm15, %v11048_v62, %v4174_v8  ;;  %vm4195_vm9 = vcmp.lt.s32.totalorder %v11050_v6, 0 }
 0x3b6   : > { %5789 = vperm.xlu0 %7671, %v5708_v57   ;;  %v4273_v16 = vand.u32 2147483647, %v4272_v35  ;;  %5741 = vperm.xlu1 %7672, %v5692_v5   ;;  %v11348_v61 = vmul.f32 2.0, %v11323_v56  ;;  %v11358_v10 = vsub.f32 1.0, %v4821_v51  ;;  %vm11374_vm5 = vcmp.le.f32.partialorder %v4193_v29, 0.7853982 }
 0x3b7   : > { %v4358_v25 = vadd.s32 536870912, %v4357_v14  ;;  %4980 = vmatprep.subr.mxu1 %v4979_v50  ;;  %7677 = vcosq.f32 %v4177_v46  ;;  %v5706_v29 = vld [vmem:[%s11178_s26 + $0xb0] sm:$0xff]  ;;  %v4175_v18 = vsub.s32 4, %v11144_v27  ;;  %v4279_v49 = vsub.s32 4, %v11222_v13 }
 0x3b8   : > { %v4276_v4 = vmul.f32 %v4275_v1, %v4273_v16  ;;  %v11370_v45 = vmul.f32 %v11348_v61, %v11358_v10  ;;  %4986 = vmatpush1.msra.mxu1 %v4979_v50  ;;  %7679 = vsinq.f32 %v4177_v46  ;;  %v5687_v16 = vld [vmem:[%s11178_s26 + $0x18] sm:$0xff]  ;;  %v5686_v46 = vld [vmem:[%s11178_s26 + $0x10] sm:$0xff]  ;;  %vm4181_vm12 = vweird.f32 %v11048_v62 }
 0x3b9   : > { %v11364_v32 = vshrl.u32 %v4358_v25, 30  ;;  %v4176_v15 = vsel %vm4091_vm6, %v4175_v18, %v11144_v27  ;;  %v4280_v31 = vsel %vm4195_vm9, %v4279_v49, %v11222_v13  ;;  %v4353_v13 = vadd.s32 %v11318_v20, %v11315_v52  ;;  %v5702_v25 = vld [vmem:[%s11178_s26 + $0x90] sm:$0xff] }
 0x3ba   : > { %v4277_v36 = vxor.u32 2147483648, %v4276_v4  ;;  %5786 = vperm.xlu0 %7671, %v5707_v39   ;;  %5738 = vperm.xlu1 %7672, %v5691_v0   ;;  %v4178_v59 = vsel %vm11354_vm15, 0, %v4176_v15  ;;  %v4282_v2 = vsel %vm11374_vm5, 0, %v4280_v31  ;;  %vm4285_vm13 = vweird.f32 %v11050_v6  ;;  %v5684_v31 = vld [vmem:[%s11178_s26] sm:$0xff] }
 0x3bb   : > { %v4360_v30 = vshll.u32 %v11364_v32, 30  ;;  %v4182_v63 = vadd.s32 3, %v4178_v59  ;;  %v4286_v19 = vadd.s32 3, %v4282_v2  ;;  %vm4299_vm14 = vcmp.lt.s32.totalorder %v11135_v44, 0 }
 0x3bc   : > { %v4278_v54 = vsel %vm4195_vm9, %v4277_v36, %v4276_v4  ;;  %v4597_v36 = vand.u32 3, %v4178_v59  ;;  %vm11424_vm6 = vcmp.le.f32.partialorder %v4297_v47, 0.7853982 }
 0x3bd   : > { %v4281_v34 = vsel %vm11374_vm5, %v11050_v6, %v4278_v54  ;;  %v4361_v38 = vsub.s32 %v4357_v14, %v4360_v30  ;;  %v4183_v14 = vand.u32 3, %v4182_v63  ;;  %v4287_v4 = vand.u32 3, %v4286_v19 }
 0x3be   : > { %7681 = vcosq.f32 %v4281_v34  ;;  %5783 = vperm.xlu0 %7671, %v5706_v29   ;;  %5735 = vperm.xlu1 %7672, %v5690_v7   ;;  %v4700_v7 = vand.u32 3, %v4282_v2  ;;  %vm4599_vm11 = vcmp.eq.s32.totalorder %v4597_v36, 0  ;;  %vm4602_vm15 = vcmp.eq.s32.totalorder %v4597_v36, 2 }
 0x3bf   : > { %7683 = vsinq.f32 %v4281_v34  ;;  %v4363_v43 = vsub.s32 0, %v4361_v38  ;;  %vm4185_vm0 = vcmp.eq.s32.totalorder %v4183_v14, 0  ;;  %vm4188_vm2 = vcmp.eq.s32.totalorder %v4183_v14, 2  ;;  %v5701_v34 = vld [vmem:[%s11178_s26 + $0x88] sm:$0xff] }
 0x3c0   : > { %vm4289_vm7 = vcmp.eq.s32.totalorder %v4287_v4, 0  ;;  %vm4292_vm8 = vcmp.eq.s32.totalorder %v4287_v4, 2  ;;  %vm4184_vm10 = vcmp.lt.s32.totalorder %v4183_v14, 2  ;;  %vm4288_vm4 = vcmp.lt.s32.totalorder %v4287_v4, 2 }
 0x3c1   : > { %v7220_v60 = vmin.u32 %v4363_v43, %v4361_v38  ;;  %v5685_v43 = vld [vmem:[%s11178_s26 + $0x8] sm:$0xff]  ;;  %vm4702_vm9 = vcmp.eq.s32.totalorder %v4700_v7, 0  ;;  %vm4705_vm5 = vcmp.eq.s32.totalorder %v4700_v7, 2 }
 0x3c2   : > { %5780 = vperm.xlu0 %7671, %v5705_v41   ;;  %5732 = vperm.xlu1 %7672, %v5689_v33   ;;  %v5700_v41 = vld [vmem:[%s11178_s26 + $0x80] sm:$0xff] }
 0x3c3   : > { %v4365_v42 = vclz %v7220_v60 }
 0x3c4   : > { %v11402_v40 = vpop.eup %7677 }
 0x3c5   : > { %v7221_v9 = vadd.s32 4294967294, %v4365_v42  ;;  %v7680_v35 = vpop.eup %7679  ;;  %v4189_v20 = vxor.u32 2147483648, %v11402_v40  ;;  %v4383_v42 = vsub.s32 4, %v11364_v32 }
 0x3c6   : > { %5777 = vperm.xlu0 %7671, %v5704_v26   ;;  %5729 = vperm.xlu1 %7672, %v5688_v21   ;;  %v4186_v52 = vxor.u32 2147483648, %v7680_v35 }
 0x3c7   : > { %vm7222_vm3 = vcmp.lt.s32.totalorder %v7221_v9, 0  ;;  %v4190_v30 = vsel %vm4188_vm2, %v4189_v20, %v7680_v35  ;;  %v4604_v47 = vsel %vm4602_vm15, %v4189_v20, %v7680_v35 }
 0x3c8   : > { %v4368_v27 = vsel %vm7222_vm3, 0, %v7221_v9  ;;  %v4187_v54 = vsel %vm4185_vm0, %v11402_v40, %v4186_v52  ;;  %v4601_v59 = vsel %vm4599_vm11, %v11402_v40, %v4186_v52  ;;  %vm4598_vm3 = vcmp.lt.s32.totalorder %v4597_v36, 2 }
 0x3c9   : > { %v4369_v55 = vsub.s32 32, %v4368_v27  ;;  %v4373_v58 = vsub.s32 4294967266, %v4368_v27  ;;  %v4370_v48 = vshll.u32 %v4361_v38, %v4368_v27  ;;  %v4191_v49 = vsel %vm4184_vm10, %v4187_v54, %v4190_v30 }
 0x3ca   : > { %5774 = vperm.xlu0 %7671, %v5703_v53   ;;  %5726 = vperm.xlu1 %7672, %v5687_v16   ;;  %v11434_v26 = vsel %vm4181_vm12, nan, %v4191_v49  ;;  %v4837_v40 = vmul.f32 %v11348_v61, %v11323_v56  ;;  %vm4701_vm0 = vcmp.lt.s32.totalorder %v4700_v7, 2 }
 0x3cb   : > { %v11407_v57 = vpop.eup %7681  ;;  %v4371_v51 = vshrl.u32 %v4353_v13, %v4369_v55  ;;  %v4374_v5 = vadd.s32 127, %v4373_v58  ;;  %v4384_v13 = vsel %vm4299_vm14, %v4383_v42, %v11364_v32  ;;  %v4605_v55 = vsel %vm4598_vm3, %v4601_v59, %v4604_v47 }
 0x3cc   : > { %v7684_v1 = vpop.eup %7683  ;;  %v4293_v50 = vxor.u32 2147483648, %v11407_v57  ;;  %v4814_v58 = vmul.f32 2.0, %v11434_v26  ;;  %v4386_v19 = vsel %vm11424_vm6, 0, %v4384_v13 }
 0x3cd   : > { %v4372_v8 = vor.u32 %v4371_v51, %v4370_v48  ;;  %v4375_v12 = vshll.u32 %v4374_v5, 23  ;;  %v4290_v3 = vxor.u32 2147483648, %v7684_v1  ;;  %v4841_v48 = vsub.f32 1.0, %v4837_v40 }
 0x3ce   : > { %5771 = vperm.xlu0 %7671, %v5702_v25   ;;  %5723 = vperm.xlu1 %7672, %v5686_v46   ;;  %v4294_v29 = vsel %vm4292_vm8, %v4293_v50, %v7684_v1  ;;  %v4707_v63 = vsel %vm4705_vm5, %v4293_v50, %v7684_v1  ;;  %v4390_v5 = vadd.s32 3, %v4386_v19  ;;  %v4803_v1 = vand.u32 3, %v4386_v19 }
 0x3cf   : > { %v4376_v39 = vor.u32 4788187, %v4375_v12  ;;  %v4379_v24 = vcvt.s32.f32 %v4372_v8  ;;  %v4291_v38 = vsel %vm4289_vm7, %v11407_v57, %v4290_v3  ;;  %v4704_v27 = vsel %vm4702_vm9, %v11407_v57, %v4290_v3 }
 0x3d0   : > { %v4295_v33 = vsel %vm4288_vm4, %v4291_v38, %v4294_v29  ;;  %v4708_v53 = vsel %vm4701_vm0, %v4704_v27, %v4707_v63  ;;  %v11456_v57 = vsel %vm4181_vm12, nan, %v4605_v55  ;;  %v11468_v16 = vand.u32 4294901760, %v4841_v48 }
 0x3d1   : > { %v4377_v0 = vand.u32 2147483647, %v4376_v39  ;;  %v11442_v2 = vsel %vm4285_vm13, nan, %v4295_v33  ;;  %v11459_v32 = vmul.f32 %v4814_v58, %v11456_v57  ;;  %v11463_v61 = vsel %vm4285_vm13, nan, %v4708_v53 }
 0x3d2   : > { %5768 = vperm.xlu0 %7671, %v5701_v34   ;;  %5720 = vperm.xlu1 %7672, %v5685_v43   ;;  %v4815_v35 = vmul.f32 2.0, %v11442_v2  ;;  %v4391_v62 = vand.u32 3, %v4390_v5  ;;  %v11473_v52 = vsub.f32 %v4841_v48, %v11468_v16  ;;  %vm4808_vm2 = vcmp.eq.s32.totalorder %v4803_v1, 2 }
 0x3d3   : > { %v4380_v18 = vmul.f32 %v4379_v24, %v4377_v0  ;;  %v4830_v14 = vmul.f32 2.0, %v11459_v32  ;;  %v4822_v25 = vmul.f32 %v4814_v58, %v11434_v26  ;;  %vm4805_vm12 = vcmp.eq.s32.totalorder %v4803_v1, 0 }
 0x3d4   : > { %v11466_v51 = vmul.f32 %v4815_v35, %v11463_v61  ;;  %vm4396_vm7 = vcmp.eq.s32.totalorder %v4391_v62, 2  ;;  %v4823_v39 = vmul.f32 %v4815_v35, %v11442_v2  ;;  %vm4393_vm8 = vcmp.eq.s32.totalorder %v4391_v62, 0 }
 0x3d5   : > { %v4381_v60 = vxor.u32 2147483648, %v4380_v18  ;;  %v4838_v4 = vmul.f32 %v4830_v14, %v11459_v32  ;;  %vm4392_vm10 = vcmp.lt.s32.totalorder %v4391_v62, 2  ;;  %vm4804_vm13 = vcmp.lt.s32.totalorder %v4803_v1, 2 }
 0x3d6   : > { %5765 = vperm.xlu0 %7671, %v5700_v41   ;;  %5717 = vperm.xlu1 %7672, %v5684_v31   ;;  %v4831_v8 = vmul.f32 2.0, %v11466_v51  ;;  %vm4389_vm4 = vweird.f32 %v11135_v44  ;;  %v4827_v29 = vsub.f32 1.0, %v4823_v39  ;;  %v4826_v7 = vsub.f32 1.0, %v4822_v25 }
 0x3d7   : > { %v4382_v9 = vsel %vm4299_vm14, %v4381_v60, %v4380_v18  ;;  %v4842_v43 = vsub.f32 1.0, %v4838_v4  ;;  %v13324_v60 = vand.u32 4294901760, %v11473_v52  ;;  %v11493_v31 = vand.u32 4294901760, %v11370_v45 }
 0x3d8   : > { %v4385_v21 = vsel %vm11424_vm6, %v11135_v44, %v4382_v9  ;;  %v4839_v50 = vmul.f32 %v4831_v8, %v11466_v51  ;;  %v4835_v15 = vmul.f32 %v4831_v8, %v4827_v29  ;;  %v4834_v42 = vmul.f32 %v4830_v14, %v4826_v7 }
 0x3d9   : > { %7685 = vcosq.f32 %v4385_v21  ;;  %13934 = vst [vmem:[#allocation11_spill] sm:$0xff] %v11493_v31  ;;  %v11496_v59 = vand.u32 4294901760, %v4842_v43  ;;  %v11504_v27 = vand.u32 4294901760, %v11305_v28  ;;  %v11507_v63 = vand.u32 4294901760, %v11301_v23 }
 0x3da   : > { %7687 = vsinq.f32 %v4385_v21  ;;  %v4843_v38 = vsub.f32 1.0, %v4839_v50  ;;  %v11501_v21 = vsub.f32 %v11473_v52, %v13324_v60  ;;  %v11511_v55 = vand.u32 4294901760, %v11323_v56 }
 0x3db   : > { %13935 = vst [vmem:[#allocation10_spill] sm:$0xff] %v11504_v27  ;;  %v11514_v58 = vand.u32 4294901760, %v11456_v57  ;;  %v11519_v35 = vand.u32 4294901760, %v4835_v15  ;;  %v11521_v19 = vand.u32 4294901760, %v4834_v42  ;;  %v11525_v48 = vsub.f32 %v11370_v45, %v11493_v31 }
 0x3dc   : > { %v11490_v44 = vand.u32 4294901760, %v4843_v38  ;;  %13936 = vst [vmem:[#allocation9_spill] sm:$0xff] %v11511_v55  ;;  %v11529_v14 = vand.u32 4294901760, %v4826_v7  ;;  %v11532_v62 = vsub.f32 %v4842_v43, %v11496_v59  ;;  %v11535_v8 = vand.u32 4294901760, %v11358_v10 }
 0x3dd   : > { %vm4845_vm14 = vcmask 793600   ;;  %v11555_v50 = vsub.f32 %v4835_v15, %v11519_v35  ;;  %v11557_v39 = vand.u32 4294901760, %v4827_v29  ;;  %v11583_v43 = vsub.f32 %v11323_v56, %v11511_v55 }
 0x3de   : > { %v11517_v53 = vsub.f32 %v4843_v38, %v11490_v44  ;;  %13937 = vst [vmem:[#allocation40_spill] sm:$0xff] %v11529_v14  ;;  %v11575_v38 = vsub.f32 %v11358_v10, %v11535_v8  ;;  %v11622_v60 = vand.u32 4294901760, %v11463_v61 }
 0x3df   : > { %13938 = vst [vmem:[#allocation38_spill] sm:$0xff] %v11557_v39 }
 0x3e0   : > { %13941 = vst [vmem:[#allocation29_spill] sm:$0xff] %v11622_v60 }
 0x3e6   : > { %v7686_v12 = vpop.eup %7685 }
 0x3e7   : > { %v7688_v20 = vpop.eup %7687  ;;  %v4397_v6 = vxor.u32 2147483648, %v7686_v12 }
 0x3e8   : > { %v4394_v3 = vxor.u32 2147483648, %v7688_v20 }
 0x3e9   : > { %v4398_v46 = vsel %vm4396_vm7, %v4397_v6, %v7688_v20  ;;  %v4810_v36 = vsel %vm4808_vm2, %v4397_v6, %v7688_v20  ;;  %v11539_v20 = vand.u32 4294901760, %v11459_v32  ;;  %v11542_v6 = vand.u32 4294901760, %v11434_v26 }
 0x3ea   : > { %v4395_v0 = vsel %vm4393_vm8, %v7686_v12, %v4394_v3  ;;  %v4807_v24 = vsel %vm4805_vm12, %v7686_v12, %v4394_v3  ;;  %v3047_v3 = vld [vmem:[%s13042_s3 + $0x10] sm:$0xff] }
 0x3eb   : > { %v4399_v54 = vsel %vm4392_vm10, %v4395_v0, %v4398_v46  ;;  %v4811_v30 = vsel %vm4804_vm13, %v4807_v24, %v4810_v36  ;;  %v13325_v46 = vand.u32 4294901760, %v11517_v53  ;;  %v11561_v36 = vsub.f32 %v4834_v42, %v11521_v19 }
 0x3ec   : > { %v11480_v34 = vsel %vm4389_vm4, nan, %v4399_v54  ;;  %v11483_v49 = vsel %vm4389_vm4, nan, %v4811_v30  ;;  %v13327_v24 = vand.u32 4294901760, %v11532_v62  ;;  %v13328_v54 = vand.u32 4294901760, %v11525_v48 }
 0x3ed   : > { %v4816_v18 = vmul.f32 2.0, %v11480_v34  ;;  %v11570_v30 = vsub.f32 %v4826_v7, %v11529_v14  ;;  %v4996_v56 = vsub.f32 %v11517_v53, %v13325_v46  ;;  %v13943_v46 = vand.u32 4294901760, %v11555_v50 }
 0x3ef   : > { %v11487_v41 = vmul.f32 %v4816_v18, %v11483_v49  ;;  %v4824_v33 = vmul.f32 %v4816_v18, %v11480_v34  ;;  %v11579_v18 = vsub.f32 %v11459_v32, %v11539_v20  ;;  %v11600_v32 = vand.u32 4294901760, %v11466_v51 }
 0x3f0   : > { %v5020_v11 = vsub.f32 %v11555_v50, %v13943_v46  ;;  %v11653_v46 = vand.u32 4294901760, %v11480_v34 }
 0x3f1   : > { %v4832_v9 = vmul.f32 2.0, %v11487_v41  ;;  %v4828_v47 = vsub.f32 1.0, %v4824_v33  ;;  %v4847_v33 = vsel %vm4845_vm14, %v3047_v3, 0  ;;  %v11589_v15 = vand.u32 4294901760, %v11487_v41  ;;  %13939 = vst [vmem:[#allocation33_spill] sm:$0xff] %v11600_v32 }
 0x3f2   : > { %v5032_v3 = vsub.f32 %v11525_v48, %v13328_v54  ;;  %13945 = vst [vmem:[#allocation27_spill] sm:$0xff] %v11653_v46 }
 0x3f3   : > { %v4840_v13 = vmul.f32 %v4832_v9, %v11487_v41  ;;  %v4836_v40 = vmul.f32 %v4832_v9, %v4828_v47  ;;  %v11546_v4 = vand.u32 4294901760, %v4828_v47  ;;  %v4997_v9 = vand.u32 4294901760, %v4996_v56 }
 0x3f5   : > { %v4844_v5 = vsub.f32 1.0, %v4840_v13  ;;  %v11527_v1 = vand.u32 4294901760, %v4836_v40  ;;  %v11593_v42 = vsub.f32 %v4828_v47, %v11546_v4  ;;  %v11604_v13 = vsub.f32 %v4827_v29, %v11557_v39 }
 0x3f6   : > { %v11619_v29 = vand.u32 4294901760, %v11483_v49 }
 0x3f7   : > { %v11544_v45 = vand.u32 4294901760, %v4844_v5  ;;  %v11549_v25 = vsub.f32 %v4836_v40, %v11527_v1  ;;  %v5002_v40 = vsub.f32 %v11532_v62, %v13327_v24 }
 0x3f8   : > { %13940 = vst [vmem:[#allocation30_spill] sm:$0xff] %v11619_v29  ;;  %v11669_v22 = vsub.f32 %v11483_v49, %v11619_v29 }
 0x3f9   : > { %4867 = vmatprep.subr.mxu0 %v11544_v45  ;;  %v11565_v0 = vsub.f32 %v4844_v5, %v11544_v45  ;;  %v13332_v10 = vand.u32 4294901760, %v11549_v25  ;;  %v11634_v5 = vsub.f32 %v11487_v41, %v11589_v15  ;;  %v13944_v41 = vand.u32 4294901760, %v11561_v36 }
 0x3fa   : > { %4869 = vmatpush1.msra.mxu0 %v11490_v44 }
 0x3fb   : > { %4871 = vmatprep.subr.mxu0 %v11496_v59  ;;  %v13326_v7 = vand.u32 4294901760, %v11565_v0  ;;  %v5014_v12 = vsub.f32 %v11549_v25, %v13332_v10  ;;  %v5003_v10 = vand.u32 4294901760, %v5002_v40  ;;  %v5026_v54 = vsub.f32 %v11561_v36, %v13944_v41 }
 0x3fc   : > { %4873 = vmatpush1.msra.mxu0 %v11468_v16 }
 0x3fd   : > { %4875 = vmatprep.subr.mxu0 %v11527_v1  ;;  %v4990_v47 = vsub.f32 %v11565_v0, %v13326_v7  ;;  %v11625_v7 = vand.u32 4294901760, %v4847_v33  ;;  %v5015_v41 = vand.u32 4294901760, %v5014_v12  ;;  %v5027_v49 = vand.u32 4294901760, %v5026_v54 }
 0x3fe   : > { %4877 = vmatpush1.msra.mxu0 %v11519_v35 }
 0x3ff   : > { %13942 = vst [vmem:[#allocation28_spill] sm:$0xff] %v11625_v7  ;;  %4879 = vmatprep.subr.mxu0 %v11521_v19  ;;  %v4991_v24 = vand.u32 4294901760, %v4990_v47  ;;  %v11643_v47 = vsub.f32 %v11466_v51, %v11600_v32  ;;  %v11656_v51 = vand.u32 4294901760, %v11442_v2  ;;  %v11660_v40 = vsub.f32 %v4847_v33, %v11625_v7 }
 0x400   : > { %4881 = vmatpush1.msra.mxu0 %v11493_v31  ;;  %v13946_v31 = vand.u32 4294901760, %v11593_v42  ;;  %v5021_v33 = vand.u32 4294901760, %v5020_v11  ;;  %v13950_v11 = vand.u32 4294901760, %v11575_v38 }
 0x401   : > { %4883 = vmatprep.subr.mxu0 %v11546_v4  ;;  %4992 = vmatprep.subr.mxu1 %v4991_v24  ;;  %v13947_v24 = vand.u32 4294901760, %v11501_v21 }
 0x402   : > { %4885 = vmatpush1.msra.mxu0 %v11557_v39  ;;  %4998 = vmatpush1.msra.mxu1 %v4997_v9  ;;  %v5038_v56 = vsub.f32 %v11593_v42, %v13946_v31  ;;  %v11680_v31 = vsub.f32 %v11463_v61, %v11622_v60  ;;  %v13949_v9 = vand.u32 4294901760, %v11570_v30  ;;  %v5033_v61 = vand.u32 4294901760, %v5032_v3 }
 0x403   : > { %4887 = vmatprep.subr.mxu0 %v11529_v14  ;;  %5004 = vmatprep.subr.mxu1 %v5003_v10  ;;  %v13948_v14 = vand.u32 4294901760, %v11604_v13  ;;  %v13952_v10 = vand.u32 4294901760, %v11579_v18 }
 0x404   : > { %4889 = vmatpush1.msra.mxu0 %v11535_v8  ;;  %5010 = vmatpush1.msra.mxu1 %v13947_v24  ;;  %v5050_v21 = vsub.f32 %v11570_v30, %v13949_v9  ;;  %v5056_v24 = vsub.f32 %v11575_v38, %v13950_v11  ;;  %v11700_v9 = vsub.f32 %v11305_v28, %v11504_v27  ;;  %v5039_v11 = vand.u32 4294901760, %v5038_v56 }
 0x405   : > { %v5044_v12 = vsub.f32 %v11604_v13, %v13948_v14  ;;  %4891 = vmatprep.subr.mxu0 %v11589_v15  ;;  %5016 = vmatprep.subr.mxu1 %v5015_v41  ;;  %v11691_v14 = vsub.f32 %v11456_v57, %v11514_v58  ;;  %v5074_v54 = vsub.f32 %v11579_v18, %v13952_v10  ;;  %v13954_v57 = vand.u32 4294901760, %v11634_v5 }
 0x406   : > { %4893 = vmatpush1.msra.mxu0 %v11600_v32  ;;  %5022 = vmatpush1.msra.mxu1 %v5021_v33  ;;  %13953 = vst [vmem:[#allocation24_spill] sm:$0xff] %v11700_v9  ;;  %v11709_v33 = vsub.f32 %v11480_v34, %v11653_v46  ;;  %v13955_v28 = vand.u32 4294901760, %v11643_v47  ;;  %v5057_v34 = vand.u32 4294901760, %v5056_v24  ;;  %v11736_v24 = vsub.f32 %v11301_v23, %v11507_v63 }
 0x407   : > { %13951 = vst [vmem:[#allocation2_spill] sm:$0xff] %v11691_v14  ;;  %4895 = vmatprep.subr.mxu0 %v11539_v20  ;;  %5028 = vmatprep.subr.mxu1 %v5027_v49  ;;  %v5062_v32 = vsub.f32 %v11634_v5, %v13954_v57  ;;  %v5045_v10 = vand.u32 4294901760, %v5044_v12  ;;  %v11718_v49 = vsub.f32 %v11442_v2, %v11656_v51  ;;  %v5051_v57 = vand.u32 4294901760, %v5050_v21 }
 0x408   : > { %4897 = vmatpush1.msra.mxu0 %v11511_v55  ;;  %5034 = vmatpush1.msra.mxu1 %v5033_v61  ;;  %v5068_v41 = vsub.f32 %v11643_v47, %v13955_v28  ;;  %v11724_v12 = vsub.f32 %v11434_v26, %v11542_v6  ;;  %v13957_v61 = vand.u32 4294901760, %v11583_v43  ;;  %v13958_v2 = vand.u32 4294901760, %v11660_v40 }
 0x409   : > { %4899 = vmatprep.subr.mxu0 %v11619_v29  ;;  %5040 = vmatprep.subr.mxu1 %v5039_v11  ;;  %v5063_v26 = vand.u32 4294901760, %v5062_v32  ;;  %v13959_v11 = vand.u32 4294901760, %v11669_v22  ;;  %v13960_v21 = vand.u32 4294901760, %v11680_v31  ;;  %v5075_v32 = vand.u32 4294901760, %v5074_v54  ;;  %v3048_v54 = vld [vmem:[%s13042_s3 + $0x18] sm:$0xff] }
 0x40a   : > { %13956 = vst [vmem:[#allocation26_spill] sm:$0xff] %v11724_v12  ;;  %4901 = vmatpush1.msra.mxu0 %v11622_v60  ;;  %5046 = vmatpush1.msra.mxu1 %v5045_v10  ;;  %v5080_v28 = vsub.f32 %v11583_v43, %v13957_v61  ;;  %v4950_v56 = vsub.f32 %v11660_v40, %v13958_v2  ;;  %v5069_v2 = vand.u32 4294901760, %v5068_v41  ;;  %v13341_v61 = vand.u32 4294901760, %v11724_v12 }
 0x40b   : > { %4903 = vmatprep.subr.mxu0 %v11514_v58  ;;  %5052 = vmatprep.subr.mxu1 %v5051_v57  ;;  %v5086_v10 = vsub.f32 %v11669_v22, %v13959_v11  ;;  %v5092_v3 = vsub.f32 %v11680_v31, %v13960_v21  ;;  %v13961_v57 = vand.u32 4294901760, %v11691_v14 }
 0x40c   : > { %4905 = vmatpush1.msra.mxu0 %v11504_v27  ;;  %5058 = vmatpush1.msra.mxu1 %v5057_v34  ;;  %v5081_v41 = vand.u32 4294901760, %v5080_v28  ;;  %v4951_v34 = vand.u32 4294901760, %v4950_v56  ;;  %v13962_v27 = vand.u32 4294901760, %v11700_v9 }
 0x40d   : > { %4907 = vmatprep.subr.mxu0 %v11653_v46  ;;  %5064 = vmatprep.subr.mxu1 %v5063_v26  ;;  %v5098_v11 = vsub.f32 %v11691_v14, %v13961_v57  ;;  %v5087_v26 = vand.u32 4294901760, %v5086_v10  ;;  %v13963_v57 = vand.u32 4294901760, %v11709_v33  ;;  %v5093_v56 = vand.u32 4294901760, %v5092_v3 }
 0x40e   : > { %4909 = vmatpush1.msra.mxu0 %v11656_v51  ;;  %5070 = vmatpush1.msra.mxu1 %v5069_v2  ;;  %v5104_v21 = vsub.f32 %v11700_v9, %v13962_v27  ;;  %v13964_v27 = vand.u32 4294901760, %v11718_v49  ;;  %v5122_v10 = vsub.f32 %v11724_v12, %v13341_v61 }
 0x40f   : > { %4911 = vmatprep.subr.mxu0 %v11542_v6  ;;  %5076 = vmatprep.subr.mxu1 %v5075_v32  ;;  %v5110_v2 = vsub.f32 %v11709_v33, %v13963_v57  ;;  %v5099_v23 = vand.u32 4294901760, %v5098_v11  ;;  %v4850_v32 = vsel %vm4845_vm14, %v3048_v54, 0 }
 0x410   : > { %4913 = vmatpush1.msra.mxu0 %v11507_v63  ;;  %5082 = vmatpush1.msra.mxu1 %v5081_v41  ;;  %v5116_v28 = vsub.f32 %v11718_v49, %v13964_v27  ;;  %v5105_v57 = vand.u32 4294901760, %v5104_v21  ;;  %v13965_v41 = vand.u32 4294901760, %v11736_v24  ;;  %v11781_v61 = vand.u32 4294901760, %v4850_v32 }
 0x411   : > { %5088 = vmatprep.subr.mxu1 %v5087_v26  ;;  %5186 = vmatprep.subr.mxu0 %v11329_v17  ;;  %v5111_v26 = vand.u32 4294901760, %v5110_v2 }
 0x412   : > { %4952 = vmatmul.mubr.f32.vlgmr.msra.gmra.mxu0 %v4951_v34  ;;  %5094 = vmatpush1.msra.mxu1 %v5093_v56  ;;  %v5128_v3 = vsub.f32 %v11736_v24, %v13965_v41  ;;  %v5117_v11 = vand.u32 4294901760, %v5116_v28  ;;  %13967 = vst [vmem:[#allocation19_spill] sm:$0xff] %v11781_v61  ;;  %v5123_v34 = vand.u32 4294901760, %v5122_v10  ;;  %v11792_v21 = vsub.f32 %v4850_v32, %v11781_v61 }
 0x413   : > { %5189 = vmatpush1.msra.mxu0 %v11329_v17  ;;  %5100 = vmatprep.subr.mxu1 %v5099_v23 }
 0x414   : > { %5192 = vmatprep.subr.mxu0 %v11565_v0  ;;  %5106 = vmatpush1.msra.mxu1 %v5105_v57  ;;  %v5129_v17 = vand.u32 4294901760, %v5128_v3  ;;  %v13342_v28 = vand.u32 4294901760, %v11792_v21  ;;  %v13968_v3 = vld [vmem:[#allocation11_spill] sm:$0xff] }
 0x415   : > { %v11778_v27 = vpop.permute.xlu0 %5810  ;;  %v11783_v54 = vpop.permute.xlu1 %5807  ;;  %5195 = vmatpush1.msra.mxu0 %v11517_v53  ;;  %5112 = vmatprep.subr.mxu1 %v5111_v26 }
 0x416   : > { %13966 = vst [vmem:[#allocation18_spill] sm:$0xff] %v11778_v27  ;;  %5198 = vmatprep.subr.mxu0 %v11532_v62  ;;  %5118 = vmatpush1.msra.mxu1 %v5117_v11  ;;  %v4961_v57 = vsub.f32 %v11792_v21, %v13342_v28  ;;  %v13970_v28 = vmov 0.0  }
 0x417   : > { %5201 = vmatpush1.msra.mxu0 %v11473_v52  ;;  %5124 = vmatprep.subr.mxu1 %v5123_v34  ;;  %254 = vst [vmem:[%s13022_s8 + $0x10] sm:$0x1] %v13970_v28 }
 0x418   : > { %5204 = vmatprep.subr.mxu0 %v11549_v25  ;;  %5130 = vmatpush1.msra.mxu1 %v5129_v17  ;;  %v4962_v11 = vand.u32 4294901760, %v4961_v57  ;;  %v13969_v17 = vld [vmem:[#allocation40_spill] sm:$0xff] }
 0x419   : > { %v11788_v23 = vpop.permute.xlu0 %5762  ;;  %v11794_v2 = vpop.permute.xlu1 %5759  ;;  %5207 = vmatpush1.msra.mxu0 %v11555_v50  ;;  %5165 = vmatmul.mubr.f32.vlgmr.msra.gmra.mxu1 %v11625_v7 }
 0x41a   : > { %5210 = vmatprep.subr.mxu0 %v11561_v36  ;;  %7241 = vmatprep.subr.msk.mxu1 %vm4852_vm1, %v13926_v37 }
 0x41b   : > { %5213 = vmatpush1.msra.mxu0 %v11525_v48  ;;  %7242 = vmatpush1.msk.msra.mxu1 %vm4852_vm1, %v13926_v37 }
 0x41c   : > { %5216 = vmatprep.subr.mxu0 %v11593_v42  ;;  %5322 = vmatprep.subr.mxu1 %v11544_v45 }
 0x41d   : > { %v11804_v56 = vpop.permute.xlu0 %5804  ;;  %v11809_v10 = vpop.permute.xlu1 %5756  ;;  %5219 = vmatpush1.msra.mxu0 %v11604_v13  ;;  %5324 = vmatpush1.msra.mxu1 %v11490_v44 }
 0x41e   : > { %5222 = vmatprep.subr.mxu0 %v11570_v30  ;;  %5326 = vmatprep.subr.mxu1 %v11496_v59 }
 0x41f   : > { %5225 = vmatpush1.msra.mxu0 %v11575_v38  ;;  %5328 = vmatpush1.msra.mxu1 %v11468_v16 }
 0x420   : > { %5228 = vmatprep.subr.mxu0 %v11634_v5  ;;  %5330 = vmatprep.subr.mxu1 %v11527_v1 }
 0x421   : > { %v11817_v32 = vpop.permute.xlu0 %5801  ;;  %v11824_v41 = vpop.permute.xlu1 %5753  ;;  %5231 = vmatpush1.msra.mxu0 %v11643_v47  ;;  %5332 = vmatpush1.msra.mxu1 %v11519_v35 }
 0x422   : > { %5234 = vmatprep.subr.mxu0 %v11579_v18  ;;  %5334 = vmatprep.subr.mxu1 %v11521_v19 }
 0x423   : > { %5237 = vmatpush1.msra.mxu0 %v11583_v43  ;;  %5336 = vmatpush1.msra.mxu1 %v13968_v3 }
 0x424   : > { %5240 = vmatprep.subr.mxu0 %v11669_v22  ;;  %5338 = vmatprep.subr.mxu1 %v11546_v4 }
 0x425   : > { %v11832_v26 = vpop.permute.xlu0 %5798  ;;  %v11836_v34 = vpop.permute.xlu1 %5750  ;;  %5243 = vmatpush1.msra.mxu0 %v11680_v31  ;;  %5340 = vmatpush1.msra.mxu1 %v11557_v39 }
 0x426   : > { %5246 = vmatprep.subr.mxu0 %v11691_v14  ;;  %5342 = vmatprep.subr.mxu1 %v13969_v17  ;;  %v13971_v14 = vld [vmem:[#allocation33_spill] sm:$0xff]  ;;  %v13972_v17 = vlaneseq }
 0x427   : > { %4957 = vmatprep.mubr.f32.mxu0 %v13970_v28  ;;  %5249 = vmatpush1.msra.mxu0 %v11700_v9 }
 0x428   : > { %5344 = vmatpush1.msra.mxu1 %v11535_v8  ;;  %4963 = vmatmul.mubr.f32.gmra.mxu0 %v4962_v11  ;;  %v11858_v39 = vand.u32 127, %v13972_v17 }
 0x429   : > { %v11844_v7 = vpop.permute.xlu0 %5795  ;;  %v11847_v57 = vpop.permute.xlu1 %5747  ;;  %5252 = vmatprep.subr.mxu0 %v11709_v33  ;;  %5346 = vmatprep.subr.mxu1 %v11589_v15 }
 0x42a   : > { %5255 = vmatpush1.msra.mxu0 %v11718_v49  ;;  %5348 = vmatpush1.msra.mxu1 %v13971_v14  ;;  %vm13381_vm11 = vcmp.eq.s32.totalorder %v11778_v27, %v11858_v39  ;;  %vm13384_vm6 = vcmp.eq.s32.totalorder %v11783_v54, %v11858_v39  ;;  %vm13383_vm15 = vcmp.eq.s32.totalorder %v11788_v23, %v11858_v39 }
 0x42b   : > { %5258 = vmatprep.subr.mxu0 %v11724_v12  ;;  %5350 = vmatprep.subr.mxu1 %v11539_v20  ;;  %v13973_v12 = vld [vmem:[#allocation13_spill] sm:$0xff]  ;;  %vm13391_vm9 = vcmp.eq.s32.totalorder %v11794_v2, %v11858_v39  ;;  %vm13386_vm5 = vcmp.eq.s32.totalorder %v11804_v56, %v11858_v39  ;;  %vm13397_vm3 = vcmp.eq.s32.totalorder %v11817_v32, %v11858_v39 }
 0x42c   : > { %5261 = vmatpush1.msra.mxu0 %v11736_v24  ;;  %5294 = vmatprep.mubr.f32.mxu0 %v13970_v28  ;;  %vm13398_vm0 = vcmp.eq.s32.totalorder %v11824_v41, %v11858_v39  ;;  %vm13401_vm2 = vcmp.eq.s32.totalorder %v11832_v26, %v11858_v39  ;;  %vm13402_vm7 = vcmp.eq.s32.totalorder %v11836_v34, %v11858_v39 }
 0x42d   : > { %v11855_v9 = vpop.permute.xlu0 %5792  ;;  %v11862_v11 = vpop.permute.xlu1 %5744  ;;  %5352 = vmatpush1.msra.mxu1 %v11511_v55  ;;  %5297 = vmatmul.mubr.f32.vlgmr.msra.gmra.mxu0 %v11660_v40  ;;  %vm13403_vm8 = vcmp.eq.s32.totalorder %v11844_v7, %v11858_v39  ;;  %vm5822_vm12 = vcmp.eq.s32.totalorder %v11847_v57, %v11858_v39 }
 0x42e   : > { %5354 = vmatprep.subr.mxu1 %v11619_v29  ;;  %5429 = vmatprep.subr.mxu0 %v13973_v12  ;;  %v13974_v29 = vand.u32 4294901760, %v11565_v0  ;;  %v13977_v0 = vand.u32 4294901760, %v11532_v62  ;;  %vm13357_vm10 = vcmp.eq.s32.totalorder %v11855_v9, %v11858_v39  ;;  %vm5821_vm13 = vcmp.eq.s32.totalorder %v11862_v11, %v11858_v39 }
 0x42f   : > { %5170 = vmatprep.mubr.f32.mxu1 %v13970_v28  ;;  %5356 = vmatpush1.msra.mxu1 %v11622_v60  ;;  %v13975_v60 = vld [vmem:[#allocation10_spill] sm:$0xff] }
 0x430   : > { %5433 = vmatpush1.msra.mxu0 %v13973_v12  ;;  %5172 = vmatmul.mubr.f32.gmra.mxu1 %v11781_v61  ;;  %v13976_v12 = vand.u32 4294901760, %v11517_v53  ;;  %v7276_v61 = vsel %vm13381_vm11, 1.0, %v13970_v28  ;;  %v13978_v53 = vand.u32 4294901760, %v11473_v52  ;;  %v13982_v52 = vand.u32 4294901760, %v11555_v50 }
 0x431   : > { %v11870_v17 = vpop.permute.xlu0 %5789  ;;  %v11876_v55 = vpop.permute.xlu1 %5741  ;;  %5358 = vmatprep.subr.mxu1 %v11514_v58  ;;  %5437 = vmatprep.subr.mxu0 %v13974_v29  ;;  %v7275_v29 = vsel %vm13384_vm6, 1.0, %v13970_v28  ;;  %v13985_v50 = vand.u32 4294901760, %v11525_v48  ;;  %v13987_v48 = vand.u32 4294901760, %v11604_v13  ;;  %v13990_v13 = vand.u32 4294901760, %v11792_v21 }
 0x432   : > { %5302 = vmatprep.mubr.f32.mxu0 %v13970_v28  ;;  %5360 = vmatpush1.msra.mxu1 %v13975_v60  ;;  %vm5836_vm4 = vcmp.eq.s32.totalorder %v11870_v17, %v11858_v39  ;;  %vm13417_vm14 = vcmp.eq.s32.totalorder %v11876_v55, %v11858_v39 }
 0x433   : > { %5441 = vmatpush1.msra.mxu0 %v13976_v12  ;;  %5362 = vmatprep.subr.mxu1 %v11653_v46  ;;  %v13979_v12 = vand.u32 4294901760, %v11549_v25  ;;  %v11907_v46 = vsub.f32 %v7276_v61, %v7276_v61  ;;  %v13984_v25 = vand.u32 4294901760, %v11561_v36  ;;  %v7260_v61 = vsel %vm13383_vm15, 1.0, %v13970_v28 }
 0x434   : > { %5305 = vmatmul.mubr.f32.gmra.mxu0 %v11792_v21  ;;  %5445 = vmatprep.subr.mxu0 %v13977_v0  ;;  %v11915_v0 = vsub.f32 %v7275_v29, %v7275_v29 }
 0x435   : > { %v11899_v60 = vpop.permute.xlu0 %5786  ;;  %5364 = vmatpush1.msra.mxu1 %v11656_v51  ;;  %5449 = vmatpush1.msra.mxu0 %v13978_v53  ;;  %13980 = vst [vmem:[#allocation7_spill] sm:$0xff] %v11907_v46  ;;  %v11911_v62 = vpop.permute.xlu1 %5738  ;;  %v13983_v53 = vand.u32 4294901760, %v11660_v40  ;;  %v13356_v40 = vand.u32 4294901760, %v11907_v46 }
 0x436   : > { %5366 = vmatprep.subr.mxu1 %v11542_v6  ;;  %5453 = vmatprep.subr.mxu0 %v13979_v12  ;;  %13981 = vst [vmem:[#allocation36_spill] sm:$0xff] %v11915_v0  ;;  %v13986_v12 = vand.u32 4294901760, %v11593_v42  ;;  %v7259_v42 = vsel %vm13391_vm9, 1.0, %v13970_v28 }
 0x437   : > { %5368 = vmatpush1.msra.mxu1 %v11507_v63  ;;  %5401 = vmatprep.mubr.f32.mxu1 %v13970_v28 }
 0x438   : > { %5457 = vmatpush1.msra.mxu0 %v13982_v52  ;;  %5405 = vmatmul.mubr.f32.vlgmr.msra.gmra.mxu1 %v13983_v53  ;;  %v13355_v52 = vand.u32 4294901760, %v11915_v0  ;;  %v11949_v53 = vsub.f32 %v7260_v61, %v7260_v61  ;;  %v7274_v61 = vsel %vm13386_vm5, 1.0, %v13970_v28 }
 0x439   : > { %5461 = vmatprep.subr.mxu0 %v13984_v25  ;;  %7243 = vmatprep.subr.msk.mxu1 %vm4852_vm1, %v13926_v37  ;;  %v11931_v29 = vpop.permute.xlu0 %5783  ;;  %v11937_v36 = vpop.permute.xlu1 %5735 }
 0x43a   : > { %5465 = vmatpush1.msra.mxu0 %v13985_v50  ;;  %7244 = vmatpush1.msk.msra.mxu1 %vm4852_vm1, %v13926_v37  ;;  %13988 = vst [vmem:[#allocation15_spill] sm:$0xff] %v11949_v53  ;;  %vm13394_vm1 = vcmp.eq.s32.totalorder %v11809_v10, %v11858_v39 }
 0x43b   : > { %5469 = vmatprep.subr.mxu0 %v13986_v12  ;;  %5588 = vmatprep.subr.mxu1 %v11544_v45  ;;  %v13989_v45 = vand.u32 4294901760, %v11570_v30  ;;  %v13991_v30 = vand.u32 4294901760, %v11575_v38  ;;  %v7258_v21 = vsel %vm13394_vm1, 1.0, %v13970_v28  ;;  %v11992_v12 = vsub.f32 %v11915_v0, %v13355_v52 }
 0x43c   : > { %5410 = vmatprep.mubr.f32.mxu1 %v13970_v28  ;;  %5473 = vmatpush1.msra.mxu0 %v13987_v48  ;;  %v13993_v38 = vand.u32 4294901760, %v11634_v5  ;;  %v13994_v48 = vand.u32 4294901760, %v11643_v47  ;;  %v7273_v5 = vsel %vm13397_vm3, 1.0, %v13970_v28  ;;  %v12016_v47 = vsub.f32 %v7258_v21, %v7258_v21 }
 0x43d   : > { %5590 = vmatpush1.msra.mxu1 %v11490_v44  ;;  %5477 = vmatprep.subr.mxu0 %v13989_v45  ;;  %v11960_v25 = vpop.permute.xlu0 %5780  ;;  %v11971_v50 = vpop.permute.xlu1 %5732  ;;  %v11976_v44 = vsub.f32 %v11907_v46, %v13356_v40  ;;  %v14006_v40 = vld [vmem:[#allocation40_spill] sm:$0xff] }
 0x43e   : > { %5414 = vmatmul.mubr.f32.gmra.mxu1 %v13990_v13  ;;  %5592 = vmatprep.subr.mxu1 %v11496_v59  ;;  %v11981_v59 = vsub.f32 %v7259_v42, %v7259_v42  ;;  %v12003_v42 = vsub.f32 %v7274_v61, %v7274_v61  ;;  %13997 = vst [vmem:[#allocation4_spill] sm:$0xff] %v12016_v47  ;;  %v13998_v61 = vand.u32 4294901760, %v11583_v43 }
 0x43f   : > { %5481 = vmatpush1.msra.mxu0 %v13991_v30  ;;  %5594 = vmatpush1.msra.mxu1 %v11468_v16  ;;  %v13358_v16 = vand.u32 4294901760, %v11949_v53  ;;  %v12043_v43 = vsub.f32 %v7273_v5, %v7273_v5  ;;  %v7255_v5 = vsel %vm5822_vm12, 1.0, %v13970_v28 }
 0x440   : > { %13992 = vst [vmem:[#allocation32_spill] sm:$0xff] %v11981_v59  ;;  %5485 = vmatprep.subr.mxu0 %v13993_v38  ;;  %5596 = vmatprep.subr.mxu1 %v11527_v1  ;;  %13995 = vst [vmem:[#allocation35_spill] sm:$0xff] %v12003_v42  ;;  %v13996_v1 = vand.u32 4294901760, %v11579_v18  ;;  %v7272_v18 = vsel %vm13401_vm2, 1.0, %v13970_v28  ;;  %v13999_v38 = vand.u32 4294901760, %v11669_v22  ;;  %v14001_v22 = vand.u32 4294901760, %v11680_v31 }
 0x441   : > { %5489 = vmatpush1.msra.mxu0 %v13994_v48  ;;  %5598 = vmatpush1.msra.mxu1 %v11519_v35  ;;  %v7257_v35 = vsel %vm13398_vm0, 1.0, %v13970_v28  ;;  %v12025_v13 = vpop.permute.xlu0 %5777  ;;  %v12038_v21 = vpop.permute.xlu1 %5729  ;;  %14000 = vst [vmem:[#allocation8_spill] sm:$0xff] %v12043_v43  ;;  %v7271_v48 = vsel %vm13403_vm8, 1.0, %v13970_v28  ;;  %v13364_v31 = vand.u32 4294901760, %v12016_v47 }
 0x442   : > { %5493 = vmatprep.subr.mxu0 %v13996_v1  ;;  %5600 = vmatprep.subr.mxu1 %v11521_v19  ;;  %v13359_v19 = vand.u32 4294901760, %v11981_v59  ;;  %v14002_v1 = vld [vmem:[#allocation38_spill] sm:$0xff] }
 0x443   : > { %5497 = vmatpush1.msra.mxu0 %v13998_v61  ;;  %5602 = vmatpush1.msra.mxu1 %v13968_v3  ;;  %v7256_v3 = vsel %vm13402_vm7, 1.0, %v13970_v28  ;;  %v13360_v61 = vand.u32 4294901760, %v12003_v42 }
 0x444   : > { %5501 = vmatprep.subr.mxu0 %v13999_v38  ;;  %5604 = vmatprep.subr.mxu1 %v11546_v4  ;;  %v12058_v4 = vsub.f32 %v7257_v35, %v7257_v35  ;;  %v14004_v38 = vld [vmem:[#allocation2_spill] sm:$0xff]  ;;  %v7270_v35 = vsel %vm13357_vm10, 1.0, %v13970_v28  ;;  %vm13363_vm10 = vcmp.eq.s32.totalorder %v11899_v60, %v11858_v39 }
 0x445   : > { %5505 = vmatpush1.msra.mxu0 %v14001_v22  ;;  %5606 = vmatpush1.msra.mxu1 %v14002_v1  ;;  %v14005_v52 = vand.u32 4294901760, %v14004_v38  ;;  %v12071_v22 = vsub.f32 %v7272_v18, %v7272_v18  ;;  %v14008_v1 = vld [vmem:[#allocation24_spill] sm:$0xff]  ;;  %v7254_v18 = vsel %vm5821_vm13, 1.0, %v13970_v28  ;;  %v14011_v38 = vand.u32 4294901760, %v11709_v33  ;;  %v12124_v45 = vpop.permute.xlu1 %5726 }
 0x446   : > { %14003 = vst [vmem:[#allocation25_spill] sm:$0xff] %v12058_v4  ;;  %5608 = vmatprep.subr.mxu1 %v14006_v40  ;;  %v14009_v30 = vand.u32 4294901760, %v14008_v1  ;;  %v12084_v40 = vsub.f32 %v7271_v48, %v7271_v48  ;;  %v12107_v1 = vpop.permute.xlu0 %5774  ;;  %v14013_v33 = vand.u32 4294901760, %v11718_v49  ;;  %14015 = vst [vmem:[#allocation22_spill] sm:$0xff] %v12124_v45  ;;  %v14016_v49 = vld [vmem:[#allocation26_spill] sm:$0xff]  ;;  %v14019_v48 = vand.u32 4294901760, %v11736_v24  ;;  %5562 = vmatprep.mubr.f32.mxu0 %v13970_v28 }
 0x447   : > { %5509 = vmatprep.subr.mxu0 %v14005_v52  ;;  %14007 = vst [vmem:[#allocation21_spill] sm:$0xff] %v12071_v22  ;;  %5610 = vmatpush1.msra.mxu1 %v11535_v8  ;;  %v12082_v52 = vsub.f32 %v7256_v3, %v7256_v3  ;;  %v7269_v8 = vsel %vm5836_vm4, 1.0, %v13970_v28  ;;  %v12104_v3 = vsub.f32 %v11949_v53, %v13358_v16  ;;  %v14027_v24 = vand.u32 4294901760, %v12058_v4 }
 0x448   : > { %5513 = vmatpush1.msra.mxu0 %v14009_v30  ;;  %5612 = vmatprep.subr.mxu1 %v11589_v15  ;;  %v12095_v30 = vsub.f32 %v7255_v5, %v7255_v5  ;;  %v12113_v5 = vsub.f32 %v7270_v35, %v7270_v35  ;;  %v12122_v16 = vsub.f32 %v11981_v59, %v13359_v19  ;;  %v7268_v35 = vsel %vm13363_vm10, 1.0, %v13970_v28  ;;  %v14034_v19 = vld [vmem:[#allocation10_spill] sm:$0xff] }
 0x449   : > { %14010 = vst [vmem:[#allocation16_spill] sm:$0xff] %v12082_v52  ;;  %5517 = vmatprep.subr.mxu0 %v14011_v38  ;;  %5614 = vmatpush1.msra.mxu1 %v13971_v14  ;;  %v7253_v38 = vsel %vm13417_vm14, 1.0, %v13970_v28  ;;  %v12129_v14 = vsub.f32 %v7254_v18, %v7254_v18  ;;  %v12138_v15 = vsub.f32 %v12003_v42, %v13360_v61  ;;  %v14021_v61 = vld [vmem:[#allocation9_spill] sm:$0xff]  ;;  %v14022_v42 = vld [vmem:[#allocation28_spill] sm:$0xff] }
 0x44a   : > { %14012 = vst [vmem:[#allocation34_spill] sm:$0xff] %v12095_v30  ;;  %5521 = vmatpush1.msra.mxu0 %v14013_v33  ;;  %14014 = vst [vmem:[#allocation17_spill] sm:$0xff] %v12113_v5  ;;  %v14017_v33 = vand.u32 4294901760, %v14016_v49  ;;  %5616 = vmatprep.subr.mxu1 %v11539_v20  ;;  %v12145_v18 = vsub.f32 %v7269_v8, %v7269_v8  ;;  %v12150_v49 = vsub.f32 %v12016_v47, %v13364_v31  ;;  %v14025_v31 = vld [vmem:[#allocation30_spill] sm:$0xff]  ;;  %v14028_v47 = vld [vmem:[#allocation29_spill] sm:$0xff]  ;;  %v12186_v59 = vpop.permute.xlu0 %5771 }
 0x44b   : > { %14018 = vst [vmem:[#allocation39_spill] sm:$0xff] %v12129_v14  ;;  %5618 = vmatpush1.msra.mxu1 %v14021_v61  ;;  %vm13382_vm10 = vcmp.eq.s32.totalorder %v11911_v62, %v11858_v39  ;;  %v14024_v8 = vand.u32 4294901760, %v12043_v43  ;;  %v6048_v61 = vand.u32 4294901760, %v12104_v3  ;;  %5667 = vmatprep.mubr.f32.mxu1 %v13970_v28  ;;  %14030 = vst [vmem:[#allocation23_spill] sm:$0xff] %v12186_v59 }
 0x44c   : > { %5525 = vmatprep.subr.mxu0 %v14017_v33  ;;  %14020 = vst [vmem:[#allocation14_spill] sm:$0xff] %v12145_v18  ;;  %5620 = vmatprep.subr.mxu1 %v14025_v31  ;;  %v12167_v33 = vsub.f32 %v7268_v35, %v7268_v35  ;;  %v6062_v0 = vand.u32 4294901760, %v12150_v49  ;;  %v14038_v49 = vand.u32 4294901760, %v12113_v5 }
 0x44d   : > { %5529 = vmatpush1.msra.mxu0 %v14019_v48  ;;  %v12156_v48 = vsub.f32 %v7253_v38, %v7253_v38  ;;  %v12163_v20 = vsub.f32 %v12043_v43, %v14024_v8  ;;  %v12173_v38 = vsub.f32 %v12058_v4, %v14027_v24  ;;  %5622 = vmatpush1.msra.mxu1 %v14028_v47  ;;  %v14029_v43 = vand.u32 4294901760, %v12071_v22 }
 0x44e   : > { %5564 = vmatmul.mubr.f32.vlgmr.msra.gmra.mxu0 %v14022_v42  ;;  %14026 = vst [vmem:[#allocation6_spill] sm:$0xff] %v12167_v33  ;;  %5624 = vmatprep.subr.mxu1 %v11514_v58  ;;  %v7252_v47 = vsel %vm13382_vm10, 1.0, %v13970_v28  ;;  %v14031_v24 = vand.u32 4294901760, %v12082_v52  ;;  %v12207_v58 = vpop.permute.xlu1 %5723  ;;  %v13385_v8 = vand.u32 4294901760, %v12145_v18  ;;  %vm13392_vm10 = vcmp.eq.s32.totalorder %v11937_v36, %v11858_v39 }
 0x44f   : > { %14023 = vst [vmem:[#allocation20_spill] sm:$0xff] %v12156_v48  ;;  %5569 = vmatprep.mubr.f32.mxu0 %v13970_v28  ;;  %v12184_v3 = vsub.f32 %v12071_v22, %v14029_v43  ;;  %7375 = vmatprep.subr.msk.mxu0 %vm13381_vm11, %v13926_v37  ;;  %v14032_v43 = vand.u32 4294901760, %v12084_v40  ;;  %14033 = vst [vmem:[#allocation12_spill] sm:$0xff] %v12207_v58  ;;  %v14035_v22 = vld [vmem:[#allocation19_spill] sm:$0xff]  ;;  %vm5834_vm11 = vcmp.eq.s32.totalorder %v11931_v29, %v11858_v39 }
 0x450   : > { %v12200_v35 = vsub.f32 %v12082_v52, %v14031_v24  ;;  %5626 = vmatpush1.msra.mxu1 %v14034_v19  ;;  %v14036_v52 = vand.u32 4294901760, %v12095_v30  ;;  %7376 = vmatpush3.msk.msra.mxu0 %vm13383_vm15, %v13926_v37  ;;  %v12231_v24 = vsub.f32 %v12113_v5, %v14038_v49  ;;  %v14040_v4 = vand.u32 4294901760, %v12129_v14 }
 0x451   : > { %v12205_v31 = vsub.f32 %v12084_v40, %v14032_v43  ;;  %v14037_v43 = vld [vmem:[#allocation27_spill] sm:$0xff]  ;;  %7377 = vmatprep.subr.msk.mxu0 %vm13384_vm6, %v13926_v37  ;;  %vm5833_vm15 = vcmp.eq.s32.totalorder %v11960_v25, %v11858_v39  ;;  %v12261_v19 = vsub.f32 %v12145_v18, %v13385_v8  ;;  %vm13393_vm6 = vcmp.eq.s32.totalorder %v11971_v50, %v11858_v39 }
 0x452   : > { %5571 = vmatmul.mubr.f32.gmra.mxu0 %v14035_v22  ;;  %v12218_v53 = vsub.f32 %v12095_v30, %v14036_v52  ;;  %5628 = vmatprep.subr.mxu1 %v14037_v43  ;;  %v12235_v43 = vsub.f32 %v7252_v47, %v7252_v47  ;;  %v12247_v49 = vsub.f32 %v12129_v14, %v14040_v4  ;;  %v12275_v47 = vpop.permute.xlu0 %5768  ;;  %v14042_v8 = vand.u32 4294901760, %v12156_v48  ;;  %v12292_v18 = vpop.permute.xlu1 %5720 }
 0x453   : > { %5630 = vmatpush1.msra.mxu1 %v11656_v51  ;;  %7378 = vmatpush3.msk.msra.mxu0 %vm13391_vm9, %v13926_v37  ;;  %14041 = vst [vmem:[#allocation5_spill] sm:$0xff] %v12275_v47  ;;  %v7251_v51 = vsel %vm13392_vm10, 1.0, %v13970_v28  ;;  %v14043_v52 = vand.u32 4294901760, %v11976_v44  ;;  %14044 = vst [vmem:[#allocation31_spill] sm:$0xff] %v12292_v18  ;;  %v7266_v44 = vsel %vm5833_vm15, 1.0, %v13970_v28  ;;  %vm5816_vm9 = vcmp.eq.s32.totalorder %v12038_v21, %v11858_v39 }
 0x454   : > { %14039 = vst [vmem:[#allocation37_spill] sm:$0xff] %v12235_v43  ;;  %5632 = vmatprep.subr.mxu1 %v11542_v6  ;;  %v7267_v6 = vsel %vm5834_vm11, 1.0, %v13970_v28  ;;  %7379 = vmatprep.subr.msk.mxu0 %vm13386_vm5, %v13926_v37  ;;  %vm5832_vm5 = vcmp.eq.s32.totalorder %v12025_v13, %v11858_v39  ;;  %vm5831_vm10 = vcmp.eq.s32.totalorder %v12107_v1, %v11858_v39 }
 0x455   : > { %5634 = vmatpush1.msra.mxu1 %v11507_v63  ;;  %v12280_v63 = vsub.f32 %v12156_v48, %v14042_v8  ;;  %v14045_v8 = vand.u32 4294901760, %v12167_v33  ;;  %v12308_v4 = vsub.f32 %v7267_v6, %v7267_v6  ;;  %7380 = vmatpush3.msk.msra.mxu0 %vm13394_vm1, %v13926_v37  ;;  %v12323_v6 = vsub.f32 %v7251_v51, %v7251_v51 }
 0x456   : > { %5669 = vmatmul.mubr.f32.vlgmr.msra.gmra.mxu1 %v14022_v42  ;;  %7416 = vmatprep.subr.mxu1 %v14043_v52  ;;  %v14047_v42 = vand.u32 4294901760, %v11992_v12  ;;  %v7265_v52 = vsel %vm5832_vm5, 1.0, %v13970_v28  ;;  %v14049_v12 = vand.u32 4294901760, %v12122_v16  ;;  %v12339_v51 = vsub.f32 %v7266_v44, %v7266_v44 }
 0x457   : > { %v12297_v48 = vsub.f32 %v12167_v33, %v14045_v8  ;;  %5674 = vmatprep.mubr.f32.mxu1 %v13970_v28  ;;  %7417 = vmatpush3.msra.mxu1 %v6048_v61  ;;  %14046 = vst [vmem:[#allocation3_spill] sm:$0xff] %v12308_v4  ;;  %v7250_v8 = vsel %vm13393_vm6, 1.0, %v13970_v28  ;;  %14048 = vst [vmem:[#allocation11_spill] sm:$0xff] %v12323_v6  ;;  %vm5815_vm6 = vcmp.eq.s32.totalorder %v12124_v45, %v11858_v39 }
 0x458   : > { %7418 = vmatprep.subr.mxu1 %v14047_v42  ;;  %7381 = vmatprep.subr.msk.mxu0 %vm13397_vm3, %v13926_v37  ;;  %14050 = vst [vmem:[#allocation33_spill] sm:$0xff] %v12339_v51  ;;  %v7249_v16 = vsel %vm5816_vm9, 1.0, %v13970_v28  ;;  %vm5830_vm1 = vcmp.eq.s32.totalorder %v12186_v59, %v11858_v39  ;;  %v12350_v33 = vsub.f32 %v7250_v8, %v7250_v8  ;;  %v12367_v8 = vpop.permute.xlu0 %5765  ;;  %v7248_v61 = vsel %vm5815_vm6, 1.0, %v13970_v28 }
 0x459   : > { %7419 = vmatpush3.msra.mxu1 %v14049_v12  ;;  %v14051_v12 = vand.u32 4294901760, %v12138_v15  ;;  %7382 = vmatpush3.msk.msra.mxu0 %vm13398_vm0, %v13926_v37  ;;  %vm13404_vm3 = vcmp.eq.s32.totalorder %v12207_v58, %v11858_v39  ;;  %v14053_v15 = vand.u32 4294901760, %v12235_v43  ;;  %14054 = vst [vmem:[#allocation38_spill] sm:$0xff] %v12367_v8  ;;  %vm5829_vm0 = vcmp.eq.s32.totalorder %v12275_v47, %v11858_v39 }
 0x45a   : > { %5676 = vmatmul.mubr.f32.gmra.mxu1 %v14035_v22  ;;  %14052 = vst [vmem:[#allocation13_spill] sm:$0xff] %v12350_v33  ;;  %v7264_v22 = vsel %vm5831_vm10, 1.0, %v13970_v28  ;;  %7383 = vmatprep.subr.msk.mxu0 %vm13401_vm2, %v13926_v37  ;;  %v14059_v42 = vand.u32 4294901760, %v12173_v38  ;;  %vm5813_vm2 = vcmp.eq.s32.totalorder %v12292_v18, %v11858_v39  ;;  %v7247_v38 = vsel %vm13404_vm3, 1.0, %v13970_v28 }
 0x45b   : > { %7420 = vmatprep.subr.mxu1 %v14051_v12  ;;  %v12365_v44 = vsub.f32 %v12235_v43, %v14053_v15  ;;  %v14056_v12 = vand.u32 4294901760, %v12163_v20  ;;  %v7263_v43 = vsel %vm5830_vm1, 1.0, %v13970_v28  ;;  %7384 = vmatpush3.msk.msra.mxu0 %vm13402_vm7, %v13926_v37  ;;  %v12401_v15 = vsub.f32 %v7264_v22, %v7264_v22 }
 0x45c   : > { %7421 = vmatpush3.msra.mxu1 %v6062_v0  ;;  %v12369_v0 = vsub.f32 %v7265_v52, %v7265_v52  ;;  %v12384_v52 = vpop.permute.xlu1 %5717  ;;  %7385 = vmatprep.subr.msk.mxu0 %vm13403_vm8, %v13926_v37  ;;  %vm5828_vm7 = vcmp.eq.s32.totalorder %v12367_v8, %v11858_v39  ;;  %v12417_v20 = vsub.f32 %v7248_v61, %v7248_v61  ;;  %v14064_v22 = vand.u32 4294901760, %v12205_v31 }
 0x45d   : > { %7422 = vmatprep.subr.mxu1 %v14056_v12  ;;  %14057 = vst [vmem:[#allocation40_spill] sm:$0xff] %v12384_v52  ;;  %v12387_v12 = vsub.f32 %v7249_v16, %v7249_v16  ;;  %14060 = vst [vmem:[#allocation26_spill] sm:$0xff] %v12401_v15  ;;  %v14061_v16 = vand.u32 4294901760, %v12184_v3  ;;  %v14063_v3 = vand.u32 4294901760, %v12200_v35  ;;  %7386 = vmatpush3.msk.msra.mxu0 %vm5822_vm12, %v13926_v37  ;;  %v7246_v35 = vsel %vm5813_vm2, 1.0, %v13970_v28 }
 0x45e   : > { %14055 = vst [vmem:[#allocation2_spill] sm:$0xff] %v12369_v0  ;;  %7423 = vmatpush3.msra.mxu1 %v14059_v42  ;;  %14062 = vst [vmem:[#allocation9_spill] sm:$0xff] %v12417_v20  ;;  %vm13460_vm8 = vcmp.eq.s32.totalorder %v12384_v52, %v11858_v39  ;;  %v12433_v61 = vsub.f32 %v7263_v43, %v7263_v43  ;;  %vm14066_vm3 = vcmp.eq.s32.totalorder %v11855_v9, %v11858_v39 }
 0x45f   : > { %14058 = vst [vmem:[#allocation24_spill] sm:$0xff] %v12387_v12  ;;  %7424 = vmatprep.subr.mxu1 %v14061_v16  ;;  %v7262_v16 = vsel %vm5829_vm0, 1.0, %v13970_v28  ;;  %7387 = vmatprep.subr.msk.mxu0 %vm14066_vm3, %v13926_v37  ;;  %v14068_v43 = vand.u32 4294901760, %v12218_v53  ;;  %v7261_v5 = vsel %vm5828_vm7, 1.0, %v13970_v28  ;;  %v14071_v31 = vand.u32 4294901760, %v12231_v24 }
 0x460   : > { %7425 = vmatpush3.msra.mxu1 %v14063_v3  ;;  %14065 = vst [vmem:[#allocation28_spill] sm:$0xff] %v12433_v61  ;;  %v14067_v3 = vand.u32 4294901760, %v12308_v4  ;;  %7388 = vmatpush3.msk.msra.mxu0 %vm5821_vm13, %v13926_v37  ;;  %v12465_v53 = vsub.f32 %v7262_v16, %v7262_v16  ;;  %v14074_v16 = vand.u32 4294901760, %v12247_v49  ;;  %v14076_v30 = vand.u32 4294901760, %v12350_v33 }
 0x461   : > { %7426 = vmatprep.subr.mxu1 %v14064_v22  ;;  %v12450_v22 = vsub.f32 %v7247_v38, %v7247_v38  ;;  %7389 = vmatprep.subr.msk.mxu0 %vm5836_vm4, %v13926_v37  ;;  %v7245_v38 = vsel %vm13460_vm8, 1.0, %v13970_v28  ;;  %vm14078_vm3 = vcmp.eq.s32.totalorder %v11899_v60, %v11858_v39 }
 0x462   : > { %v6222_v42 = vsub.f32 %v12308_v4, %v14067_v3  ;;  %7427 = vmatpush3.msra.mxu1 %v14068_v43  ;;  %v14070_v3 = vand.u32 4294901760, %v12323_v6  ;;  %14072 = vst [vmem:[#allocation29_spill] sm:$0xff] %v12465_v53  ;;  %v14073_v43 = vand.u32 4294901760, %v12339_v51  ;;  %7390 = vmatpush3.msk.msra.mxu0 %vm13417_vm14, %v13926_v37  ;;  %vm14082_vm14 = vcmp.eq.s32.totalorder %v11911_v62, %v11858_v39 }
 0x463   : > { %14069 = vst [vmem:[#allocation30_spill] sm:$0xff] %v12450_v22  ;;  %7428 = vmatprep.subr.mxu1 %v14071_v31  ;;  %v12482_v31 = vsub.f32 %v7246_v35, %v7246_v35  ;;  %7391 = vmatprep.subr.msk.mxu0 %vm14078_vm3, %v13926_v37  ;;  %v12498_v35 = vsub.f32 %v7261_v5, %v7261_v5  ;;  %v14084_v5 = vand.u32 4294901760, %v12387_v12 }
 0x464   : > { %v6110_v14 = vsub.f32 %v12323_v6, %v14070_v3  ;;  %v6229_v4 = vsub.f32 %v12339_v51, %v14073_v43  ;;  %7429 = vmatpush3.msra.mxu1 %v14074_v16  ;;  %v6104_v6 = vand.u32 4294901760, %v12365_v44  ;;  %v6117_v43 = vsub.f32 %v12350_v33, %v14076_v30  ;;  %7392 = vmatpush3.msk.msra.mxu0 %vm14082_vm14, %v13926_v37 }
 0x465   : > { %14075 = vst [vmem:[#allocation10_spill] sm:$0xff] %v12482_v31  ;;  %v14077_v3 = vand.u32 4294901760, %v12261_v19  ;;  %v6223_v49 = vand.u32 4294901760, %v6222_v42  ;;  %14079 = vst [vmem:[#allocation19_spill] sm:$0xff] %v12498_v35  ;;  %v14080_v16 = vand.u32 4294901760, %v12369_v0  ;;  %v13421_v44 = vand.u32 4294901760, %v12433_v61  ;;  %7393 = vmatprep.subr.msk.mxu0 %vm5834_vm11, %v13926_v37 }
 0x466   : > { %v14081_v30 = vand.u32 4294901760, %v12280_v63  ;;  %v6111_v19 = vand.u32 4294901760, %v6110_v14  ;;  %v12511_v42 = vsub.f32 %v7245_v38, %v7245_v38  ;;  %v6230_v63 = vand.u32 4294901760, %v6229_v4 }
 0x467   : > { %7430 = vmatprep.subr.mxu1 %v14077_v3  ;;  %v6236_v24 = vsub.f32 %v12369_v0, %v14080_v16  ;;  %v6124_v3 = vsub.f32 %v12387_v12, %v14084_v5  ;;  %v14085_v16 = vand.u32 4294901760, %v12297_v48  ;;  %v13420_v14 = vand.u32 4294901760, %v12465_v53 }
 0x468   : > { %7431 = vmatpush3.msra.mxu1 %v14081_v30  ;;  %14083 = vst [vmem:[#allocation27_spill] sm:$0xff] %v12511_v42  ;;  %v14086_v30 = vand.u32 4294901760, %v12401_v15  ;;  %vm14087_vm14 = vcmp.eq.s32.totalorder %v11937_v36, %v11858_v39  ;;  %v6118_v48 = vand.u32 4294901760, %v6117_v43  ;;  %v14088_v5 = vand.u32 4294901760, %v12417_v20 }
 0x469   : > { %7432 = vmatprep.subr.mxu1 %v14085_v16  ;;  %7394 = vmatpush3.msk.msra.mxu0 %vm14087_vm14, %v13926_v37  ;;  %v6237_v4 = vand.u32 4294901760, %v6236_v24  ;;  %v13418_v43 = vand.u32 4294901760, %v12511_v42  ;;  %vm14089_vm3 = vcmp.eq.s32.totalorder %v11971_v50, %v11858_v39  ;;  %vm14092_vm14 = vcmp.eq.s32.totalorder %v12207_v58, %v11858_v39 }
 0x46a   : > { %v6243_v51 = vsub.f32 %v12401_v15, %v14086_v30  ;;  %7433 = vmatpush3.msra.mxu1 %v6104_v6  ;;  %v6131_v16 = vsub.f32 %v12417_v20, %v14088_v5  ;;  %7395 = vmatprep.subr.msk.mxu0 %vm5833_vm15, %v13926_v37  ;;  %v6250_v6 = vsub.f32 %v12433_v61, %v13421_v44  ;;  %v13419_v30 = vand.u32 4294901760, %v12498_v35 }
 0x46b   : > { %7434 = vmatprep.subr.mxu1 %v6223_v49  ;;  %7396 = vmatpush3.msk.msra.mxu0 %vm14089_vm3, %v13926_v37  ;;  %v6125_v49 = vand.u32 4294901760, %v6124_v3  ;;  %v14090_v5 = vand.u32 4294901760, %v12450_v22  ;;  %vm14093_vm3 = vcmp.eq.s32.totalorder %v11778_v27, %v11858_v39 }
 0x46c   : > { %7435 = vmatpush3.msra.mxu1 %v6111_v19  ;;  %7397 = vmatprep.subr.msk.mxu0 %vm5832_vm5, %v13926_v37  ;;  %v6244_v24 = vand.u32 4294901760, %v6243_v51  ;;  %v6257_v19 = vsub.f32 %v12465_v53, %v13420_v14  ;;  %v6132_v3 = vand.u32 4294901760, %v6131_v16  ;;  %v6251_v51 = vand.u32 4294901760, %v6250_v6 }
 0x46d   : > { %v6138_v38 = vsub.f32 %v12450_v22, %v14090_v5  ;;  %7436 = vmatprep.subr.mxu1 %v6230_v63  ;;  %7398 = vmatpush3.msk.msra.mxu0 %vm5816_vm9, %v13926_v37  ;;  %v14091_v5 = vand.u32 4294901760, %v12482_v31 }
 0x46e   : > { %7437 = vmatpush3.msra.mxu1 %v6118_v48  ;;  %7399 = vmatprep.subr.msk.mxu0 %vm5831_vm10, %v13926_v37  ;;  %v6264_v48 = vsub.f32 %v12498_v35, %v13419_v30  ;;  %v6258_v6 = vand.u32 4294901760, %v6257_v19 }
 0x46f   : > { %v6145_v63 = vsub.f32 %v12482_v31, %v14091_v5  ;;  %7438 = vmatprep.subr.mxu1 %v6237_v4  ;;  %7400 = vmatpush3.msk.msra.mxu0 %vm5815_vm6, %v13926_v37  ;;  %v6139_v16 = vand.u32 4294901760, %v6138_v38  ;;  %v6152_v4 = vsub.f32 %v12511_v42, %v13418_v43 }
 0x470   : > { %7439 = vmatpush3.msra.mxu1 %v6125_v49  ;;  %7401 = vmatprep.subr.msk.mxu0 %vm5830_vm1, %v13926_v37  ;;  %v6265_v38 = vand.u32 4294901760, %v6264_v48 }
 0x471   : > { %7440 = vmatprep.subr.mxu1 %v6244_v24  ;;  %7402 = vmatpush3.msk.msra.mxu0 %vm14092_vm14, %v13926_v37  ;;  %v6146_v49 = vand.u32 4294901760, %v6145_v63  ;;  %v6153_v24 = vand.u32 4294901760, %v6152_v4  ;;  %vm14097_vm14 = vcmp.eq.s32.totalorder %v11788_v23, %v11858_v39 }
 0x472   : > { %7441 = vmatpush3.msra.mxu1 %v6132_v3  ;;  %7403 = vmatprep.subr.msk.mxu0 %vm5829_vm0, %v13926_v37 }
 0x473   : > { %7442 = vmatprep.subr.mxu1 %v6251_v51  ;;  %7404 = vmatpush3.msk.msra.mxu0 %vm5813_vm2, %v13926_v37 }
 0x474   : > { %7443 = vmatpush3.msra.mxu1 %v6139_v16  ;;  %7405 = vmatprep.subr.msk.mxu0 %vm5828_vm7, %v13926_v37 }
 0x475   : > { %7444 = vmatprep.subr.mxu1 %v6258_v6  ;;  %7406 = vmatpush3.msk.msra.mxu0 %vm13460_vm8, %v13926_v37  ;;  %vm14099_vm8 = vcmp.eq.s32.totalorder %v11794_v2, %v11858_v39 }
 0x476   : > { %7445 = vmatpush3.msra.mxu1 %v6146_v49  ;;  %7457 = vmatprep.subr.mxu0 %v11907_v46 }
 0x477   : > { %7446 = vmatprep.subr.mxu1 %v6265_v38 }
 0x478   : > { %7447 = vmatpush3.msra.mxu1 %v6153_v24 }
 0x479   : > { %7498 = vmatprep.subr.msk.mxu1 %vm14093_vm3, %v13926_v37  ;;  %vm14098_vm3 = vcmp.eq.s32.totalorder %v11783_v54, %v11858_v39 }
 0x4d2   : > { %v4953_v19 = vpop.f32.mrf.mxu0 }
 0x4d4   : > { %v4955_v3 = vpop.f32.mrf.mxu0 }
 0x4d9   : > { %v5166_v51 = vpop.f32.mrf.mxu1 }
 0x4da   : > { %v5167_v44 = vadd.f32 %v5166_v51, %v4953_v19 }
 0x4db   : > { %v5168_v16 = vpop.f32.mrf.mxu1 }
 0x4dc   : > { %v5169_v35 = vadd.f32 %v5168_v16, %v4955_v3 }
 0x4e8   : > { %v4964_v5 = vpop.f32.mrf.mxu0 }
 0x4ea   : > { %v4966_v63 = vpop.f32.mrf.mxu0 }
 0x4ed   : > { %v5298_v48 = vpop.f32.mrf.mxu0 }
 0x4ee   : > { %v5299_v31 = vadd.f32 %v5298_v48, %v5167_v44  ;;  %v14109_v48 = vld [vmem:[#allocation32_spill] sm:$0xff] }
 0x4ef   : > { %v5300_v6 = vpop.f32.mrf.mxu0 }
 0x4f0   : > { %v5173_v4 = vpop.f32.mrf.mxu1  ;;  %v5301_v22 = vadd.f32 %v5300_v6, %v5169_v35  ;;  %v14112_v6 = vld [vmem:[#allocation4_spill] sm:$0xff] }
 0x4f1   : > { %v5174_v53 = vadd.f32 %v5173_v4, %v4964_v5  ;;  %v14110_v4 = vld [vmem:[#allocation35_spill] sm:$0xff] }
 0x4f2   : > { %v5175_v49 = vpop.f32.mrf.mxu1 }
 0x4f3   : > { %v5176_v61 = vadd.f32 %v5175_v49, %v4966_v63  ;;  %v14107_v63 = vld [vmem:[#allocation36_spill] sm:$0xff] }
 0x4f4   : > { %v5306_v43 = vpop.f32.mrf.mxu0  ;;  %v14113_v49 = vld [vmem:[#allocation8_spill] sm:$0xff] }
 0x4f5   : > { %v5307_v52 = vadd.f32 %v5306_v43, %v5174_v53  ;;  %v14175_v57 = vand.u32 4294901760, %v14113_v49 }
 0x4f6   : > { %v5308_v30 = vpop.f32.mrf.mxu0 }
 0x4f7   : > { %v5309_v18 = vadd.f32 %v5308_v30, %v5176_v61  ;;  %v14105_v30 = vld [vmem:[#allocation15_spill] sm:$0xff] }
 0x4f8   : > { %v5406_v38 = vpop.f32.mrf.mxu1 }
 0x4f9   : > { %v5407_v20 = vadd.f32 %v5406_v38, %v5299_v31  ;;  %v14114_v38 = vld [vmem:[#allocation25_spill] sm:$0xff] }
 0x4fa   : > { %v5408_v14 = vpop.f32.mrf.mxu1 }
 0x4fb   : > { %v5409_v12 = vadd.f32 %v5408_v14, %v5301_v22 }
 0x4fe   : > { %v5415_v46 = vpop.f32.mrf.mxu1 }
 0x4ff   : > { %v5416_v33 = vadd.f32 %v5415_v46, %v5307_v52 }
 0x500   : > { %v5417_v27 = vpop.f32.mrf.mxu1 }
 0x501   : > { %v5418_v51 = vadd.f32 %v5417_v27, %v5309_v18 }
 0x50e   : > { %v5565_v24 = vpop.f32.mrf.mxu0 }
 0x50f   : > { %v5566_v8 = vadd.f32 %v5565_v24, %v5407_v20  ;;  %v14116_v24 = vld [vmem:[#allocation21_spill] sm:$0xff] }
 0x510   : > { %v5567_v42 = vpop.f32.mrf.mxu0  ;;  %v14178_v11 = vand.u32 4294901760, %v14116_v24 }
 0x511   : > { %v5568_v47 = vadd.f32 %v5567_v42, %v5409_v12 }
 0x512   : > { %v5572_v15 = vpop.f32.mrf.mxu0 }
 0x513   : > { %v5573_v45 = vadd.f32 %v5572_v15, %v5416_v33 }
 0x514   : > { %v5574_v59 = vpop.f32.mrf.mxu0 }
 0x515   : > { %v5575_v5 = vadd.f32 %v5574_v59, %v5418_v51  ;;  %v14120_v51 = vld [vmem:[#allocation34_spill] sm:$0xff] }
 0x516   : > { %v5670_v0 = vpop.f32.mrf.mxu1 }
 0x517   : > { %v5671_v58 = vadd.f32 %v5670_v0, %v5566_v8 }
 0x518   : > { %v5672_v19 = vpop.f32.mrf.mxu1 }
 0x519   : > { %v12607_v3 = vand.u32 4294901760, %v5671_v58  ;;  %v5673_v44 = vadd.f32 %v5672_v19, %v5568_v47  ;;  %v14118_v19 = vld [vmem:[#allocation16_spill] sm:$0xff] }
 0x51a   : > { %v5677_v35 = vpop.f32.mrf.mxu1  ;;  %v14180_v17 = vand.u32 4294901760, %v14118_v19 }
 0x51b   : > { %14094 = vst [vmem:[#allocation41_spill] sm:$0xff] %v12607_v3  ;;  %v12610_v31 = vsub.f32 %v5671_v58, %v12607_v3  ;;  %v12612_v53 = vand.u32 4294901760, %v5673_v44  ;;  %v5678_v20 = vadd.f32 %v5677_v35, %v5573_v45  ;;  %v14123_v35 = vld [vmem:[#allocation39_spill] sm:$0xff] }
 0x51c   : > { %v5679_v22 = vpop.f32.mrf.mxu1 }
 0x51d   : > { %v13463_v46 = vand.u32 4294901760, %v12610_v31  ;;  %v6008_v8 = vsub.f32 %v5673_v44, %v12612_v53  ;;  %v12616_v0 = vand.u32 4294901760, %v5678_v20  ;;  %v5680_v27 = vadd.f32 %v5679_v22, %v5575_v5  ;;  %6268 = vmatprep.mubr.f32.mxu1 %v12612_v53  ;;  %v14122_v44 = vld [vmem:[#allocation17_spill] sm:$0xff]  ;;  %v14125_v5 = vld [vmem:[#allocation14_spill] sm:$0xff] }
 0x51e   : > { %6270 = vmatmul.mubr.f32.vlgmr.msra.gmra.mxu1 %v12607_v3  ;;  %v14127_v22 = vld [vmem:[#allocation6_spill] sm:$0xff]  ;;  %v14188_v29 = vand.u32 4294901760, %v14125_v5 }
 0x51f   : > { %14095 = vst [vmem:[#allocation42_spill] sm:$0xff] %v12616_v0  ;;  %v12621_v59 = vsub.f32 %v5678_v20, %v12616_v0  ;;  %v12623_v18 = vand.u32 4294901760, %v5680_v27  ;;  %7499 = vmatpush3.msk.msra.mxu1 %vm14097_vm14, %v13926_v37  ;;  %v6009_v45 = vand.u32 4294901760, %v6008_v8  ;;  %v6016_v33 = vsub.f32 %v12610_v31, %v13463_v46  ;;  %v14126_v20 = vld [vmem:[#allocation20_spill] sm:$0xff]  ;;  %v14146_v3 = vld [vmem:[#allocation18_spill] sm:$0xff] }
 0x520   : > { %7500 = vmatprep.subr.msk.mxu1 %vm14098_vm3, %v13926_v37  ;;  %vm14100_vm14 = vcmp.eq.s32.totalorder %v11804_v56, %v11858_v39  ;;  %vm14101_vm3 = vcmp.eq.s32.totalorder %v11809_v10, %v11858_v39  ;;  %v14142_v46 = vld [vmem:[#allocation40_spill] sm:$0xff]  ;;  %v14190_v25 = vand.u32 4294901760, %v14127_v22 }
 0x521   : > { %14096 = vst [vmem:[#allocation43_spill] sm:$0xff] %v12623_v18  ;;  %v12637_v58 = vsub.f32 %v5680_v27, %v12623_v18  ;;  %7501 = vmatpush3.msk.msra.mxu1 %vm14099_vm8, %v13926_v37  ;;  %6275 = vmatprep.mubr.f32.mxu1 %v12623_v18  ;;  %v6010_v47 = vsub.f32 %v6008_v8, %v6009_v45  ;;  %v13461_v15 = vand.u32 4294901760, %v12621_v59  ;;  %v6017_v61 = vand.u32 4294901760, %v6016_v33 }
 0x522   : > { %7502 = vmatprep.subr.msk.mxu1 %vm14100_vm14, %v13926_v37  ;;  %6277 = vmatmul.mubr.f32.gmra.mxu1 %v12616_v0  ;;  %vm14102_vm8 = vcmp.eq.s32.totalorder %v11817_v32, %v11858_v39  ;;  %vm14103_vm14 = vcmp.eq.s32.totalorder %v11824_v41, %v11858_v39  ;;  %v14144_v0 = vld [vmem:[#allocation26_spill] sm:$0xff]  ;;  %v14145_v18 = vand.u32 4294901760, %v12610_v31 }
 0x523   : > { %7503 = vmatpush3.msk.msra.mxu1 %vm14101_vm3, %v13926_v37  ;;  %v6011_v52 = vand.u32 4294901760, %v6010_v47  ;;  %6281 = vmatprep.mubr.f32.mxu1 %v13926_v37  ;;  %v13462_v12 = vand.u32 4294901760, %v12637_v58  ;;  %v6031_v14 = vsub.f32 %v12621_v59, %v13461_v15  ;;  %vm14104_vm3 = vcmp.eq.s32.totalorder %v11832_v26, %v11858_v39  ;;  %v14132_v47 = vld [vmem:[#allocation11_spill] sm:$0xff] }
 0x524   : > { %7504 = vmatprep.subr.msk.mxu1 %vm14102_vm8, %v13926_v37  ;;  %vm14106_vm8 = vcmp.eq.s32.totalorder %v11836_v34, %v11858_v39  ;;  %v14149_v15 = vand.u32 4294901760, %v12637_v58  ;;  %v14193_v21 = vand.u32 4294901760, %v14132_v47 }
 0x525   : > { %7505 = vmatpush3.msk.msra.mxu1 %vm14103_vm14, %v13926_v37  ;;  %6012 = vmatprep.mubr.f32.mxu0 %v6011_v52  ;;  %v6025_v42 = vsub.f32 %v12637_v58, %v13462_v12  ;;  %vm14108_vm14 = vcmp.eq.s32.totalorder %v11844_v7, %v11858_v39  ;;  %v6032_v16 = vand.u32 4294901760, %v6031_v14  ;;  %v14133_v52 = vld [vmem:[#allocation12_spill] sm:$0xff]  ;;  %v14137_v14 = vld [vmem:[#allocation13_spill] sm:$0xff] }
 0x526   : > { %7506 = vmatprep.subr.msk.mxu1 %vm14104_vm3, %v13926_v37  ;;  %6018 = vmatmul.mubr.f32.vlgmr.msra.gmra.mxu0 %v6017_v61  ;;  %vm14111_vm3 = vcmp.eq.s32.totalorder %v11855_v9, %v11858_v39  ;;  %v14135_v61 = vld [vmem:[#allocation33_spill] sm:$0xff]  ;;  %v14141_v12 = vld [vmem:[#allocation24_spill] sm:$0xff]  ;;  %v14196_v1 = vand.u32 4294901760, %v14137_v14 }
 0x527   : > { %6282 = vmatmul.mubr.f32.gmra.mxu1 %v13926_v37  ;;  %7458 = vmatpush3.msra.mxu0 %v14105_v30  ;;  %v6026_v43 = vand.u32 4294901760, %v6025_v42 }
 0x528   : > { %7507 = vmatpush3.msk.msra.mxu1 %vm14106_vm8, %v13926_v37  ;;  %7459 = vmatprep.subr.mxu0 %v14107_v63  ;;  %vm14115_vm8 = vcmp.eq.s32.totalorder %v11876_v55, %v11858_v39 }
 0x529   : > { %7508 = vmatprep.subr.msk.mxu1 %vm14108_vm14, %v13926_v37  ;;  %6538 = vmatprep.mubr.f32.mxu1 %v6009_v45  ;;  %vm14117_vm14 = vcmp.eq.s32.totalorder %v11899_v60, %v11858_v39  ;;  %v14130_v45 = vld [vmem:[#allocation3_spill] sm:$0xff] }
 0x52a   : > { %7460 = vmatpush3.msra.mxu0 %v14109_v48  ;;  %7509 = vmatpush3.msk.msra.mxu1 %vm5822_vm12, %v13926_v37  ;;  %v14192_v13 = vand.u32 4294901760, %v14130_v45 }
 0x52b   : > { %6027 = vmatprep.mubr.f32.mxu0 %v6026_v43  ;;  %7461 = vmatprep.subr.mxu0 %v14110_v4 }
 0x52c   : > { %7510 = vmatprep.subr.msk.mxu1 %vm14111_vm3, %v13926_v37  ;;  %6033 = vmatmul.mubr.f32.gmra.mxu0 %v6032_v16  ;;  %vm14119_vm3 = vcmp.eq.s32.totalorder %v11911_v62, %v11858_v39  ;;  %v14139_v16 = vld [vmem:[#allocation2_spill] sm:$0xff] }
 0x52d   : > { %7462 = vmatpush3.msra.mxu0 %v14112_v6  ;;  %7511 = vmatpush3.msk.msra.mxu1 %vm5821_vm13, %v13926_v37 }
 0x52e   : > { %7463 = vmatprep.subr.mxu0 %v14113_v49  ;;  %7512 = vmatprep.subr.msk.mxu1 %vm5836_vm4, %v13926_v37  ;;  %v14206_v49 = vld [vmem:[#allocation43_spill] sm:$0xff] }
 0x52f   : > { %7464 = vmatpush3.msra.mxu0 %v14114_v38  ;;  %7513 = vmatpush3.msk.msra.mxu1 %vm14115_vm8, %v13926_v37  ;;  %vm14121_vm8 = vcmp.eq.s32.totalorder %v11937_v36, %v11858_v39 }
 0x530   : > { %6037 = vmatprep.mubr.f32.mxu0 %v13970_v28  ;;  %7465 = vmatprep.subr.mxu0 %v14116_v24 }
 0x531   : > { %7514 = vmatprep.subr.msk.mxu1 %vm14117_vm14, %v13926_v37  ;;  %6038 = vmatmul.mubr.f32.gmra.mxu0 %v13970_v28  ;;  %vm14124_vm14 = vcmp.eq.s32.totalorder %v11971_v50, %v11858_v39 }
 0x532   : > { %7466 = vmatpush3.msra.mxu0 %v14118_v19  ;;  %7515 = vmatpush3.msk.msra.mxu1 %vm14119_vm3, %v13926_v37  ;;  %vm14134_vm3 = vcmp.eq.s32.totalorder %v14133_v52, %v11858_v39 }
 0x533   : > { %7467 = vmatprep.subr.mxu0 %v12084_v40  ;;  %6417 = vmatprep.mubr.f32.mxu0 %v6008_v8  ;;  %v14128_v8 = vld [vmem:[#allocation37_spill] sm:$0xff] }
 0x534   : > { %7516 = vmatprep.subr.msk.mxu1 %vm5834_vm11, %v13926_v37  ;;  %7468 = vmatpush3.msra.mxu0 %v14120_v51 }
 0x535   : > { %7517 = vmatpush3.msk.msra.mxu1 %vm14121_vm8, %v13926_v37  ;;  %7469 = vmatprep.subr.mxu0 %v14122_v44  ;;  %vm14143_vm8 = vcmp.eq.s32.totalorder %v14142_v46, %v11858_v39  ;;  %v14151_v46 = vld [vmem:[#allocation28_spill] sm:$0xff] }
 0x536   : > { %7518 = vmatprep.subr.msk.mxu1 %vm5833_vm15, %v13926_v37  ;;  %7470 = vmatpush3.msra.mxu0 %v14123_v35 }
 0x537   : > { %7519 = vmatpush3.msk.msra.mxu1 %vm14124_vm14, %v13926_v37  ;;  %7471 = vmatprep.subr.mxu0 %v14125_v5  ;;  %vm14147_vm14 = vcmp.eq.s32.totalorder %v14146_v3, %v11858_v39  ;;  %v14155_v3 = vld [vmem:[#allocation29_spill] sm:$0xff] }
 0x538   : > { %7520 = vmatprep.subr.msk.mxu1 %vm5832_vm5, %v13926_v37  ;;  %7472 = vmatpush3.msra.mxu0 %v14126_v20 }
 0x539   : > { %7521 = vmatpush3.msk.msra.mxu1 %vm5816_vm9, %v13926_v37  ;;  %7473 = vmatprep.subr.mxu0 %v14127_v22 }
 0x53a   : > { %7522 = vmatprep.subr.msk.mxu1 %vm5831_vm10, %v13926_v37  ;;  %7474 = vmatpush3.msra.mxu0 %v14128_v8 }
 0x53b   : > { %7523 = vmatpush3.msk.msra.mxu1 %vm5815_vm6, %v13926_v37  ;;  %7475 = vmatprep.subr.mxu0 %v14130_v45 }
 0x53c   : > { %7524 = vmatprep.subr.msk.mxu1 %vm5830_vm1, %v13926_v37  ;;  %7476 = vmatpush3.msra.mxu0 %v14132_v47 }
 0x53d   : > { %7525 = vmatpush3.msk.msra.mxu1 %vm14134_vm3, %v13926_v37  ;;  %7477 = vmatprep.subr.mxu0 %v14135_v61  ;;  %vm14150_vm3 = vcmp.eq.s32.totalorder %v11788_v23, %v11858_v39  ;;  %v14158_v23 = vld [vmem:[#allocation10_spill] sm:$0xff] }
 0x53e   : > { %7526 = vmatprep.subr.msk.mxu1 %vm5829_vm0, %v13926_v37  ;;  %7478 = vmatpush3.msra.mxu0 %v14137_v14  ;;  %v14211_v24 = vand.u32 4294901760, %v14158_v23 }
 0x53f   : > { %7527 = vmatpush3.msk.msra.mxu1 %vm5813_vm2, %v13926_v37  ;;  %7479 = vmatprep.subr.mxu0 %v14139_v16  ;;  %v14148_v16 = vld [vmem:[#allocation9_spill] sm:$0xff] }
 0x540   : > { %7528 = vmatprep.subr.msk.mxu1 %vm5828_vm7, %v13926_v37  ;;  %7480 = vmatpush3.msra.mxu0 %v14141_v12 }
 0x541   : > { %7529 = vmatpush3.msk.msra.mxu1 %vm14143_vm8, %v13926_v37  ;;  %7481 = vmatprep.subr.mxu0 %v14144_v0  ;;  %vm14152_vm8 = vcmp.eq.s32.totalorder %v11783_v54, %v11858_v39  ;;  %v14160_v54 = vld [vmem:[#allocation19_spill] sm:$0xff] }
 0x542   : > { %6542 = vmatmul.mubr.f32.vlgmr.msra.gmra.mxu1 %v14145_v18  ;;  %7580 = vmatprep.subr.msk.mxu1 %vm14147_vm14, %v13926_v37  ;;  %v14153_v18 = vld [vmem:[#allocation30_spill] sm:$0xff]  ;;  %vm14154_vm14 = vcmp.eq.s32.totalorder %v11794_v2, %v11858_v39  ;;  %v14162_v2 = vld [vmem:[#allocation27_spill] sm:$0xff]  ;;  %v14212_v19 = vand.u32 4294901760, %v14160_v54 }
 0x543   : > { %7482 = vmatpush3.msra.mxu0 %v14148_v16  ;;  %6549 = vmatprep.mubr.f32.mxu1 %v14149_v15  ;;  %v14156_v15 = vand.u32 4294901760, %v12621_v59 }
 0x544   : > { %7581 = vmatpush3.msk.msra.mxu1 %vm14150_vm3, %v13926_v37  ;;  %7483 = vmatprep.subr.mxu0 %v14151_v46  ;;  %vm14157_vm3 = vcmp.eq.s32.totalorder %v11804_v56, %v11858_v39  ;;  %v14164_v56 = vld [vmem:[#allocation7_spill] sm:$0xff] }
 0x545   : > { %7582 = vmatprep.subr.msk.mxu1 %vm14152_vm8, %v13926_v37  ;;  %7484 = vmatpush3.msra.mxu0 %v14153_v18  ;;  %vm14159_vm8 = vcmp.eq.s32.totalorder %v11809_v10, %v11858_v39  ;;  %v14165_v10 = vand.u32 4294901760, %v14164_v56 }
 0x546   : > { %7583 = vmatpush3.msk.msra.mxu1 %vm14154_vm14, %v13926_v37  ;;  %7485 = vmatprep.subr.mxu0 %v14155_v3  ;;  %vm14161_vm14 = vcmp.eq.s32.totalorder %v11817_v32, %v11858_v39  ;;  %v14167_v32 = vand.u32 4294901760, %v14105_v30  ;;  %v14200_v30 = vand.u32 4294901760, %v14141_v12  ;;  %v14208_v12 = vand.u32 4294901760, %v14153_v18 }
 0x547   : > { %6553 = vmatmul.mubr.f32.gmra.mxu1 %v14156_v15  ;;  %7584 = vmatprep.subr.msk.mxu1 %vm14157_vm3, %v13926_v37  ;;  %vm14163_vm3 = vcmp.eq.s32.totalorder %v11824_v41, %v11858_v39  ;;  %v14169_v41 = vand.u32 4294901760, %v14107_v63  ;;  %v14201_v63 = vld [vmem:[#allocation40_spill] sm:$0xff] }
 0x548   : > { %7486 = vmatpush3.msra.mxu0 %v14158_v23  ;;  %7585 = vmatpush3.msk.msra.mxu1 %vm14159_vm8, %v13926_v37  ;;  %vm14166_vm8 = vcmp.eq.s32.totalorder %v11832_v26, %v11858_v39  ;;  %v14171_v26 = vand.u32 4294901760, %v14109_v48  ;;  %v14203_v48 = vand.u32 4294901760, %v14144_v0  ;;  %v14210_v0 = vld [vmem:[#allocation42_spill] sm:$0xff] }
 0x549   : > { %7487 = vmatprep.subr.mxu0 %v14160_v54  ;;  %7586 = vmatprep.subr.msk.mxu1 %vm14161_vm14, %v13926_v37  ;;  %vm14168_vm14 = vcmp.eq.s32.totalorder %v11836_v34, %v11858_v39  ;;  %v14172_v34 = vand.u32 4294901760, %v14110_v4  ;;  %v14204_v4 = vld [vmem:[#allocation41_spill] sm:$0xff] }
 0x54a   : > { %7488 = vmatpush3.msra.mxu0 %v14162_v2  ;;  %6557 = vmatprep.mubr.f32.mxu1 %v13970_v28 }
 0x54b   : > { %7587 = vmatpush3.msk.msra.mxu1 %vm14163_vm3, %v13926_v37  ;;  %6420 = vmatmul.mubr.f32.vlgmr.msra.gmra.mxu0 %v12610_v31  ;;  %vm14170_vm3 = vcmp.eq.s32.totalorder %v11844_v7, %v11858_v39  ;;  %v14174_v7 = vand.u32 4294901760, %v14112_v6  ;;  %v14185_v31 = vand.u32 4294901760, %v14122_v44  ;;  %v14205_v6 = vand.u32 4294901760, %v14148_v16 }
 0x54c   : > { %6558 = vmatmul.mubr.f32.gmra.mxu1 %v13970_v28  ;;  %7539 = vmatprep.subr.mxu0 %v14165_v10 }
 0x54d   : > { %7588 = vmatprep.subr.msk.mxu1 %vm14166_vm8, %v13926_v37  ;;  %6426 = vmatprep.mubr.f32.mxu0 %v12637_v58  ;;  %vm14173_vm8 = vcmp.eq.s32.totalorder %v11855_v9, %v11858_v39  ;;  %v14176_v9 = vand.u32 4294901760, %v14114_v38  ;;  %v14207_v38 = vand.u32 4294901760, %v14151_v46  ;;  %v14213_v46 = vand.u32 4294901760, %v14162_v2 }
 0x54e   : > { %7540 = vmatpush3.msra.mxu0 %v14167_v32  ;;  %7589 = vmatpush3.msk.msra.mxu1 %vm14168_vm14, %v13926_v37  ;;  %vm14184_vm14 = vcmp.eq.s32.totalorder %v11937_v36, %v11858_v39  ;;  %v14189_v36 = vand.u32 4294901760, %v14126_v20 }
 0x54f   : > { %6840 = vmatprep.mubr.f32.mxu1 %v12612_v53  ;;  %7541 = vmatprep.subr.mxu0 %v14169_v41 }
 0x550   : > { %7590 = vmatprep.subr.msk.mxu1 %vm14170_vm3, %v13926_v37  ;;  %7542 = vmatpush3.msra.mxu0 %v14171_v26 }
 0x551   : > { %7591 = vmatpush3.msk.msra.mxu1 %vm5822_vm12, %v13926_v37  ;;  %6429 = vmatmul.mubr.f32.gmra.mxu0 %v12621_v59  ;;  %vm14177_vm12 = vcmp.eq.s32.totalorder %v11876_v55, %v11858_v39  ;;  %v14182_v55 = vand.u32 4294901760, %v12084_v40  ;;  %v14195_v40 = vand.u32 4294901760, %v14135_v61 }
 0x552   : > { %7543 = vmatprep.subr.mxu0 %v14172_v34  ;;  %7592 = vmatprep.subr.msk.mxu1 %vm14173_vm8, %v13926_v37 }
 0x553   : > { %7544 = vmatpush3.msra.mxu0 %v14174_v7  ;;  %7593 = vmatpush3.msk.msra.mxu1 %vm5821_vm13, %v13926_v37  ;;  %vm14179_vm13 = vcmp.eq.s32.totalorder %v11899_v60, %v11858_v39  ;;  %v14183_v60 = vand.u32 4294901760, %v14120_v51 }
 0x554   : > { %7545 = vmatprep.subr.mxu0 %v14175_v57  ;;  %7594 = vmatprep.subr.msk.mxu1 %vm5836_vm4, %v13926_v37  ;;  %vm14181_vm4 = vcmp.eq.s32.totalorder %v11911_v62, %v11858_v39  ;;  %v14186_v62 = vand.u32 4294901760, %v14123_v35 }
 0x555   : > { %6433 = vmatprep.mubr.f32.mxu0 %v13970_v28  ;;  %7546 = vmatpush3.msra.mxu0 %v14176_v9 }
 0x556   : > { %7595 = vmatpush3.msk.msra.mxu1 %vm14177_vm12, %v13926_v37  ;;  %6434 = vmatmul.mubr.f32.gmra.mxu0 %v13970_v28 }
 0x557   : > { %7547 = vmatprep.subr.mxu0 %v14178_v11  ;;  %7596 = vmatprep.subr.msk.mxu1 %vm14179_vm13, %v13926_v37 }
 0x558   : > { %7548 = vmatpush3.msra.mxu0 %v14180_v17  ;;  %6724 = vmatprep.mubr.f32.mxu0 %v12612_v53  ;;  %v14197_v53 = vld [vmem:[#allocation2_spill] sm:$0xff] }
 0x559   : > { %7597 = vmatpush3.msk.msra.mxu1 %vm14181_vm4, %v13926_v37  ;;  %7549 = vmatprep.subr.mxu0 %v14182_v55  ;;  %v14198_v59 = vand.u32 4294901760, %v14197_v53 }
 0x55a   : > { %7598 = vmatprep.subr.msk.mxu1 %vm5834_vm11, %v13926_v37  ;;  %7550 = vmatpush3.msra.mxu0 %v14183_v60  ;;  %vm14187_vm11 = vcmp.eq.s32.totalorder %v11971_v50, %v11858_v39  ;;  %v14191_v50 = vand.u32 4294901760, %v14128_v8 }
 0x55b   : > { %7599 = vmatpush3.msk.msra.mxu1 %vm14184_vm14, %v13926_v37  ;;  %7551 = vmatprep.subr.mxu0 %v14185_v31 }
 0x55c   : > { %7600 = vmatprep.subr.msk.mxu1 %vm5833_vm15, %v13926_v37  ;;  %7552 = vmatpush3.msra.mxu0 %v14186_v62  ;;  %vm14194_vm15 = vcmp.eq.s32.totalorder %v14133_v52, %v11858_v39 }
 0x55d   : > { %7601 = vmatpush3.msk.msra.mxu1 %vm14187_vm11, %v13926_v37  ;;  %7553 = vmatprep.subr.mxu0 %v14188_v29 }
 0x55e   : > { %7602 = vmatprep.subr.msk.mxu1 %vm5832_vm5, %v13926_v37  ;;  %7554 = vmatpush3.msra.mxu0 %v14189_v36 }
 0x55f   : > { %7603 = vmatpush3.msk.msra.mxu1 %vm5816_vm9, %v13926_v37  ;;  %7555 = vmatprep.subr.mxu0 %v14190_v25 }
 0x560   : > { %7604 = vmatprep.subr.msk.mxu1 %vm5831_vm10, %v13926_v37  ;;  %7556 = vmatpush3.msra.mxu0 %v14191_v50 }
 0x561   : > { %7605 = vmatpush3.msk.msra.mxu1 %vm5815_vm6, %v13926_v37  ;;  %7557 = vmatprep.subr.mxu0 %v14192_v13  ;;  %vm14202_vm6 = vcmp.eq.s32.totalorder %v14201_v63, %v11858_v39  ;;  %v14209_v39 = vand.u32 4294901760, %v14155_v3 }
 0x562   : > { %7606 = vmatprep.subr.msk.mxu1 %vm5830_vm1, %v13926_v37  ;;  %7558 = vmatpush3.msra.mxu0 %v14193_v21 }
 0x563   : > { %7607 = vmatpush3.msk.msra.mxu1 %vm14194_vm15, %v13926_v37  ;;  %7559 = vmatprep.subr.mxu0 %v14195_v40 }
 0x564   : > { %7608 = vmatprep.subr.msk.mxu1 %vm5829_vm0, %v13926_v37  ;;  %7560 = vmatpush3.msra.mxu0 %v14196_v1 }
 0x565   : > { %7609 = vmatpush3.msk.msra.mxu1 %vm5813_vm2, %v13926_v37  ;;  %7561 = vmatprep.subr.mxu0 %v14198_v59 }
 0x566   : > { %7610 = vmatprep.subr.msk.mxu1 %vm5828_vm7, %v13926_v37  ;;  %7562 = vmatpush3.msra.mxu0 %v14200_v30 }
 0x567   : > { %7611 = vmatpush3.msk.msra.mxu1 %vm14202_vm6, %v13926_v37  ;;  %7563 = vmatprep.subr.mxu0 %v14203_v48 }
 0x568   : > { %6842 = vmatmul.mubr.f32.vlgmr.msra.gmra.mxu1 %v14204_v4  ;;  %7564 = vmatpush3.msra.mxu0 %v14205_v6 }
 0x569   : > { %6847 = vmatprep.mubr.f32.mxu1 %v14206_v49  ;;  %7565 = vmatprep.subr.mxu0 %v14207_v38 }
 0x56a   : > { %7566 = vmatpush3.msra.mxu0 %v14208_v12 }
 0x56b   : > { %7567 = vmatprep.subr.mxu0 %v14209_v39 }
 0x56c   : > { %6849 = vmatmul.mubr.f32.gmra.mxu1 %v14210_v0  ;;  %7568 = vmatpush3.msra.mxu0 %v14211_v24 }
 0x56d   : > { %7569 = vmatprep.subr.mxu0 %v14212_v19  ;;  %6853 = vmatprep.mubr.f32.mxu1 %v13926_v37 }
 0x56e   : > { %7570 = vmatpush3.msra.mxu0 %v14213_v46 }
 0x56f   : > { %6726 = vmatmul.mubr.f32.vlgmr.msra.gmra.mxu0 %v14204_v4 }
 0x570   : > { %6731 = vmatprep.mubr.f32.mxu0 %v14206_v49  ;;  %6854 = vmatmul.mubr.f32.gmra.mxu1 %v13926_v37 }
 0x573   : > { %6733 = vmatmul.mubr.f32.gmra.mxu0 %v14210_v0 }
 0x574   : > { %6737 = vmatprep.mubr.f32.mxu0 %v13926_v37 }
 0x577   : > { %6738 = vmatmul.mubr.f32.gmra.mxu0 %v13926_v37 }
 0x5de   : > { %v7448_v51 = vpop.f32.mrf.mxu1 }
 0x5e0   : > { %v7449_v44 = vpop.f32.mrf.mxu1 }
 0x5e1   : > { %v7450_v56 = vadd.f32 %v7449_v44, %v7448_v51 }
 0x5e2   : > { %v7451_v5 = vpop.f32.mrf.mxu1 }
 0x5e4   : > { %v7452_v22 = vpop.f32.mrf.mxu1 }
 0x5e5   : > { %v7453_v7 = vadd.f32 %v7452_v22, %v7451_v5 }
 0x5e6   : > { %v7407_v35 = vpop.f32.mrf.mxu0 }
 0x5e7   : > { %v7454_v27 = vpop.f32.mrf.mxu1 }
 0x5e8   : > { %v7408_v20 = vpop.f32.mrf.mxu0 }
 0x5e9   : > { %v7455_v45 = vpop.f32.mrf.mxu1  ;;  %v7409_v23 = vadd.f32 %v7408_v20, %v7407_v35  ;;  %v5910_v20 = vld [vmem:[%s13022_s8 + $0x10] sm:$0x1] }
 0x5ea   : > { %v7456_v60 = vadd.f32 %v7455_v45, %v7454_v27 }
 0x5eb   : > { %v6272_v41 = vadd.f32 %v7450_v56, %v7409_v23 }
 0x5ec   : > { %v7410_v8 = vpop.f32.mrf.mxu0 }
 0x5ee   : > { %v7411_v37 = vpop.f32.mrf.mxu0 }
 0x5ef   : > { %v7412_v26 = vadd.f32 %v7411_v37, %v7410_v8 }
 0x5f1   : > { %v7413_v33 = vpop.f32.mrf.mxu0  ;;  %v6279_v55 = vadd.f32 %v7453_v7, %v7412_v26 }
 0x5f3   : > { %v7414_v52 = vpop.f32.mrf.mxu0 }
 0x5f4   : > { %v7415_v62 = vadd.f32 %v7414_v52, %v7413_v33 }
 0x5f6   : > { %v6284_v1 = vadd.f32 %v7456_v60, %v7415_v62 }
 0x602   : > { %v7530_v47 = vpop.f32.mrf.mxu1 }
 0x604   : > { %v7531_v61 = vpop.f32.mrf.mxu1 }
 0x605   : > { %v7532_v31 = vadd.f32 %v7531_v61, %v7530_v47 }
 0x607   : > { %v7533_v14 = vpop.f32.mrf.mxu1 }
 0x609   : > { %v7534_v16 = vpop.f32.mrf.mxu1 }
 0x60a   : > { %v7535_v53 = vadd.f32 %v7534_v16, %v7533_v14 }
 0x60b   : > { %v7489_v42 = vpop.f32.mrf.mxu0 }
 0x60c   : > { %v7536_v28 = vpop.f32.mrf.mxu1 }
 0x60d   : > { %v7490_v43 = vpop.f32.mrf.mxu0 }
 0x60e   : > { %v7537_v15 = vpop.f32.mrf.mxu1  ;;  %v7491_v10 = vadd.f32 %v7490_v43, %v7489_v42 }
 0x60f   : > { %v7538_v30 = vadd.f32 %v7537_v15, %v7536_v28 }
 0x610   : > { %v6422_v57 = vadd.f32 %v7491_v10, %v6272_v41 }
 0x611   : > { %v7492_v18 = vpop.f32.mrf.mxu0 }
 0x612   : > { %v6544_v50 = vadd.f32 %v7532_v31, %v6422_v57 }
 0x613   : > { %v7493_v3 = vpop.f32.mrf.mxu0 }
 0x614   : > { %v7494_v9 = vadd.f32 %v7493_v3, %v7492_v18 }
 0x616   : > { %v7495_v2 = vpop.f32.mrf.mxu0  ;;  %v6431_v36 = vadd.f32 %v7494_v9, %v6279_v55 }
 0x618   : > { %v7496_v34 = vpop.f32.mrf.mxu0  ;;  %v6555_v49 = vadd.f32 %v7535_v53, %v6431_v36 }
 0x619   : > { %v7497_v25 = vadd.f32 %v7496_v34, %v7495_v2 }
 0x61b   : > { %v6436_v4 = vadd.f32 %v7497_v25, %v6284_v1 }
 0x61d   : > { %v6560_v46 = vadd.f32 %v7538_v30, %v6436_v4 }
 0x628   : > { %v7612_v54 = vpop.f32.mrf.mxu1 }
 0x62a   : > { %v7613_v32 = vpop.f32.mrf.mxu1 }
 0x62b   : > { %v7614_v59 = vadd.f32 %v7613_v32, %v7612_v54 }
 0x62c   : > { %v7615_v11 = vpop.f32.mrf.mxu1 }
 0x62e   : > { %v7616_v21 = vpop.f32.mrf.mxu1 }
 0x62f   : > { %v7571_v17 = vpop.f32.mrf.mxu0  ;;  %v7617_v39 = vadd.f32 %v7616_v21, %v7615_v11 }
 0x630   : > { %v7618_v48 = vpop.f32.mrf.mxu1 }
 0x631   : > { %v7572_v29 = vpop.f32.mrf.mxu0 }
 0x632   : > { %v7573_v13 = vadd.f32 %v7572_v29, %v7571_v17  ;;  %v7619_v19 = vpop.f32.mrf.mxu1 }
 0x633   : > { %v7574_v40 = vpop.f32.mrf.mxu0  ;;  %v7620_v5 = vadd.f32 %v7619_v19, %v7618_v48 }
 0x634   : > { %v6728_v58 = vadd.f32 %v7573_v13, %v6544_v50 }
 0x635   : > { %v7575_v63 = vpop.f32.mrf.mxu0 }
 0x636   : > { %v6844_v6 = vadd.f32 %v7614_v59, %v6728_v58  ;;  %v7576_v38 = vadd.f32 %v7575_v63, %v7574_v40 }
 0x637   : > { %v7577_v12 = vpop.f32.mrf.mxu0 }
 0x638   : > { %v6735_v0 = vadd.f32 %v7576_v38, %v6555_v49  ;;  %6862 = vst [vmem:[%s13022_s8] sm:$0xff] %v6844_v6 }
 0x639   : > { %v7578_v24 = vpop.f32.mrf.mxu0 }
 0x63a   : > { %v6851_v51 = vadd.f32 %v7617_v39, %v6735_v0  ;;  %v7579_v44 = vadd.f32 %v7578_v24, %v7577_v12 }
 0x63c   : > { %v6740_v35 = vadd.f32 %v7579_v44, %v6560_v46  ;;  %6863 = vst [vmem:[%s13022_s8 + $0x8] sm:$0xff] %v6851_v51 }
 0x63e   : > { %v6856_v22 = vadd.f32 %v7620_v5, %v6740_v35 }
 0x640   : > { %v6861_v8 = vadd.f32 %v6856_v22, %v5910_v20 }
 0x642   : > { %6864 = vst [vmem:[%s13022_s8 + $0x10] sm:$0x1] %v6861_v8 }
 0x643 PF: > { %s14_s17 = sadd.s32 1, %s7711_s17   ;;  %s14214_s15 = smov %s7707_s16 }
 0x644   : > { %p11_p7 = scmp.ge.s32.totalorder %s14_s17, 4   ;;  %s14215_s16 = smov %s14217_s18 }
 0x646   :  { %13 = sbr.rel (!%p11_p7) target bundleno = 2 (0x2), region = 74 }

</bundles_post_ra>
